<compile_context>
chip_gen: v7x
topology: tpu7x:2x2x1
jax: 0.10.0
libtpu: 0.0.40
codegen_flags: <defaults>
</compile_context>

<pallas_src>
import functools

import jax
import jax.numpy as jnp
from jax.experimental import pallas as pl
from jax.experimental.pallas import tpu as pltpu


# ----------------------------------------------------------------------------
# Tile-size helpers
# ----------------------------------------------------------------------------
def _tile(dim, target, quantum):
    """Largest divisor of `dim` that is a multiple of `quantum` and <= target.

    Falls back to the full dim (full-array blocks are exempt from the (8,128) rule)."""
    if dim <= target:
        return dim
    t = (target // quantum) * quantum
    while t >= quantum:
        if dim % t == 0:
            return t
        t -= quantum
    return dim


def _row_tile(dim, target):
    """MXU-friendly row tile: prefer multiples of 128, fall back to multiples of 8."""
    t = _tile(dim, target, 128)
    if t == dim and dim > target:
        t = _tile(dim, target, 8)
    return t


def _choose_group(bi, per_item_bytes, budget=8 * 1024 * 1024):
    """Largest divisor of bi (leaving >=2 grid programs when bi > 1 so both v7x
    TensorCores get work) whose rough per-program VMEM footprint fits the budget."""
    gcap = bi if bi == 1 else max(1, bi // 2)
    g = 1
    for cand in range(1, gcap + 1):
        if bi % cand == 0 and cand * per_item_bytes <= budget:
            g = cand
    return g


def _gelu(y):
    # exact (erf) GELU to match torch.nn.GELU default; math stays in f32.
    return 0.5 * y * (1.0 + jax.lax.erf(y * (2.0 ** -0.5)))


# ----------------------------------------------------------------------------
# Pallas kernels
# ----------------------------------------------------------------------------
def _make_mm_kernel(gelu, has_residual):
    """Tiled matmul (bf16 MXU operands, f32 accumulator); bias/GELU/residual fused."""

    def kernel(*refs):
        if has_residual:
            x_ref, w_ref, b_ref, r_ref, o_ref, acc_ref = refs
        else:
            x_ref, w_ref, b_ref, o_ref, acc_ref = refs
        k = pl.program_id(2)

        @pl.when(k == 0)
        def _init():
            acc_ref[...] = jnp.zeros_like(acc_ref)

        acc_ref[...] += jnp.dot(x_ref[...].astype(jnp.bfloat16), w_ref[...],
                                preferred_element_type=jnp.float32)

        @pl.when(k == pl.num_programs(2) - 1)
        def _flush():
            y = acc_ref[...] + b_ref[...].astype(jnp.float32)
            if gelu:
                y = _gelu(y)
            if has_residual:
                y = y + r_ref[...].astype(jnp.float32)
            o_ref[...] = y.astype(o_ref.dtype)

    return kernel


def _make_ln_mm_kernel(gelu, has_residual):
    """LayerNorm prologue (f32 math, computed once per row tile and cached as a bf16
    VMEM scratch) + bf16 matmul + bias (+GELU, +residual) epilogue."""

    def kernel(*refs):
        if has_residual:
            x_ref, g_ref, bb_ref, w_ref, b_ref, r_ref, o_ref, xn_ref = refs
        else:
            x_ref, g_ref, bb_ref, w_ref, b_ref, o_ref, xn_ref = refs

        @pl.when(pl.program_id(1) == 0)
        def _ln():
            x = x_ref[...].astype(jnp.float32)
            mu = jnp.mean(x, axis=-1, keepdims=True)
            var = jnp.mean((x - mu) ** 2, axis=-1, keepdims=True)
            xn = (x - mu) * jax.lax.rsqrt(var + 1e-5)
            xn = xn * g_ref[...].astype(jnp.float32) + bb_ref[...].astype(jnp.float32)
            xn_ref[...] = xn.astype(jnp.bfloat16)

        y = jnp.dot(xn_ref[...], w_ref[...], preferred_element_type=jnp.float32)
        y = y + b_ref[...].astype(jnp.float32)
        if gelu:
            y = _gelu(y)
        if has_residual:
            y = y + r_ref[...].astype(jnp.float32)
        o_ref[...] = y.astype(o_ref.dtype)

    return kernel


def _mm_lnout_kernel(x_ref, w_ref, b_ref, g_ref, bb_ref, o_ref):
    """bf16 matmul + bias, then f32 LayerNorm over the (full-width) output row."""
    y = jnp.dot(x_ref[...].astype(jnp.bfloat16), w_ref[...],
                preferred_element_type=jnp.float32)
    y = y + b_ref[...].astype(jnp.float32)
    mu = jnp.mean(y, axis=-1, keepdims=True)
    var = jnp.mean((y - mu) ** 2, axis=-1, keepdims=True)
    yn = (y - mu) * jax.lax.rsqrt(var + 1e-5)
    o_ref[...] = (yn * g_ref[...].astype(jnp.float32)
                  + bb_ref[...].astype(jnp.float32)).astype(o_ref.dtype)


def _layernorm_kernel(x_ref, g_ref, b_ref, o_ref):
    x = x_ref[...].astype(jnp.float32)
    mu = jnp.mean(x, axis=-1, keepdims=True)
    var = jnp.mean((x - mu) ** 2, axis=-1, keepdims=True)
    y = (x - mu) * jax.lax.rsqrt(var + 1e-5)
    o_ref[...] = (y * g_ref[...].astype(jnp.float32)
                  + b_ref[...].astype(jnp.float32)).astype(o_ref.dtype)


def _make_attention_kernel(num_heads, fused_q):
    """Multi-head attention on G (batch / batch*window) items per program.

    q/k/v stay in the projection layout (heads-major along the channel dim); heads are
    read with static lane slices and written back per-head into the (G, Nq, C) output
    block, so the HBM-side out_spec is lane-dense over C = heads*hd and no XLA head
    transposes are needed.  Softmax math is f32; MXU operands are bf16; q is pre-scaled
    (scale folded into the projection weights)."""

    def kernel(*refs):
        if fused_q:
            qkv_ref, o_ref = refs
            C = o_ref.shape[-1]
            hd = C // num_heads

            def q_sl(h):
                return qkv_ref[:, :, h * hd:(h + 1) * hd]

            def k_sl(h):
                return qkv_ref[:, :, C + h * hd:C + (h + 1) * hd]

            def v_sl(h):
                return qkv_ref[:, :, 2 * C + h * hd:2 * C + (h + 1) * hd]
        else:
            q_ref, kv_ref, o_ref = refs
            C = o_ref.shape[-1]
            hd = C // num_heads

            def q_sl(h):
                return q_ref[:, :, h * hd:(h + 1) * hd]

            def k_sl(h):
                return kv_ref[:, :, h * hd:(h + 1) * hd]

            def v_sl(h):
                return kv_ref[:, :, C + h * hd:C + (h + 1) * hd]

        for h in range(num_heads):
            qh = q_sl(h).astype(jnp.bfloat16)            # (G, Nq, hd)
            kh = k_sl(h).astype(jnp.bfloat16)            # (G, Nk, hd)
            vh = v_sl(h).astype(jnp.bfloat16)            # (G, Nk, hd)
            s = jnp.einsum('gqd,gkd->gqk', qh, kh,
                           preferred_element_type=jnp.float32)
            s = s - jnp.max(s, axis=-1, keepdims=True)
            p = jnp.exp(s)
            denom = jnp.sum(p, axis=-1, keepdims=True)
            oh = jnp.einsum('gqk,gkd->gqd', p.astype(jnp.bfloat16), vh,
                            preferred_element_type=jnp.float32)
            oh = oh * pl.reciprocal(denom, approx=True)  # EUP slot, nearly free
            o_ref[:, :, h * hd:(h + 1) * hd] = oh.astype(o_ref.dtype)

    return kernel


# ----------------------------------------------------------------------------
# Pallas wrappers
# ----------------------------------------------------------------------------
def pallas_matmul(x2d, w, b, *, gelu=False, residual=None):
    """x2d: (M, K) @ w: (K, N) + b, tiled over (M, N, K) with an f32 accumulator."""
    M, K = x2d.shape
    N = w.shape[1]
    tm = _row_tile(M, 256)
    tn = _tile(N, 512, 128)
    tk = _tile(K, 512, 128)
    grid = (M // tm, N // tn, K // tk)
    in_specs = [
        pl.BlockSpec((tm, tk), lambda i, j, k: (i, k)),
        pl.BlockSpec((tk, tn), lambda i, j, k: (k, j)),
        pl.BlockSpec((1, tn), lambda i, j, k: (0, j)),
    ]
    args = [x2d, w.astype(jnp.bfloat16), b.reshape(1, N).astype(jnp.float32)]
    if residual is not None:
        in_specs.append(pl.BlockSpec((tm, tn), lambda i, j, k: (i, j)))
        args.append(residual)
    return pl.pallas_call(
        _make_mm_kernel(gelu, residual is not None),
        out_shape=jax.ShapeDtypeStruct((M, N), x2d.dtype),
        grid=grid,
        in_specs=in_specs,
        out_specs=pl.BlockSpec((tm, tn), lambda i, j, k: (i, j)),
        scratch_shapes=[pltpu.VMEM((tm, tn), jnp.float32)],
        compiler_params=pltpu.CompilerParams(
            dimension_semantics=("parallel", "parallel", "arbitrary")),
    )(*args)


def pallas_ln_matmul(x2d, gamma, beta, w, b, *, gelu=False, residual=None):
    """LayerNorm(x2d) @ w + b with the LN fused as a (once-per-row-tile) prologue."""
    M, K = x2d.shape
    N = w.shape[1]
    tm = _row_tile(M, 256)
    tn = _tile(N, 512, 128)
    grid = (M // tm, N // tn)
    in_specs = [
        pl.BlockSpec((tm, K), lambda i, j: (i, 0)),
        pl.BlockSpec((1, K), lambda i, j: (0, 0)),
        pl.BlockSpec((1, K), lambda i, j: (0, 0)),
        pl.BlockSpec((K, tn), lambda i, j: (0, j)),
        pl.BlockSpec((1, tn), lambda i, j: (0, j)),
    ]
    args = [x2d, gamma.reshape(1, K).astype(jnp.float32),
            beta.reshape(1, K).astype(jnp.float32),
            w.astype(jnp.bfloat16), b.reshape(1, N).astype(jnp.float32)]
    if residual is not None:
        in_specs.append(pl.BlockSpec((tm, tn), lambda i, j: (i, j)))
        args.append(residual)
    return pl.pallas_call(
        _make_ln_mm_kernel(gelu, residual is not None),
        out_shape=jax.ShapeDtypeStruct((M, N), x2d.dtype),
        grid=grid,
        in_specs=in_specs,
        out_specs=pl.BlockSpec((tm, tn), lambda i, j: (i, j)),
        scratch_shapes=[pltpu.VMEM((tm, K), jnp.bfloat16)],   # cached LN output
        compiler_params=pltpu.CompilerParams(
            dimension_semantics=("parallel", "arbitrary")),
    )(*args)


def pallas_matmul_lnout(x2d, w, b, gamma, beta):
    """Matmul + bias + LayerNorm over the output channels (full N per tile)."""
    M, K = x2d.shape
    N = w.shape[1]
    tm = _row_tile(M, 256)
    return pl.pallas_call(
        _mm_lnout_kernel,
        out_shape=jax.ShapeDtypeStruct((M, N), x2d.dtype),
        grid=(M // tm,),
        in_specs=[
            pl.BlockSpec((tm, K), lambda i: (i, 0)),
            pl.BlockSpec((K, N), lambda i: (0, 0)),
            pl.BlockSpec((1, N), lambda i: (0, 0)),
            pl.BlockSpec((1, N), lambda i: (0, 0)),
            pl.BlockSpec((1, N), lambda i: (0, 0)),
        ],
        out_specs=pl.BlockSpec((tm, N), lambda i: (i, 0)),
        compiler_params=pltpu.CompilerParams(dimension_semantics=("parallel",)),
    )(x2d, w.astype(jnp.bfloat16), b.reshape(1, N).astype(jnp.float32),
      gamma.reshape(1, N).astype(jnp.float32), beta.reshape(1, N).astype(jnp.float32))


def pallas_layernorm(x2d, gamma, beta):
    """Standalone row-tiled LayerNorm; tiles sized to a ~2 MiB byte budget."""
    M, C = x2d.shape
    target_rows = max(8, (2 << 20) // (4 * C))
    tm = _row_tile(M, target_rows)
    return pl.pallas_call(
        _layernorm_kernel,
        out_shape=jax.ShapeDtypeStruct((M, C), x2d.dtype),
        grid=(M // tm,),
        in_specs=[
            pl.BlockSpec((tm, C), lambda i: (i, 0)),
            pl.BlockSpec((1, C), lambda i: (0, 0)),
            pl.BlockSpec((1, C), lambda i: (0, 0)),
        ],
        out_specs=pl.BlockSpec((tm, C), lambda i: (i, 0)),
        compiler_params=pltpu.CompilerParams(dimension_semantics=("parallel",)),
    )(x2d, gamma.reshape(1, C).astype(jnp.float32),
      beta.reshape(1, C).astype(jnp.float32))


def pallas_attention(q, kv, num_heads):
    """q: (Bi, Nq, C) (q-scale pre-folded); kv: (Bi, Nk, 2C) -> (Bi, Nq, C)."""
    Bi, Nq, C = q.shape
    Nk = kv.shape[1]
    per = 4 * (3 * Nq * C + 3 * Nk * 2 * C + 2 * Nq * Nk + 2 * Nq * C)
    G = _choose_group(Bi, per)
    return pl.pallas_call(
        _make_attention_kernel(num_heads, fused_q=False),
        out_shape=jax.ShapeDtypeStruct((Bi, Nq, C), q.dtype),
        grid=(Bi // G,),
        in_specs=[
            pl.BlockSpec((G, Nq, C), lambda i: (i, 0, 0)),
            pl.BlockSpec((G, Nk, 2 * C), lambda i: (i, 0, 0)),
        ],
        out_specs=pl.BlockSpec((G, Nq, C), lambda i: (i, 0, 0)),
        compiler_params=pltpu.CompilerParams(dimension_semantics=("parallel",)),
    )(q, kv)


def pallas_attention_fused(qkv, num_heads):
    """qkv: (Bi, N, 3C) (q-scale pre-folded) -> (Bi, N, C), heads merged lane-dense."""
    Bi, N, C3 = qkv.shape
    C = C3 // 3
    per = 4 * (4 * N * C3 + 2 * N * N + 2 * N * C)
    G = _choose_group(Bi, per)
    return pl.pallas_call(
        _make_attention_kernel(num_heads, fused_q=True),
        out_shape=jax.ShapeDtypeStruct((Bi, N, C), qkv.dtype),
        grid=(Bi // G,),
        in_specs=[pl.BlockSpec((G, N, C3), lambda i: (i, 0, 0))],
        out_specs=pl.BlockSpec((G, N, C), lambda i: (i, 0, 0)),
        compiler_params=pltpu.CompilerParams(dimension_semantics=("parallel",)),
    )(qkv)


# ----------------------------------------------------------------------------
# Conv helpers (kernel == stride convs are pure space-to-depth + matmul)
# ----------------------------------------------------------------------------
def conv_patches_nonoverlap(x_nhwc, w):
    """kernel==stride, no padding: space-to-depth patches + weight matrix."""
    B, H, W, Cin = x_nhwc.shape
    Cout, _, kh, kw = w.shape
    Ho, Wo = H // kh, W // kw
    patches = x_nhwc.reshape(B, Ho, kh, Wo, kw, Cin).transpose(0, 1, 3, 2, 4, 5)
    patches = patches.reshape(B * Ho * Wo, kh * kw * Cin)
    wm = w.transpose(2, 3, 1, 0).reshape(kh * kw * Cin, Cout)
    return patches, wm, Ho, Wo


# ----------------------------------------------------------------------------
# Module forwards
# ----------------------------------------------------------------------------
def gsa_forward(p, x, H, W, num_heads, window_size):
    """x: (B, N, C) raw block input; pre-norm applied inside (fused where possible)."""
    B, N, C = x.shape
    hd = C // num_heads
    scale = hd ** (-0.5)
    x2d = x.reshape(B * N, C)

    if window_size > 1:
        # pre-norm output feeds both the q projection and the down-sample conv.
        xn2d = pallas_layernorm(x2d, p["pre_g"], p["pre_b"])
        # softmax scale folded into the q weights (free at trace time)
        q2d = pallas_matmul(xn2d, p["q_w"] * scale, p["q_b"] * scale)
        assert H % window_size == 0 and W % window_size == 0  # TODO(synk): ref conv truncates otherwise
        patches, wm, Ho, Wo = conv_patches_nonoverlap(
            xn2d.reshape(B, H, W, C), p["down_w"])
        xt2d = pallas_matmul(patches, wm, p["down_b"])          # (B*M, C)
        M = Ho * Wo
        # down_norm fused as the prologue of the kv projection; kv stays packed (B,M,2C)
        kv2d = pallas_ln_matmul(xt2d, p["dn_g"], p["dn_b"], p["kv_w"], p["kv_b"])
        o = pallas_attention(q2d.reshape(B, N, C), kv2d.reshape(B, M, 2 * C), num_heads)
    else:
        # fuse pre-norm into a single combined q|kv projection (one pass over x)
        # TODO(synk): for window_size==1 and large N (early Twins stages) the attention
        # kernel materializes (Nq,Nk) scores per head; a flash-style Nk-tiled kernel is
        # needed for production token counts.
        wqkv = jnp.concatenate([p["q_w"] * scale, p["kv_w"]], axis=1)
        bqkv = jnp.concatenate([p["q_b"] * scale, p["kv_b"]], axis=0)
        qkv2d = pallas_ln_matmul(x2d, p["pre_g"], p["pre_b"], wqkv, bqkv)
        o = pallas_attention_fused(qkv2d.reshape(B, N, 3 * C), num_heads)
    # heads already merged lane-dense inside the kernel: o is (B, N, C), heads-major.
    # NOTE: reference GSA.forward never applies self.proj; dropouts are 0.
    return o


def lsa_forward(p, x, H, W, num_heads, window_size):
    """x: (B, N, C) raw block input; pre-norm fused into the qkv projection."""
    B, N, C = x.shape
    hd = C // num_heads
    scale = hd ** (-0.5)
    wh, ww = window_size
    # TODO(synk): reference padding path (F.pad on (B,H,W,C) pads C/W dims -- a bug);
    #             we require H % wh == 0 and W % ww == 0 so no padding is needed.
    assert H % wh == 0 and W % ww == 0
    hp, wp = H // wh, W // ww
    P, wa = hp * wp, wh * ww

    # fold softmax scale into the q-third of the fused qkv projection
    colscale = jnp.concatenate(
        [jnp.full((C,), scale, jnp.float32), jnp.ones((2 * C,), jnp.float32)])
    wqkv = p["qkv_w"] * colscale[None, :]
    bqkv = p["qkv_b"] * colscale

    # window partition (pure layout) + fused pre-norm -> qkv projection
    xw = x.reshape(B, hp, wh, wp, ww, C).transpose(0, 1, 3, 2, 4, 5)  # (B,hp,wp,wh,ww,C)
    qkv2d = pallas_ln_matmul(xw.reshape(B * P * wa, C), p["pre_g"], p["pre_b"],
                             wqkv, bqkv)
    o = pallas_attention_fused(qkv2d.reshape(B * P, wa, 3 * C), num_heads)  # (B*P,wa,C)

    # un-window: 'b (p q) (wh ww) c -> b (p wh) (q ww) c' (heads already merged in-kernel)
    o = o.reshape(B, hp, wp, wh, ww, C).transpose(0, 1, 3, 2, 4, 5)
    # NOTE: reference LSA.forward never applies self.proj; dropouts are 0.
    return o.reshape(B, N, C)


def twins_block_forward(p, x, H, W, block_type, num_heads, global_window, local_window):
    B, N, C = x.shape
    if block_type == "lsa":
        attn = lsa_forward(p, x, H, W, num_heads, local_window)
    else:
        attn = gsa_forward(p, x, H, W, num_heads, global_window)
    x = x + attn                                       # attention-branch residual
    x2d = x.reshape(B * N, C)
    # TODO(synk): Mlp source not provided; implemented as fc1 -> GELU -> fc2 (drop=0).
    # post-norm fused into fc1 (+GELU); MLP-branch residual fused into the fc2 epilogue.
    h = pallas_ln_matmul(x2d, p["post_g"], p["post_b"],
                         p["mlp"]["fc1_w"], p["mlp"]["fc1_b"], gelu=True)
    y = pallas_matmul(h, p["mlp"]["fc2_w"], p["mlp"]["fc2_b"], residual=x2d)
    return y.reshape(B, N, C)


def cpe_forward(p, x, H, W):
    # TODO(synk): CPE source not provided; implemented as PEG-style residual 3x3 conv.
    # TODO(synk): overlapping 3x3 conv is left to XLA (halo windows need manual DMA);
    #             run in NHWC so no layout transposes surround the (B, N, C) tokens.
    B, N, C = x.shape
    feat = x.reshape(B, H, W, C)
    w_hwio = jnp.transpose(p["w"], (2, 3, 1, 0))          # OIHW -> HWIO (tiny)
    out = jax.lax.conv_general_dilated(
        feat, w_hwio, window_strides=(1, 1), padding=((1, 1), (1, 1)),
        dimension_numbers=("NHWC", "HWIO", "NHWC"))
    out = out + p["b"][None, None, None, :] + feat
    return out.reshape(B, N, C)


def patch_embed_forward(p, x_nchw, patch_size, stride, padding):
    # TODO(synk): PatchEmbeddingV1 source not provided; assumed Conv2d + LayerNorm.
    B, _, H, W = x_nchw.shape
    E = p["w"].shape[0]
    if (patch_size == stride and (H + 2 * padding) % stride == 0
            and (W + 2 * padding) % stride == 0):
        x_nhwc = jnp.transpose(x_nchw, (0, 2, 3, 1))
        if padding:
            x_nhwc = jnp.pad(x_nhwc, ((0, 0), (padding, padding),
                                      (padding, padding), (0, 0)))
        patches, wm, Ho, Wo = conv_patches_nonoverlap(x_nhwc, p["w"])
        # conv matmul with the patch-embed LayerNorm fused as an epilogue
        tok = pallas_matmul_lnout(patches, wm, p["b"], p["ln_g"], p["ln_b"])
    else:
        # TODO(synk): overlapping patch embed falls back to an XLA conv.
        feat = jax.lax.conv_general_dilated(
            x_nchw, p["w"], (stride, stride),
            ((padding, padding), (padding, padding)),
            dimension_numbers=("NCHW", "OIHW", "NCHW"))
        feat = feat + p["b"][None, :, None, None]
        Ho, Wo = feat.shape[2], feat.shape[3]
        tok = pallas_layernorm(
            feat.reshape(B, E, Ho * Wo).transpose(0, 2, 1).reshape(B * Ho * Wo, E),
            p["ln_g"], p["ln_b"])
    return tok.reshape(B, Ho * Wo, E), Ho, Wo


def twins_stage_forward(params, x, *, patch_size, stride, padding, types,
                        num_heads, global_window, local_window):
    tok, H_, W_ = patch_embed_forward(params["pe"], x, patch_size, stride, padding)
    tok = twins_block_forward(params["blocks"][0], tok, H_, W_, types[0],
                              num_heads, global_window, local_window)
    tok = cpe_forward(params["cpe"], tok, H_, W_)
    for idx in range(1, len(types)):
        tok = twins_block_forward(params["blocks"][idx], tok, H_, W_, types[idx],
                                  num_heads, global_window, local_window)
    return tok


# ----------------------------------------------------------------------------
# Deterministic parameter init
# ----------------------------------------------------------------------------
def _init_params(key, *, in_channels, embed_channels, patch_size, types,
                 num_heads, global_window, mlp_ratio):
    C = embed_channels
    hidden = int(mlp_ratio * C)

    def nxt():
        nonlocal key
        key, sub = jax.random.split(key)
        return sub

    def w(shape, s=0.02):
        return (jax.random.normal(nxt(), shape, jnp.float32) * s)

    params = {
        "pe": {
            "w": w((C, in_channels, patch_size, patch_size)),
            "b": w((C,), 0.01),
            "ln_g": jnp.ones((C,), jnp.float32),
            "ln_b": jnp.zeros((C,), jnp.float32),
        },
        "cpe": {"w": w((C, C, 3, 3)), "b": w((C,), 0.01)},
        "blocks": [],
    }
    for t in types:
        bp = {
            "pre_g": jnp.ones((C,), jnp.float32), "pre_b": jnp.zeros((C,), jnp.float32),
            "post_g": jnp.ones((C,), jnp.float32), "post_b": jnp.zeros((C,), jnp.float32),
            "mlp": {
                "fc1_w": w((C, hidden)), "fc1_b": w((hidden,), 0.01),
                "fc2_w": w((hidden, C)), "fc2_b": w((C,), 0.01),
            },
        }
        if t == "lsa":
            bp["qkv_w"] = w((C, 3 * C))
            bp["qkv_b"] = w((3 * C,), 0.01)
        else:  # gsa
            bp["q_w"] = w((C, C))
            bp["q_b"] = w((C,), 0.01)
            bp["kv_w"] = w((C, 2 * C))
            bp["kv_b"] = w((2 * C,), 0.01)
            if global_window > 1:
                bp["down_w"] = w((C, C, global_window, global_window))
                bp["down_b"] = w((C,), 0.01)
                bp["dn_g"] = jnp.ones((C,), jnp.float32)
                bp["dn_b"] = jnp.zeros((C,), jnp.float32)
        params["blocks"].append(bp)
    return params


# ----------------------------------------------------------------------------
if __name__ == "__main__":
    key = jax.random.PRNGKey(0)
    k_x, k_p = jax.random.split(key)

    # Stage configuration (small, consistent with the module defaults).
    B, C_in, H, W = 2, 4, 16, 16
    embed_channels = 32
    patch_size, stride, padding = 4, 4, 0
    types = ("gsa", "lsa")
    num_heads = 8
    global_window = 2
    local_window = (2, 2)
    mlp_ratio = 4

    x = jax.random.normal(k_x, (B, C_in, H, W), jnp.float32)
    params = _init_params(
        k_p, in_channels=C_in, embed_channels=embed_channels, patch_size=patch_size,
        types=types, num_heads=num_heads, global_window=global_window,
        mlp_ratio=mlp_ratio,
    )

    fwd = functools.partial(
        twins_stage_forward,
        patch_size=patch_size, stride=stride, padding=padding, types=types,
        num_heads=num_heads, global_window=global_window, local_window=local_window,
    )
    out = jax.jit(fwd)(params, x)
    out = jax.block_until_ready(out)

    H_ = (H + 2 * padding - patch_size) // stride + 1
    W_ = (W + 2 * padding - patch_size) // stride + 1
    assert out.shape == (B, H_ * W_, embed_channels), out.shape
    assert jnp.all(jnp.isfinite(out))
    print("KERNEL_OK")
</pallas_src>

<mosaic_0001>
module attributes {stable_mosaic.version = 11 : i64} {
  func.func @_mm_lnout_kernel(%arg0: i32, %arg1: memref<32x64xf32, #tpu.memory_space<vmem>>, %arg2: memref<64x32xbf16, #tpu.memory_space<vmem>>, %arg3: memref<1x32xf32, #tpu.memory_space<vmem>>, %arg4: memref<1x32xf32, #tpu.memory_space<vmem>>, %arg5: memref<1x32xf32, #tpu.memory_space<vmem>>, %arg6: memref<32x32xf32, #tpu.memory_space<vmem>>) attributes {dimension_semantics = [#tpu.dimension_semantics<parallel>], iteration_bounds = array<i64: 1>, scalar_prefetch = 0 : i64, scratch_operands = 0 : i64, tpu.core_type = #tpu.core_type<tc>, window_params = [{transform_indices = @transform_0, window_bounds = array<i64: 32, 64>}, {pipeline_mode = #tpu.pipeline_mode<synchronous>, transform_indices = @transform_1, window_bounds = array<i64: 64, 32>}, {pipeline_mode = #tpu.pipeline_mode<synchronous>, transform_indices = @transform_2, window_bounds = array<i64: 1, 32>}, {pipeline_mode = #tpu.pipeline_mode<synchronous>, transform_indices = @transform_3, window_bounds = array<i64: 1, 32>}, {pipeline_mode = #tpu.pipeline_mode<synchronous>, transform_indices = @transform_4, window_bounds = array<i64: 1, 32>}, {transform_indices = @transform_5, window_bounds = array<i64: 32, 32>}]} {
    %c0 = arith.constant 0 : index
    %c0_0 = arith.constant 0 : index
    %0 = vector.load %arg1[%c0, %c0_0] : memref<32x64xf32, #tpu.memory_space<vmem>>, vector<32x64xf32>
    %1 = arith.truncf %0 : vector<32x64xf32> to vector<32x64xbf16>
    %c0_1 = arith.constant 0 : index
    %c0_2 = arith.constant 0 : index
    %2 = vector.load %arg2[%c0_1, %c0_2] : memref<64x32xbf16, #tpu.memory_space<vmem>>, vector<64x32xbf16>
    %cst = arith.constant dense<0.000000e+00> : vector<32x32xf32>
    %3 = tpu.matmul %1, %2, %cst {dimension_numbers = #tpu.dot_dimension_numbers<[1], [0], [0], [1], [0, 0, 1, 1], [], []>} : vector<32x64xbf16>, vector<64x32xbf16>, vector<32x32xf32> -> vector<32x32xf32>
    %c0_3 = arith.constant 0 : index
    %c0_4 = arith.constant 0 : index
    %4 = vector.load %arg3[%c0_3, %c0_4] : memref<1x32xf32, #tpu.memory_space<vmem>>, vector<1x32xf32>
    %5 = vector.broadcast %4 : vector<1x32xf32> to vector<32x32xf32>
    %6 = arith.addf %3, %5 : vector<32x32xf32>
    %cst_5 = arith.constant dense<0.000000e+00> : vector<32xf32>
    %7 = vector.multi_reduction <add>, %6, %cst_5 [1] : vector<32x32xf32> to vector<32xf32>
    %8 = vector.shape_cast %7 : vector<32xf32> to vector<32x1xf32>
    %cst_6 = arith.constant 3.200000e+01 : f32
    %9 = vector.broadcast %cst_6 : f32 to vector<32x1xf32>
    %10 = arith.divf %8, %9 : vector<32x1xf32>
    %11 = vector.broadcast %10 : vector<32x1xf32> to vector<32x32xf32>
    %12 = arith.subf %6, %11 : vector<32x32xf32>
    %13 = arith.mulf %12, %12 : vector<32x32xf32>
    %cst_7 = arith.constant dense<0.000000e+00> : vector<32xf32>
    %14 = vector.multi_reduction <add>, %13, %cst_7 [1] : vector<32x32xf32> to vector<32xf32>
    %15 = vector.shape_cast %14 : vector<32xf32> to vector<32x1xf32>
    %cst_8 = arith.constant 3.200000e+01 : f32
    %16 = vector.broadcast %cst_8 : f32 to vector<32x1xf32>
    %17 = arith.divf %15, %16 : vector<32x1xf32>
    %18 = vector.broadcast %10 : vector<32x1xf32> to vector<32x32xf32>
    %19 = arith.subf %6, %18 : vector<32x32xf32>
    %cst_9 = arith.constant 9.99999974E-6 : f32
    %20 = vector.broadcast %cst_9 : f32 to vector<32x1xf32>
    %21 = arith.addf %17, %20 : vector<32x1xf32>
    %22 = math.rsqrt %21 : vector<32x1xf32>
    %23 = vector.broadcast %22 : vector<32x1xf32> to vector<32x32xf32>
    %24 = arith.mulf %19, %23 : vector<32x32xf32>
    %c0_10 = arith.constant 0 : index
    %c0_11 = arith.constant 0 : index
    %25 = vector.load %arg4[%c0_10, %c0_11] : memref<1x32xf32, #tpu.memory_space<vmem>>, vector<1x32xf32>
    %26 = vector.broadcast %25 : vector<1x32xf32> to vector<32x32xf32>
    %27 = arith.mulf %24, %26 : vector<32x32xf32>
    %c0_12 = arith.constant 0 : index
    %c0_13 = arith.constant 0 : index
    %28 = vector.load %arg5[%c0_12, %c0_13] : memref<1x32xf32, #tpu.memory_space<vmem>>, vector<1x32xf32>
    %29 = vector.broadcast %28 : vector<1x32xf32> to vector<32x32xf32>
    %30 = arith.addf %27, %29 : vector<32x32xf32>
    %c0_14 = arith.constant 0 : index
    %c0_15 = arith.constant 0 : index
    %31 = vector.load %arg6[%c0_14, %c0_15] : memref<32x32xf32, #tpu.memory_space<vmem>>, vector<32x32xf32>
    tpu.vector_store %arg6[%c0_14, %c0_15], %30 {strides = array<i32>} : memref<32x32xf32, #tpu.memory_space<vmem>>, vector<32x32xf32>,
    return
  }
  func.func @transform_0(%arg0: i32) -> (i32, i32) {
    %c0_i32 = arith.constant 0 : i32
    %c0_i32_0 = arith.constant 0 : i32
    return %arg0, %c0_i32 : i32, i32
  }
  func.func @transform_1(%arg0: i32) -> (i32, i32) {
    %c0_i32 = arith.constant 0 : i32
    %c0_i32_0 = arith.constant 0 : i32
    %c0_i32_1 = arith.constant 0 : i32
    return %c0_i32, %c0_i32_0 : i32, i32
  }
  func.func @transform_2(%arg0: i32) -> (i32, i32) {
    %c0_i32 = arith.constant 0 : i32
    %c0_i32_0 = arith.constant 0 : i32
    %c0_i32_1 = arith.constant 0 : i32
    return %c0_i32, %c0_i32_0 : i32, i32
  }
  func.func @transform_3(%arg0: i32) -> (i32, i32) {
    %c0_i32 = arith.constant 0 : i32
    %c0_i32_0 = arith.constant 0 : i32
    %c0_i32_1 = arith.constant 0 : i32
    return %c0_i32, %c0_i32_0 : i32, i32
  }
  func.func @transform_4(%arg0: i32) -> (i32, i32) {
    %c0_i32 = arith.constant 0 : i32
    %c0_i32_0 = arith.constant 0 : i32
    %c0_i32_1 = arith.constant 0 : i32
    return %c0_i32, %c0_i32_0 : i32, i32
  }
  func.func @transform_5(%arg0: i32) -> (i32, i32) {
    %c0_i32 = arith.constant 0 : i32
    %c0_i32_0 = arith.constant 0 : i32
    return %arg0, %c0_i32 : i32, i32
  }
}

module attributes {stable_mosaic.version = 11 : i64} {
  func.func @_layernorm_kernel(%arg0: i32, %arg1: memref<32x32xf32, #tpu.memory_space<vmem>>, %arg2: memref<1x32xf32, #tpu.memory_space<vmem>>, %arg3: memref<1x32xf32, #tpu.memory_space<vmem>>, %arg4: memref<32x32xf32, #tpu.memory_space<vmem>>) attributes {dimension_semantics = [#tpu.dimension_semantics<parallel>], iteration_bounds = array<i64: 1>, scalar_prefetch = 0 : i64, scratch_operands = 0 : i64, tpu.core_type = #tpu.core_type<tc>, window_params = [{transform_indices = @transform_0, window_bounds = array<i64: 32, 32>}, {pipeline_mode = #tpu.pipeline_mode<synchronous>, transform_indices = @transform_1, window_bounds = array<i64: 1, 32>}, {pipeline_mode = #tpu.pipeline_mode<synchronous>, transform_indices = @transform_2, window_bounds = array<i64: 1, 32>}, {transform_indices = @transform_3, window_bounds = array<i64: 32, 32>}]} {
    %c0 = arith.constant 0 : index
    %c0_0 = arith.constant 0 : index
    %0 = vector.load %arg1[%c0, %c0_0] : memref<32x32xf32, #tpu.memory_space<vmem>>, vector<32x32xf32>
    %cst = arith.constant dense<0.000000e+00> : vector<32xf32>
    %1 = vector.multi_reduction <add>, %0, %cst [1] : vector<32x32xf32> to vector<32xf32>
    %2 = vector.shape_cast %1 : vector<32xf32> to vector<32x1xf32>
    %cst_1 = arith.constant 3.200000e+01 : f32
    %3 = vector.broadcast %cst_1 : f32 to vector<32x1xf32>
    %4 = arith.divf %2, %3 : vector<32x1xf32>
    %5 = vector.broadcast %4 : vector<32x1xf32> to vector<32x32xf32>
    %6 = arith.subf %0, %5 : vector<32x32xf32>
    %7 = arith.mulf %6, %6 : vector<32x32xf32>
    %cst_2 = arith.constant dense<0.000000e+00> : vector<32xf32>
    %8 = vector.multi_reduction <add>, %7, %cst_2 [1] : vector<32x32xf32> to vector<32xf32>
    %9 = vector.shape_cast %8 : vector<32xf32> to vector<32x1xf32>
    %cst_3 = arith.constant 3.200000e+01 : f32
    %10 = vector.broadcast %cst_3 : f32 to vector<32x1xf32>
    %11 = arith.divf %9, %10 : vector<32x1xf32>
    %12 = vector.broadcast %4 : vector<32x1xf32> to vector<32x32xf32>
    %13 = arith.subf %0, %12 : vector<32x32xf32>
    %cst_4 = arith.constant 9.99999974E-6 : f32
    %14 = vector.broadcast %cst_4 : f32 to vector<32x1xf32>
    %15 = arith.addf %11, %14 : vector<32x1xf32>
    %16 = math.rsqrt %15 : vector<32x1xf32>
    %17 = vector.broadcast %16 : vector<32x1xf32> to vector<32x32xf32>
    %18 = arith.mulf %13, %17 : vector<32x32xf32>
    %c0_5 = arith.constant 0 : index
    %c0_6 = arith.constant 0 : index
    %19 = vector.load %arg2[%c0_5, %c0_6] : memref<1x32xf32, #tpu.memory_space<vmem>>, vector<1x32xf32>
    %20 = vector.broadcast %19 : vector<1x32xf32> to vector<32x32xf32>
    %21 = arith.mulf %18, %20 : vector<32x32xf32>
    %c0_7 = arith.constant 0 : index
    %c0_8 = arith.constant 0 : index
    %22 = vector.load %arg3[%c0_7, %c0_8] : memref<1x32xf32, #tpu.memory_space<vmem>>, vector<1x32xf32>
    %23 = vector.broadcast %22 : vector<1x32xf32> to vector<32x32xf32>
    %24 = arith.addf %21, %23 : vector<32x32xf32>
    %c0_9 = arith.constant 0 : index
    %c0_10 = arith.constant 0 : index
    %25 = vector.load %arg4[%c0_9, %c0_10] : memref<32x32xf32, #tpu.memory_space<vmem>>, vector<32x32xf32>
    tpu.vector_store %arg4[%c0_9, %c0_10], %24 {strides = array<i32>} : memref<32x32xf32, #tpu.memory_space<vmem>>, vector<32x32xf32>,
    return
  }
  func.func @transform_0(%arg0: i32) -> (i32, i32) {
    %c0_i32 = arith.constant 0 : i32
    %c0_i32_0 = arith.constant 0 : i32
    return %arg0, %c0_i32 : i32, i32
  }
  func.func @transform_1(%arg0: i32) -> (i32, i32) {
    %c0_i32 = arith.constant 0 : i32
    %c0_i32_0 = arith.constant 0 : i32
    %c0_i32_1 = arith.constant 0 : i32
    return %c0_i32, %c0_i32_0 : i32, i32
  }
  func.func @transform_2(%arg0: i32) -> (i32, i32) {
    %c0_i32 = arith.constant 0 : i32
    %c0_i32_0 = arith.constant 0 : i32
    %c0_i32_1 = arith.constant 0 : i32
    return %c0_i32, %c0_i32_0 : i32, i32
  }
  func.func @transform_3(%arg0: i32) -> (i32, i32) {
    %c0_i32 = arith.constant 0 : i32
    %c0_i32_0 = arith.constant 0 : i32
    return %arg0, %c0_i32 : i32, i32
  }
}

module attributes {stable_mosaic.version = 11 : i64} {
  func.func @kernel(%arg0: i32, %arg1: i32, %arg2: i32, %arg3: memref<8x128xf32, #tpu.memory_space<vmem>>, %arg4: memref<128x32xbf16, #tpu.memory_space<vmem>>, %arg5: memref<1x32xf32, #tpu.memory_space<vmem>>, %arg6: memref<8x32xf32, #tpu.memory_space<vmem>>, %arg7: memref<8x32xf32, #tpu.memory_space<vmem>>) attributes {dimension_semantics = [#tpu.dimension_semantics<parallel>, #tpu.dimension_semantics<parallel>, #tpu.dimension_semantics<arbitrary>], iteration_bounds = array<i64: 1, 1, 1>, scalar_prefetch = 0 : i64, scratch_operands = 1 : i64, tpu.core_type = #tpu.core_type<tc>, window_params = [{transform_indices = @transform_0, window_bounds = array<i64: 8, 128>}, {transform_indices = @transform_1, window_bounds = array<i64: 128, 32>}, {transform_indices = @transform_2, window_bounds = array<i64: 1, 32>}, {transform_indices = @transform_3, window_bounds = array<i64: 8, 32>}]} {
    %c0_i32 = arith.constant 0 : i32
    %0 = arith.cmpi eq, %arg2, %c0_i32 : i32
    %1 = arith.extui %0 : i1 to i32
    %c0_i32_0 = arith.constant 0 : i32
    %2 = arith.cmpi ne, %1, %c0_i32_0 : i32
    scf.if %2 {
      %cst_10 = arith.constant 0.000000e+00 : f32
      %13 = vector.broadcast %cst_10 : f32 to vector<8x32xf32>
      %c0_11 = arith.constant 0 : index
      %c0_12 = arith.constant 0 : index
      %14 = vector.load %arg7[%c0_11, %c0_12] : memref<8x32xf32, #tpu.memory_space<vmem>>, vector<8x32xf32>
      tpu.vector_store %arg7[%c0_11, %c0_12], %13 {strides = array<i32>} : memref<8x32xf32, #tpu.memory_space<vmem>>, vector<8x32xf32>,
    } else {
    }
    %c0 = arith.constant 0 : index
    %c0_1 = arith.constant 0 : index
    %3 = vector.load %arg7[%c0, %c0_1] : memref<8x32xf32, #tpu.memory_space<vmem>>, vector<8x32xf32>
    %c0_2 = arith.constant 0 : index
    %c0_3 = arith.constant 0 : index
    %4 = vector.load %arg3[%c0_2, %c0_3] : memref<8x128xf32, #tpu.memory_space<vmem>>, vector<8x128xf32>
    %5 = arith.truncf %4 : vector<8x128xf32> to vector<8x128xbf16>
    %c0_4 = arith.constant 0 : index
    %c0_5 = arith.constant 0 : index
    %6 = vector.load %arg4[%c0_4, %c0_5] : memref<128x32xbf16, #tpu.memory_space<vmem>>, vector<128x32xbf16>
    %cst = arith.constant dense<0.000000e+00> : vector<8x32xf32>
    %7 = tpu.matmul %5, %6, %cst {dimension_numbers = #tpu.dot_dimension_numbers<[1], [0], [0], [1], [0, 0, 1, 1], [], []>} : vector<8x128xbf16>, vector<128x32xbf16>, vector<8x32xf32> -> vector<8x32xf32>
    %8 = arith.addf %3, %7 : vector<8x32xf32>
    %c0_6 = arith.constant 0 : index
    %c0_7 = arith.constant 0 : index
    %9 = vector.load %arg7[%c0_6, %c0_7] : memref<8x32xf32, #tpu.memory_space<vmem>>, vector<8x32xf32>
    tpu.vector_store %arg7[%c0_6, %c0_7], %8 {strides = array<i32>} : memref<8x32xf32, #tpu.memory_space<vmem>>, vector<8x32xf32>,
    %c0_i32_8 = arith.constant 0 : i32
    %10 = arith.cmpi eq, %arg2, %c0_i32_8 : i32
    %11 = arith.extui %10 : i1 to i32
    %c0_i32_9 = arith.constant 0 : i32
    %12 = arith.cmpi ne, %11, %c0_i32_9 : i32
    scf.if %12 {
      %c0_10 = arith.constant 0 : index
      %c0_11 = arith.constant 0 : index
      %13 = vector.load %arg7[%c0_10, %c0_11] : memref<8x32xf32, #tpu.memory_space<vmem>>, vector<8x32xf32>
      %c0_12 = arith.constant 0 : index
      %c0_13 = arith.constant 0 : index
      %14 = vector.load %arg5[%c0_12, %c0_13] : memref<1x32xf32, #tpu.memory_space<vmem>>, vector<1x32xf32>
      %15 = vector.broadcast %14 : vector<1x32xf32> to vector<8x32xf32>
      %16 = arith.addf %13, %15 : vector<8x32xf32>
      %c0_14 = arith.constant 0 : index
      %c0_15 = arith.constant 0 : index
      %17 = vector.load %arg6[%c0_14, %c0_15] : memref<8x32xf32, #tpu.memory_space<vmem>>, vector<8x32xf32>
      tpu.vector_store %arg6[%c0_14, %c0_15], %16 {strides = array<i32>} : memref<8x32xf32, #tpu.memory_space<vmem>>, vector<8x32xf32>,
    } else {
    }
    return
  }
  func.func @transform_0(%arg0: i32, %arg1: i32, %arg2: i32) -> (i32, i32) {
    %c0_i32 = arith.constant 0 : i32
    return %arg0, %arg2 : i32, i32
  }
  func.func @transform_1(%arg0: i32, %arg1: i32, %arg2: i32) -> (i32, i32) {
    %c0_i32 = arith.constant 0 : i32
    return %arg2, %arg1 : i32, i32
  }
  func.func @transform_2(%arg0: i32, %arg1: i32, %arg2: i32) -> (i32, i32) {
    %c0_i32 = arith.constant 0 : i32
    %c0_i32_0 = arith.constant 0 : i32
    return %c0_i32, %arg1 : i32, i32
  }
  func.func @transform_3(%arg0: i32, %arg1: i32, %arg2: i32) -> (i32, i32) {
    %c0_i32 = arith.constant 0 : i32
    return %arg0, %arg1 : i32, i32
  }
}

module attributes {stable_mosaic.version = 11 : i64} {
  func.func @kernel(%arg0: i32, %arg1: i32, %arg2: memref<8x32xf32, #tpu.memory_space<vmem>>, %arg3: memref<1x32xf32, #tpu.memory_space<vmem>>, %arg4: memref<1x32xf32, #tpu.memory_space<vmem>>, %arg5: memref<32x64xbf16, #tpu.memory_space<vmem>>, %arg6: memref<1x64xf32, #tpu.memory_space<vmem>>, %arg7: memref<8x64xf32, #tpu.memory_space<vmem>>, %arg8: memref<8x32xbf16, #tpu.memory_space<vmem>>) attributes {dimension_semantics = [#tpu.dimension_semantics<parallel>, #tpu.dimension_semantics<arbitrary>], iteration_bounds = array<i64: 1, 1>, scalar_prefetch = 0 : i64, scratch_operands = 1 : i64, tpu.core_type = #tpu.core_type<tc>, window_params = [{transform_indices = @transform_0, window_bounds = array<i64: 8, 32>}, {pipeline_mode = #tpu.pipeline_mode<synchronous>, transform_indices = @transform_1, window_bounds = array<i64: 1, 32>}, {pipeline_mode = #tpu.pipeline_mode<synchronous>, transform_indices = @transform_2, window_bounds = array<i64: 1, 32>}, {transform_indices = @transform_3, window_bounds = array<i64: 32, 64>}, {transform_indices = @transform_4, window_bounds = array<i64: 1, 64>}, {transform_indices = @transform_5, window_bounds = array<i64: 8, 64>}]} {
    %c0_i32 = arith.constant 0 : i32
    %0 = arith.cmpi eq, %arg1, %c0_i32 : i32
    %1 = arith.extui %0 : i1 to i32
    %c0_i32_0 = arith.constant 0 : i32
    %2 = arith.cmpi ne, %1, %c0_i32_0 : i32
    scf.if %2 {
      %c0_8 = arith.constant 0 : index
      %c0_9 = arith.constant 0 : index
      %10 = vector.load %arg2[%c0_8, %c0_9] : memref<8x32xf32, #tpu.memory_space<vmem>>, vector<8x32xf32>
      %cst_10 = arith.constant dense<0.000000e+00> : vector<8xf32>
      %11 = vector.multi_reduction <add>, %10, %cst_10 [1] : vector<8x32xf32> to vector<8xf32>
      %12 = vector.shape_cast %11 : vector<8xf32> to vector<8x1xf32>
      %cst_11 = arith.constant 3.200000e+01 : f32
      %13 = vector.broadcast %cst_11 : f32 to vector<8x1xf32>
      %14 = arith.divf %12, %13 : vector<8x1xf32>
      %15 = vector.broadcast %14 : vector<8x1xf32> to vector<8x32xf32>
      %16 = arith.subf %10, %15 : vector<8x32xf32>
      %17 = arith.mulf %16, %16 : vector<8x32xf32>
      %cst_12 = arith.constant dense<0.000000e+00> : vector<8xf32>
      %18 = vector.multi_reduction <add>, %17, %cst_12 [1] : vector<8x32xf32> to vector<8xf32>
      %19 = vector.shape_cast %18 : vector<8xf32> to vector<8x1xf32>
      %cst_13 = arith.constant 3.200000e+01 : f32
      %20 = vector.broadcast %cst_13 : f32 to vector<8x1xf32>
      %21 = arith.divf %19, %20 : vector<8x1xf32>
      %22 = vector.broadcast %14 : vector<8x1xf32> to vector<8x32xf32>
      %23 = arith.subf %10, %22 : vector<8x32xf32>
      %cst_14 = arith.constant 9.99999974E-6 : f32
      %24 = vector.broadcast %cst_14 : f32 to vector<8x1xf32>
      %25 = arith.addf %21, %24 : vector<8x1xf32>
      %26 = math.rsqrt %25 : vector<8x1xf32>
      %27 = vector.broadcast %26 : vector<8x1xf32> to vector<8x32xf32>
      %28 = arith.mulf %23, %27 : vector<8x32xf32>
      %c0_15 = arith.constant 0 : index
      %c0_16 = arith.constant 0 : index
      %29 = vector.load %arg3[%c0_15, %c0_16] : memref<1x32xf32, #tpu.memory_space<vmem>>, vector<1x32xf32>
      %30 = vector.broadcast %29 : vector<1x32xf32> to vector<8x32xf32>
      %31 = arith.mulf %28, %30 : vector<8x32xf32>
      %c0_17 = arith.constant 0 : index
      %c0_18 = arith.constant 0 : index
      %32 = vector.load %arg4[%c0_17, %c0_18] : memref<1x32xf32, #tpu.memory_space<vmem>>, vector<1x32xf32>
      %33 = vector.broadcast %32 : vector<1x32xf32> to vector<8x32xf32>
      %34 = arith.addf %31, %33 : vector<8x32xf32>
      %35 = arith.truncf %34 : vector<8x32xf32> to vector<8x32xbf16>
      %c0_19 = arith.constant 0 : index
      %c0_20 = arith.constant 0 : index
      %36 = vector.load %arg8[%c0_19, %c0_20] : memref<8x32xbf16, #tpu.memory_space<vmem>>, vector<8x32xbf16>
      tpu.vector_store %arg8[%c0_19, %c0_20], %35 {strides = array<i32>} : memref<8x32xbf16, #tpu.memory_space<vmem>>, vector<8x32xbf16>,
    } else {
    }
    %c0 = arith.constant 0 : index
    %c0_1 = arith.constant 0 : index
    %3 = vector.load %arg8[%c0, %c0_1] : memref<8x32xbf16, #tpu.memory_space<vmem>>, vector<8x32xbf16>
    %c0_2 = arith.constant 0 : index
    %c0_3 = arith.constant 0 : index
    %4 = vector.load %arg5[%c0_2, %c0_3] : memref<32x64xbf16, #tpu.memory_space<vmem>>, vector<32x64xbf16>
    %cst = arith.constant dense<0.000000e+00> : vector<8x64xf32>
    %5 = tpu.matmul %3, %4, %cst {dimension_numbers = #tpu.dot_dimension_numbers<[1], [0], [0], [1], [0, 0, 1, 1], [], []>} : vector<8x32xbf16>, vector<32x64xbf16>, vector<8x64xf32> -> vector<8x64xf32>
    %c0_4 = arith.constant 0 : index
    %c0_5 = arith.constant 0 : index
    %6 = vector.load %arg6[%c0_4, %c0_5] : memref<1x64xf32, #tpu.memory_space<vmem>>, vector<1x64xf32>
    %7 = vector.broadcast %6 : vector<1x64xf32> to vector<8x64xf32>
    %8 = arith.addf %5, %7 : vector<8x64xf32>
    %c0_6 = arith.constant 0 : index
    %c0_7 = arith.constant 0 : index
    %9 = vector.load %arg7[%c0_6, %c0_7] : memref<8x64xf32, #tpu.memory_space<vmem>>, vector<8x64xf32>
    tpu.vector_store %arg7[%c0_6, %c0_7], %8 {strides = array<i32>} : memref<8x64xf32, #tpu.memory_space<vmem>>, vector<8x64xf32>,
    return
  }
  func.func @transform_0(%arg0: i32, %arg1: i32) -> (i32, i32) {
    %c0_i32 = arith.constant 0 : i32
    %c0_i32_0 = arith.constant 0 : i32
    return %arg0, %c0_i32 : i32, i32
  }
  func.func @transform_1(%arg0: i32, %arg1: i32) -> (i32, i32) {
    %c0_i32 = arith.constant 0 : i32
    %c0_i32_0 = arith.constant 0 : i32
    %c0_i32_1 = arith.constant 0 : i32
    return %c0_i32, %c0_i32_0 : i32, i32
  }
  func.func @transform_2(%arg0: i32, %arg1: i32) -> (i32, i32) {
    %c0_i32 = arith.constant 0 : i32
    %c0_i32_0 = arith.constant 0 : i32
    %c0_i32_1 = arith.constant 0 : i32
    return %c0_i32, %c0_i32_0 : i32, i32
  }
  func.func @transform_3(%arg0: i32, %arg1: i32) -> (i32, i32) {
    %c0_i32 = arith.constant 0 : i32
    %c0_i32_0 = arith.constant 0 : i32
    return %c0_i32, %arg1 : i32, i32
  }
  func.func @transform_4(%arg0: i32, %arg1: i32) -> (i32, i32) {
    %c0_i32 = arith.constant 0 : i32
    %c0_i32_0 = arith.constant 0 : i32
    return %c0_i32, %arg1 : i32, i32
  }
  func.func @transform_5(%arg0: i32, %arg1: i32) -> (i32, i32) {
    %c0_i32 = arith.constant 0 : i32
    return %arg0, %arg1 : i32, i32
  }
}

module attributes {stable_mosaic.version = 11 : i64} {
  func.func @kernel(%arg0: i32, %arg1: i32, %arg2: i32, %arg3: memref<32x32xf32, #tpu.memory_space<vmem>>, %arg4: memref<32x32xbf16, #tpu.memory_space<vmem>>, %arg5: memref<1x32xf32, #tpu.memory_space<vmem>>, %arg6: memref<32x32xf32, #tpu.memory_space<vmem>>, %arg7: memref<32x32xf32, #tpu.memory_space<vmem>>) attributes {dimension_semantics = [#tpu.dimension_semantics<parallel>, #tpu.dimension_semantics<parallel>, #tpu.dimension_semantics<arbitrary>], iteration_bounds = array<i64: 1, 1, 1>, scalar_prefetch = 0 : i64, scratch_operands = 1 : i64, tpu.core_type = #tpu.core_type<tc>, window_params = [{transform_indices = @transform_0, window_bounds = array<i64: 32, 32>}, {transform_indices = @transform_1, window_bounds = array<i64: 32, 32>}, {transform_indices = @transform_2, window_bounds = array<i64: 1, 32>}, {transform_indices = @transform_3, window_bounds = array<i64: 32, 32>}]} {
    %c0_i32 = arith.constant 0 : i32
    %0 = arith.cmpi eq, %arg2, %c0_i32 : i32
    %1 = arith.extui %0 : i1 to i32
    %c0_i32_0 = arith.constant 0 : i32
    %2 = arith.cmpi ne, %1, %c0_i32_0 : i32
    scf.if %2 {
      %cst_10 = arith.constant 0.000000e+00 : f32
      %13 = vector.broadcast %cst_10 : f32 to vector<32x32xf32>
      %c0_11 = arith.constant 0 : index
      %c0_12 = arith.constant 0 : index
      %14 = vector.load %arg7[%c0_11, %c0_12] : memref<32x32xf32, #tpu.memory_space<vmem>>, vector<32x32xf32>
      tpu.vector_store %arg7[%c0_11, %c0_12], %13 {strides = array<i32>} : memref<32x32xf32, #tpu.memory_space<vmem>>, vector<32x32xf32>,
    } else {
    }
    %c0 = arith.constant 0 : index
    %c0_1 = arith.constant 0 : index
    %3 = vector.load %arg7[%c0, %c0_1] : memref<32x32xf32, #tpu.memory_space<vmem>>, vector<32x32xf32>
    %c0_2 = arith.constant 0 : index
    %c0_3 = arith.constant 0 : index
    %4 = vector.load %arg3[%c0_2, %c0_3] : memref<32x32xf32, #tpu.memory_space<vmem>>, vector<32x32xf32>
    %5 = arith.truncf %4 : vector<32x32xf32> to vector<32x32xbf16>
    %c0_4 = arith.constant 0 : index
    %c0_5 = arith.constant 0 : index
    %6 = vector.load %arg4[%c0_4, %c0_5] : memref<32x32xbf16, #tpu.memory_space<vmem>>, vector<32x32xbf16>
    %cst = arith.constant dense<0.000000e+00> : vector<32x32xf32>
    %7 = tpu.matmul %5, %6, %cst {dimension_numbers = #tpu.dot_dimension_numbers<[1], [0], [0], [1], [0, 0, 1, 1], [], []>} : vector<32x32xbf16>, vector<32x32xbf16>, vector<32x32xf32> -> vector<32x32xf32>
    %8 = arith.addf %3, %7 : vector<32x32xf32>
    %c0_6 = arith.constant 0 : index
    %c0_7 = arith.constant 0 : index
    %9 = vector.load %arg7[%c0_6, %c0_7] : memref<32x32xf32, #tpu.memory_space<vmem>>, vector<32x32xf32>
    tpu.vector_store %arg7[%c0_6, %c0_7], %8 {strides = array<i32>} : memref<32x32xf32, #tpu.memory_space<vmem>>, vector<32x32xf32>,
    %c0_i32_8 = arith.constant 0 : i32
    %10 = arith.cmpi eq, %arg2, %c0_i32_8 : i32
    %11 = arith.extui %10 : i1 to i32
    %c0_i32_9 = arith.constant 0 : i32
    %12 = arith.cmpi ne, %11, %c0_i32_9 : i32
    scf.if %12 {
      %c0_10 = arith.constant 0 : index
      %c0_11 = arith.constant 0 : index
      %13 = vector.load %arg7[%c0_10, %c0_11] : memref<32x32xf32, #tpu.memory_space<vmem>>, vector<32x32xf32>
      %c0_12 = arith.constant 0 : index
      %c0_13 = arith.constant 0 : index
      %14 = vector.load %arg5[%c0_12, %c0_13] : memref<1x32xf32, #tpu.memory_space<vmem>>, vector<1x32xf32>
      %15 = vector.broadcast %14 : vector<1x32xf32> to vector<32x32xf32>
      %16 = arith.addf %13, %15 : vector<32x32xf32>
      %c0_14 = arith.constant 0 : index
      %c0_15 = arith.constant 0 : index
      %17 = vector.load %arg6[%c0_14, %c0_15] : memref<32x32xf32, #tpu.memory_space<vmem>>, vector<32x32xf32>
      tpu.vector_store %arg6[%c0_14, %c0_15], %16 {strides = array<i32>} : memref<32x32xf32, #tpu.memory_space<vmem>>, vector<32x32xf32>,
    } else {
    }
    return
  }
  func.func @transform_0(%arg0: i32, %arg1: i32, %arg2: i32) -> (i32, i32) {
    %c0_i32 = arith.constant 0 : i32
    return %arg0, %arg2 : i32, i32
  }
  func.func @transform_1(%arg0: i32, %arg1: i32, %arg2: i32) -> (i32, i32) {
    %c0_i32 = arith.constant 0 : i32
    return %arg2, %arg1 : i32, i32
  }
  func.func @transform_2(%arg0: i32, %arg1: i32, %arg2: i32) -> (i32, i32) {
    %c0_i32 = arith.constant 0 : i32
    %c0_i32_0 = arith.constant 0 : i32
    return %c0_i32, %arg1 : i32, i32
  }
  func.func @transform_3(%arg0: i32, %arg1: i32, %arg2: i32) -> (i32, i32) {
    %c0_i32 = arith.constant 0 : i32
    return %arg0, %arg1 : i32, i32
  }
}

module attributes {stable_mosaic.version = 11 : i64} {
  func.func @kernel(%arg0: i32, %arg1: memref<1x16x32xf32, #tpu.memory_space<vmem>>, %arg2: memref<1x4x64xf32, #tpu.memory_space<vmem>>, %arg3: memref<1x16x32xf32, #tpu.memory_space<vmem>>) attributes {dimension_semantics = [#tpu.dimension_semantics<parallel>], iteration_bounds = array<i64: 2>, scalar_prefetch = 0 : i64, scratch_operands = 0 : i64, tpu.core_type = #tpu.core_type<tc>, window_params = [{transform_indices = @transform_0, window_bounds = array<i64: 1, 16, 32>}, {transform_indices = @transform_1, window_bounds = array<i64: 1, 4, 64>}, {transform_indices = @transform_2, window_bounds = array<i64: 1, 16, 32>}]} {
    %c0 = arith.constant 0 : index
    %c0_0 = arith.constant 0 : index
    %c0_1 = arith.constant 0 : index
    %0 = vector.load %arg1[%c0, %c0_0, %c0_1] : memref<1x16x32xf32, #tpu.memory_space<vmem>>, vector<1x16x4xf32>
    %1 = arith.truncf %0 : vector<1x16x4xf32> to vector<1x16x4xbf16>
    %c0_2 = arith.constant 0 : index
    %c0_3 = arith.constant 0 : index
    %c0_4 = arith.constant 0 : index
    %2 = vector.load %arg2[%c0_2, %c0_3, %c0_4] : memref<1x4x64xf32, #tpu.memory_space<vmem>>, vector<1x4x4xf32>
    %3 = arith.truncf %2 : vector<1x4x4xf32> to vector<1x4x4xbf16>
    %c0_5 = arith.constant 0 : index
    %c0_6 = arith.constant 0 : index
    %c32 = arith.constant 32 : index
    %4 = vector.load %arg2[%c0_5, %c0_6, %c32] : memref<1x4x64xf32, #tpu.memory_space<vmem>>, vector<1x4x4xf32>
    %5 = arith.truncf %4 : vector<1x4x4xf32> to vector<1x4x4xbf16>
    "tpu.trace_start"() <{level = 10 : i32, message = "gqd,gkd->gqk"}> : () -> ()
    %cst = arith.constant dense<0.000000e+00> : vector<1x16x4xf32>
    %6 = tpu.matmul %1, %3, %cst {dimension_numbers = #tpu.dot_dimension_numbers<[2], [2], [1], [1], [0, 0, 0, 1, 1, 1], [0], [0]>} : vector<1x16x4xbf16>, vector<1x4x4xbf16>, vector<1x16x4xf32> -> vector<1x16x4xf32>
    "tpu.trace_stop"() : () -> ()
    %cst_7 = arith.constant dense<0xFF800000> : vector<1x16xf32>
    %7 = vector.multi_reduction <maximumf>, %6, %cst_7 [2] : vector<1x16x4xf32> to vector<1x16xf32>
    %8 = vector.shape_cast %7 : vector<1x16xf32> to vector<1x16x1xf32>
    %9 = vector.broadcast %8 : vector<1x16x1xf32> to vector<1x16x4xf32>
    %10 = arith.subf %6, %9 : vector<1x16x4xf32>
    %11 = math.exp %10 : vector<1x16x4xf32>
    %cst_8 = arith.constant dense<0.000000e+00> : vector<1x16xf32>
    %12 = vector.multi_reduction <add>, %11, %cst_8 [2] : vector<1x16x4xf32> to vector<1x16xf32>
    %13 = vector.shape_cast %12 : vector<1x16xf32> to vector<1x16x1xf32>
    %14 = arith.truncf %11 : vector<1x16x4xf32> to vector<1x16x4xbf16>
    "tpu.trace_start"() <{level = 10 : i32, message = "gqk,gkd->gqd"}> : () -> ()
    %cst_9 = arith.constant dense<0.000000e+00> : vector<1x16x4xf32>
    %15 = tpu.matmul %14, %5, %cst_9 {dimension_numbers = #tpu.dot_dimension_numbers<[2], [1], [1], [2], [0, 0, 0, 1, 1, 2], [0], [0]>} : vector<1x16x4xbf16>, vector<1x4x4xbf16>, vector<1x16x4xf32> -> vector<1x16x4xf32>
    "tpu.trace_stop"() : () -> ()
    %16 = tpu.reciprocal %13 {approx = true} : vector<1x16x1xf32> -> vector<1x16x1xf32>
    %17 = vector.broadcast %16 : vector<1x16x1xf32> to vector<1x16x4xf32>
    %18 = arith.mulf %15, %17 : vector<1x16x4xf32>
    %c0_10 = arith.constant 0 : index
    %c0_11 = arith.constant 0 : index
    %c0_12 = arith.constant 0 : index
    %19 = vector.load %arg3[%c0_10, %c0_11, %c0_12] : memref<1x16x32xf32, #tpu.memory_space<vmem>>, vector<1x16x4xf32>
    tpu.vector_store %arg3[%c0_10, %c0_11, %c0_12], %18 {strides = array<i32>} : memref<1x16x32xf32, #tpu.memory_space<vmem>>, vector<1x16x4xf32>,
    %c0_13 = arith.constant 0 : index
    %c0_14 = arith.constant 0 : index
    %c4 = arith.constant 4 : index
    %20 = vector.load %arg1[%c0_13, %c0_14, %c4] : memref<1x16x32xf32, #tpu.memory_space<vmem>>, vector<1x16x4xf32>
    %21 = arith.truncf %20 : vector<1x16x4xf32> to vector<1x16x4xbf16>
    %c0_15 = arith.constant 0 : index
    %c0_16 = arith.constant 0 : index
    %c4_17 = arith.constant 4 : index
    %22 = vector.load %arg2[%c0_15, %c0_16, %c4_17] : memref<1x4x64xf32, #tpu.memory_space<vmem>>, vector<1x4x4xf32>
    %23 = arith.truncf %22 : vector<1x4x4xf32> to vector<1x4x4xbf16>
    %c0_18 = arith.constant 0 : index
    %c0_19 = arith.constant 0 : index
    %c36 = arith.constant 36 : index
    %24 = vector.load %arg2[%c0_18, %c0_19, %c36] : memref<1x4x64xf32, #tpu.memory_space<vmem>>, vector<1x4x4xf32>
    %25 = arith.truncf %24 : vector<1x4x4xf32> to vector<1x4x4xbf16>
    "tpu.trace_start"() <{level = 10 : i32, message = "gqd,gkd->gqk"}> : () -> ()
    %cst_20 = arith.constant dense<0.000000e+00> : vector<1x16x4xf32>
    %26 = tpu.matmul %21, %23, %cst_20 {dimension_numbers = #tpu.dot_dimension_numbers<[2], [2], [1], [1], [0, 0, 0, 1, 1, 1], [0], [0]>} : vector<1x16x4xbf16>, vector<1x4x4xbf16>, vector<1x16x4xf32> -> vector<1x16x4xf32>
    "tpu.trace_stop"() : () -> ()
    %cst_21 = arith.constant dense<0xFF800000> : vector<1x16xf32>
    %27 = vector.multi_reduction <maximumf>, %26, %cst_21 [2] : vector<1x16x4xf32> to vector<1x16xf32>
    %28 = vector.shape_cast %27 : vector<1x16xf32> to vector<1x16x1xf32>
    %29 = vector.broadcast %28 : vector<1x16x1xf32> to vector<1x16x4xf32>
    %30 = arith.subf %26, %29 : vector<1x16x4xf32>
    %31 = math.exp %30 : vector<1x16x4xf32>
    %cst_22 = arith.constant dense<0.000000e+00> : vector<1x16xf32>
    %32 = vector.multi_reduction <add>, %31, %cst_22 [2] : vector<1x16x4xf32> to vector<1x16xf32>
    %33 = vector.shape_cast %32 : vector<1x16xf32> to vector<1x16x1xf32>
    %34 = arith.truncf %31 : vector<1x16x4xf32> to vector<1x16x4xbf16>
    "tpu.trace_start"() <{level = 10 : i32, message = "gqk,gkd->gqd"}> : () -> ()
    %cst_23 = arith.constant dense<0.000000e+00> : vector<1x16x4xf32>
    %35 = tpu.matmul %34, %25, %cst_23 {dimension_numbers = #tpu.dot_dimension_numbers<[2], [1], [1], [2], [0, 0, 0, 1, 1, 2], [0], [0]>} : vector<1x16x4xbf16>, vector<1x4x4xbf16>, vector<1x16x4xf32> -> vector<1x16x4xf32>
    "tpu.trace_stop"() : () -> ()
    %36 = tpu.reciprocal %33 {approx = true} : vector<1x16x1xf32> -> vector<1x16x1xf32>
    %37 = vector.broadcast %36 : vector<1x16x1xf32> to vector<1x16x4xf32>
    %38 = arith.mulf %35, %37 : vector<1x16x4xf32>
    %c0_24 = arith.constant 0 : index
    %c0_25 = arith.constant 0 : index
    %c4_26 = arith.constant 4 : index
    %39 = vector.load %arg3[%c0_24, %c0_25, %c4_26] : memref<1x16x32xf32, #tpu.memory_space<vmem>>, vector<1x16x4xf32>
    tpu.vector_store %arg3[%c0_24, %c0_25, %c4_26], %38 {strides = array<i32>} : memref<1x16x32xf32, #tpu.memory_space<vmem>>, vector<1x16x4xf32>,
    %c0_27 = arith.constant 0 : index
    %c0_28 = arith.constant 0 : index
    %c8 = arith.constant 8 : index
    %40 = vector.load %arg1[%c0_27, %c0_28, %c8] : memref<1x16x32xf32, #tpu.memory_space<vmem>>, vector<1x16x4xf32>
    %41 = arith.truncf %40 : vector<1x16x4xf32> to vector<1x16x4xbf16>
    %c0_29 = arith.constant 0 : index
    %c0_30 = arith.constant 0 : index
    %c8_31 = arith.constant 8 : index
    %42 = vector.load %arg2[%c0_29, %c0_30, %c8_31] : memref<1x4x64xf32, #tpu.memory_space<vmem>>, vector<1x4x4xf32>
    %43 = arith.truncf %42 : vector<1x4x4xf32> to vector<1x4x4xbf16>
    %c0_32 = arith.constant 0 : index
    %c0_33 = arith.constant 0 : index
    %c40 = arith.constant 40 : index
    %44 = vector.load %arg2[%c0_32, %c0_33, %c40] : memref<1x4x64xf32, #tpu.memory_space<vmem>>, vector<1x4x4xf32>
    %45 = arith.truncf %44 : vector<1x4x4xf32> to vector<1x4x4xbf16>
    "tpu.trace_start"() <{level = 10 : i32, message = "gqd,gkd->gqk"}> : () -> ()
    %cst_34 = arith.constant dense<0.000000e+00> : vector<1x16x4xf32>
    %46 = tpu.matmul %41, %43, %cst_34 {dimension_numbers = #tpu.dot_dimension_numbers<[2], [2], [1], [1], [0, 0, 0, 1, 1, 1], [0], [0]>} : vector<1x16x4xbf16>, vector<1x4x4xbf16>, vector<1x16x4xf32> -> vector<1x16x4xf32>
    "tpu.trace_stop"() : () -> ()
    %cst_35 = arith.constant dense<0xFF800000> : vector<1x16xf32>
    %47 = vector.multi_reduction <maximumf>, %46, %cst_35 [2] : vector<1x16x4xf32> to vector<1x16xf32>
    %48 = vector.shape_cast %47 : vector<1x16xf32> to vector<1x16x1xf32>
    %49 = vector.broadcast %48 : vector<1x16x1xf32> to vector<1x16x4xf32>
    %50 = arith.subf %46, %49 : vector<1x16x4xf32>
    %51 = math.exp %50 : vector<1x16x4xf32>
    %cst_36 = arith.constant dense<0.000000e+00> : vector<1x16xf32>
    %52 = vector.multi_reduction <add>, %51, %cst_36 [2] : vector<1x16x4xf32> to vector<1x16xf32>
    %53 = vector.shape_cast %52 : vector<1x16xf32> to vector<1x16x1xf32>
    %54 = arith.truncf %51 : vector<1x16x4xf32> to vector<1x16x4xbf16>
    "tpu.trace_start"() <{level = 10 : i32, message = "gqk,gkd->gqd"}> : () -> ()
    %cst_37 = arith.constant dense<0.000000e+00> : vector<1x16x4xf32>
    %55 = tpu.matmul %54, %45, %cst_37 {dimension_numbers = #tpu.dot_dimension_numbers<[2], [1], [1], [2], [0, 0, 0, 1, 1, 2], [0], [0]>} : vector<1x16x4xbf16>, vector<1x4x4xbf16>, vector<1x16x4xf32> -> vector<1x16x4xf32>
    "tpu.trace_stop"() : () -> ()
    %56 = tpu.reciprocal %53 {approx = true} : vector<1x16x1xf32> -> vector<1x16x1xf32>
    %57 = vector.broadcast %56 : vector<1x16x1xf32> to vector<1x16x4xf32>
    %58 = arith.mulf %55, %57 : vector<1x16x4xf32>
    %c0_38 = arith.constant 0 : index
    %c0_39 = arith.constant 0 : index
    %c8_40 = arith.constant 8 : index
    %59 = vector.load %arg3[%c0_38, %c0_39, %c8_40] : memref<1x16x32xf32, #tpu.memory_space<vmem>>, vector<1x16x4xf32>
    tpu.vector_store %arg3[%c0_38, %c0_39, %c8_40], %58 {strides = array<i32>} : memref<1x16x32xf32, #tpu.memory_space<vmem>>, vector<1x16x4xf32>,
    %c0_41 = arith.constant 0 : index
    %c0_42 = arith.constant 0 : index
    %c12 = arith.constant 12 : index
    %60 = vector.load %arg1[%c0_41, %c0_42, %c12] : memref<1x16x32xf32, #tpu.memory_space<vmem>>, vector<1x16x4xf32>
    %61 = arith.truncf %60 : vector<1x16x4xf32> to vector<1x16x4xbf16>
    %c0_43 = arith.constant 0 : index
    %c0_44 = arith.constant 0 : index
    %c12_45 = arith.constant 12 : index
    %62 = vector.load %arg2[%c0_43, %c0_44, %c12_45] : memref<1x4x64xf32, #tpu.memory_space<vmem>>, vector<1x4x4xf32>
    %63 = arith.truncf %62 : vector<1x4x4xf32> to vector<1x4x4xbf16>
    %c0_46 = arith.constant 0 : index
    %c0_47 = arith.constant 0 : index
    %c44 = arith.constant 44 : index
    %64 = vector.load %arg2[%c0_46, %c0_47, %c44] : memref<1x4x64xf32, #tpu.memory_space<vmem>>, vector<1x4x4xf32>
    %65 = arith.truncf %64 : vector<1x4x4xf32> to vector<1x4x4xbf16>
    "tpu.trace_start"() <{level = 10 : i32, message = "gqd,gkd->gqk"}> : () -> ()
    %cst_48 = arith.constant dense<0.000000e+00> : vector<1x16x4xf32>
    %66 = tpu.matmul %61, %63, %cst_48 {dimension_numbers = #tpu.dot_dimension_numbers<[2], [2], [1], [1], [0, 0, 0, 1, 1, 1], [0], [0]>} : vector<1x16x4xbf16>, vector<1x4x4xbf16>, vector<1x16x4xf32> -> vector<1x16x4xf32>
    "tpu.trace_stop"() : () -> ()
    %cst_49 = arith.constant dense<0xFF800000> : vector<1x16xf32>
    %67 = vector.multi_reduction <maximumf>, %66, %cst_49 [2] : vector<1x16x4xf32> to vector<1x16xf32>
    %68 = vector.shape_cast %67 : vector<1x16xf32> to vector<1x16x1xf32>
    %69 = vector.broadcast %68 : vector<1x16x1xf32> to vector<1x16x4xf32>
    %70 = arith.subf %66, %69 : vector<1x16x4xf32>
    %71 = math.exp %70 : vector<1x16x4xf32>
    %cst_50 = arith.constant dense<0.000000e+00> : vector<1x16xf32>
    %72 = vector.multi_reduction <add>, %71, %cst_50 [2] : vector<1x16x4xf32> to vector<1x16xf32>
    %73 = vector.shape_cast %72 : vector<1x16xf32> to vector<1x16x1xf32>
    %74 = arith.truncf %71 : vector<1x16x4xf32> to vector<1x16x4xbf16>
    "tpu.trace_start"() <{level = 10 : i32, message = "gqk,gkd->gqd"}> : () -> ()
    %cst_51 = arith.constant dense<0.000000e+00> : vector<1x16x4xf32>
    %75 = tpu.matmul %74, %65, %cst_51 {dimension_numbers = #tpu.dot_dimension_numbers<[2], [1], [1], [2], [0, 0, 0, 1, 1, 2], [0], [0]>} : vector<1x16x4xbf16>, vector<1x4x4xbf16>, vector<1x16x4xf32> -> vector<1x16x4xf32>
    "tpu.trace_stop"() : () -> ()
    %76 = tpu.reciprocal %73 {approx = true} : vector<1x16x1xf32> -> vector<1x16x1xf32>
    %77 = vector.broadcast %76 : vector<1x16x1xf32> to vector<1x16x4xf32>
    %78 = arith.mulf %75, %77 : vector<1x16x4xf32>
    %c0_52 = arith.constant 0 : index
    %c0_53 = arith.constant 0 : index
    %c12_54 = arith.constant 12 : index
    %79 = vector.load %arg3[%c0_52, %c0_53, %c12_54] : memref<1x16x32xf32, #tpu.memory_space<vmem>>, vector<1x16x4xf32>
    tpu.vector_store %arg3[%c0_52, %c0_53, %c12_54], %78 {strides = array<i32>} : memref<1x16x32xf32, #tpu.memory_space<vmem>>, vector<1x16x4xf32>,
    %c0_55 = arith.constant 0 : index
    %c0_56 = arith.constant 0 : index
    %c16 = arith.constant 16 : index
    %80 = vector.load %arg1[%c0_55, %c0_56, %c16] : memref<1x16x32xf32, #tpu.memory_space<vmem>>, vector<1x16x4xf32>
    %81 = arith.truncf %80 : vector<1x16x4xf32> to vector<1x16x4xbf16>
    %c0_57 = arith.constant 0 : index
    %c0_58 = arith.constant 0 : index
    %c16_59 = arith.constant 16 : index
    %82 = vector.load %arg2[%c0_57, %c0_58, %c16_59] : memref<1x4x64xf32, #tpu.memory_space<vmem>>, vector<1x4x4xf32>
    %83 = arith.truncf %82 : vector<1x4x4xf32> to vector<1x4x4xbf16>
    %c0_60 = arith.constant 0 : index
    %c0_61 = arith.constant 0 : index
    %c48 = arith.constant 48 : index
    %84 = vector.load %arg2[%c0_60, %c0_61, %c48] : memref<1x4x64xf32, #tpu.memory_space<vmem>>, vector<1x4x4xf32>
    %85 = arith.truncf %84 : vector<1x4x4xf32> to vector<1x4x4xbf16>
    "tpu.trace_start"() <{level = 10 : i32, message = "gqd,gkd->gqk"}> : () -> ()
    %cst_62 = arith.constant dense<0.000000e+00> : vector<1x16x4xf32>
    %86 = tpu.matmul %81, %83, %cst_62 {dimension_numbers = #tpu.dot_dimension_numbers<[2], [2], [1], [1], [0, 0, 0, 1, 1, 1], [0], [0]>} : vector<1x16x4xbf16>, vector<1x4x4xbf16>, vector<1x16x4xf32> -> vector<1x16x4xf32>
    "tpu.trace_stop"() : () -> ()
    %cst_63 = arith.constant dense<0xFF800000> : vector<1x16xf32>
    %87 = vector.multi_reduction <maximumf>, %86, %cst_63 [2] : vector<1x16x4xf32> to vector<1x16xf32>
    %88 = vector.shape_cast %87 : vector<1x16xf32> to vector<1x16x1xf32>
    %89 = vector.broadcast %88 : vector<1x16x1xf32> to vector<1x16x4xf32>
    %90 = arith.subf %86, %89 : vector<1x16x4xf32>
    %91 = math.exp %90 : vector<1x16x4xf32>
    %cst_64 = arith.constant dense<0.000000e+00> : vector<1x16xf32>
    %92 = vector.multi_reduction <add>, %91, %cst_64 [2] : vector<1x16x4xf32> to vector<1x16xf32>
    %93 = vector.shape_cast %92 : vector<1x16xf32> to vector<1x16x1xf32>
    %94 = arith.truncf %91 : vector<1x16x4xf32> to vector<1x16x4xbf16>
    "tpu.trace_start"() <{level = 10 : i32, message = "gqk,gkd->gqd"}> : () -> ()
    %cst_65 = arith.constant dense<0.000000e+00> : vector<1x16x4xf32>
    %95 = tpu.matmul %94, %85, %cst_65 {dimension_numbers = #tpu.dot_dimension_numbers<[2], [1], [1], [2], [0, 0, 0, 1, 1, 2], [0], [0]>} : vector<1x16x4xbf16>, vector<1x4x4xbf16>, vector<1x16x4xf32> -> vector<1x16x4xf32>
    "tpu.trace_stop"() : () -> ()
    %96 = tpu.reciprocal %93 {approx = true} : vector<1x16x1xf32> -> vector<1x16x1xf32>
    %97 = vector.broadcast %96 : vector<1x16x1xf32> to vector<1x16x4xf32>
    %98 = arith.mulf %95, %97 : vector<1x16x4xf32>
    %c0_66 = arith.constant 0 : index
    %c0_67 = arith.constant 0 : index
    %c16_68 = arith.constant 16 : index
    %99 = vector.load %arg3[%c0_66, %c0_67, %c16_68] : memref<1x16x32xf32, #tpu.memory_space<vmem>>, vector<1x16x4xf32>
    tpu.vector_store %arg3[%c0_66, %c0_67, %c16_68], %98 {strides = array<i32>} : memref<1x16x32xf32, #tpu.memory_space<vmem>>, vector<1x16x4xf32>,
    %c0_69 = arith.constant 0 : index
    %c0_70 = arith.constant 0 : index
    %c20 = arith.constant 20 : index
    %100 = vector.load %arg1[%c0_69, %c0_70, %c20] : memref<1x16x32xf32, #tpu.memory_space<vmem>>, vector<1x16x4xf32>
    %101 = arith.truncf %100 : vector<1x16x4xf32> to vector<1x16x4xbf16>
    %c0_71 = arith.constant 0 : index
    %c0_72 = arith.constant 0 : index
    %c20_73 = arith.constant 20 : index
    %102 = vector.load %arg2[%c0_71, %c0_72, %c20_73] : memref<1x4x64xf32, #tpu.memory_space<vmem>>, vector<1x4x4xf32>
    %103 = arith.truncf %102 : vector<1x4x4xf32> to vector<1x4x4xbf16>
    %c0_74 = arith.constant 0 : index
    %c0_75 = arith.constant 0 : index
    %c52 = arith.constant 52 : index
    %104 = vector.load %arg2[%c0_74, %c0_75, %c52] : memref<1x4x64xf32, #tpu.memory_space<vmem>>, vector<1x4x4xf32>
    %105 = arith.truncf %104 : vector<1x4x4xf32> to vector<1x4x4xbf16>
    "tpu.trace_start"() <{level = 10 : i32, message = "gqd,gkd->gqk"}> : () -> ()
    %cst_76 = arith.constant dense<0.000000e+00> : vector<1x16x4xf32>
    %106 = tpu.matmul %101, %103, %cst_76 {dimension_numbers = #tpu.dot_dimension_numbers<[2], [2], [1], [1], [0, 0, 0, 1, 1, 1], [0], [0]>} : vector<1x16x4xbf16>, vector<1x4x4xbf16>, vector<1x16x4xf32> -> vector<1x16x4xf32>
    "tpu.trace_stop"() : () -> ()
    %cst_77 = arith.constant dense<0xFF800000> : vector<1x16xf32>
    %107 = vector.multi_reduction <maximumf>, %106, %cst_77 [2] : vector<1x16x4xf32> to vector<1x16xf32>
    %108 = vector.shape_cast %107 : vector<1x16xf32> to vector<1x16x1xf32>
    %109 = vector.broadcast %108 : vector<1x16x1xf32> to vector<1x16x4xf32>
    %110 = arith.subf %106, %109 : vector<1x16x4xf32>
    %111 = math.exp %110 : vector<1x16x4xf32>
    %cst_78 = arith.constant dense<0.000000e+00> : vector<1x16xf32>
    %112 = vector.multi_reduction <add>, %111, %cst_78 [2] : vector<1x16x4xf32> to vector<1x16xf32>
    %113 = vector.shape_cast %112 : vector<1x16xf32> to vector<1x16x1xf32>
    %114 = arith.truncf %111 : vector<1x16x4xf32> to vector<1x16x4xbf16>
    "tpu.trace_start"() <{level = 10 : i32, message = "gqk,gkd->gqd"}> : () -> ()
    %cst_79 = arith.constant dense<0.000000e+00> : vector<1x16x4xf32>
    %115 = tpu.matmul %114, %105, %cst_79 {dimension_numbers = #tpu.dot_dimension_numbers<[2], [1], [1], [2], [0, 0, 0, 1, 1, 2], [0], [0]>} : vector<1x16x4xbf16>, vector<1x4x4xbf16>, vector<1x16x4xf32> -> vector<1x16x4xf32>
    "tpu.trace_stop"() : () -> ()
    %116 = tpu.reciprocal %113 {approx = true} : vector<1x16x1xf32> -> vector<1x16x1xf32>
    %117 = vector.broadcast %116 : vector<1x16x1xf32> to vector<1x16x4xf32>
    %118 = arith.mulf %115, %117 : vector<1x16x4xf32>
    %c0_80 = arith.constant 0 : index
    %c0_81 = arith.constant 0 : index
    %c20_82 = arith.constant 20 : index
    %119 = vector.load %arg3[%c0_80, %c0_81, %c20_82] : memref<1x16x32xf32, #tpu.memory_space<vmem>>, vector<1x16x4xf32>
    tpu.vector_store %arg3[%c0_80, %c0_81, %c20_82], %118 {strides = array<i32>} : memref<1x16x32xf32, #tpu.memory_space<vmem>>, vector<1x16x4xf32>,
    %c0_83 = arith.constant 0 : index
    %c0_84 = arith.constant 0 : index
    %c24 = arith.constant 24 : index
    %120 = vector.load %arg1[%c0_83, %c0_84, %c24] : memref<1x16x32xf32, #tpu.memory_space<vmem>>, vector<1x16x4xf32>
    %121 = arith.truncf %120 : vector<1x16x4xf32> to vector<1x16x4xbf16>
    %c0_85 = arith.constant 0 : index
    %c0_86 = arith.constant 0 : index
    %c24_87 = arith.constant 24 : index
    %122 = vector.load %arg2[%c0_85, %c0_86, %c24_87] : memref<1x4x64xf32, #tpu.memory_space<vmem>>, vector<1x4x4xf32>
    %123 = arith.truncf %122 : vector<1x4x4xf32> to vector<1x4x4xbf16>
    %c0_88 = arith.constant 0 : index
    %c0_89 = arith.constant 0 : index
    %c56 = arith.constant 56 : index
    %124 = vector.load %arg2[%c0_88, %c0_89, %c56] : memref<1x4x64xf32, #tpu.memory_space<vmem>>, vector<1x4x4xf32>
    %125 = arith.truncf %124 : vector<1x4x4xf32> to vector<1x4x4xbf16>
    "tpu.trace_start"() <{level = 10 : i32, message = "gqd,gkd->gqk"}> : () -> ()
    %cst_90 = arith.constant dense<0.000000e+00> : vector<1x16x4xf32>
    %126 = tpu.matmul %121, %123, %cst_90 {dimension_numbers = #tpu.dot_dimension_numbers<[2], [2], [1], [1], [0, 0, 0, 1, 1, 1], [0], [0]>} : vector<1x16x4xbf16>, vector<1x4x4xbf16>, vector<1x16x4xf32> -> vector<1x16x4xf32>
    "tpu.trace_stop"() : () -> ()
    %cst_91 = arith.constant dense<0xFF800000> : vector<1x16xf32>
    %127 = vector.multi_reduction <maximumf>, %126, %cst_91 [2] : vector<1x16x4xf32> to vector<1x16xf32>
    %128 = vector.shape_cast %127 : vector<1x16xf32> to vector<1x16x1xf32>
    %129 = vector.broadcast %128 : vector<1x16x1xf32> to vector<1x16x4xf32>
    %130 = arith.subf %126, %129 : vector<1x16x4xf32>
    %131 = math.exp %130 : vector<1x16x4xf32>
    %cst_92 = arith.constant dense<0.000000e+00> : vector<1x16xf32>
    %132 = vector.multi_reduction <add>, %131, %cst_92 [2] : vector<1x16x4xf32> to vector<1x16xf32>
    %133 = vector.shape_cast %132 : vector<1x16xf32> to vector<1x16x1xf32>
    %134 = arith.truncf %131 : vector<1x16x4xf32> to vector<1x16x4xbf16>
    "tpu.trace_start"() <{level = 10 : i32, message = "gqk,gkd->gqd"}> : () -> ()
    %cst_93 = arith.constant dense<0.000000e+00> : vector<1x16x4xf32>
    %135 = tpu.matmul %134, %125, %cst_93 {dimension_numbers = #tpu.dot_dimension_numbers<[2], [1], [1], [2], [0, 0, 0, 1, 1, 2], [0], [0]>} : vector<1x16x4xbf16>, vector<1x4x4xbf16>, vector<1x16x4xf32> -> vector<1x16x4xf32>
    "tpu.trace_stop"() : () -> ()
    %136 = tpu.reciprocal %133 {approx = true} : vector<1x16x1xf32> -> vector<1x16x1xf32>
    %137 = vector.broadcast %136 : vector<1x16x1xf32> to vector<1x16x4xf32>
    %138 = arith.mulf %135, %137 : vector<1x16x4xf32>
    %c0_94 = arith.constant 0 : index
    %c0_95 = arith.constant 0 : index
    %c24_96 = arith.constant 24 : index
    %139 = vector.load %arg3[%c0_94, %c0_95, %c24_96] : memref<1x16x32xf32, #tpu.memory_space<vmem>>, vector<1x16x4xf32>
    tpu.vector_store %arg3[%c0_94, %c0_95, %c24_96], %138 {strides = array<i32>} : memref<1x16x32xf32, #tpu.memory_space<vmem>>, vector<1x16x4xf32>,
    %c0_97 = arith.constant 0 : index
    %c0_98 = arith.constant 0 : index
    %c28 = arith.constant 28 : index
    %140 = vector.load %arg1[%c0_97, %c0_98, %c28] : memref<1x16x32xf32, #tpu.memory_space<vmem>>, vector<1x16x4xf32>
    %141 = arith.truncf %140 : vector<1x16x4xf32> to vector<1x16x4xbf16>
    %c0_99 = arith.constant 0 : index
    %c0_100 = arith.constant 0 : index
    %c28_101 = arith.constant 28 : index
    %142 = vector.load %arg2[%c0_99, %c0_100, %c28_101] : memref<1x4x64xf32, #tpu.memory_space<vmem>>, vector<1x4x4xf32>
    %143 = arith.truncf %142 : vector<1x4x4xf32> to vector<1x4x4xbf16>
    %c0_102 = arith.constant 0 : index
    %c0_103 = arith.constant 0 : index
    %c60 = arith.constant 60 : index
    %144 = vector.load %arg2[%c0_102, %c0_103, %c60] : memref<1x4x64xf32, #tpu.memory_space<vmem>>, vector<1x4x4xf32>
    %145 = arith.truncf %144 : vector<1x4x4xf32> to vector<1x4x4xbf16>
    "tpu.trace_start"() <{level = 10 : i32, message = "gqd,gkd->gqk"}> : () -> ()
    %cst_104 = arith.constant dense<0.000000e+00> : vector<1x16x4xf32>
    %146 = tpu.matmul %141, %143, %cst_104 {dimension_numbers = #tpu.dot_dimension_numbers<[2], [2], [1], [1], [0, 0, 0, 1, 1, 1], [0], [0]>} : vector<1x16x4xbf16>, vector<1x4x4xbf16>, vector<1x16x4xf32> -> vector<1x16x4xf32>
    "tpu.trace_stop"() : () -> ()
    %cst_105 = arith.constant dense<0xFF800000> : vector<1x16xf32>
    %147 = vector.multi_reduction <maximumf>, %146, %cst_105 [2] : vector<1x16x4xf32> to vector<1x16xf32>
    %148 = vector.shape_cast %147 : vector<1x16xf32> to vector<1x16x1xf32>
    %149 = vector.broadcast %148 : vector<1x16x1xf32> to vector<1x16x4xf32>
    %150 = arith.subf %146, %149 : vector<1x16x4xf32>
    %151 = math.exp %150 : vector<1x16x4xf32>
    %cst_106 = arith.constant dense<0.000000e+00> : vector<1x16xf32>
    %152 = vector.multi_reduction <add>, %151, %cst_106 [2] : vector<1x16x4xf32> to vector<1x16xf32>
    %153 = vector.shape_cast %152 : vector<1x16xf32> to vector<1x16x1xf32>
    %154 = arith.truncf %151 : vector<1x16x4xf32> to vector<1x16x4xbf16>
    "tpu.trace_start"() <{level = 10 : i32, message = "gqk,gkd->gqd"}> : () -> ()
    %cst_107 = arith.constant dense<0.000000e+00> : vector<1x16x4xf32>
    %155 = tpu.matmul %154, %145, %cst_107 {dimension_numbers = #tpu.dot_dimension_numbers<[2], [1], [1], [2], [0, 0, 0, 1, 1, 2], [0], [0]>} : vector<1x16x4xbf16>, vector<1x4x4xbf16>, vector<1x16x4xf32> -> vector<1x16x4xf32>
    "tpu.trace_stop"() : () -> ()
    %156 = tpu.reciprocal %153 {approx = true} : vector<1x16x1xf32> -> vector<1x16x1xf32>
    %157 = vector.broadcast %156 : vector<1x16x1xf32> to vector<1x16x4xf32>
    %158 = arith.mulf %155, %157 : vector<1x16x4xf32>
    %c0_108 = arith.constant 0 : index
    %c0_109 = arith.constant 0 : index
    %c28_110 = arith.constant 28 : index
    %159 = vector.load %arg3[%c0_108, %c0_109, %c28_110] : memref<1x16x32xf32, #tpu.memory_space<vmem>>, vector<1x16x4xf32>
    tpu.vector_store %arg3[%c0_108, %c0_109, %c28_110], %158 {strides = array<i32>} : memref<1x16x32xf32, #tpu.memory_space<vmem>>, vector<1x16x4xf32>,
    return
  }
  func.func @transform_0(%arg0: i32) -> (i32, i32, i32) {
    %c0_i32 = arith.constant 0 : i32
    %c0_i32_0 = arith.constant 0 : i32
    %c0_i32_1 = arith.constant 0 : i32
    return %arg0, %c0_i32, %c0_i32_0 : i32, i32, i32
  }
  func.func @transform_1(%arg0: i32) -> (i32, i32, i32) {
    %c0_i32 = arith.constant 0 : i32
    %c0_i32_0 = arith.constant 0 : i32
    %c0_i32_1 = arith.constant 0 : i32
    return %arg0, %c0_i32, %c0_i32_0 : i32, i32, i32
  }
  func.func @transform_2(%arg0: i32) -> (i32, i32, i32) {
    %c0_i32 = arith.constant 0 : i32
    %c0_i32_0 = arith.constant 0 : i32
    %c0_i32_1 = arith.constant 0 : i32
    return %arg0, %c0_i32, %c0_i32_0 : i32, i32, i32
  }
}

module attributes {stable_mosaic.version = 11 : i64} {
  func.func @kernel(%arg0: i32, %arg1: i32, %arg2: memref<32x32xf32, #tpu.memory_space<vmem>>, %arg3: memref<1x32xf32, #tpu.memory_space<vmem>>, %arg4: memref<1x32xf32, #tpu.memory_space<vmem>>, %arg5: memref<32x128xbf16, #tpu.memory_space<vmem>>, %arg6: memref<1x128xf32, #tpu.memory_space<vmem>>, %arg7: memref<32x128xf32, #tpu.memory_space<vmem>>, %arg8: memref<32x32xbf16, #tpu.memory_space<vmem>>) attributes {dimension_semantics = [#tpu.dimension_semantics<parallel>, #tpu.dimension_semantics<arbitrary>], iteration_bounds = array<i64: 1, 1>, scalar_prefetch = 0 : i64, scratch_operands = 1 : i64, tpu.core_type = #tpu.core_type<tc>, window_params = [{transform_indices = @transform_0, window_bounds = array<i64: 32, 32>}, {pipeline_mode = #tpu.pipeline_mode<synchronous>, transform_indices = @transform_1, window_bounds = array<i64: 1, 32>}, {pipeline_mode = #tpu.pipeline_mode<synchronous>, transform_indices = @transform_2, window_bounds = array<i64: 1, 32>}, {transform_indices = @transform_3, window_bounds = array<i64: 32, 128>}, {transform_indices = @transform_4, window_bounds = array<i64: 1, 128>}, {transform_indices = @transform_5, window_bounds = array<i64: 32, 128>}]} {
    %c0_i32 = arith.constant 0 : i32
    %0 = arith.cmpi eq, %arg1, %c0_i32 : i32
    %1 = arith.extui %0 : i1 to i32
    %c0_i32_0 = arith.constant 0 : i32
    %2 = arith.cmpi ne, %1, %c0_i32_0 : i32
    scf.if %2 {
      %c0_11 = arith.constant 0 : index
      %c0_12 = arith.constant 0 : index
      %18 = vector.load %arg2[%c0_11, %c0_12] : memref<32x32xf32, #tpu.memory_space<vmem>>, vector<32x32xf32>
      %cst_13 = arith.constant dense<0.000000e+00> : vector<32xf32>
      %19 = vector.multi_reduction <add>, %18, %cst_13 [1] : vector<32x32xf32> to vector<32xf32>
      %20 = vector.shape_cast %19 : vector<32xf32> to vector<32x1xf32>
      %cst_14 = arith.constant 3.200000e+01 : f32
      %21 = vector.broadcast %cst_14 : f32 to vector<32x1xf32>
      %22 = arith.divf %20, %21 : vector<32x1xf32>
      %23 = vector.broadcast %22 : vector<32x1xf32> to vector<32x32xf32>
      %24 = arith.subf %18, %23 : vector<32x32xf32>
      %25 = arith.mulf %24, %24 : vector<32x32xf32>
      %cst_15 = arith.constant dense<0.000000e+00> : vector<32xf32>
      %26 = vector.multi_reduction <add>, %25, %cst_15 [1] : vector<32x32xf32> to vector<32xf32>
      %27 = vector.shape_cast %26 : vector<32xf32> to vector<32x1xf32>
      %cst_16 = arith.constant 3.200000e+01 : f32
      %28 = vector.broadcast %cst_16 : f32 to vector<32x1xf32>
      %29 = arith.divf %27, %28 : vector<32x1xf32>
      %30 = vector.broadcast %22 : vector<32x1xf32> to vector<32x32xf32>
      %31 = arith.subf %18, %30 : vector<32x32xf32>
      %cst_17 = arith.constant 9.99999974E-6 : f32
      %32 = vector.broadcast %cst_17 : f32 to vector<32x1xf32>
      %33 = arith.addf %29, %32 : vector<32x1xf32>
      %34 = math.rsqrt %33 : vector<32x1xf32>
      %35 = vector.broadcast %34 : vector<32x1xf32> to vector<32x32xf32>
      %36 = arith.mulf %31, %35 : vector<32x32xf32>
      %c0_18 = arith.constant 0 : index
      %c0_19 = arith.constant 0 : index
      %37 = vector.load %arg3[%c0_18, %c0_19] : memref<1x32xf32, #tpu.memory_space<vmem>>, vector<1x32xf32>
      %38 = vector.broadcast %37 : vector<1x32xf32> to vector<32x32xf32>
      %39 = arith.mulf %36, %38 : vector<32x32xf32>
      %c0_20 = arith.constant 0 : index
      %c0_21 = arith.constant 0 : index
      %40 = vector.load %arg4[%c0_20, %c0_21] : memref<1x32xf32, #tpu.memory_space<vmem>>, vector<1x32xf32>
      %41 = vector.broadcast %40 : vector<1x32xf32> to vector<32x32xf32>
      %42 = arith.addf %39, %41 : vector<32x32xf32>
      %43 = arith.truncf %42 : vector<32x32xf32> to vector<32x32xbf16>
      %c0_22 = arith.constant 0 : index
      %c0_23 = arith.constant 0 : index
      %44 = vector.load %arg8[%c0_22, %c0_23] : memref<32x32xbf16, #tpu.memory_space<vmem>>, vector<32x32xbf16>
      tpu.vector_store %arg8[%c0_22, %c0_23], %43 {strides = array<i32>} : memref<32x32xbf16, #tpu.memory_space<vmem>>, vector<32x32xbf16>,
    } else {
    }
    %c0 = arith.constant 0 : index
    %c0_1 = arith.constant 0 : index
    %3 = vector.load %arg8[%c0, %c0_1] : memref<32x32xbf16, #tpu.memory_space<vmem>>, vector<32x32xbf16>
    %c0_2 = arith.constant 0 : index
    %c0_3 = arith.constant 0 : index
    %4 = vector.load %arg5[%c0_2, %c0_3] : memref<32x128xbf16, #tpu.memory_space<vmem>>, vector<32x128xbf16>
    %cst = arith.constant dense<0.000000e+00> : vector<32x128xf32>
    %5 = tpu.matmul %3, %4, %cst {dimension_numbers = #tpu.dot_dimension_numbers<[1], [0], [0], [1], [0, 0, 1, 1], [], []>} : vector<32x32xbf16>, vector<32x128xbf16>, vector<32x128xf32> -> vector<32x128xf32>
    %c0_4 = arith.constant 0 : index
    %c0_5 = arith.constant 0 : index
    %6 = vector.load %arg6[%c0_4, %c0_5] : memref<1x128xf32, #tpu.memory_space<vmem>>, vector<1x128xf32>
    %7 = vector.broadcast %6 : vector<1x128xf32> to vector<32x128xf32>
    %8 = arith.addf %5, %7 : vector<32x128xf32>
    %cst_6 = arith.constant 5.000000e-01 : f32
    %9 = vector.broadcast %cst_6 : f32 to vector<32x128xf32>
    %10 = arith.mulf %9, %8 : vector<32x128xf32>
    %cst_7 = arith.constant 0.707106769 : f32
    %11 = vector.broadcast %cst_7 : f32 to vector<32x128xf32>
    %12 = arith.mulf %8, %11 : vector<32x128xf32>
    %13 = math.erf %12 : vector<32x128xf32>
    %cst_8 = arith.constant 1.000000e+00 : f32
    %14 = vector.broadcast %cst_8 : f32 to vector<32x128xf32>
    %15 = arith.addf %14, %13 : vector<32x128xf32>
    %16 = arith.mulf %10, %15 : vector<32x128xf32>
    %c0_9 = arith.constant 0 : index
    %c0_10 = arith.constant 0 : index
    %17 = vector.load %arg7[%c0_9, %c0_10] : memref<32x128xf32, #tpu.memory_space<vmem>>, vector<32x128xf32>
    tpu.vector_store %arg7[%c0_9, %c0_10], %16 {strides = array<i32>} : memref<32x128xf32, #tpu.memory_space<vmem>>, vector<32x128xf32>,
    return
  }
  func.func @transform_0(%arg0: i32, %arg1: i32) -> (i32, i32) {
    %c0_i32 = arith.constant 0 : i32
    %c0_i32_0 = arith.constant 0 : i32
    return %arg0, %c0_i32 : i32, i32
  }
  func.func @transform_1(%arg0: i32, %arg1: i32) -> (i32, i32) {
    %c0_i32 = arith.constant 0 : i32
    %c0_i32_0 = arith.constant 0 : i32
    %c0_i32_1 = arith.constant 0 : i32
    return %c0_i32, %c0_i32_0 : i32, i32
  }
  func.func @transform_2(%arg0: i32, %arg1: i32) -> (i32, i32) {
    %c0_i32 = arith.constant 0 : i32
    %c0_i32_0 = arith.constant 0 : i32
    %c0_i32_1 = arith.constant 0 : i32
    return %c0_i32, %c0_i32_0 : i32, i32
  }
  func.func @transform_3(%arg0: i32, %arg1: i32) -> (i32, i32) {
    %c0_i32 = arith.constant 0 : i32
    %c0_i32_0 = arith.constant 0 : i32
    return %c0_i32, %arg1 : i32, i32
  }
  func.func @transform_4(%arg0: i32, %arg1: i32) -> (i32, i32) {
    %c0_i32 = arith.constant 0 : i32
    %c0_i32_0 = arith.constant 0 : i32
    return %c0_i32, %arg1 : i32, i32
  }
  func.func @transform_5(%arg0: i32, %arg1: i32) -> (i32, i32) {
    %c0_i32 = arith.constant 0 : i32
    return %arg0, %arg1 : i32, i32
  }
}

module attributes {stable_mosaic.version = 11 : i64} {
  func.func @kernel(%arg0: i32, %arg1: i32, %arg2: i32, %arg3: memref<32x128xf32, #tpu.memory_space<vmem>>, %arg4: memref<128x32xbf16, #tpu.memory_space<vmem>>, %arg5: memref<1x32xf32, #tpu.memory_space<vmem>>, %arg6: memref<32x32xf32, #tpu.memory_space<vmem>>, %arg7: memref<32x32xf32, #tpu.memory_space<vmem>>, %arg8: memref<32x32xf32, #tpu.memory_space<vmem>>) attributes {dimension_semantics = [#tpu.dimension_semantics<parallel>, #tpu.dimension_semantics<parallel>, #tpu.dimension_semantics<arbitrary>], iteration_bounds = array<i64: 1, 1, 1>, scalar_prefetch = 0 : i64, scratch_operands = 1 : i64, tpu.core_type = #tpu.core_type<tc>, window_params = [{transform_indices = @transform_0, window_bounds = array<i64: 32, 128>}, {transform_indices = @transform_1, window_bounds = array<i64: 128, 32>}, {transform_indices = @transform_2, window_bounds = array<i64: 1, 32>}, {transform_indices = @transform_3, window_bounds = array<i64: 32, 32>}, {transform_indices = @transform_4, window_bounds = array<i64: 32, 32>}]} {
    %c0_i32 = arith.constant 0 : i32
    %0 = arith.cmpi eq, %arg2, %c0_i32 : i32
    %1 = arith.extui %0 : i1 to i32
    %c0_i32_0 = arith.constant 0 : i32
    %2 = arith.cmpi ne, %1, %c0_i32_0 : i32
    scf.if %2 {
      %cst_10 = arith.constant 0.000000e+00 : f32
      %13 = vector.broadcast %cst_10 : f32 to vector<32x32xf32>
      %c0_11 = arith.constant 0 : index
      %c0_12 = arith.constant 0 : index
      %14 = vector.load %arg8[%c0_11, %c0_12] : memref<32x32xf32, #tpu.memory_space<vmem>>, vector<32x32xf32>
      tpu.vector_store %arg8[%c0_11, %c0_12], %13 {strides = array<i32>} : memref<32x32xf32, #tpu.memory_space<vmem>>, vector<32x32xf32>,
    } else {
    }
    %c0 = arith.constant 0 : index
    %c0_1 = arith.constant 0 : index
    %3 = vector.load %arg8[%c0, %c0_1] : memref<32x32xf32, #tpu.memory_space<vmem>>, vector<32x32xf32>
    %c0_2 = arith.constant 0 : index
    %c0_3 = arith.constant 0 : index
    %4 = vector.load %arg3[%c0_2, %c0_3] : memref<32x128xf32, #tpu.memory_space<vmem>>, vector<32x128xf32>
    %5 = arith.truncf %4 : vector<32x128xf32> to vector<32x128xbf16>
    %c0_4 = arith.constant 0 : index
    %c0_5 = arith.constant 0 : index
    %6 = vector.load %arg4[%c0_4, %c0_5] : memref<128x32xbf16, #tpu.memory_space<vmem>>, vector<128x32xbf16>
    %cst = arith.constant dense<0.000000e+00> : vector<32x32xf32>
    %7 = tpu.matmul %5, %6, %cst {dimension_numbers = #tpu.dot_dimension_numbers<[1], [0], [0], [1], [0, 0, 1, 1], [], []>} : vector<32x128xbf16>, vector<128x32xbf16>, vector<32x32xf32> -> vector<32x32xf32>
    %8 = arith.addf %3, %7 : vector<32x32xf32>
    %c0_6 = arith.constant 0 : index
    %c0_7 = arith.constant 0 : index
    %9 = vector.load %arg8[%c0_6, %c0_7] : memref<32x32xf32, #tpu.memory_space<vmem>>, vector<32x32xf32>
    tpu.vector_store %arg8[%c0_6, %c0_7], %8 {strides = array<i32>} : memref<32x32xf32, #tpu.memory_space<vmem>>, vector<32x32xf32>,
    %c0_i32_8 = arith.constant 0 : i32
    %10 = arith.cmpi eq, %arg2, %c0_i32_8 : i32
    %11 = arith.extui %10 : i1 to i32
    %c0_i32_9 = arith.constant 0 : i32
    %12 = arith.cmpi ne, %11, %c0_i32_9 : i32
    scf.if %12 {
      %c0_10 = arith.constant 0 : index
      %c0_11 = arith.constant 0 : index
      %13 = vector.load %arg8[%c0_10, %c0_11] : memref<32x32xf32, #tpu.memory_space<vmem>>, vector<32x32xf32>
      %c0_12 = arith.constant 0 : index
      %c0_13 = arith.constant 0 : index
      %14 = vector.load %arg5[%c0_12, %c0_13] : memref<1x32xf32, #tpu.memory_space<vmem>>, vector<1x32xf32>
      %15 = vector.broadcast %14 : vector<1x32xf32> to vector<32x32xf32>
      %16 = arith.addf %13, %15 : vector<32x32xf32>
      %c0_14 = arith.constant 0 : index
      %c0_15 = arith.constant 0 : index
      %17 = vector.load %arg6[%c0_14, %c0_15] : memref<32x32xf32, #tpu.memory_space<vmem>>, vector<32x32xf32>
      %18 = arith.addf %16, %17 : vector<32x32xf32>
      %c0_16 = arith.constant 0 : index
      %c0_17 = arith.constant 0 : index
      %19 = vector.load %arg7[%c0_16, %c0_17] : memref<32x32xf32, #tpu.memory_space<vmem>>, vector<32x32xf32>
      tpu.vector_store %arg7[%c0_16, %c0_17], %18 {strides = array<i32>} : memref<32x32xf32, #tpu.memory_space<vmem>>, vector<32x32xf32>,
    } else {
    }
    return
  }
  func.func @transform_0(%arg0: i32, %arg1: i32, %arg2: i32) -> (i32, i32) {
    %c0_i32 = arith.constant 0 : i32
    return %arg0, %arg2 : i32, i32
  }
  func.func @transform_1(%arg0: i32, %arg1: i32, %arg2: i32) -> (i32, i32) {
    %c0_i32 = arith.constant 0 : i32
    return %arg2, %arg1 : i32, i32
  }
  func.func @transform_2(%arg0: i32, %arg1: i32, %arg2: i32) -> (i32, i32) {
    %c0_i32 = arith.constant 0 : i32
    %c0_i32_0 = arith.constant 0 : i32
    return %c0_i32, %arg1 : i32, i32
  }
  func.func @transform_3(%arg0: i32, %arg1: i32, %arg2: i32) -> (i32, i32) {
    %c0_i32 = arith.constant 0 : i32
    return %arg0, %arg1 : i32, i32
  }
  func.func @transform_4(%arg0: i32, %arg1: i32, %arg2: i32) -> (i32, i32) {
    %c0_i32 = arith.constant 0 : i32
    return %arg0, %arg1 : i32, i32
  }
}

module attributes {stable_mosaic.version = 11 : i64} {
  func.func @kernel(%arg0: i32, %arg1: i32, %arg2: memref<32x32xf32, #tpu.memory_space<vmem>>, %arg3: memref<1x32xf32, #tpu.memory_space<vmem>>, %arg4: memref<1x32xf32, #tpu.memory_space<vmem>>, %arg5: memref<32x96xbf16, #tpu.memory_space<vmem>>, %arg6: memref<1x96xf32, #tpu.memory_space<vmem>>, %arg7: memref<32x96xf32, #tpu.memory_space<vmem>>, %arg8: memref<32x32xbf16, #tpu.memory_space<vmem>>) attributes {dimension_semantics = [#tpu.dimension_semantics<parallel>, #tpu.dimension_semantics<arbitrary>], iteration_bounds = array<i64: 1, 1>, scalar_prefetch = 0 : i64, scratch_operands = 1 : i64, tpu.core_type = #tpu.core_type<tc>, window_params = [{transform_indices = @transform_0, window_bounds = array<i64: 32, 32>}, {pipeline_mode = #tpu.pipeline_mode<synchronous>, transform_indices = @transform_1, window_bounds = array<i64: 1, 32>}, {pipeline_mode = #tpu.pipeline_mode<synchronous>, transform_indices = @transform_2, window_bounds = array<i64: 1, 32>}, {transform_indices = @transform_3, window_bounds = array<i64: 32, 96>}, {transform_indices = @transform_4, window_bounds = array<i64: 1, 96>}, {transform_indices = @transform_5, window_bounds = array<i64: 32, 96>}]} {
    %c0_i32 = arith.constant 0 : i32
    %0 = arith.cmpi eq, %arg1, %c0_i32 : i32
    %1 = arith.extui %0 : i1 to i32
    %c0_i32_0 = arith.constant 0 : i32
    %2 = arith.cmpi ne, %1, %c0_i32_0 : i32
    scf.if %2 {
      %c0_8 = arith.constant 0 : index
      %c0_9 = arith.constant 0 : index
      %10 = vector.load %arg2[%c0_8, %c0_9] : memref<32x32xf32, #tpu.memory_space<vmem>>, vector<32x32xf32>
      %cst_10 = arith.constant dense<0.000000e+00> : vector<32xf32>
      %11 = vector.multi_reduction <add>, %10, %cst_10 [1] : vector<32x32xf32> to vector<32xf32>
      %12 = vector.shape_cast %11 : vector<32xf32> to vector<32x1xf32>
      %cst_11 = arith.constant 3.200000e+01 : f32
      %13 = vector.broadcast %cst_11 : f32 to vector<32x1xf32>
      %14 = arith.divf %12, %13 : vector<32x1xf32>
      %15 = vector.broadcast %14 : vector<32x1xf32> to vector<32x32xf32>
      %16 = arith.subf %10, %15 : vector<32x32xf32>
      %17 = arith.mulf %16, %16 : vector<32x32xf32>
      %cst_12 = arith.constant dense<0.000000e+00> : vector<32xf32>
      %18 = vector.multi_reduction <add>, %17, %cst_12 [1] : vector<32x32xf32> to vector<32xf32>
      %19 = vector.shape_cast %18 : vector<32xf32> to vector<32x1xf32>
      %cst_13 = arith.constant 3.200000e+01 : f32
      %20 = vector.broadcast %cst_13 : f32 to vector<32x1xf32>
      %21 = arith.divf %19, %20 : vector<32x1xf32>
      %22 = vector.broadcast %14 : vector<32x1xf32> to vector<32x32xf32>
      %23 = arith.subf %10, %22 : vector<32x32xf32>
      %cst_14 = arith.constant 9.99999974E-6 : f32
      %24 = vector.broadcast %cst_14 : f32 to vector<32x1xf32>
      %25 = arith.addf %21, %24 : vector<32x1xf32>
      %26 = math.rsqrt %25 : vector<32x1xf32>
      %27 = vector.broadcast %26 : vector<32x1xf32> to vector<32x32xf32>
      %28 = arith.mulf %23, %27 : vector<32x32xf32>
      %c0_15 = arith.constant 0 : index
      %c0_16 = arith.constant 0 : index
      %29 = vector.load %arg3[%c0_15, %c0_16] : memref<1x32xf32, #tpu.memory_space<vmem>>, vector<1x32xf32>
      %30 = vector.broadcast %29 : vector<1x32xf32> to vector<32x32xf32>
      %31 = arith.mulf %28, %30 : vector<32x32xf32>
      %c0_17 = arith.constant 0 : index
      %c0_18 = arith.constant 0 : index
      %32 = vector.load %arg4[%c0_17, %c0_18] : memref<1x32xf32, #tpu.memory_space<vmem>>, vector<1x32xf32>
      %33 = vector.broadcast %32 : vector<1x32xf32> to vector<32x32xf32>
      %34 = arith.addf %31, %33 : vector<32x32xf32>
      %35 = arith.truncf %34 : vector<32x32xf32> to vector<32x32xbf16>
      %c0_19 = arith.constant 0 : index
      %c0_20 = arith.constant 0 : index
      %36 = vector.load %arg8[%c0_19, %c0_20] : memref<32x32xbf16, #tpu.memory_space<vmem>>, vector<32x32xbf16>
      tpu.vector_store %arg8[%c0_19, %c0_20], %35 {strides = array<i32>} : memref<32x32xbf16, #tpu.memory_space<vmem>>, vector<32x32xbf16>,
    } else {
    }
    %c0 = arith.constant 0 : index
    %c0_1 = arith.constant 0 : index
    %3 = vector.load %arg8[%c0, %c0_1] : memref<32x32xbf16, #tpu.memory_space<vmem>>, vector<32x32xbf16>
    %c0_2 = arith.constant 0 : index
    %c0_3 = arith.constant 0 : index
    %4 = vector.load %arg5[%c0_2, %c0_3] : memref<32x96xbf16, #tpu.memory_space<vmem>>, vector<32x96xbf16>
    %cst = arith.constant dense<0.000000e+00> : vector<32x96xf32>
    %5 = tpu.matmul %3, %4, %cst {dimension_numbers = #tpu.dot_dimension_numbers<[1], [0], [0], [1], [0, 0, 1, 1], [], []>} : vector<32x32xbf16>, vector<32x96xbf16>, vector<32x96xf32> -> vector<32x96xf32>
    %c0_4 = arith.constant 0 : index
    %c0_5 = arith.constant 0 : index
    %6 = vector.load %arg6[%c0_4, %c0_5] : memref<1x96xf32, #tpu.memory_space<vmem>>, vector<1x96xf32>
    %7 = vector.broadcast %6 : vector<1x96xf32> to vector<32x96xf32>
    %8 = arith.addf %5, %7 : vector<32x96xf32>
    %c0_6 = arith.constant 0 : index
    %c0_7 = arith.constant 0 : index
    %9 = vector.load %arg7[%c0_6, %c0_7] : memref<32x96xf32, #tpu.memory_space<vmem>>, vector<32x96xf32>
    tpu.vector_store %arg7[%c0_6, %c0_7], %8 {strides = array<i32>} : memref<32x96xf32, #tpu.memory_space<vmem>>, vector<32x96xf32>,
    return
  }
  func.func @transform_0(%arg0: i32, %arg1: i32) -> (i32, i32) {
    %c0_i32 = arith.constant 0 : i32
    %c0_i32_0 = arith.constant 0 : i32
    return %arg0, %c0_i32 : i32, i32
  }
  func.func @transform_1(%arg0: i32, %arg1: i32) -> (i32, i32) {
    %c0_i32 = arith.constant 0 : i32
    %c0_i32_0 = arith.constant 0 : i32
    %c0_i32_1 = arith.constant 0 : i32
    return %c0_i32, %c0_i32_0 : i32, i32
  }
  func.func @transform_2(%arg0: i32, %arg1: i32) -> (i32, i32) {
    %c0_i32 = arith.constant 0 : i32
    %c0_i32_0 = arith.constant 0 : i32
    %c0_i32_1 = arith.constant 0 : i32
    return %c0_i32, %c0_i32_0 : i32, i32
  }
  func.func @transform_3(%arg0: i32, %arg1: i32) -> (i32, i32) {
    %c0_i32 = arith.constant 0 : i32
    %c0_i32_0 = arith.constant 0 : i32
    return %c0_i32, %arg1 : i32, i32
  }
  func.func @transform_4(%arg0: i32, %arg1: i32) -> (i32, i32) {
    %c0_i32 = arith.constant 0 : i32
    %c0_i32_0 = arith.constant 0 : i32
    return %c0_i32, %arg1 : i32, i32
  }
  func.func @transform_5(%arg0: i32, %arg1: i32) -> (i32, i32) {
    %c0_i32 = arith.constant 0 : i32
    return %arg0, %arg1 : i32, i32
  }
}

module attributes {stable_mosaic.version = 11 : i64} {
  func.func @kernel(%arg0: i32, %arg1: memref<4x4x96xf32, #tpu.memory_space<vmem>>, %arg2: memref<4x4x32xf32, #tpu.memory_space<vmem>>) attributes {dimension_semantics = [#tpu.dimension_semantics<parallel>], iteration_bounds = array<i64: 2>, scalar_prefetch = 0 : i64, scratch_operands = 0 : i64, tpu.core_type = #tpu.core_type<tc>, window_params = [{transform_indices = @transform_0, window_bounds = array<i64: 4, 4, 96>}, {transform_indices = @transform_1, window_bounds = array<i64: 4, 4, 32>}]} {
    %c0 = arith.constant 0 : index
    %c0_0 = arith.constant 0 : index
    %c0_1 = arith.constant 0 : index
    %0 = vector.load %arg1[%c0, %c0_0, %c0_1] : memref<4x4x96xf32, #tpu.memory_space<vmem>>, vector<4x4x4xf32>
    %1 = arith.truncf %0 : vector<4x4x4xf32> to vector<4x4x4xbf16>
    %c0_2 = arith.constant 0 : index
    %c0_3 = arith.constant 0 : index
    %c32 = arith.constant 32 : index
    %2 = vector.load %arg1[%c0_2, %c0_3, %c32] : memref<4x4x96xf32, #tpu.memory_space<vmem>>, vector<4x4x4xf32>
    %3 = arith.truncf %2 : vector<4x4x4xf32> to vector<4x4x4xbf16>
    %c0_4 = arith.constant 0 : index
    %c0_5 = arith.constant 0 : index
    %c64 = arith.constant 64 : index
    %4 = vector.load %arg1[%c0_4, %c0_5, %c64] : memref<4x4x96xf32, #tpu.memory_space<vmem>>, vector<4x4x4xf32>
    %5 = arith.truncf %4 : vector<4x4x4xf32> to vector<4x4x4xbf16>
    "tpu.trace_start"() <{level = 10 : i32, message = "gqd,gkd->gqk"}> : () -> ()
    %cst = arith.constant dense<0.000000e+00> : vector<4x4x4xf32>
    %6 = tpu.matmul %1, %3, %cst {dimension_numbers = #tpu.dot_dimension_numbers<[2], [2], [1], [1], [0, 0, 0, 1, 1, 1], [0], [0]>} : vector<4x4x4xbf16>, vector<4x4x4xbf16>, vector<4x4x4xf32> -> vector<4x4x4xf32>
    "tpu.trace_stop"() : () -> ()
    %cst_6 = arith.constant dense<0xFF800000> : vector<4x4xf32>
    %7 = vector.multi_reduction <maximumf>, %6, %cst_6 [2] : vector<4x4x4xf32> to vector<4x4xf32>
    %8 = vector.shape_cast %7 : vector<4x4xf32> to vector<4x4x1xf32>
    %9 = vector.broadcast %8 : vector<4x4x1xf32> to vector<4x4x4xf32>
    %10 = arith.subf %6, %9 : vector<4x4x4xf32>
    %11 = math.exp %10 : vector<4x4x4xf32>
    %cst_7 = arith.constant dense<0.000000e+00> : vector<4x4xf32>
    %12 = vector.multi_reduction <add>, %11, %cst_7 [2] : vector<4x4x4xf32> to vector<4x4xf32>
    %13 = vector.shape_cast %12 : vector<4x4xf32> to vector<4x4x1xf32>
    %14 = arith.truncf %11 : vector<4x4x4xf32> to vector<4x4x4xbf16>
    "tpu.trace_start"() <{level = 10 : i32, message = "gqk,gkd->gqd"}> : () -> ()
    %cst_8 = arith.constant dense<0.000000e+00> : vector<4x4x4xf32>
    %15 = tpu.matmul %14, %5, %cst_8 {dimension_numbers = #tpu.dot_dimension_numbers<[2], [1], [1], [2], [0, 0, 0, 1, 1, 2], [0], [0]>} : vector<4x4x4xbf16>, vector<4x4x4xbf16>, vector<4x4x4xf32> -> vector<4x4x4xf32>
    "tpu.trace_stop"() : () -> ()
    %16 = tpu.reciprocal %13 {approx = true} : vector<4x4x1xf32> -> vector<4x4x1xf32>
    %17 = vector.broadcast %16 : vector<4x4x1xf32> to vector<4x4x4xf32>
    %18 = arith.mulf %15, %17 : vector<4x4x4xf32>
    %c0_9 = arith.constant 0 : index
    %c0_10 = arith.constant 0 : index
    %c0_11 = arith.constant 0 : index
    %19 = vector.load %arg2[%c0_9, %c0_10, %c0_11] : memref<4x4x32xf32, #tpu.memory_space<vmem>>, vector<4x4x4xf32>
    tpu.vector_store %arg2[%c0_9, %c0_10, %c0_11], %18 {strides = array<i32>} : memref<4x4x32xf32, #tpu.memory_space<vmem>>, vector<4x4x4xf32>,
    %c0_12 = arith.constant 0 : index
    %c0_13 = arith.constant 0 : index
    %c4 = arith.constant 4 : index
    %20 = vector.load %arg1[%c0_12, %c0_13, %c4] : memref<4x4x96xf32, #tpu.memory_space<vmem>>, vector<4x4x4xf32>
    %21 = arith.truncf %20 : vector<4x4x4xf32> to vector<4x4x4xbf16>
    %c0_14 = arith.constant 0 : index
    %c0_15 = arith.constant 0 : index
    %c36 = arith.constant 36 : index
    %22 = vector.load %arg1[%c0_14, %c0_15, %c36] : memref<4x4x96xf32, #tpu.memory_space<vmem>>, vector<4x4x4xf32>
    %23 = arith.truncf %22 : vector<4x4x4xf32> to vector<4x4x4xbf16>
    %c0_16 = arith.constant 0 : index
    %c0_17 = arith.constant 0 : index
    %c68 = arith.constant 68 : index
    %24 = vector.load %arg1[%c0_16, %c0_17, %c68] : memref<4x4x96xf32, #tpu.memory_space<vmem>>, vector<4x4x4xf32>
    %25 = arith.truncf %24 : vector<4x4x4xf32> to vector<4x4x4xbf16>
    "tpu.trace_start"() <{level = 10 : i32, message = "gqd,gkd->gqk"}> : () -> ()
    %cst_18 = arith.constant dense<0.000000e+00> : vector<4x4x4xf32>
    %26 = tpu.matmul %21, %23, %cst_18 {dimension_numbers = #tpu.dot_dimension_numbers<[2], [2], [1], [1], [0, 0, 0, 1, 1, 1], [0], [0]>} : vector<4x4x4xbf16>, vector<4x4x4xbf16>, vector<4x4x4xf32> -> vector<4x4x4xf32>
    "tpu.trace_stop"() : () -> ()
    %cst_19 = arith.constant dense<0xFF800000> : vector<4x4xf32>
    %27 = vector.multi_reduction <maximumf>, %26, %cst_19 [2] : vector<4x4x4xf32> to vector<4x4xf32>
    %28 = vector.shape_cast %27 : vector<4x4xf32> to vector<4x4x1xf32>
    %29 = vector.broadcast %28 : vector<4x4x1xf32> to vector<4x4x4xf32>
    %30 = arith.subf %26, %29 : vector<4x4x4xf32>
    %31 = math.exp %30 : vector<4x4x4xf32>
    %cst_20 = arith.constant dense<0.000000e+00> : vector<4x4xf32>
    %32 = vector.multi_reduction <add>, %31, %cst_20 [2] : vector<4x4x4xf32> to vector<4x4xf32>
    %33 = vector.shape_cast %32 : vector<4x4xf32> to vector<4x4x1xf32>
    %34 = arith.truncf %31 : vector<4x4x4xf32> to vector<4x4x4xbf16>
    "tpu.trace_start"() <{level = 10 : i32, message = "gqk,gkd->gqd"}> : () -> ()
    %cst_21 = arith.constant dense<0.000000e+00> : vector<4x4x4xf32>
    %35 = tpu.matmul %34, %25, %cst_21 {dimension_numbers = #tpu.dot_dimension_numbers<[2], [1], [1], [2], [0, 0, 0, 1, 1, 2], [0], [0]>} : vector<4x4x4xbf16>, vector<4x4x4xbf16>, vector<4x4x4xf32> -> vector<4x4x4xf32>
    "tpu.trace_stop"() : () -> ()
    %36 = tpu.reciprocal %33 {approx = true} : vector<4x4x1xf32> -> vector<4x4x1xf32>
    %37 = vector.broadcast %36 : vector<4x4x1xf32> to vector<4x4x4xf32>
    %38 = arith.mulf %35, %37 : vector<4x4x4xf32>
    %c0_22 = arith.constant 0 : index
    %c0_23 = arith.constant 0 : index
    %c4_24 = arith.constant 4 : index
    %39 = vector.load %arg2[%c0_22, %c0_23, %c4_24] : memref<4x4x32xf32, #tpu.memory_space<vmem>>, vector<4x4x4xf32>
    tpu.vector_store %arg2[%c0_22, %c0_23, %c4_24], %38 {strides = array<i32>} : memref<4x4x32xf32, #tpu.memory_space<vmem>>, vector<4x4x4xf32>,
    %c0_25 = arith.constant 0 : index
    %c0_26 = arith.constant 0 : index
    %c8 = arith.constant 8 : index
    %40 = vector.load %arg1[%c0_25, %c0_26, %c8] : memref<4x4x96xf32, #tpu.memory_space<vmem>>, vector<4x4x4xf32>
    %41 = arith.truncf %40 : vector<4x4x4xf32> to vector<4x4x4xbf16>
    %c0_27 = arith.constant 0 : index
    %c0_28 = arith.constant 0 : index
    %c40 = arith.constant 40 : index
    %42 = vector.load %arg1[%c0_27, %c0_28, %c40] : memref<4x4x96xf32, #tpu.memory_space<vmem>>, vector<4x4x4xf32>
    %43 = arith.truncf %42 : vector<4x4x4xf32> to vector<4x4x4xbf16>
    %c0_29 = arith.constant 0 : index
    %c0_30 = arith.constant 0 : index
    %c72 = arith.constant 72 : index
    %44 = vector.load %arg1[%c0_29, %c0_30, %c72] : memref<4x4x96xf32, #tpu.memory_space<vmem>>, vector<4x4x4xf32>
    %45 = arith.truncf %44 : vector<4x4x4xf32> to vector<4x4x4xbf16>
    "tpu.trace_start"() <{level = 10 : i32, message = "gqd,gkd->gqk"}> : () -> ()
    %cst_31 = arith.constant dense<0.000000e+00> : vector<4x4x4xf32>
    %46 = tpu.matmul %41, %43, %cst_31 {dimension_numbers = #tpu.dot_dimension_numbers<[2], [2], [1], [1], [0, 0, 0, 1, 1, 1], [0], [0]>} : vector<4x4x4xbf16>, vector<4x4x4xbf16>, vector<4x4x4xf32> -> vector<4x4x4xf32>
    "tpu.trace_stop"() : () -> ()
    %cst_32 = arith.constant dense<0xFF800000> : vector<4x4xf32>
    %47 = vector.multi_reduction <maximumf>, %46, %cst_32 [2] : vector<4x4x4xf32> to vector<4x4xf32>
    %48 = vector.shape_cast %47 : vector<4x4xf32> to vector<4x4x1xf32>
    %49 = vector.broadcast %48 : vector<4x4x1xf32> to vector<4x4x4xf32>
    %50 = arith.subf %46, %49 : vector<4x4x4xf32>
    %51 = math.exp %50 : vector<4x4x4xf32>
    %cst_33 = arith.constant dense<0.000000e+00> : vector<4x4xf32>
    %52 = vector.multi_reduction <add>, %51, %cst_33 [2] : vector<4x4x4xf32> to vector<4x4xf32>
    %53 = vector.shape_cast %52 : vector<4x4xf32> to vector<4x4x1xf32>
    %54 = arith.truncf %51 : vector<4x4x4xf32> to vector<4x4x4xbf16>
    "tpu.trace_start"() <{level = 10 : i32, message = "gqk,gkd->gqd"}> : () -> ()
    %cst_34 = arith.constant dense<0.000000e+00> : vector<4x4x4xf32>
    %55 = tpu.matmul %54, %45, %cst_34 {dimension_numbers = #tpu.dot_dimension_numbers<[2], [1], [1], [2], [0, 0, 0, 1, 1, 2], [0], [0]>} : vector<4x4x4xbf16>, vector<4x4x4xbf16>, vector<4x4x4xf32> -> vector<4x4x4xf32>
    "tpu.trace_stop"() : () -> ()
    %56 = tpu.reciprocal %53 {approx = true} : vector<4x4x1xf32> -> vector<4x4x1xf32>
    %57 = vector.broadcast %56 : vector<4x4x1xf32> to vector<4x4x4xf32>
    %58 = arith.mulf %55, %57 : vector<4x4x4xf32>
    %c0_35 = arith.constant 0 : index
    %c0_36 = arith.constant 0 : index
    %c8_37 = arith.constant 8 : index
    %59 = vector.load %arg2[%c0_35, %c0_36, %c8_37] : memref<4x4x32xf32, #tpu.memory_space<vmem>>, vector<4x4x4xf32>
    tpu.vector_store %arg2[%c0_35, %c0_36, %c8_37], %58 {strides = array<i32>} : memref<4x4x32xf32, #tpu.memory_space<vmem>>, vector<4x4x4xf32>,
    %c0_38 = arith.constant 0 : index
    %c0_39 = arith.constant 0 : index
    %c12 = arith.constant 12 : index
    %60 = vector.load %arg1[%c0_38, %c0_39, %c12] : memref<4x4x96xf32, #tpu.memory_space<vmem>>, vector<4x4x4xf32>
    %61 = arith.truncf %60 : vector<4x4x4xf32> to vector<4x4x4xbf16>
    %c0_40 = arith.constant 0 : index
    %c0_41 = arith.constant 0 : index
    %c44 = arith.constant 44 : index
    %62 = vector.load %arg1[%c0_40, %c0_41, %c44] : memref<4x4x96xf32, #tpu.memory_space<vmem>>, vector<4x4x4xf32>
    %63 = arith.truncf %62 : vector<4x4x4xf32> to vector<4x4x4xbf16>
    %c0_42 = arith.constant 0 : index
    %c0_43 = arith.constant 0 : index
    %c76 = arith.constant 76 : index
    %64 = vector.load %arg1[%c0_42, %c0_43, %c76] : memref<4x4x96xf32, #tpu.memory_space<vmem>>, vector<4x4x4xf32>
    %65 = arith.truncf %64 : vector<4x4x4xf32> to vector<4x4x4xbf16>
    "tpu.trace_start"() <{level = 10 : i32, message = "gqd,gkd->gqk"}> : () -> ()
    %cst_44 = arith.constant dense<0.000000e+00> : vector<4x4x4xf32>
    %66 = tpu.matmul %61, %63, %cst_44 {dimension_numbers = #tpu.dot_dimension_numbers<[2], [2], [1], [1], [0, 0, 0, 1, 1, 1], [0], [0]>} : vector<4x4x4xbf16>, vector<4x4x4xbf16>, vector<4x4x4xf32> -> vector<4x4x4xf32>
    "tpu.trace_stop"() : () -> ()
    %cst_45 = arith.constant dense<0xFF800000> : vector<4x4xf32>
    %67 = vector.multi_reduction <maximumf>, %66, %cst_45 [2] : vector<4x4x4xf32> to vector<4x4xf32>
    %68 = vector.shape_cast %67 : vector<4x4xf32> to vector<4x4x1xf32>
    %69 = vector.broadcast %68 : vector<4x4x1xf32> to vector<4x4x4xf32>
    %70 = arith.subf %66, %69 : vector<4x4x4xf32>
    %71 = math.exp %70 : vector<4x4x4xf32>
    %cst_46 = arith.constant dense<0.000000e+00> : vector<4x4xf32>
    %72 = vector.multi_reduction <add>, %71, %cst_46 [2] : vector<4x4x4xf32> to vector<4x4xf32>
    %73 = vector.shape_cast %72 : vector<4x4xf32> to vector<4x4x1xf32>
    %74 = arith.truncf %71 : vector<4x4x4xf32> to vector<4x4x4xbf16>
    "tpu.trace_start"() <{level = 10 : i32, message = "gqk,gkd->gqd"}> : () -> ()
    %cst_47 = arith.constant dense<0.000000e+00> : vector<4x4x4xf32>
    %75 = tpu.matmul %74, %65, %cst_47 {dimension_numbers = #tpu.dot_dimension_numbers<[2], [1], [1], [2], [0, 0, 0, 1, 1, 2], [0], [0]>} : vector<4x4x4xbf16>, vector<4x4x4xbf16>, vector<4x4x4xf32> -> vector<4x4x4xf32>
    "tpu.trace_stop"() : () -> ()
    %76 = tpu.reciprocal %73 {approx = true} : vector<4x4x1xf32> -> vector<4x4x1xf32>
    %77 = vector.broadcast %76 : vector<4x4x1xf32> to vector<4x4x4xf32>
    %78 = arith.mulf %75, %77 : vector<4x4x4xf32>
    %c0_48 = arith.constant 0 : index
    %c0_49 = arith.constant 0 : index
    %c12_50 = arith.constant 12 : index
    %79 = vector.load %arg2[%c0_48, %c0_49, %c12_50] : memref<4x4x32xf32, #tpu.memory_space<vmem>>, vector<4x4x4xf32>
    tpu.vector_store %arg2[%c0_48, %c0_49, %c12_50], %78 {strides = array<i32>} : memref<4x4x32xf32, #tpu.memory_space<vmem>>, vector<4x4x4xf32>,
    %c0_51 = arith.constant 0 : index
    %c0_52 = arith.constant 0 : index
    %c16 = arith.constant 16 : index
    %80 = vector.load %arg1[%c0_51, %c0_52, %c16] : memref<4x4x96xf32, #tpu.memory_space<vmem>>, vector<4x4x4xf32>
    %81 = arith.truncf %80 : vector<4x4x4xf32> to vector<4x4x4xbf16>
    %c0_53 = arith.constant 0 : index
    %c0_54 = arith.constant 0 : index
    %c48 = arith.constant 48 : index
    %82 = vector.load %arg1[%c0_53, %c0_54, %c48] : memref<4x4x96xf32, #tpu.memory_space<vmem>>, vector<4x4x4xf32>
    %83 = arith.truncf %82 : vector<4x4x4xf32> to vector<4x4x4xbf16>
    %c0_55 = arith.constant 0 : index
    %c0_56 = arith.constant 0 : index
    %c80 = arith.constant 80 : index
    %84 = vector.load %arg1[%c0_55, %c0_56, %c80] : memref<4x4x96xf32, #tpu.memory_space<vmem>>, vector<4x4x4xf32>
    %85 = arith.truncf %84 : vector<4x4x4xf32> to vector<4x4x4xbf16>
    "tpu.trace_start"() <{level = 10 : i32, message = "gqd,gkd->gqk"}> : () -> ()
    %cst_57 = arith.constant dense<0.000000e+00> : vector<4x4x4xf32>
    %86 = tpu.matmul %81, %83, %cst_57 {dimension_numbers = #tpu.dot_dimension_numbers<[2], [2], [1], [1], [0, 0, 0, 1, 1, 1], [0], [0]>} : vector<4x4x4xbf16>, vector<4x4x4xbf16>, vector<4x4x4xf32> -> vector<4x4x4xf32>
    "tpu.trace_stop"() : () -> ()
    %cst_58 = arith.constant dense<0xFF800000> : vector<4x4xf32>
    %87 = vector.multi_reduction <maximumf>, %86, %cst_58 [2] : vector<4x4x4xf32> to vector<4x4xf32>
    %88 = vector.shape_cast %87 : vector<4x4xf32> to vector<4x4x1xf32>
    %89 = vector.broadcast %88 : vector<4x4x1xf32> to vector<4x4x4xf32>
    %90 = arith.subf %86, %89 : vector<4x4x4xf32>
    %91 = math.exp %90 : vector<4x4x4xf32>
    %cst_59 = arith.constant dense<0.000000e+00> : vector<4x4xf32>
    %92 = vector.multi_reduction <add>, %91, %cst_59 [2] : vector<4x4x4xf32> to vector<4x4xf32>
    %93 = vector.shape_cast %92 : vector<4x4xf32> to vector<4x4x1xf32>
    %94 = arith.truncf %91 : vector<4x4x4xf32> to vector<4x4x4xbf16>
    "tpu.trace_start"() <{level = 10 : i32, message = "gqk,gkd->gqd"}> : () -> ()
    %cst_60 = arith.constant dense<0.000000e+00> : vector<4x4x4xf32>
    %95 = tpu.matmul %94, %85, %cst_60 {dimension_numbers = #tpu.dot_dimension_numbers<[2], [1], [1], [2], [0, 0, 0, 1, 1, 2], [0], [0]>} : vector<4x4x4xbf16>, vector<4x4x4xbf16>, vector<4x4x4xf32> -> vector<4x4x4xf32>
    "tpu.trace_stop"() : () -> ()
    %96 = tpu.reciprocal %93 {approx = true} : vector<4x4x1xf32> -> vector<4x4x1xf32>
    %97 = vector.broadcast %96 : vector<4x4x1xf32> to vector<4x4x4xf32>
    %98 = arith.mulf %95, %97 : vector<4x4x4xf32>
    %c0_61 = arith.constant 0 : index
    %c0_62 = arith.constant 0 : index
    %c16_63 = arith.constant 16 : index
    %99 = vector.load %arg2[%c0_61, %c0_62, %c16_63] : memref<4x4x32xf32, #tpu.memory_space<vmem>>, vector<4x4x4xf32>
    tpu.vector_store %arg2[%c0_61, %c0_62, %c16_63], %98 {strides = array<i32>} : memref<4x4x32xf32, #tpu.memory_space<vmem>>, vector<4x4x4xf32>,
    %c0_64 = arith.constant 0 : index
    %c0_65 = arith.constant 0 : index
    %c20 = arith.constant 20 : index
    %100 = vector.load %arg1[%c0_64, %c0_65, %c20] : memref<4x4x96xf32, #tpu.memory_space<vmem>>, vector<4x4x4xf32>
    %101 = arith.truncf %100 : vector<4x4x4xf32> to vector<4x4x4xbf16>
    %c0_66 = arith.constant 0 : index
    %c0_67 = arith.constant 0 : index
    %c52 = arith.constant 52 : index
    %102 = vector.load %arg1[%c0_66, %c0_67, %c52] : memref<4x4x96xf32, #tpu.memory_space<vmem>>, vector<4x4x4xf32>
    %103 = arith.truncf %102 : vector<4x4x4xf32> to vector<4x4x4xbf16>
    %c0_68 = arith.constant 0 : index
    %c0_69 = arith.constant 0 : index
    %c84 = arith.constant 84 : index
    %104 = vector.load %arg1[%c0_68, %c0_69, %c84] : memref<4x4x96xf32, #tpu.memory_space<vmem>>, vector<4x4x4xf32>
    %105 = arith.truncf %104 : vector<4x4x4xf32> to vector<4x4x4xbf16>
    "tpu.trace_start"() <{level = 10 : i32, message = "gqd,gkd->gqk"}> : () -> ()
    %cst_70 = arith.constant dense<0.000000e+00> : vector<4x4x4xf32>
    %106 = tpu.matmul %101, %103, %cst_70 {dimension_numbers = #tpu.dot_dimension_numbers<[2], [2], [1], [1], [0, 0, 0, 1, 1, 1], [0], [0]>} : vector<4x4x4xbf16>, vector<4x4x4xbf16>, vector<4x4x4xf32> -> vector<4x4x4xf32>
    "tpu.trace_stop"() : () -> ()
    %cst_71 = arith.constant dense<0xFF800000> : vector<4x4xf32>
    %107 = vector.multi_reduction <maximumf>, %106, %cst_71 [2] : vector<4x4x4xf32> to vector<4x4xf32>
    %108 = vector.shape_cast %107 : vector<4x4xf32> to vector<4x4x1xf32>
    %109 = vector.broadcast %108 : vector<4x4x1xf32> to vector<4x4x4xf32>
    %110 = arith.subf %106, %109 : vector<4x4x4xf32>
    %111 = math.exp %110 : vector<4x4x4xf32>
    %cst_72 = arith.constant dense<0.000000e+00> : vector<4x4xf32>
    %112 = vector.multi_reduction <add>, %111, %cst_72 [2] : vector<4x4x4xf32> to vector<4x4xf32>
    %113 = vector.shape_cast %112 : vector<4x4xf32> to vector<4x4x1xf32>
    %114 = arith.truncf %111 : vector<4x4x4xf32> to vector<4x4x4xbf16>
    "tpu.trace_start"() <{level = 10 : i32, message = "gqk,gkd->gqd"}> : () -> ()
    %cst_73 = arith.constant dense<0.000000e+00> : vector<4x4x4xf32>
    %115 = tpu.matmul %114, %105, %cst_73 {dimension_numbers = #tpu.dot_dimension_numbers<[2], [1], [1], [2], [0, 0, 0, 1, 1, 2], [0], [0]>} : vector<4x4x4xbf16>, vector<4x4x4xbf16>, vector<4x4x4xf32> -> vector<4x4x4xf32>
    "tpu.trace_stop"() : () -> ()
    %116 = tpu.reciprocal %113 {approx = true} : vector<4x4x1xf32> -> vector<4x4x1xf32>
    %117 = vector.broadcast %116 : vector<4x4x1xf32> to vector<4x4x4xf32>
    %118 = arith.mulf %115, %117 : vector<4x4x4xf32>
    %c0_74 = arith.constant 0 : index
    %c0_75 = arith.constant 0 : index
    %c20_76 = arith.constant 20 : index
    %119 = vector.load %arg2[%c0_74, %c0_75, %c20_76] : memref<4x4x32xf32, #tpu.memory_space<vmem>>, vector<4x4x4xf32>
    tpu.vector_store %arg2[%c0_74, %c0_75, %c20_76], %118 {strides = array<i32>} : memref<4x4x32xf32, #tpu.memory_space<vmem>>, vector<4x4x4xf32>,
    %c0_77 = arith.constant 0 : index
    %c0_78 = arith.constant 0 : index
    %c24 = arith.constant 24 : index
    %120 = vector.load %arg1[%c0_77, %c0_78, %c24] : memref<4x4x96xf32, #tpu.memory_space<vmem>>, vector<4x4x4xf32>
    %121 = arith.truncf %120 : vector<4x4x4xf32> to vector<4x4x4xbf16>
    %c0_79 = arith.constant 0 : index
    %c0_80 = arith.constant 0 : index
    %c56 = arith.constant 56 : index
    %122 = vector.load %arg1[%c0_79, %c0_80, %c56] : memref<4x4x96xf32, #tpu.memory_space<vmem>>, vector<4x4x4xf32>
    %123 = arith.truncf %122 : vector<4x4x4xf32> to vector<4x4x4xbf16>
    %c0_81 = arith.constant 0 : index
    %c0_82 = arith.constant 0 : index
    %c88 = arith.constant 88 : index
    %124 = vector.load %arg1[%c0_81, %c0_82, %c88] : memref<4x4x96xf32, #tpu.memory_space<vmem>>, vector<4x4x4xf32>
    %125 = arith.truncf %124 : vector<4x4x4xf32> to vector<4x4x4xbf16>
    "tpu.trace_start"() <{level = 10 : i32, message = "gqd,gkd->gqk"}> : () -> ()
    %cst_83 = arith.constant dense<0.000000e+00> : vector<4x4x4xf32>
    %126 = tpu.matmul %121, %123, %cst_83 {dimension_numbers = #tpu.dot_dimension_numbers<[2], [2], [1], [1], [0, 0, 0, 1, 1, 1], [0], [0]>} : vector<4x4x4xbf16>, vector<4x4x4xbf16>, vector<4x4x4xf32> -> vector<4x4x4xf32>
    "tpu.trace_stop"() : () -> ()
    %cst_84 = arith.constant dense<0xFF800000> : vector<4x4xf32>
    %127 = vector.multi_reduction <maximumf>, %126, %cst_84 [2] : vector<4x4x4xf32> to vector<4x4xf32>
    %128 = vector.shape_cast %127 : vector<4x4xf32> to vector<4x4x1xf32>
    %129 = vector.broadcast %128 : vector<4x4x1xf32> to vector<4x4x4xf32>
    %130 = arith.subf %126, %129 : vector<4x4x4xf32>
    %131 = math.exp %130 : vector<4x4x4xf32>
    %cst_85 = arith.constant dense<0.000000e+00> : vector<4x4xf32>
    %132 = vector.multi_reduction <add>, %131, %cst_85 [2] : vector<4x4x4xf32> to vector<4x4xf32>
    %133 = vector.shape_cast %132 : vector<4x4xf32> to vector<4x4x1xf32>
    %134 = arith.truncf %131 : vector<4x4x4xf32> to vector<4x4x4xbf16>
    "tpu.trace_start"() <{level = 10 : i32, message = "gqk,gkd->gqd"}> : () -> ()
    %cst_86 = arith.constant dense<0.000000e+00> : vector<4x4x4xf32>
    %135 = tpu.matmul %134, %125, %cst_86 {dimension_numbers = #tpu.dot_dimension_numbers<[2], [1], [1], [2], [0, 0, 0, 1, 1, 2], [0], [0]>} : vector<4x4x4xbf16>, vector<4x4x4xbf16>, vector<4x4x4xf32> -> vector<4x4x4xf32>
    "tpu.trace_stop"() : () -> ()
    %136 = tpu.reciprocal %133 {approx = true} : vector<4x4x1xf32> -> vector<4x4x1xf32>
    %137 = vector.broadcast %136 : vector<4x4x1xf32> to vector<4x4x4xf32>
    %138 = arith.mulf %135, %137 : vector<4x4x4xf32>
    %c0_87 = arith.constant 0 : index
    %c0_88 = arith.constant 0 : index
    %c24_89 = arith.constant 24 : index
    %139 = vector.load %arg2[%c0_87, %c0_88, %c24_89] : memref<4x4x32xf32, #tpu.memory_space<vmem>>, vector<4x4x4xf32>
    tpu.vector_store %arg2[%c0_87, %c0_88, %c24_89], %138 {strides = array<i32>} : memref<4x4x32xf32, #tpu.memory_space<vmem>>, vector<4x4x4xf32>,
    %c0_90 = arith.constant 0 : index
    %c0_91 = arith.constant 0 : index
    %c28 = arith.constant 28 : index
    %140 = vector.load %arg1[%c0_90, %c0_91, %c28] : memref<4x4x96xf32, #tpu.memory_space<vmem>>, vector<4x4x4xf32>
    %141 = arith.truncf %140 : vector<4x4x4xf32> to vector<4x4x4xbf16>
    %c0_92 = arith.constant 0 : index
    %c0_93 = arith.constant 0 : index
    %c60 = arith.constant 60 : index
    %142 = vector.load %arg1[%c0_92, %c0_93, %c60] : memref<4x4x96xf32, #tpu.memory_space<vmem>>, vector<4x4x4xf32>
    %143 = arith.truncf %142 : vector<4x4x4xf32> to vector<4x4x4xbf16>
    %c0_94 = arith.constant 0 : index
    %c0_95 = arith.constant 0 : index
    %c92 = arith.constant 92 : index
    %144 = vector.load %arg1[%c0_94, %c0_95, %c92] : memref<4x4x96xf32, #tpu.memory_space<vmem>>, vector<4x4x4xf32>
    %145 = arith.truncf %144 : vector<4x4x4xf32> to vector<4x4x4xbf16>
    "tpu.trace_start"() <{level = 10 : i32, message = "gqd,gkd->gqk"}> : () -> ()
    %cst_96 = arith.constant dense<0.000000e+00> : vector<4x4x4xf32>
    %146 = tpu.matmul %141, %143, %cst_96 {dimension_numbers = #tpu.dot_dimension_numbers<[2], [2], [1], [1], [0, 0, 0, 1, 1, 1], [0], [0]>} : vector<4x4x4xbf16>, vector<4x4x4xbf16>, vector<4x4x4xf32> -> vector<4x4x4xf32>
    "tpu.trace_stop"() : () -> ()
    %cst_97 = arith.constant dense<0xFF800000> : vector<4x4xf32>
    %147 = vector.multi_reduction <maximumf>, %146, %cst_97 [2] : vector<4x4x4xf32> to vector<4x4xf32>
    %148 = vector.shape_cast %147 : vector<4x4xf32> to vector<4x4x1xf32>
    %149 = vector.broadcast %148 : vector<4x4x1xf32> to vector<4x4x4xf32>
    %150 = arith.subf %146, %149 : vector<4x4x4xf32>
    %151 = math.exp %150 : vector<4x4x4xf32>
    %cst_98 = arith.constant dense<0.000000e+00> : vector<4x4xf32>
    %152 = vector.multi_reduction <add>, %151, %cst_98 [2] : vector<4x4x4xf32> to vector<4x4xf32>
    %153 = vector.shape_cast %152 : vector<4x4xf32> to vector<4x4x1xf32>
    %154 = arith.truncf %151 : vector<4x4x4xf32> to vector<4x4x4xbf16>
    "tpu.trace_start"() <{level = 10 : i32, message = "gqk,gkd->gqd"}> : () -> ()
    %cst_99 = arith.constant dense<0.000000e+00> : vector<4x4x4xf32>
    %155 = tpu.matmul %154, %145, %cst_99 {dimension_numbers = #tpu.dot_dimension_numbers<[2], [1], [1], [2], [0, 0, 0, 1, 1, 2], [0], [0]>} : vector<4x4x4xbf16>, vector<4x4x4xbf16>, vector<4x4x4xf32> -> vector<4x4x4xf32>
    "tpu.trace_stop"() : () -> ()
    %156 = tpu.reciprocal %153 {approx = true} : vector<4x4x1xf32> -> vector<4x4x1xf32>
    %157 = vector.broadcast %156 : vector<4x4x1xf32> to vector<4x4x4xf32>
    %158 = arith.mulf %155, %157 : vector<4x4x4xf32>
    %c0_100 = arith.constant 0 : index
    %c0_101 = arith.constant 0 : index
    %c28_102 = arith.constant 28 : index
    %159 = vector.load %arg2[%c0_100, %c0_101, %c28_102] : memref<4x4x32xf32, #tpu.memory_space<vmem>>, vector<4x4x4xf32>
    tpu.vector_store %arg2[%c0_100, %c0_101, %c28_102], %158 {strides = array<i32>} : memref<4x4x32xf32, #tpu.memory_space<vmem>>, vector<4x4x4xf32>,
    return
  }
  func.func @transform_0(%arg0: i32) -> (i32, i32, i32) {
    %c0_i32 = arith.constant 0 : i32
    %c0_i32_0 = arith.constant 0 : i32
    %c0_i32_1 = arith.constant 0 : i32
    return %arg0, %c0_i32, %c0_i32_0 : i32, i32, i32
  }
  func.func @transform_1(%arg0: i32) -> (i32, i32, i32) {
    %c0_i32 = arith.constant 0 : i32
    %c0_i32_0 = arith.constant 0 : i32
    %c0_i32_1 = arith.constant 0 : i32
    return %arg0, %c0_i32, %c0_i32_0 : i32, i32, i32
  }
}

module attributes {stable_mosaic.version = 11 : i64} {
  func.func @kernel(%arg0: i32, %arg1: i32, %arg2: i32, %arg3: memref<32x128xf32, #tpu.memory_space<vmem>>, %arg4: memref<128x32xbf16, #tpu.memory_space<vmem>>, %arg5: memref<1x32xf32, #tpu.memory_space<vmem>>, %arg6: memref<32x32xf32, #tpu.memory_space<vmem>>, %arg7: memref<32x32xf32, #tpu.memory_space<vmem>>, %arg8: memref<32x32xf32, #tpu.memory_space<vmem>>) attributes {dimension_semantics = [#tpu.dimension_semantics<parallel>, #tpu.dimension_semantics<parallel>, #tpu.dimension_semantics<arbitrary>], iteration_bounds = array<i64: 1, 1, 1>, scalar_prefetch = 0 : i64, scratch_operands = 1 : i64, tpu.core_type = #tpu.core_type<tc>, window_params = [{transform_indices = @transform_0, window_bounds = array<i64: 32, 128>}, {transform_indices = @transform_1, window_bounds = array<i64: 128, 32>}, {transform_indices = @transform_2, window_bounds = array<i64: 1, 32>}, {transform_indices = @transform_3, window_bounds = array<i64: 32, 32>}, {transform_indices = @transform_4, window_bounds = array<i64: 32, 32>}]} {
    %c0_i32 = arith.constant 0 : i32
    %0 = arith.cmpi eq, %arg2, %c0_i32 : i32
    %1 = arith.extui %0 : i1 to i32
    %c0_i32_0 = arith.constant 0 : i32
    %2 = arith.cmpi ne, %1, %c0_i32_0 : i32
    scf.if %2 {
      %cst_10 = arith.constant 0.000000e+00 : f32
      %13 = vector.broadcast %cst_10 : f32 to vector<32x32xf32>
      %c0_11 = arith.constant 0 : index
      %c0_12 = arith.constant 0 : index
      %14 = vector.load %arg8[%c0_11, %c0_12] : memref<32x32xf32, #tpu.memory_space<vmem>>, vector<32x32xf32>
      tpu.vector_store %arg8[%c0_11, %c0_12], %13 {strides = array<i32>} : memref<32x32xf32, #tpu.memory_space<vmem>>, vector<32x32xf32>,
    } else {
    }
    %c0 = arith.constant 0 : index
    %c0_1 = arith.constant 0 : index
    %3 = vector.load %arg8[%c0, %c0_1] : memref<32x32xf32, #tpu.memory_space<vmem>>, vector<32x32xf32>
    %c0_2 = arith.constant 0 : index
    %c0_3 = arith.constant 0 : index
    %4 = vector.load %arg3[%c0_2, %c0_3] : memref<32x128xf32, #tpu.memory_space<vmem>>, vector<32x128xf32>
    %5 = arith.truncf %4 : vector<32x128xf32> to vector<32x128xbf16>
    %c0_4 = arith.constant 0 : index
    %c0_5 = arith.constant 0 : index
    %6 = vector.load %arg4[%c0_4, %c0_5] : memref<128x32xbf16, #tpu.memory_space<vmem>>, vector<128x32xbf16>
    %cst = arith.constant dense<0.000000e+00> : vector<32x32xf32>
    %7 = tpu.matmul %5, %6, %cst {dimension_numbers = #tpu.dot_dimension_numbers<[1], [0], [0], [1], [0, 0, 1, 1], [], []>} : vector<32x128xbf16>, vector<128x32xbf16>, vector<32x32xf32> -> vector<32x32xf32>
    %8 = arith.addf %3, %7 : vector<32x32xf32>
    %c0_6 = arith.constant 0 : index
    %c0_7 = arith.constant 0 : index
    %9 = vector.load %arg8[%c0_6, %c0_7] : memref<32x32xf32, #tpu.memory_space<vmem>>, vector<32x32xf32>
    tpu.vector_store %arg8[%c0_6, %c0_7], %8 {strides = array<i32>} : memref<32x32xf32, #tpu.memory_space<vmem>>, vector<32x32xf32>,
    %c0_i32_8 = arith.constant 0 : i32
    %10 = arith.cmpi eq, %arg2, %c0_i32_8 : i32
    %11 = arith.extui %10 : i1 to i32
    %c0_i32_9 = arith.constant 0 : i32
    %12 = arith.cmpi ne, %11, %c0_i32_9 : i32
    scf.if %12 {
      %c0_10 = arith.constant 0 : index
      %c0_11 = arith.constant 0 : index
      %13 = vector.load %arg8[%c0_10, %c0_11] : memref<32x32xf32, #tpu.memory_space<vmem>>, vector<32x32xf32>
      %c0_12 = arith.constant 0 : index
      %c0_13 = arith.constant 0 : index
      %14 = vector.load %arg5[%c0_12, %c0_13] : memref<1x32xf32, #tpu.memory_space<vmem>>, vector<1x32xf32>
      %15 = vector.broadcast %14 : vector<1x32xf32> to vector<32x32xf32>
      %16 = arith.addf %13, %15 : vector<32x32xf32>
      %c0_14 = arith.constant 0 : index
      %c0_15 = arith.constant 0 : index
      %17 = vector.load %arg6[%c0_14, %c0_15] : memref<32x32xf32, #tpu.memory_space<vmem>>, vector<32x32xf32>
      %18 = arith.addf %16, %17 : vector<32x32xf32>
      %c0_16 = arith.constant 0 : index
      %c0_17 = arith.constant 0 : index
      %19 = vector.load %arg7[%c0_16, %c0_17] : memref<32x32xf32, #tpu.memory_space<vmem>>, vector<32x32xf32>
      tpu.vector_store %arg7[%c0_16, %c0_17], %18 {strides = array<i32>} : memref<32x32xf32, #tpu.memory_space<vmem>>, vector<32x32xf32>,
    } else {
    }
    return
  }
  func.func @transform_0(%arg0: i32, %arg1: i32, %arg2: i32) -> (i32, i32) {
    %c0_i32 = arith.constant 0 : i32
    return %arg0, %arg2 : i32, i32
  }
  func.func @transform_1(%arg0: i32, %arg1: i32, %arg2: i32) -> (i32, i32) {
    %c0_i32 = arith.constant 0 : i32
    return %arg2, %arg1 : i32, i32
  }
  func.func @transform_2(%arg0: i32, %arg1: i32, %arg2: i32) -> (i32, i32) {
    %c0_i32 = arith.constant 0 : i32
    %c0_i32_0 = arith.constant 0 : i32
    return %c0_i32, %arg1 : i32, i32
  }
  func.func @transform_3(%arg0: i32, %arg1: i32, %arg2: i32) -> (i32, i32) {
    %c0_i32 = arith.constant 0 : i32
    return %arg0, %arg1 : i32, i32
  }
  func.func @transform_4(%arg0: i32, %arg1: i32, %arg2: i32) -> (i32, i32) {
    %c0_i32 = arith.constant 0 : i32
    return %arg0, %arg1 : i32, i32
  }
}

</mosaic_0001>

<bundles_post_ra>
// kernel: twins_stage_forward.13
= control target key start
LH: loop header
LB: loop body
LE: loop exit
PB: predicated region body
PF: predicated region fallthrough
CT: control target
= control target key end

     0   :  { %vm18_vm0 = vcmask 261120   ;;  %s174_s0 = inlined_call_operand.vmem [shape: f32[32,32], index: 0, kind: input, shape index: {}]   ;;  %s175_s1 = inlined_call_operand.vmem [shape: f32[1,32], index: 1, kind: input, shape index: {}]   ;;  %s176_s2 = inlined_call_operand.vmem [shape: f32[1,32], index: 2, kind: input, shape index: {}]   ;;  %s177_s3 = inlined_call_operand.vmem [shape: f32[32,32], index: 3, kind: output, shape index: {}]  }
   0x1   :  { %v14_v0 = vld [vmem:[%s174_s0] sm:$0xff]  ;;  %v16_v1 = vld [vmem:[%s174_s0 + $0x10] sm:$0xff]  ;;  %v15_v2 = vld [vmem:[%s174_s0 + $0x8] sm:$0xff] }
   0x2   :  { %v19_v3 = vsel %vm18_vm0, %v14_v0, 0.0  ;;  %v25_v4 = vsel %vm18_vm0, %v16_v1, 0.0  ;;  %v17_v5 = vld [vmem:[%s174_s0 + $0x18] sm:$0xff]  ;;  %v22_v6 = vsel %vm18_vm0, %v15_v2, 0.0  ;;  %v102_v41 = vld [vmem:[%s175_s1] ss:$0 sm:$0xff] }
   0x3   :  { %20 = vadd.xlane.f32.xlu0 %v19_v3  ;;  %26 = vadd.xlane.f32.xlu1 %v25_v4  ;;  %v28_v7 = vsel %vm18_vm0, %v17_v5, 0.0  ;;  %v103_v43 = vld [vmem:[%s176_s2] ss:$0 sm:$0xff] }
   0x7   :  { %23 = vadd.xlane.f32.xlu0 %v22_v6  ;;  %29 = vadd.xlane.f32.xlu1 %v28_v7 }
  0x90   :  { %v21_v8 = vpop.xlane.xlu0 %20  ;;  %v27_v9 = vpop.xlane.xlu1 %26 }
  0x91   :  { %v32_v10 = vmul.f32 0.03125, %v21_v8  ;;  %v34_v11 = vmul.f32 0.03125, %v27_v9 }
  0x93   :  { %v36_v12 = vsub.f32 %v14_v0, %v32_v10  ;;  %v38_v13 = vsub.f32 %v16_v1, %v34_v11 }
  0x94   :  { %v24_v14 = vpop.xlane.xlu0 %23  ;;  %v30_v15 = vpop.xlane.xlu1 %29 }
  0x95   :  { %v33_v16 = vmul.f32 0.03125, %v24_v14  ;;  %v35_v17 = vmul.f32 0.03125, %v30_v15  ;;  %v40_v18 = vmul.f32 %v36_v12, %v36_v12  ;;  %v42_v19 = vmul.f32 %v38_v13, %v38_v13 }
  0x97   :  { %v37_v20 = vsub.f32 %v15_v2, %v33_v16  ;;  %v39_v21 = vsub.f32 %v17_v5, %v35_v17  ;;  %v44_v22 = vsel %vm18_vm0, %v40_v18, 0.0  ;;  %v50_v23 = vsel %vm18_vm0, %v42_v19, 0.0 }
  0x98   :  { %45 = vadd.xlane.f32.xlu0 %v44_v22 }
  0x99   :  { %v41_v24 = vmul.f32 %v37_v20, %v37_v20  ;;  %v43_v25 = vmul.f32 %v39_v21, %v39_v21 }
  0x9b   :  { %v47_v26 = vsel %vm18_vm0, %v41_v24, 0.0  ;;  %v53_v27 = vsel %vm18_vm0, %v43_v25, 0.0 }
  0x9c   :  { %51 = vadd.xlane.f32.xlu0 %v50_v23  ;;  %48 = vadd.xlane.f32.xlu1 %v47_v26 }
  0xa0   :  { %54 = vadd.xlane.f32.xlu1 %v53_v27 }
 0x125   :  { %v46_v28 = vpop.xlane.xlu0 %45 }
 0x126   :  { %v56_v29 = vmul.f32 0.03125, %v46_v28 }
 0x128   :  { %v60_v30 = vadd.f32 1e-05, %v56_v29 }
 0x129   :  { %v49_v31 = vpop.xlane.xlu1 %48  ;;  %v52_v32 = vpop.xlane.xlu0 %51 }
 0x12a   :  { %104 = vrsqrt.f32 %v60_v30  ;;  %v57_v33 = vmul.f32 0.03125, %v49_v31  ;;  %v58_v34 = vmul.f32 0.03125, %v52_v32 }
 0x12c   :  { %v61_v35 = vadd.f32 1e-05, %v57_v33  ;;  %v62_v36 = vadd.f32 1e-05, %v58_v34 }
 0x12d   :  { %v55_v37 = vpop.xlane.xlu1 %54 }
 0x12e   :  { %106 = vrsqrt.f32 %v61_v35  ;;  %v59_v38 = vmul.f32 0.03125, %v55_v37 }
 0x12f   :  { %108 = vrsqrt.f32 %v62_v36 }
 0x130   :  { %v63_v39 = vadd.f32 1e-05, %v59_v38 }
 0x132   :  { %110 = vrsqrt.f32 %v63_v39 }
 0x134   :  { %v105_v40 = vpop.eup %104 }
 0x135   :  { %v68_v42 = vmul.f32 %v105_v40, %v36_v12 }
 0x137   :  { %v79_v44 = vmul.f32 %v102_v41, %v68_v42 }
 0x138   :  { %v107_v45 = vpop.eup %106 }
 0x139   :  { %v109_v46 = vpop.eup %108  ;;  %v90_v47 = vadd.f32 %v103_v43, %v79_v44  ;;  %v69_v48 = vmul.f32 %v107_v45, %v37_v20 }
 0x13a   :  { %v70_v49 = vmul.f32 %v109_v46, %v38_v13 }
 0x13b   :  { %94 = vst.msk [vmem:[%s177_s3] sm:$0xff] %vm18_vm0, %v90_v47  ;;  %v80_v50 = vmul.f32 %v102_v41, %v69_v48 }
 0x13c   :  { %v111_v51 = vpop.eup %110  ;;  %v81_v52 = vmul.f32 %v102_v41, %v70_v49 }
 0x13d   :  { %v91_v53 = vadd.f32 %v103_v43, %v80_v50  ;;  %v71_v54 = vmul.f32 %v111_v51, %v39_v21 }
 0x13e   :  { %v92_v55 = vadd.f32 %v103_v43, %v81_v52 }
 0x13f   :  { %95 = vst.msk [vmem:[%s177_s3 + $0x8] sm:$0xff] %vm18_vm0, %v91_v53  ;;  %v82_v56 = vmul.f32 %v102_v41, %v71_v54 }
 0x140   :  { %96 = vst.msk [vmem:[%s177_s3 + $0x10] sm:$0xff] %vm18_vm0, %v92_v55 }
 0x141   :  { %v93_v57 = vadd.f32 %v103_v43, %v82_v56 }
 0x143   :  { %97 = vst.msk [vmem:[%s177_s3 + $0x18] sm:$0xff] %vm18_vm0, %v93_v57 }

// kernel: twins_stage_forward.12
= control target key start
LH: loop header
LB: loop body
LE: loop exit
PB: predicated region body
PF: predicated region fallthrough
CT: control target
= control target key end

     0   :  { %vm66_vm0 = vcmask 523264   ;;  %vm122_vm1 = vcmask 261120   ;;  %s332_s1 = inlined_call_operand.vmem [shape: bf16[64,32], index: 1, kind: input, shape index: {}]   ;;  %s333_s0 = inlined_call_operand.vmem [shape: f32[32,64], index: 0, kind: input, shape index: {}]   ;;  %s334_s2 = inlined_call_operand.vmem [shape: f32[1,32], index: 2, kind: input, shape index: {}]   ;;  %s335_s3 = inlined_call_operand.vmem [shape: f32[1,32], index: 3, kind: input, shape index: {}]   ;;  %s336_s4 = inlined_call_operand.vmem [shape: f32[1,32], index: 4, kind: input, shape index: {}]   ;;  %s337_s5 = inlined_call_operand.vmem [shape: f32[32,32], index: 5, kind: output, shape index: {}]  }
   0x1   :  { %v233_v0 = vld [vmem:[%s332_s1] sm:$0xff]   ;;  %v234_v1 = vld [vmem:[%s332_s1 + $0x8] sm:$0xff]   ;;  %v235_v2 = vld [vmem:[%s332_s1 + $0x10] sm:$0xff]  }
   0x2   :  { %221 = vmatprep.subr.bf16.mxu0 %v233_v0  ;;  %v21_v3 = vld [vmem:[%s333_s0] sm:$0xff]  ;;  %v22_v4 = vld [vmem:[%s333_s0 + $0x8] sm:$0xff]  ;;  %v236_v6 = vld [vmem:[%s332_s1 + $0x18] sm:$0xff]  }
   0x3   :  { %222 = vmatpush3.bf16.msra.mxu0 %v233_v0  ;;  %v25_v5 = vpack.c.bf16 %v22_v4, %v21_v3  ;;  %v23_v7 = vld [vmem:[%s333_s0 + $0x10] sm:$0xff]  ;;  %v24_v8 = vld [vmem:[%s333_s0 + $0x18] sm:$0xff]  ;;  %v206_v10 = vld [vmem:[%s334_s2] ss:$0 sm:$0xff] }
   0x4   :  { %223 = vmatprep.subr.bf16.mxu0 %v234_v1  ;;  %v26_v9 = vpack.c.bf16 %v24_v8, %v23_v7  ;;  %v213_v56 = vld [vmem:[%s335_s3] ss:$0 sm:$0xff] }
   0x5   :  { %229 = vmatprep.mubr.msk.bf16.mxu0 %vm66_vm0, %v25_v5  ;;  %v214_v58 = vld [vmem:[%s336_s4] ss:$0 sm:$0xff] }
   0x7   :  { %224 = vmatpush3.bf16.msra.mxu0 %v234_v1 }
   0x8   :  { %225 = vmatprep.subr.bf16.mxu0 %v235_v2 }
   0xb   :  { %226 = vmatpush3.bf16.msra.mxu0 %v235_v2 }
   0xc   :  { %227 = vmatprep.subr.bf16.mxu0 %v236_v6 }
   0xf   :  { %228 = vmatpush3.bf16.msra.mxu0 %v236_v6 }
  0x12   :  { %230 = vmatmul.mubr.msk.bf16.vlgmr.msra.gmra.mrb[0].mxu0 %vm66_vm0, %v26_v9 }
  0xe5   :  { %v231_v11 = vpop.f32.mrb[0].mxu0 }
  0xe6   :  { %v116_v12 = vadd.f32 %v231_v11, %v206_v10  ;;  %v107_v13 = vpop.f32.mrb[1].mxu0 }
  0xe7   :  { %v108_v14 = vadd.f32 %v206_v10, %v107_v13  ;;  %v232_v15 = vpop.f32.mrb[2].mxu0 }
  0xe8   :  { %v119_v16 = vadd.f32 %v232_v15, %v206_v10  ;;  %v110_v17 = vpop.f32.mrb[3].mxu0  ;;  %v129_v18 = vsel %vm122_vm1, %v116_v12, 0.0 }
  0xe9   :  { %v111_v19 = vadd.f32 %v206_v10, %v110_v17  ;;  %130 = vadd.xlane.f32.xlu1 %v129_v18  ;;  %v123_v20 = vsel %vm122_vm1, %v108_v14, 0.0 }
  0xea   :  { %124 = vadd.xlane.f32.xlu0 %v123_v20  ;;  %v132_v21 = vsel %vm122_vm1, %v119_v16, 0.0 }
  0xeb   :  { %v126_v22 = vsel %vm122_vm1, %v111_v19, 0.0 }
  0xed   :  { %133 = vadd.xlane.f32.xlu1 %v132_v21 }
  0xee   :  { %127 = vadd.xlane.f32.xlu0 %v126_v22 }
 0x176   :  { %v131_v23 = vpop.xlane.xlu1 %130 }
 0x177   :  { %v138_v24 = vmul.f32 0.03125, %v131_v23  ;;  %v125_v25 = vpop.xlane.xlu0 %124 }
 0x178   :  { %v136_v26 = vmul.f32 0.03125, %v125_v25 }
 0x179   :  { %v142_v27 = vsub.f32 %v116_v12, %v138_v24 }
 0x17a   :  { %v140_v28 = vsub.f32 %v108_v14, %v136_v26  ;;  %v134_v29 = vpop.xlane.xlu1 %133 }
 0x17b   :  { %v139_v30 = vmul.f32 0.03125, %v134_v29  ;;  %v128_v31 = vpop.xlane.xlu0 %127  ;;  %v146_v37 = vmul.f32 %v142_v27, %v142_v27 }
 0x17c   :  { %v137_v32 = vmul.f32 0.03125, %v128_v31  ;;  %v144_v33 = vmul.f32 %v140_v28, %v140_v28 }
 0x17d   :  { %v143_v34 = vsub.f32 %v119_v16, %v139_v30  ;;  %v154_v39 = vsel %vm122_vm1, %v146_v37, 0.0 }
 0x17e   :  { %v141_v35 = vsub.f32 %v111_v19, %v137_v32  ;;  %v148_v36 = vsel %vm122_vm1, %v144_v33, 0.0 }
 0x17f   :  { %149 = vadd.xlane.f32.xlu0 %v148_v36  ;;  %v147_v41 = vmul.f32 %v143_v34, %v143_v34 }
 0x180   :  { %v145_v38 = vmul.f32 %v141_v35, %v141_v35 }
 0x181   :  { %v157_v42 = vsel %vm122_vm1, %v147_v41, 0.0 }
 0x182   :  { %v151_v40 = vsel %vm122_vm1, %v145_v38, 0.0 }
 0x183   :  { %155 = vadd.xlane.f32.xlu0 %v154_v39  ;;  %152 = vadd.xlane.f32.xlu1 %v151_v40 }
 0x187   :  { %158 = vadd.xlane.f32.xlu1 %v157_v42 }
 0x20c   :  { %v150_v43 = vpop.xlane.xlu0 %149 }
 0x20d   :  { %v160_v44 = vmul.f32 0.03125, %v150_v43 }
 0x20f   :  { %v164_v45 = vadd.f32 1e-05, %v160_v44 }
 0x210   :  { %v153_v46 = vpop.xlane.xlu1 %152  ;;  %v156_v47 = vpop.xlane.xlu0 %155 }
 0x211   :  { %237 = vrsqrt.f32 %v164_v45  ;;  %v161_v48 = vmul.f32 0.03125, %v153_v46  ;;  %v162_v49 = vmul.f32 0.03125, %v156_v47 }
 0x213   :  { %v165_v50 = vadd.f32 1e-05, %v161_v48  ;;  %v166_v51 = vadd.f32 1e-05, %v162_v49 }
 0x214   :  { %v159_v52 = vpop.xlane.xlu1 %158 }
 0x215   :  { %239 = vrsqrt.f32 %v165_v50  ;;  %v163_v53 = vmul.f32 0.03125, %v159_v52 }
 0x216   :  { %241 = vrsqrt.f32 %v166_v51 }
 0x217   :  { %v167_v54 = vadd.f32 1e-05, %v163_v53 }
 0x219   :  { %243 = vrsqrt.f32 %v167_v54 }
 0x21b   :  { %v238_v55 = vpop.eup %237 }
 0x21c   :  { %v172_v57 = vmul.f32 %v238_v55, %v140_v28 }
 0x21e   :  { %v183_v59 = vmul.f32 %v213_v56, %v172_v57 }
 0x21f   :  { %v240_v60 = vpop.eup %239 }
 0x220   :  { %v242_v61 = vpop.eup %241  ;;  %v194_v62 = vadd.f32 %v214_v58, %v183_v59  ;;  %v173_v63 = vmul.f32 %v240_v60, %v141_v35 }
 0x221   :  { %v174_v0 = vmul.f32 %v242_v61, %v142_v27 }
 0x222   :  { %198 = vst.msk [vmem:[%s337_s5] sm:$0xff] %vm122_vm1, %v194_v62  ;;  %v184_v1 = vmul.f32 %v213_v56, %v173_v63 }
 0x223   :  { %v244_v2 = vpop.eup %243  ;;  %v185_v3 = vmul.f32 %v213_v56, %v174_v0 }
 0x224   :  { %v195_v4 = vadd.f32 %v214_v58, %v184_v1  ;;  %v175_v5 = vmul.f32 %v244_v2, %v143_v34 }
 0x225   :  { %v196_v6 = vadd.f32 %v214_v58, %v185_v3 }
 0x226   :  { %199 = vst.msk [vmem:[%s337_s5 + $0x8] sm:$0xff] %vm122_vm1, %v195_v4  ;;  %v186_v7 = vmul.f32 %v213_v56, %v175_v5 }
 0x227   :  { %200 = vst.msk [vmem:[%s337_s5 + $0x10] sm:$0xff] %vm122_vm1, %v196_v6 }
 0x228   :  { %v197_v8 = vadd.f32 %v214_v58, %v186_v7 }
 0x22a   :  { %201 = vst.msk [vmem:[%s337_s5 + $0x18] sm:$0xff] %vm122_vm1, %v197_v8 }

// kernel: twins_stage_forward.15
= control target key start
LH: loop header
LB: loop body
LE: loop exit
PB: predicated region body
PF: predicated region fallthrough
CT: control target
= control target key end

     0   :  { %vm19_vm0 = vcmask 261120   ;;  %v196_v0 = vmov 0.0   ;;  %vm197_vm1 = vmmov 0   ;;  %s254_s1 = inlined_call_operand.vmem [shape: bf16[128,32], index: 1, kind: input, shape index: {}]   ;;  %s255_s0 = inlined_call_operand.vmem [shape: f32[8,128], index: 0, kind: input, shape index: {}]   ;;  %s256_s2 = inlined_call_operand.vmem [shape: f32[1,32], index: 2, kind: input, shape index: {}]   ;;  %s257_s3 = inlined_call_operand.vmem [shape: f32[8,32], index: 3, kind: output, shape index: {}]  }
   0x1   :  { %166 = vmatprep.subr.bf16.mxu0 %v196_v0  ;;  %v188_v1 = vld [vmem:[%s254_s1] sm:$0xff]   ;;  %182 = vmatprep.mubr.msk.bf16.mxu0 %vm197_vm1, %v196_v0  ;;  %20 = vst.msk [vmem:[#allocation2] sm:$0xff] %vm19_vm0, %v196_v0  ;;  %v189_v2 = vld [vmem:[%s254_s1 + $0x8] sm:$0xff]   ;;  %v190_v3 = vld [vmem:[%s254_s1 + $0x10] sm:$0xff]  }
   0x2   :  { %167 = vmatpush3.bf16.msra.mxu0 %v188_v1  ;;  %v191_v4 = vld [vmem:[%s254_s1 + $0x18] sm:$0xff]   ;;  %v192_v5 = vld [vmem:[%s254_s1 + $0x20] sm:$0xff]   ;;  %v193_v6 = vld [vmem:[%s254_s1 + $0x28] sm:$0xff]  }
   0x3   :  { %168 = vmatprep.subr.bf16.mxu0 %v196_v0  ;;  %v194_v7 = vld [vmem:[%s254_s1 + $0x30] sm:$0xff]   ;;  %v195_v8 = vld [vmem:[%s254_s1 + $0x38] sm:$0xff]   ;;  %v22_v9 = vld [vmem:[%s255_s0] sm:$0xff] }
   0x4   :  { %v23_v10 = vpack.c.bf16 %v22_v9, %v22_v9  ;;  %v156_v17 = vld [vmem:[%s256_s2] ss:$0 sm:$0xff] }
   0x6   :  { %169 = vmatpush3.bf16.msra.mxu0 %v189_v2 }
   0x7   :  { %170 = vmatprep.subr.bf16.mxu0 %v196_v0 }
   0x8   :  { %v21_v11 = vld [vmem:[#allocation2] sm:$0xff] }
   0xa   :  { %171 = vmatpush3.bf16.msra.mxu0 %v190_v3 }
   0xb   :  { %172 = vmatprep.subr.bf16.mxu0 %v196_v0 }
   0xe   :  { %173 = vmatpush3.bf16.msra.mxu0 %v191_v4 }
   0xf   :  { %174 = vmatprep.subr.bf16.mxu0 %v196_v0 }
  0x12   :  { %175 = vmatpush3.bf16.msra.mxu0 %v192_v5 }
  0x13   :  { %176 = vmatprep.subr.bf16.mxu0 %v196_v0 }
  0x16   :  { %177 = vmatpush3.bf16.msra.mxu0 %v193_v6 }
  0x17   :  { %178 = vmatprep.subr.bf16.mxu0 %v196_v0 }
  0x1a   :  { %179 = vmatpush3.bf16.msra.mxu0 %v194_v7 }
  0x1b   :  { %180 = vmatprep.subr.bf16.mxu0 %v196_v0 }
  0x1e   :  { %181 = vmatpush3.bf16.msra.mxu0 %v195_v8 }
  0x21   :  { %183 = vmatmul.mubr.bf16.vlgmr.msra.gmra.mrb[0].mxu0 %v23_v10 }
  0xf4   :  { %v122_v12 = vpop.f32.mrb[0].mxu0 }
  0xf5   :  { %v128_v13 = vadd.f32 %v122_v12, %v21_v11  ;;  %v184_v14 = vpop.f32.mrb[1].mxu0 }
  0xf6   :  { %v125_v15 = vpop.f32.mrb[2].mxu0 }
  0xf7   :  { %130 = vst.msk [vmem:[#allocation2] sm:$0xff] %vm19_vm0, %v128_v13  ;;  %v185_v16 = vpop.f32.mrb[3].mxu0 }
  0xfe   :  { %v134_v18 = vld [vmem:[#allocation2] sm:$0xff] }
  0xff   :  { %v142_v19 = vadd.f32 %v156_v17, %v134_v18 }
 0x101   :  { %143 = vst.msk [vmem:[%s257_s3] sm:$0xff] %vm19_vm0, %v142_v19 }

// kernel: twins_stage_forward.16
= control target key start
LH: loop header
LB: loop body
LE: loop exit
PB: predicated region body
PF: predicated region fallthrough
CT: control target
= control target key end

     0   :  { %vm26_vm0 = vcmask 261120   ;;  %v157_v8 = vmov 0.0   ;;  %vm158_vm1 = vmmov 0   ;;  %vm58_vm2 = vcmask 257024   ;;  %s213_s0 = inlined_call_operand.vmem [shape: f32[8,32], index: 0, kind: input, shape index: {}]   ;;  %s214_s3 = inlined_call_operand.vmem [shape: bf16[32,64], index: 3, kind: input, shape index: {}]   ;;  %s215_s1 = inlined_call_operand.vmem [shape: f32[1,32], index: 1, kind: input, shape index: {}]   ;;  %s216_s2 = inlined_call_operand.vmem [shape: f32[1,32], index: 2, kind: input, shape index: {}]   ;;  %s217_s4 = inlined_call_operand.vmem [shape: f32[1,64], index: 4, kind: input, shape index: {}]   ;;  %s218_s5 = inlined_call_operand.vmem [shape: f32[8,64], index: 5, kind: output, shape index: {}]  }
   0x1   :  { %v25_v0 = vld [vmem:[%s213_s0] sm:$0xff]  ;;  %143 = vmatprep.subr.bf16.mxu0 %v157_v8  ;;  %v154_v9 = vld [vmem:[%s214_s3 + $0x8] sm:$0xff]   ;;  %147 = vmatprep.mubr.msk.bf16.mxu0 %vm158_vm1, %v157_v8  ;;  %vm128_vm3 = vcmask 523264  }
   0x2   :  { %v27_v1 = vsel %vm26_vm0, %v25_v0, 0.0  ;;  %v153_v7 = vld [vmem:[%s214_s3] sm:$0xff]  }
   0x3   :  { %28 = vadd.xlane.f32.xlu0 %v27_v1  ;;  %144 = vmatpush3.bf16.msra.mxu0 %v153_v7  ;;  %v134_v14 = vld [vmem:[%s215_s1] ss:$0 sm:$0xff] }
   0x4   :  { %145 = vmatprep.subr.bf16.mxu0 %v157_v8  ;;  %v135_v16 = vld [vmem:[%s216_s2] ss:$0 sm:$0xff] }
   0x5   :  { %v136_v21 = vld [vmem:[%s217_s4] ss:$0 sm:$0xff] }
   0x7   :  { %146 = vmatpush3.bf16.msra.mxu0 %v154_v9 }
  0x90   :  { %v29_v2 = vpop.xlane.xlu0 %28 }
  0x91   :  { %v31_v3 = vmul.f32 0.03125, %v29_v2 }
  0x93   :  { %v32_v4 = vsub.f32 %v25_v0, %v31_v3 }
  0x95   :  { %v33_v5 = vmul.f32 %v32_v4, %v32_v4 }
  0x97   :  { %v34_v6 = vsel %vm26_vm0, %v33_v5, 0.0 }
  0x98   :  { %35 = vadd.xlane.f32.xlu0 %v34_v6 }
 0x125   :  { %v36_v10 = vpop.xlane.xlu0 %35 }
 0x126   :  { %v37_v11 = vmul.f32 0.03125, %v36_v10 }
 0x128   :  { %v38_v12 = vadd.f32 1e-05, %v37_v11 }
 0x12a   :  { %155 = vrsqrt.f32 %v38_v12 }
 0x134   :  { %v156_v13 = vpop.eup %155 }
 0x135   :  { %v40_v15 = vmul.f32 %v156_v13, %v32_v4 }
 0x137   :  { %v48_v17 = vmul.f32 %v134_v14, %v40_v15 }
 0x139   :  { %v56_v18 = vadd.f32 %v135_v16, %v48_v17 }
 0x13b   :  { %v57_v19 = vpack.c.bf16 %v56_v18, %v56_v18 }
 0x13d   :  { %59 = vst.msk [vmem:[#allocation2] sm:$0xf] %vm58_vm2, %v57_v19 }
 0x144   :  { %v60_v20 = vld [vmem:[#allocation2] sm:$0xf] }
 0x145   :  { %148 = vmatmul.mubr.msk.bf16.vlgmr.msra.gmra.mrb[0].mxu0 %vm26_vm0, %v60_v20 }
 0x218   :  { %v122_v22 = vpop.f32.mrb[0].mxu0 }
 0x219   :  { %v123_v23 = vadd.f32 %v136_v21, %v122_v22  ;;  %v149_v24 = vpop.f32.mrb[1].mxu0 }
 0x21a   :  { %v125_v25 = vpop.f32.mrb[2].mxu0 }
 0x21b   :  { %129 = vst.msk [vmem:[%s218_s5] sm:$0xff] %vm128_vm3, %v123_v23  ;;  %v150_v26 = vpop.f32.mrb[3].mxu0 }

// kernel: twins_stage_forward.14
= control target key start
LH: loop header
LB: loop body
LE: loop exit
PB: predicated region body
PF: predicated region fallthrough
CT: control target
= control target key end

     0   :  { %vm19_vm0 = vcmask 261120   ;;  %v160_v1 = vmov 0.0   ;;  %s228_s1 = inlined_call_operand.vmem [shape: bf16[32,32], index: 1, kind: input, shape index: {}]   ;;  %s229_s0 = inlined_call_operand.vmem [shape: f32[32,32], index: 0, kind: input, shape index: {}]   ;;  %s230_s2 = inlined_call_operand.vmem [shape: f32[1,32], index: 2, kind: input, shape index: {}]   ;;  %s231_s3 = inlined_call_operand.vmem [shape: f32[32,32], index: 3, kind: output, shape index: {}]  }
   0x1   :  { %v158_v0 = vld [vmem:[%s228_s1] sm:$0xff]   ;;  %22 = vst.msk [vmem:[#allocation2 + $0x10] sm:$0xff] %vm19_vm0, %v160_v1  ;;  %20 = vst.msk [vmem:[#allocation2] sm:$0xff] %vm19_vm0, %v160_v1  ;;  %v159_v2 = vld [vmem:[%s228_s1 + $0x8] sm:$0xff]  }
   0x2   :  { %21 = vst.msk [vmem:[#allocation2 + $0x8] sm:$0xff] %vm19_vm0, %v160_v1  ;;  %23 = vst.msk [vmem:[#allocation2 + $0x18] sm:$0xff] %vm19_vm0, %v160_v1  ;;  %149 = vmatprep.subr.bf16.mxu0 %v158_v0  ;;  %v28_v3 = vld [vmem:[%s229_s0] sm:$0xff]  ;;  %v29_v4 = vld [vmem:[%s229_s0 + $0x8] sm:$0xff] }
   0x3   :  { %150 = vmatpush3.bf16.msra.mxu0 %v158_v0  ;;  %v32_v5 = vpack.c.bf16 %v29_v4, %v28_v3  ;;  %v30_v6 = vld [vmem:[%s229_s0 + $0x10] sm:$0xff]  ;;  %v31_v7 = vld [vmem:[%s229_s0 + $0x18] sm:$0xff]  ;;  %v144_v21 = vld [vmem:[%s230_s2] ss:$0 sm:$0xff] }
   0x4   :  { %151 = vmatprep.subr.bf16.mxu0 %v159_v2  ;;  %v33_v8 = vpack.c.bf16 %v31_v7, %v30_v6 }
   0x5   :  { %153 = vmatprep.mubr.msk.bf16.mxu0 %vm19_vm0, %v32_v5 }
   0x7   :  { %152 = vmatpush3.bf16.msra.mxu0 %v159_v2 }
   0x8   :  { %v26_v9 = vld [vmem:[#allocation2 + $0x10] sm:$0xff]  ;;  %v24_v10 = vld [vmem:[#allocation2] sm:$0xff] }
   0x9   :  { %v27_v12 = vld [vmem:[#allocation2 + $0x18] sm:$0xff]  ;;  %v25_v15 = vld [vmem:[#allocation2 + $0x8] sm:$0xff] }
   0xa   :  { %154 = vmatmul.mubr.msk.bf16.vlgmr.msra.gmra.mrb[0].mxu0 %vm19_vm0, %v33_v8 }
  0xdd   :  { %v155_v11 = vpop.f32.mrb[0].mxu0 }
  0xde   :  { %v108_v13 = vadd.f32 %v155_v11, %v26_v9  ;;  %v91_v14 = vpop.f32.mrb[1].mxu0 }
  0xdf   :  { %v106_v16 = vadd.f32 %v91_v14, %v24_v10  ;;  %v156_v17 = vpop.f32.mrb[2].mxu0 }
  0xe0   :  { %112 = vst.msk [vmem:[#allocation2 + $0x10] sm:$0xff] %vm19_vm0, %v108_v13  ;;  %v109_v18 = vadd.f32 %v156_v17, %v27_v12  ;;  %v94_v19 = vpop.f32.mrb[3].mxu0 }
  0xe1   :  { %110 = vst.msk [vmem:[#allocation2] sm:$0xff] %vm19_vm0, %v106_v16  ;;  %v107_v20 = vadd.f32 %v94_v19, %v25_v15 }
  0xe2   :  { %113 = vst.msk [vmem:[#allocation2 + $0x18] sm:$0xff] %vm19_vm0, %v109_v18 }
  0xe3   :  { %111 = vst.msk [vmem:[#allocation2 + $0x8] sm:$0xff] %vm19_vm0, %v107_v20 }
  0xe7   :  { %v119_v22 = vld [vmem:[#allocation2 + $0x10] sm:$0xff] }
  0xe8   :  { %v130_v23 = vadd.f32 %v144_v21, %v119_v22  ;;  %v117_v24 = vld [vmem:[#allocation2] sm:$0xff] }
  0xe9   :  { %v128_v25 = vadd.f32 %v144_v21, %v117_v24  ;;  %v120_v26 = vld [vmem:[#allocation2 + $0x18] sm:$0xff] }
  0xea   :  { %134 = vst.msk [vmem:[%s231_s3 + $0x10] sm:$0xff] %vm19_vm0, %v130_v23  ;;  %v131_v27 = vadd.f32 %v144_v21, %v120_v26  ;;  %v118_v28 = vld [vmem:[#allocation2 + $0x8] sm:$0xff] }
  0xeb   :  { %132 = vst.msk [vmem:[%s231_s3] sm:$0xff] %vm19_vm0, %v128_v25  ;;  %v129_v29 = vadd.f32 %v144_v21, %v118_v28 }
  0xec   :  { %135 = vst.msk [vmem:[%s231_s3 + $0x18] sm:$0xff] %vm19_vm0, %v131_v27 }
  0xed   :  { %133 = vst.msk [vmem:[%s231_s3 + $0x8] sm:$0xff] %vm19_vm0, %v129_v29 }

// kernel: twins_stage_forward.18
= control target key start
LH: loop header
LB: loop body
LE: loop exit
PB: predicated region body
PF: predicated region fallthrough
CT: control target
= control target key end

     0   :  { %vm29_vm0 = vcmask 261120   ;;  %s336_s0 = inlined_call_operand.vmem [shape: f32[32,32], index: 0, kind: input, shape index: {}]   ;;  %s337_s3 = inlined_call_operand.vmem [shape: bf16[32,128], index: 3, kind: input, shape index: {}]   ;;  %s338_s1 = inlined_call_operand.vmem [shape: f32[1,32], index: 1, kind: input, shape index: {}]   ;;  %s339_s2 = inlined_call_operand.vmem [shape: f32[1,32], index: 2, kind: input, shape index: {}]   ;;  %s340_s4 = inlined_call_operand.vmem [shape: f32[1,128], index: 4, kind: input, shape index: {}]   ;;  %s341_s5 = inlined_call_operand.vmem [shape: f32[32,128], index: 5, kind: output, shape index: {}]  }
   0x1   :  { %v25_v0 = vld [vmem:[%s336_s0] sm:$0xff]  ;;  %v27_v1 = vld [vmem:[%s336_s0 + $0x10] sm:$0xff]  ;;  %v26_v2 = vld [vmem:[%s336_s0 + $0x8] sm:$0xff] }
   0x2   :  { %v30_v3 = vsel %vm29_vm0, %v25_v0, 0.0  ;;  %v36_v4 = vsel %vm29_vm0, %v27_v1, 0.0  ;;  %v28_v5 = vld [vmem:[%s336_s0 + $0x18] sm:$0xff]  ;;  %v33_v6 = vsel %vm29_vm0, %v26_v2, 0.0  ;;  %v237_v28 = vld [vmem:[%s337_s3] sm:$0xff]   ;;  %v238_v29 = vld [vmem:[%s337_s3 + $0x8] sm:$0xff]  }
   0x3   :  { %31 = vadd.xlane.f32.xlu0 %v30_v3  ;;  %37 = vadd.xlane.f32.xlu1 %v36_v4  ;;  %v39_v7 = vsel %vm29_vm0, %v28_v5, 0.0  ;;  %v218_v44 = vld [vmem:[%s338_s1] ss:$0 sm:$0xff] }
   0x4   :  { %229 = vmatprep.subr.bf16.mxu0 %v237_v28  ;;  %v219_v49 = vld [vmem:[%s339_s2] ss:$0 sm:$0xff] }
   0x5   :  { %230 = vmatpush3.bf16.msra.mxu0 %v237_v28 }
   0x6   :  { %231 = vmatprep.subr.bf16.mxu0 %v238_v29 }
   0x7   :  { %34 = vadd.xlane.f32.xlu0 %v33_v6  ;;  %40 = vadd.xlane.f32.xlu1 %v39_v7 }
   0x9   :  { %232 = vmatpush3.bf16.msra.mxu0 %v238_v29 }
  0x90   :  { %v32_v8 = vpop.xlane.xlu0 %31  ;;  %v38_v9 = vpop.xlane.xlu1 %37 }
  0x91   :  { %v43_v10 = vmul.f32 0.03125, %v32_v8  ;;  %v45_v11 = vmul.f32 0.03125, %v38_v9 }
  0x93   :  { %v47_v12 = vsub.f32 %v25_v0, %v43_v10  ;;  %v49_v13 = vsub.f32 %v27_v1, %v45_v11  ;;  %v220_v0 = vld [vmem:[%s340_s4] ss:$0 sm:$0xff] }
  0x94   :  { %v35_v14 = vpop.xlane.xlu0 %34  ;;  %v41_v15 = vpop.xlane.xlu1 %40 }
  0x95   :  { %v44_v16 = vmul.f32 0.03125, %v35_v14  ;;  %v46_v17 = vmul.f32 0.03125, %v41_v15  ;;  %v51_v18 = vmul.f32 %v47_v12, %v47_v12  ;;  %v53_v19 = vmul.f32 %v49_v13, %v49_v13 }
  0x97   :  { %v48_v20 = vsub.f32 %v26_v2, %v44_v16  ;;  %v50_v21 = vsub.f32 %v28_v5, %v46_v17  ;;  %v55_v22 = vsel %vm29_vm0, %v51_v18, 0.0  ;;  %v61_v23 = vsel %vm29_vm0, %v53_v19, 0.0 }
  0x98   :  { %56 = vadd.xlane.f32.xlu0 %v55_v22 }
  0x99   :  { %v52_v24 = vmul.f32 %v48_v20, %v48_v20  ;;  %v54_v25 = vmul.f32 %v50_v21, %v50_v21 }
  0x9b   :  { %v58_v26 = vsel %vm29_vm0, %v52_v24, 0.0  ;;  %v64_v27 = vsel %vm29_vm0, %v54_v25, 0.0 }
  0x9c   :  { %62 = vadd.xlane.f32.xlu0 %v61_v23  ;;  %59 = vadd.xlane.f32.xlu1 %v58_v26 }
  0xa0   :  { %65 = vadd.xlane.f32.xlu1 %v64_v27 }
 0x125   :  { %v57_v30 = vpop.xlane.xlu0 %56 }
 0x126   :  { %v67_v31 = vmul.f32 0.03125, %v57_v30 }
 0x128   :  { %v71_v32 = vadd.f32 1e-05, %v67_v31 }
 0x129   :  { %v60_v33 = vpop.xlane.xlu1 %59  ;;  %v63_v34 = vpop.xlane.xlu0 %62 }
 0x12a   :  { %239 = vrsqrt.f32 %v71_v32  ;;  %v68_v35 = vmul.f32 0.03125, %v60_v33  ;;  %v69_v36 = vmul.f32 0.03125, %v63_v34 }
 0x12c   :  { %v72_v37 = vadd.f32 1e-05, %v68_v35  ;;  %v73_v38 = vadd.f32 1e-05, %v69_v36 }
 0x12d   :  { %v66_v39 = vpop.xlane.xlu1 %65 }
 0x12e   :  { %241 = vrsqrt.f32 %v72_v37  ;;  %v70_v40 = vmul.f32 0.03125, %v66_v39 }
 0x12f   :  { %243 = vrsqrt.f32 %v73_v38 }
 0x130   :  { %v74_v41 = vadd.f32 1e-05, %v70_v40 }
 0x132   :  { %245 = vrsqrt.f32 %v74_v41 }
 0x134   :  { %v240_v42 = vpop.eup %239 }
 0x135   :  { %v79_v43 = vmul.f32 %v240_v42, %v47_v12 }
 0x137   :  { %v90_v47 = vmul.f32 %v218_v44, %v79_v43 }
 0x138   :  { %v242_v45 = vpop.eup %241 }
 0x139   :  { %v244_v46 = vpop.eup %243  ;;  %v80_v48 = vmul.f32 %v242_v45, %v48_v20  ;;  %v101_v53 = vadd.f32 %v219_v49, %v90_v47 }
 0x13a   :  { %v81_v50 = vmul.f32 %v244_v46, %v49_v13 }
 0x13b   :  { %v91_v51 = vmul.f32 %v218_v44, %v80_v48 }
 0x13c   :  { %v246_v52 = vpop.eup %245  ;;  %v92_v55 = vmul.f32 %v218_v44, %v81_v50 }
 0x13d   :  { %v102_v54 = vadd.f32 %v219_v49, %v91_v51  ;;  %v82_v56 = vmul.f32 %v246_v52, %v50_v21 }
 0x13e   :  { %v103_v59 = vadd.f32 %v219_v49, %v92_v55 }
 0x13f   :  { %v105_v57 = vpack.c.bf16 %v102_v54, %v101_v53  ;;  %v93_v58 = vmul.f32 %v218_v44, %v82_v56 }
 0x141   :  { %107 = vst.msk [vmem:[#allocation2] sm:$0xff] %vm29_vm0, %v105_v57  ;;  %v104_v60 = vadd.f32 %v219_v49, %v93_v58 }
 0x143   :  { %v106_v61 = vpack.c.bf16 %v104_v60, %v103_v59 }
 0x145   :  { %108 = vst.msk [vmem:[#allocation2 + $0x8] sm:$0xff] %vm29_vm0, %v106_v61 }
 0x148   :  { %v109_v62 = vld [vmem:[#allocation2] sm:$0xff] }
 0x149   :  { %233 = vmatprep.mubr.msk.bf16.mxu0 %vm29_vm0, %v109_v62 }
 0x14c   :  { %v110_v63 = vld [vmem:[#allocation2 + $0x8] sm:$0xff] }
 0x14d   :  { %234 = vmatmul.mubr.msk.bf16.vlgmr.msra.gmra.mrb[0].mxu0 %vm29_vm0, %v110_v63 }
 0x220   :  { %v235_v1 = vpop.f32.mrb[0].mxu0 }
 0x221   :  { %v184_v2 = vadd.f32 %v235_v1, %v220_v0  ;;  %v175_v3 = vpop.f32.mrb[1].mxu0 }
 0x222   :  { %v176_v4 = vadd.f32 %v220_v0, %v175_v3  ;;  %v236_v5 = vpop.f32.mrb[2].mxu0 }
 0x223   :  { %v196_v6 = vmul.f32 0.70710677, %v184_v2  ;;  %v187_v7 = vadd.f32 %v236_v5, %v220_v0  ;;  %v178_v8 = vpop.f32.mrb[3].mxu0  ;;  %v192_v15 = vmul.f32 0.5, %v184_v2 }
 0x224   :  { %v194_v9 = vmul.f32 0.70710677, %v176_v4  ;;  %v179_v10 = vadd.f32 %v220_v0, %v178_v8  ;;  %v190_v18 = vmul.f32 0.5, %v176_v4 }
 0x225   :  { %247 = verf.f32 %v196_v6  ;;  %v197_v11 = vmul.f32 0.70710677, %v187_v7  ;;  %v193_v22 = vmul.f32 0.5, %v187_v7 }
 0x226   :  { %249 = verf.f32 %v194_v9  ;;  %v195_v12 = vmul.f32 0.70710677, %v179_v10  ;;  %v191_v25 = vmul.f32 0.5, %v179_v10 }
 0x227   :  { %251 = verf.f32 %v197_v11 }
 0x228   :  { %253 = verf.f32 %v195_v12 }
 0x22f   :  { %v248_v13 = vpop.eup %247 }
 0x230   :  { %v250_v14 = vpop.eup %249  ;;  %v204_v16 = vadd.f32 1.0, %v248_v13 }
 0x231   :  { %v252_v17 = vpop.eup %251  ;;  %v202_v19 = vadd.f32 1.0, %v250_v14 }
 0x232   :  { %v254_v20 = vpop.eup %253  ;;  %v208_v21 = vmul.f32 %v204_v16, %v192_v15  ;;  %v205_v23 = vadd.f32 1.0, %v252_v17 }
 0x233   :  { %v206_v24 = vmul.f32 %v202_v19, %v190_v18  ;;  %v203_v26 = vadd.f32 1.0, %v254_v20 }
 0x234   :  { %212 = vst [vmem:[%s341_s5 + $0x10] sm:$0xff] %v208_v21  ;;  %v209_v27 = vmul.f32 %v205_v23, %v193_v22 }
 0x235   :  { %210 = vst [vmem:[%s341_s5] sm:$0xff] %v206_v24  ;;  %v207_v28 = vmul.f32 %v203_v26, %v191_v25 }
 0x236   :  { %213 = vst [vmem:[%s341_s5 + $0x18] sm:$0xff] %v209_v27 }
 0x237   :  { %211 = vst [vmem:[%s341_s5 + $0x8] sm:$0xff] %v207_v28 }

// kernel: twins_stage_forward.17
= control target key start
LH: loop header
LB: loop body
LE: loop exit
PB: predicated region body
PF: predicated region fallthrough
CT: control target
= control target key end

     0   :  { %s1646_s9 = smov 0   ;;  %s1929_s0 = inlined_call_operand.vmem [shape: f32[2,16,32], index: 0, kind: input, shape index: {}]   ;;  %s1930_s1 = inlined_call_operand.vmem [shape: f32[2,4,64], index: 1, kind: input, shape index: {}]   ;;  %s1931_s2 = inlined_call_operand.vmem [shape: f32[2,16,32], index: 2, kind: output, shape index: {}]  }
   0x1 LB: > { %s1345_s10 = sadd.s32 4294967295, %s1605_s9   ;;  %p1349_p0 = scmp.ge.s32.totalorder %s1605_s9, 1  ;;  %s1605_s9 = sphi %s1646_s9, %s12_s9  }
   0x2   : > { %p121_p1 = scmp.lt.s32.totalorder %s1605_s9, 3 }
   0x4   : > { %p122_p2 = pnand %p1349_p0, %p121_p1 }
   0x5   : > { %p147_p3 = scmp.lt.s32.totalorder (!%p122_p2), %s1345_s10, 1  ;;  %v1607_v0 = vmov (!%p122_p2), 0.0   ;;  %vm1608_vm0 = vmmov (!%p122_p2), 0   ;;  %vm167_vm1 = vcmask (!%p122_p2), 31744   ;;  %s1609_s19 = smov (!%p122_p2), 96   ;;  %vm240_vm2 = vcmask (!%p122_p2), 1041408  }
   0x6   : > { %125 = sbr.rel (%p122_p2) target bundleno = 1202 (0x4b2), region = 28  ;;  %1407 = vmatprep.subr.bf16.mxu0 (!%p122_p2), %v1607_v0  ;;  %1409 = vmatprep.mubr.msk.bf16.mxu0 (!%p122_p2), %vm1608_vm0, %v1607_v0  ;;  %s1610_s20 = smov (!%p122_p2), 124   ;;  %vm429_vm3 = vcmask (!%p122_p2), 64544   ;;  %vm570_vm4 = vcmask (!%p122_p2), 97344   ;;  %vm711_vm5 = vcmask (!%p122_p2), 130144   ;;  %vm852_vm6 = vcmask (!%p122_p2), 162944  }
   0x7   : > { %1413 = vmatprep.subr.bf16.mxu1 (!%p122_p2), %v1607_v0  ;;  %1415 = vmatprep.mubr.msk.bf16.mxu1 (!%p122_p2), %vm1608_vm0, %v1607_v0  ;;  %s1611_s21 = smov (!%p122_p2), 120   ;;  %s1612_s22 = smov (!%p122_p2), 116   ;;  %vm993_vm7 = vcmask (!%p122_p2), 195744   ;;  %vm1134_vm8 = vcmask (!%p122_p2), 228544   ;;  %vm1275_vm9 = vcmask (!%p122_p2), 261344  }
   0x8   : > { %s1613_s23 = smov (!%p122_p2), 112   ;;  %s1614_s24 = smov (!%p122_p2), 108  }
   0x9   : > { %s1615_s25 = smov (!%p122_p2), 104   ;;  %s1616_s26 = smov (!%p122_p2), 100  }
   0xa   : > { %s1617_s27 = smov (!%p122_p2), 92   ;;  %s1618_s28 = smov (!%p122_p2), 88  }
   0xb   : > { %s1619_s29 = smov (!%p122_p2), 84   ;;  %s1620_s30 = smov (!%p122_p2), 80  }
   0xc   : > { %s1621_s3 = smov (!%p122_p2), 76   ;;  %s1622_s4 = smov (!%p122_p2), 72  }
   0xd   : > { %s1933_s10 = smov (!%p147_p3, %s1345_s10), 1  ;;  %s1623_s5 = smov 68  }
   0xe   : > { %s1373_s11 = sshll.u32 %s1933_s10, 4  ;;  %s1352_s12 = sshll.u32 %s1933_s10, 2 }
   0xf   : > { %s1667_s15 = scalar_lea.vmem %s1930_s1, %s1352_s12  ;;  %s151_s18 = scalar_lea.vmem %s1929_s0, %s1373_s11 }
  0x10   : > { %v165_v1 = vld [vmem:[%s1667_s15] sm:$0xf]  ;;  %v163_v5 = vld [vmem:[%s151_s18 + $0x8] sm:$0xff]  ;;  %s1899_s8 = scalar_lea.vmem %s1931_s2, %s1373_s11  ;;  %s1624_s10 = smov 4  }
  0x11   : > { %v166_v2 = vpack.c.bf16 %v165_v1, %v165_v1  ;;  %v162_v4 = vld [vmem:[%s151_s18] sm:$0xff]  ;;  %s1625_s11 = smov 8   ;;  %s1626_s12 = smov 12  }
  0x12   : > { %v164_v6 = vpack.c.bf16 %v163_v5, %v162_v4  ;;  %v294_v7 = vld [vmem:[%s1667_s15] sm:$0xf]  ;;  %s1627_s13 = smov 16   ;;  %s1628_s14 = smov 20  }
  0x13   : > { %v172_v3 = vsel %vm167_vm1, %v166_v2, 0  ;;  %235 = vrot.lane.b32.xlu1 %v166_v2, %s1609_s19  ;;  %v295_v8 = vpack.c.bf16 %v294_v7, %v294_v7  ;;  %v435_v9 = vld [vmem:[%s1667_s15] sm:$0xf]  ;;  %s1630_s16 = smov 28  }
  0x14   : > { %1408 = vmatpush3.bf16.xpose.msra.mxu0 %v172_v3  ;;  %v436_v10 = vpack.c.bf16 %v435_v9, %v435_v9  ;;  %v576_v11 = vld [vmem:[%s1667_s15] sm:$0xf] }
  0x15   : > { %1425 = vmatprep.subr.bf16.mxu0 %v1607_v0  ;;  %v1684_v12 = vpack.c.bf16 %v576_v11, %v576_v11  ;;  %v717_v13 = vld [vmem:[%s1667_s15] sm:$0xf] }
  0x16   : > { %v1688_v14 = vpack.c.bf16 %v717_v13, %v717_v13  ;;  %v858_v22 = vld [vmem:[%s1667_s15] sm:$0xf] }
  0x17   : > { %300 = vrot.lane.b32.xlu1 %v295_v8, %s1610_s20  ;;  %v1697_v24 = vpack.c.bf16 %v858_v22, %v858_v22  ;;  %v999_v25 = vld [vmem:[%s1667_s15] sm:$0xf] }
  0x18   : > { %v1701_v26 = vpack.c.bf16 %v999_v25, %v999_v25  ;;  %v1140_v27 = vld [vmem:[%s1667_s15] sm:$0xf]  ;;  %s1629_s15 = smov 24  }
  0x19   : > { %v1705_v28 = vpack.c.bf16 %v1140_v27, %v1140_v27 }
  0x1b   : > { %1410 = vmatmul.mubr.msk.bf16.vlgmr.msra.gmra.mrb[0].mxu0 %vm167_vm1, %v164_v6  ;;  %441 = vrot.lane.b32.xlu1 %v436_v10, %s1611_s21 }
  0x1c   : > { %1427 = vmatprep.mubr.msk.bf16.mxu0 %vm1608_vm0, %v1607_v0 }
  0x1f   : > { %438 = vrot.lane.b32.xlu1 %v164_v6, %s1611_s21 }
  0x23   : > { %582 = vrot.lane.b32.xlu1 %v1684_v12, %s1612_s22 }
  0x27   : > { %579 = vrot.lane.b32.xlu1 %v164_v6, %s1612_s22 }
  0x2b   : > { %723 = vrot.lane.b32.xlu1 %v1688_v14, %s1613_s23 }
  0x2f   : > { %720 = vrot.lane.b32.xlu1 %v164_v6, %s1613_s23 }
  0x33   : > { %861 = vrot.lane.b32.xlu1 %v164_v6, %s1614_s24 }
  0x37   : > { %1002 = vrot.lane.b32.xlu1 %v164_v6, %s1615_s25 }
  0x3b   : > { %1143 = vrot.lane.b32.xlu1 %v164_v6, %s1616_s26 }
  0x3f   : > { %368 = vrot.lane.b32.xlu1 %v295_v8, %s1617_s27 }
  0x85   : > { %v236_v21 = vpop.permute.xlu1 %235 }
  0x86   : > { %v242_v23 = vsel %vm240_vm2, %v236_v21, 0 }
  0x87   : > { %1414 = vmatpush3.bf16.msra.mxu1 %v242_v23 }
  0x88   : > { %1419 = vmatprep.subr.bf16.mxu1 %v1607_v0 }
  0x89   : > { %v301_v35 = vpop.permute.xlu1 %300 }
  0x8a   : > { %v306_v39 = vsel %vm167_vm1, %v301_v35, 0 }
  0x8d   : > { %v442_v36 = vpop.permute.xlu1 %441 }
  0x8e   : > { %v447_v43 = vsel %vm167_vm1, %v442_v36, 0 }
  0x91   : > { %v439_v41 = vpop.permute.xlu1 %438 }
  0x95   : > { %v583_v44 = vpop.permute.xlu1 %582 }
  0x96   : > { %v588_v46 = vsel %vm167_vm1, %v583_v44, 0 }
  0x99   : > { %v580_v45 = vpop.permute.xlu1 %579 }
  0x9d   : > { %v724_v47 = vpop.permute.xlu1 %723 }
  0x9e   : > { %v729_v48 = vsel %vm167_vm1, %v724_v47, 0 }
  0xa1   : > { %v721_v50 = vpop.permute.xlu1 %720 }
  0xa5   : > { %v862_v53 = vpop.permute.xlu1 %861 }
  0xa9   : > { %v1003_v56 = vpop.permute.xlu1 %1002 }
  0xad   : > { %v1144_v58 = vpop.permute.xlu1 %1143 }
  0xb1   : > { %v369_v59 = vpop.permute.xlu1 %368 }
  0xb2   : > { %v374_v60 = vsel %vm240_vm2, %v369_v59, 0 }
  0xb3   : > { %1426 = vmatpush3.bf16.msra.mxu0 %v374_v60 }
  0xb4   : > { %1437 = vmatprep.subr.bf16.mxu0 %v1607_v0 }
  0xee   : > { %v208_v15 = vpop.f32.mrb[0].mxu0 }
  0xef   : > { %v1411_v16 = vpop.f32.mrb[1].mxu0  ;;  %v215_v17 = vsel %vm167_vm1, %v208_v15, -inf }
  0xf0   : > { %216 = vmax.xlane.f32.xlu0 %v215_v17  ;;  %v211_v18 = vpop.f32.mrb[2].mxu0 }
  0xf1   : > { %v1412_v19 = vpop.f32.mrb[3].mxu0  ;;  %v218_v20 = vsel %vm167_vm1, %v211_v18, -inf }
  0xf4   : > { %219 = vmax.xlane.f32.xlu0 %v218_v20 }
 0x10a   : > { %297 = vrot.lane.b32.xlu0 %v164_v6, %s1610_s20 }
 0x10e   : > { %864 = vrot.lane.b32.xlu0 %v1697_v24, %s1614_s24 }
 0x112   : > { %1005 = vrot.lane.b32.xlu0 %v1701_v26, %s1615_s25 }
 0x116   : > { %1146 = vrot.lane.b32.xlu0 %v1705_v28, %s1616_s26 }
 0x11a   : > { %509 = vrot.lane.b32.xlu0 %v436_v10, %s1618_s28 }
 0x17d   : > { %v217_v29 = vpop.xlane.xlu0 %216 }
 0x17e   : > { %v221_v30 = vsub.f32 %v208_v15, %v217_v29 }
 0x180   : > { %v223_v31 = vmul.f32 1.442695, %v221_v30 }
 0x181   : > { %v220_v32 = vpop.xlane.xlu0 %219 }
 0x182   : > { %v222_v33 = vsub.f32 %v211_v18, %v220_v32  ;;  %1535 = vpow2.f32 %v223_v31 }
 0x184   : > { %v225_v34 = vmul.f32 1.442695, %v222_v33 }
 0x185   : > { %v298_v42 = vpop.permute.xlu0 %297 }
 0x186   : > { %1537 = vpow2.f32 %v225_v34 }
 0x189   : > { %v865_v49 = vpop.permute.xlu0 %864 }
 0x18a   : > { %v870_v51 = vsel %vm167_vm1, %v865_v49, 0 }
 0x18c   : > { %v1708_v37 = vpop.eup %1535 }
 0x18d   : > { %v1006_v52 = vpop.permute.xlu0 %1005 }
 0x18e   : > { %v1011_v54 = vsel %vm167_vm1, %v1006_v52, 0 }
 0x190   : > { %v1710_v38 = vpop.eup %1537 }
 0x191   : > { %v233_v40 = vpack.c.bf16 %v1710_v38, %v1708_v37  ;;  %v1147_v55 = vpop.permute.xlu0 %1146 }
 0x192   : > { %v1152_v57 = vsel %vm167_vm1, %v1147_v55, 0 }
 0x193   : > { %1416 = vmatmul.mubr.msk.bf16.vlgmr.msra.gmra.mrb[0].mxu1 %vm167_vm1, %v233_v40 }
 0x194   : > { %1420 = vmatpush3.bf16.xpose.msra.mxu1 %v306_v39  ;;  %1421 = vmatprep.mubr.msk.bf16.mxu1 %vm1608_vm0, %v1607_v0 }
 0x195   : > { %1431 = vmatprep.subr.bf16.mxu1 %v1607_v0 }
 0x19b   : > { %1422 = vmatmul.mubr.msk.bf16.vlgmr.msra.gmra.mrb[4].mxu1 %vm167_vm1, %v298_v42 }
 0x19c   : > { %1432 = vmatpush3.bf16.xpose.msra.mxu1 %v447_v43  ;;  %1433 = vmatprep.mubr.msk.bf16.mxu1 %vm1608_vm0, %v1607_v0 }
 0x19d   : > { %1443 = vmatprep.subr.bf16.mxu1 %v1607_v0 }
 0x1a3   : > { %1434 = vmatmul.mubr.msk.bf16.vlgmr.msra.gmra.mrb[8].mxu1 %vm167_vm1, %v439_v41 }
 0x1a4   : > { %1444 = vmatpush3.bf16.xpose.msra.mxu1 %v588_v46  ;;  %1445 = vmatprep.mubr.msk.bf16.mxu1 %vm1608_vm0, %v1607_v0 }
 0x1a5   : > { %1455 = vmatprep.subr.bf16.mxu1 %v1607_v0 }
 0x1ab   : > { %1446 = vmatmul.mubr.msk.bf16.vlgmr.msra.gmra.mrb[12].mxu1 %vm167_vm1, %v580_v45 }
 0x1ac   : > { %1456 = vmatpush3.bf16.xpose.msra.mxu1 %v729_v48  ;;  %1457 = vmatprep.mubr.msk.bf16.mxu1 %vm1608_vm0, %v1607_v0 }
 0x1ad   : > { %1467 = vmatprep.subr.bf16.mxu1 %v1607_v0 }
 0x1b3   : > { %1458 = vmatmul.mubr.msk.bf16.vlgmr.msra.gmra.mrb[16].mxu1 %vm167_vm1, %v721_v50  ;;  %v510_v50 = vpop.permute.xlu0 %509 }
 0x1b4   : > { %1468 = vmatpush3.bf16.xpose.msra.mxu1 %v870_v51  ;;  %1469 = vmatprep.mubr.msk.bf16.mxu1 %vm1608_vm0, %v1607_v0 }
 0x1b5   : > { %1479 = vmatprep.subr.bf16.mxu1 %v1607_v0 }
 0x1bb   : > { %1470 = vmatmul.mubr.msk.bf16.vlgmr.msra.gmra.mrb[20].mxu1 %vm167_vm1, %v862_v53 }
 0x1bc   : > { %1480 = vmatpush3.bf16.xpose.msra.mxu1 %v1011_v54  ;;  %1481 = vmatprep.mubr.msk.bf16.mxu1 %vm1608_vm0, %v1607_v0 }
 0x1bd   : > { %1491 = vmatprep.subr.bf16.mxu1 %v1607_v0 }
 0x1c3   : > { %1482 = vmatmul.mubr.msk.bf16.vlgmr.msra.gmra.mrb[24].mxu1 %vm167_vm1, %v1003_v56 }
 0x1c4   : > { %1492 = vmatpush3.bf16.xpose.msra.mxu1 %v1152_v57  ;;  %1493 = vmatprep.mubr.msk.bf16.mxu1 %vm1608_vm0, %v1607_v0 }
 0x1cb   : > { %1494 = vmatmul.mubr.msk.bf16.vlgmr.msra.gmra.mrb[28].mxu1 %vm167_vm1, %v1144_v58 }
 0x266   : > { %v1751_v61 = vpop.f32.mrb[0].mxu1 }
 0x267   : > { %v1417_v62 = vpop.f32.mrb[1].mxu1 }
 0x268   : > { %v1753_v63 = vpop.f32.mrb[2].mxu1 }
 0x269   : > { %v1418_v1 = vpop.f32.mrb[3].mxu1 }
 0x26e   : > { %v1755_v2 = vpop.f32.mrb[4].mxu1 }
 0x26f   : > { %v1423_v3 = vpop.f32.mrb[5].mxu1  ;;  %v349_v4 = vsel %vm167_vm1, %v1755_v2, -inf }
 0x270   : > { %350 = vmax.xlane.f32.xlu0 %v349_v4  ;;  %v1759_v5 = vpop.f32.mrb[6].mxu1 }
 0x271   : > { %v1424_v6 = vpop.f32.mrb[7].mxu1  ;;  %v352_v7 = vsel %vm167_vm1, %v1759_v5, -inf }
 0x272   : > { %353 = vmax.xlane.f32.xlu1 %v352_v7 }
 0x276   : > { %v1763_v8 = vpop.f32.mrb[8].mxu1 }
 0x277   : > { %v490_v9 = vsel %vm167_vm1, %v1763_v8, -inf  ;;  %v1435_v10 = vpop.f32.mrb[9].mxu1 }
 0x278   : > { %491 = vmax.xlane.f32.xlu0 %v490_v9  ;;  %v1767_v11 = vpop.f32.mrb[10].mxu1 }
 0x279   : > { %v493_v13 = vsel %vm167_vm1, %v1767_v11, -inf  ;;  %v1436_v15 = vpop.f32.mrb[11].mxu1 }
 0x27c   : > { %494 = vmax.xlane.f32.xlu0 %v493_v13 }
 0x27e   : > { %v1771_v16 = vpop.f32.mrb[12].mxu1 }
 0x27f   : > { %v1447_v17 = vpop.f32.mrb[13].mxu1  ;;  %v631_v47 = vsel %vm167_vm1, %v1771_v16, -inf }
 0x280   : > { %v1773_v18 = vpop.f32.mrb[14].mxu1 }
 0x281   : > { %v634_v19 = vsel %vm167_vm1, %v1773_v18, -inf  ;;  %v1448_v20 = vpop.f32.mrb[15].mxu1 }
 0x282   : > { %635 = vmax.xlane.f32.xlu0 %v634_v19 }
 0x283   : > { %650 = vrot.lane.b32.xlu1 %v1684_v12, %s1619_s29 }
 0x286   : > { %v1778_v21 = vpop.f32.mrb[16].mxu1 }
 0x287   : > { %v1459_v22 = vpop.f32.mrb[17].mxu1  ;;  %v772_v48 = vsel %vm167_vm1, %v1778_v21, -inf }
 0x288   : > { %v1780_v23 = vpop.f32.mrb[18].mxu1 }
 0x289   : > { %v775_v25 = vsel %vm167_vm1, %v1780_v23, -inf  ;;  %v1460_v27 = vpop.f32.mrb[19].mxu1 }
 0x28a   : > { %776 = vmax.xlane.f32.xlu0 %v775_v25 }
 0x28e   : > { %v1784_v29 = vpop.f32.mrb[20].mxu1 }
 0x28f   : > { %v913_v30 = vsel %vm167_vm1, %v1784_v29, -inf  ;;  %v1471_v31 = vpop.f32.mrb[21].mxu1 }
 0x290   : > { %914 = vmax.xlane.f32.xlu0 %v913_v30  ;;  %v1788_v32 = vpop.f32.mrb[22].mxu1 }
 0x291   : > { %v916_v12 = vsel %vm167_vm1, %v1788_v32, -inf  ;;  %v1472_v33 = vpop.f32.mrb[23].mxu1 }
 0x294   : > { %917 = vmax.xlane.f32.xlu0 %v916_v12 }
 0x296   : > { %v1792_v34 = vpop.f32.mrb[24].mxu1 }
 0x297   : > { %v1483_v35 = vpop.f32.mrb[25].mxu1  ;;  %v1054_v49 = vsel %vm167_vm1, %v1792_v34, -inf }
 0x298   : > { %v1794_v36 = vpop.f32.mrb[26].mxu1 }
 0x299   : > { %v1057_v39 = vsel %vm167_vm1, %v1794_v36, -inf  ;;  %v1484_v40 = vpop.f32.mrb[27].mxu1 }
 0x29a   : > { %1058 = vmax.xlane.f32.xlu0 %v1057_v39 }
 0x29e   : > { %v1798_v41 = vpop.f32.mrb[28].mxu1 }
 0x29f   : > { %v1195_v42 = vsel %vm167_vm1, %v1798_v41, -inf  ;;  %v1495_v43 = vpop.f32.mrb[29].mxu1 }
 0x2a0   : > { %1196 = vmax.xlane.f32.xlu0 %v1195_v42  ;;  %v1802_v44 = vpop.f32.mrb[30].mxu1 }
 0x2a1   : > { %v1198_v45 = vsel %vm167_vm1, %v1802_v44, -inf  ;;  %v1496_v46 = vpop.f32.mrb[31].mxu1 }
 0x2a4   : > { %1199 = vmax.xlane.f32.xlu0 %v1198_v45 }
 0x2a7   : > { %632 = vmax.xlane.f32.xlu1 %v631_v47 }
 0x2ab   : > { %773 = vmax.xlane.f32.xlu1 %v772_v48 }
 0x2af   : > { %1055 = vmax.xlane.f32.xlu1 %v1054_v49 }
 0x2ba   : > { %791 = vrot.lane.b32.xlu0 %v1688_v14, %s1620_s30 }
 0x2c0   : > { %932 = vrot.lane.b32.xlu1 %v1697_v24, %s1621_s3 }
 0x2c4   : > { %1073 = vrot.lane.b32.xlu1 %v1701_v26, %s1622_s4 }
 0x2c8   : > { %1214 = vrot.lane.b32.xlu1 %v1705_v28, %s1623_s5 }
 0x2fd   : > { %v351_v51 = vpop.xlane.xlu0 %350 }
 0x2fe   : > { %v355_v52 = vsub.f32 %v1755_v2, %v351_v51 }
 0x2ff   : > { %v354_v53 = vpop.xlane.xlu1 %353 }
 0x300   : > { %v357_v54 = vmul.f32 1.442695, %v355_v52  ;;  %v356_v55 = vsub.f32 %v1759_v5, %v354_v53  ;;  %v515_v5 = vsel %vm240_vm2, %v510_v50, 0 }
 0x302   : > { %1539 = vpow2.f32 %v357_v54  ;;  %v359_v56 = vmul.f32 1.442695, %v356_v55 }
 0x304   : > { %1541 = vpow2.f32 %v359_v56 }
 0x305   : > { %v492_v14 = vpop.xlane.xlu0 %491 }
 0x306   : > { %v496_v24 = vsub.f32 %v1763_v8, %v492_v14 }
 0x308   : > { %v498_v57 = vmul.f32 1.442695, %v496_v24 }
 0x309   : > { %v495_v58 = vpop.xlane.xlu0 %494 }
 0x30a   : > { %1543 = vpow2.f32 %v498_v57  ;;  %v497_v26 = vsub.f32 %v1767_v11, %v495_v58  ;;  %v651_v11 = vpop.permute.xlu1 %650 }
 0x30b   : > { %v656_v19 = vsel %vm240_vm2, %v651_v11, 0 }
 0x30c   : > { %v1540_v28 = vpop.eup %1539  ;;  %v500_v59 = vmul.f32 1.442695, %v497_v26 }
 0x30d   : > { %v361_v60 = vsel %vm167_vm1, %v1540_v28, 0.0 }
 0x30e   : > { %v1542_v62 = vpop.eup %1541  ;;  %1545 = vpow2.f32 %v500_v59  ;;  %362 = vadd.xlane.f32.xlu1 %v361_v60 }
 0x30f   : > { %v636_v1 = vpop.xlane.xlu0 %635  ;;  %v364_v2 = vsel %vm167_vm1, %v1542_v62, 0.0  ;;  %v367_v3 = vpack.c.bf16 %v1542_v62, %v1540_v28 }
 0x310   : > { %v638_v4 = vsub.f32 %v1773_v18, %v636_v1  ;;  %365 = vadd.xlane.f32.xlu0 %v364_v2  ;;  %v230_v2 = vsel %vm167_vm1, %v1710_v38, 0.0 }
 0x311   : > { %1428 = vmatmul.mubr.msk.bf16.vlgmr.msra.gmra.mrb[4].mxu0 %vm167_vm1, %v367_v3 }
 0x312   : > { %v641_v6 = vmul.f32 1.442695, %v638_v4  ;;  %1438 = vmatpush3.bf16.msra.mxu0 %v515_v5  ;;  %1439 = vmatprep.mubr.msk.bf16.mxu0 %vm1608_vm0, %v1607_v0 }
 0x313   : > { %1449 = vmatprep.subr.bf16.mxu0 %v1607_v0 }
 0x314   : > { %v1544_v7 = vpop.eup %1543  ;;  %1547 = vpow2.f32 %v641_v6 }
 0x315   : > { %v502_v8 = vsel %vm167_vm1, %v1544_v7, 0.0 }
 0x316   : > { %503 = vadd.xlane.f32.xlu1 %v502_v8 }
 0x317   : > { %v777_v9 = vpop.xlane.xlu0 %776 }
 0x318   : > { %v1546_v10 = vpop.eup %1545  ;;  %v779_v13 = vsub.f32 %v1780_v23, %v777_v9 }
 0x319   : > { %v505_v15 = vsel %vm167_vm1, %v1546_v10, 0.0  ;;  %v508_v17 = vpack.c.bf16 %v1546_v10, %v1544_v7 }
 0x31a   : > { %v782_v18 = vmul.f32 1.442695, %v779_v13  ;;  %506 = vadd.xlane.f32.xlu1 %v505_v15  ;;  %v227_v15 = vsel %vm167_vm1, %v1708_v37, 0.0 }
 0x31b   : > { %1440 = vmatmul.mubr.msk.bf16.vlgmr.msra.gmra.mrb[8].mxu0 %vm167_vm1, %v508_v17 }
 0x31c   : > { %1549 = vpow2.f32 %v782_v18  ;;  %1450 = vmatpush3.bf16.msra.mxu0 %v656_v19  ;;  %1451 = vmatprep.mubr.msk.bf16.mxu0 %vm1608_vm0, %v1607_v0 }
 0x31d   : > { %v915_v20 = vpop.xlane.xlu0 %914  ;;  %1461 = vmatprep.subr.bf16.mxu0 %v1607_v0 }
 0x31e   : > { %v1548_v22 = vpop.eup %1547  ;;  %v919_v23 = vsub.f32 %v1784_v29, %v915_v20 }
 0x31f   : > { %v646_v25 = vsel %vm167_vm1, %v1548_v22, 0.0 }
 0x320   : > { %647 = vadd.xlane.f32.xlu1 %v646_v25  ;;  %v921_v27 = vmul.f32 1.442695, %v919_v23 }
 0x321   : > { %v918_v30 = vpop.xlane.xlu0 %917 }
 0x322   : > { %v920_v31 = vsub.f32 %v1788_v32, %v918_v30  ;;  %1551 = vpow2.f32 %v921_v27 }
 0x324   : > { %v923_v12 = vmul.f32 1.442695, %v920_v31 }
 0x326   : > { %v1839_v33 = vpop.eup %1549  ;;  %1553 = vpow2.f32 %v923_v12 }
 0x327   : > { %v1059_v35 = vpop.xlane.xlu0 %1058  ;;  %v787_v39 = vsel %vm167_vm1, %v1839_v33, 0.0 }
 0x328   : > { %v1061_v40 = vsub.f32 %v1794_v36, %v1059_v35  ;;  %788 = vadd.xlane.f32.xlu1 %v787_v39 }
 0x32a   : > { %v1064_v29 = vmul.f32 1.442695, %v1061_v40 }
 0x32c   : > { %1555 = vpow2.f32 %v1064_v29  ;;  %v1845_v45 = vpop.eup %1551 }
 0x32d   : > { %v1197_v42 = vpop.xlane.xlu0 %1196  ;;  %v925_v38 = vsel %vm167_vm1, %v1845_v45, 0.0 }
 0x32e   : > { %v1201_v43 = vsub.f32 %v1798_v41, %v1197_v42 }
 0x330   : > { %v1847_v32 = vpop.eup %1553  ;;  %v1203_v46 = vmul.f32 1.442695, %v1201_v43 }
 0x331   : > { %v1200_v47 = vpop.xlane.xlu0 %1199  ;;  %v928_v48 = vsel %vm167_vm1, %v1847_v32, 0.0  ;;  %v931_v49 = vpack.c.bf16 %v1847_v32, %v1845_v45 }
 0x332   : > { %v1202_v36 = vsub.f32 %v1802_v44, %v1200_v47  ;;  %929 = vadd.xlane.f32.xlu1 %v928_v48  ;;  %1557 = vpow2.f32 %v1203_v46 }
 0x334   : > { %v1205_v50 = vmul.f32 1.442695, %v1202_v36  ;;  %v633_v51 = vpop.xlane.xlu1 %632 }
 0x335   : > { %v637_v41 = vsub.f32 %v1771_v16, %v633_v51  ;;  %v792_v28 = vpop.permute.xlu0 %791 }
 0x336   : > { %v1556_v52 = vpop.eup %1555  ;;  %1559 = vpow2.f32 %v1205_v50  ;;  %v797_v62 = vsel %vm240_vm2, %v792_v28, 0 }
 0x337   : > { %v639_v53 = vmul.f32 1.442695, %v637_v41  ;;  %v1069_v54 = vsel %vm167_vm1, %v1556_v52, 0.0 }
 0x338   : > { %v774_v55 = vpop.xlane.xlu1 %773  ;;  %1070 = vadd.xlane.f32.xlu1 %v1069_v54 }
 0x339   : > { %1561 = vpow2.f32 %v639_v53  ;;  %v778_v56 = vsub.f32 %v1778_v21, %v774_v55 }
 0x33b   : > { %v780_v14 = vmul.f32 1.442695, %v778_v56 }
 0x33c   : > { %v1056_v24 = vpop.xlane.xlu1 %1055  ;;  %v1558_v57 = vpop.eup %1557 }
 0x33d   : > { %1563 = vpow2.f32 %v780_v14  ;;  %v1060_v44 = vsub.f32 %v1792_v34, %v1056_v24  ;;  %v1207_v13 = vsel %vm167_vm1, %v1558_v57, 0.0 }
 0x33f   : > { %v1062_v58 = vmul.f32 1.442695, %v1060_v44 }
 0x340   : > { %v1560_v26 = vpop.eup %1559  ;;  %v933_v5 = vpop.permute.xlu1 %932 }
 0x341   : > { %1565 = vpow2.f32 %v1062_v58  ;;  %v1210_v16 = vsel %vm167_vm1, %v1560_v26, 0.0  ;;  %v1213_v59 = vpack.c.bf16 %v1560_v26, %v1558_v57  ;;  %v938_v7 = vsel %vm240_vm2, %v933_v5, 0 }
 0x342   : > { %1211 = vadd.xlane.f32.xlu1 %v1210_v16 }
 0x343   : > { %v1562_v60 = vpop.eup %1561 }
 0x344   : > { %v643_v1 = vsel %vm167_vm1, %v1562_v60, 0.0  ;;  %v649_v21 = vpack.c.bf16 %v1548_v22, %v1562_v60  ;;  %v1074_v10 = vpop.permute.xlu1 %1073 }
 0x345   : > { %644 = vadd.xlane.f32.xlu0 %v643_v1  ;;  %v1079_v11 = vsel %vm240_vm2, %v1074_v10, 0 }
 0x346   : > { %1452 = vmatmul.mubr.msk.bf16.vlgmr.msra.gmra.mrb[12].mxu0 %vm167_vm1, %v649_v21  ;;  %231 = vadd.xlane.f32.xlu1 %v230_v2 }
 0x347   : > { %v1564_v34 = vpop.eup %1563  ;;  %1462 = vmatpush3.bf16.msra.mxu0 %v797_v62  ;;  %1463 = vmatprep.mubr.msk.bf16.mxu0 %vm1608_vm0, %v1607_v0 }
 0x348   : > { %v784_v3 = vsel %vm167_vm1, %v1564_v34, 0.0  ;;  %1473 = vmatprep.subr.bf16.mxu0 %v1607_v0  ;;  %v790_v4 = vpack.c.bf16 %v1839_v33, %v1564_v34  ;;  %v1215_v17 = vpop.permute.xlu1 %1214 }
 0x349   : > { %785 = vadd.xlane.f32.xlu0 %v784_v3  ;;  %v1220_v18 = vsel %vm240_vm2, %v1215_v17, 0 }
 0x34b   : > { %v1566_v6 = vpop.eup %1565 }
 0x34c   : > { %v1072_v8 = vpack.c.bf16 %v1556_v52, %v1566_v6  ;;  %v1066_v9 = vsel %vm167_vm1, %v1566_v6, 0.0 }
 0x34d   : > { %926 = vadd.xlane.f32.xlu0 %v925_v38 }
 0x34e   : > { %1464 = vmatmul.mubr.msk.bf16.vlgmr.msra.gmra.mrb[16].mxu0 %vm167_vm1, %v790_v4 }
 0x34f   : > { %1474 = vmatpush3.bf16.msra.mxu0 %v938_v7  ;;  %1475 = vmatprep.mubr.msk.bf16.mxu0 %vm1608_vm0, %v1607_v0 }
 0x350   : > { %1485 = vmatprep.subr.bf16.mxu0 %v1607_v0 }
 0x351   : > { %1067 = vadd.xlane.f32.xlu0 %v1066_v9 }
 0x355   : > { %1208 = vadd.xlane.f32.xlu0 %v1207_v13 }
 0x356   : > { %1476 = vmatmul.mubr.msk.bf16.vlgmr.msra.gmra.mrb[20].mxu0 %vm167_vm1, %v931_v49 }
 0x357   : > { %1486 = vmatpush3.bf16.msra.mxu0 %v1079_v11  ;;  %1487 = vmatprep.mubr.msk.bf16.mxu0 %vm1608_vm0, %v1607_v0 }
 0x358   : > { %1497 = vmatprep.subr.bf16.mxu0 %v1607_v0 }
 0x359   : > { %228 = vadd.xlane.f32.xlu0 %v227_v15 }
 0x35e   : > { %1488 = vmatmul.mubr.msk.bf16.vlgmr.msra.gmra.mrb[24].mxu0 %vm167_vm1, %v1072_v8 }
 0x35f   : > { %1498 = vmatpush3.bf16.msra.mxu0 %v1220_v18  ;;  %1499 = vmatprep.mubr.msk.bf16.mxu0 %vm1608_vm0, %v1607_v0 }
 0x366   : > { %1500 = vmatmul.mubr.msk.bf16.vlgmr.msra.gmra.mrb[28].mxu0 %vm167_vm1, %v1213_v59 }
 0x39b   : > { %v363_v19 = vpop.xlane.xlu1 %362 }
 0x39d   : > { %v366_v30 = vpop.xlane.xlu0 %365 }
 0x3a3   : > { %v504_v20 = vpop.xlane.xlu1 %503 }
 0x3a7   : > { %v507_v22 = vpop.xlane.xlu1 %506 }
 0x3ad   : > { %v648_v23 = vpop.xlane.xlu1 %647 }
 0x3b5   : > { %v789_v37 = vpop.xlane.xlu1 %788 }
 0x3bf   : > { %v930_v25 = vpop.xlane.xlu1 %929 }
 0x3c5   : > { %v1890_v27 = vpop.xlane.xlu1 %1070 }
 0x3cf   : > { %v1892_v31 = vpop.xlane.xlu1 %1211 }
 0x3d2   : > { %v645_v12 = vpop.xlane.xlu0 %644 }
 0x3d3   : > { %v232_v33 = vpop.xlane.xlu1 %231 }
 0x3d4   : > { %1567 = vrcp.f32 %v232_v33 }
 0x3d5   : > { %1569 = vrcp.f32 %v363_v19 }
 0x3d6   : > { %v786_v35 = vpop.xlane.xlu0 %785  ;;  %1571 = vrcp.f32 %v366_v30 }
 0x3d7   : > { %1573 = vrcp.f32 %v504_v20 }
 0x3d8   : > { %1575 = vrcp.f32 %v507_v22 }
 0x3da   : > { %v927_v0 = vpop.xlane.xlu0 %926 }
 0x3de   : > { %v1568_v39 = vpop.eup %1567  ;;  %v1068_v40 = vpop.xlane.xlu0 %1067 }
 0x3df   : > { %v288_v29 = vmul.f32 %v1568_v39, %v1753_v63  ;;  %v1570_v43 = vpop.eup %1569 }
 0x3e0   : > { %v1572_v47 = vpop.eup %1571 }
 0x3e1   : > { %290 = vst.msk [vmem:[%s1899_s8 + $0x8] sm:$0xff] %vm167_vm1, %v288_v29  ;;  %v1574_v63 = vpop.eup %1573 }
 0x3e2   : > { %v1904_v42 = vpop.xlane.xlu0 %1208  ;;  %v1576_v53 = vpop.eup %1575 }
 0x3e4   : > { %v410_v45 = vpop.f32.mrb[4].mxu0 }
 0x3e5   : > { %v419_v32 = vmul.f32 %v1570_v43, %v410_v45  ;;  %v1429_v46 = vpop.f32.mrb[5].mxu0 }
 0x3e6   : > { %v229_v48 = vpop.xlane.xlu0 %228  ;;  %v413_v49 = vpop.f32.mrb[6].mxu0 }
 0x3e7   : > { %1577 = vrcp.f32 %v229_v48  ;;  %v420_v36 = vmul.f32 %v1572_v47, %v413_v49  ;;  %423 = vrot.lane.b32.xlu0 %v419_v32, %s1624_s10  ;;  %v1430_v50 = vpop.f32.mrb[7].mxu0 }
 0x3e8   : > { %1579 = vrcp.f32 %v645_v12 }
 0x3e9   : > { %425 = vrot.lane.b32.xlu1 %v420_v36, %s1624_s10  ;;  %1581 = vrcp.f32 %v648_v23 }
 0x3ea   : > { %1583 = vrcp.f32 %v786_v35 }
 0x3eb   : > { %1585 = vrcp.f32 %v789_v37 }
 0x3ec   : > { %1587 = vrcp.f32 %v927_v0 }
 0x3ed   : > { %1589 = vrcp.f32 %v930_v25 }
 0x3ee   : > { %v551_v51 = vpop.f32.mrb[8].mxu0  ;;  %1591 = vrcp.f32 %v1068_v40 }
 0x3ef   : > { %v560_v41 = vmul.f32 %v1574_v63, %v551_v51  ;;  %v1441_v52 = vpop.f32.mrb[9].mxu0  ;;  %1593 = vrcp.f32 %v1890_v27 }
 0x3f0   : > { %v554_v54 = vpop.f32.mrb[10].mxu0  ;;  %1595 = vrcp.f32 %v1904_v42 }
 0x3f1   : > { %v1578_v55 = vpop.eup %1577  ;;  %v561_v56 = vmul.f32 %v1576_v53, %v554_v54  ;;  %564 = vrot.lane.b32.xlu1 %v560_v41, %s1625_s11  ;;  %v1442_v14 = vpop.f32.mrb[11].mxu0  ;;  %1597 = vrcp.f32 %v1892_v31 }
 0x3f2   : > { %v287_v24 = vmul.f32 %v1578_v55, %v1751_v61  ;;  %v1580_v44 = vpop.eup %1579 }
 0x3f3   : > { %566 = vrot.lane.b32.xlu0 %v561_v56, %s1625_s11  ;;  %v1582_v16 = vpop.eup %1581 }
 0x3f4   : > { %289 = vst.msk [vmem:[%s1899_s8] sm:$0xff] %vm167_vm1, %v287_v24  ;;  %v1584_v61 = vpop.eup %1583 }
 0x3f5   : > { %v1586_v2 = vpop.eup %1585 }
 0x3f6   : > { %v1588_v5 = vpop.eup %1587 }
 0x3f7   : > { %v1590_v8 = vpop.eup %1589 }
 0x3f8   : > { %v1592_v13 = vpop.eup %1591 }
 0x3f9   : > { %v1594_v19 = vpop.eup %1593 }
 0x3fa   : > { %v1596_v37 = vpop.eup %1595 }
 0x3fb   : > { %v1598_v12 = vpop.eup %1597 }
 0x419   : > { %v692_v57 = vpop.f32.mrb[12].mxu0 }
 0x41a   : > { %v701_v58 = vmul.f32 %v1580_v44, %v692_v57  ;;  %v1453_v26 = vpop.f32.mrb[13].mxu0 }
 0x41b   : > { %v695_v28 = vpop.f32.mrb[14].mxu0 }
 0x41c   : > { %v702_v59 = vmul.f32 %v1582_v16, %v695_v28  ;;  %705 = vrot.lane.b32.xlu1 %v701_v58, %s1626_s12  ;;  %v1454_v60 = vpop.f32.mrb[15].mxu0 }
 0x41e   : > { %707 = vrot.lane.b32.xlu0 %v702_v59, %s1626_s12 }
 0x421   : > { %v833_v62 = vpop.f32.mrb[16].mxu0 }
 0x422   : > { %v842_v1 = vmul.f32 %v1584_v61, %v833_v62  ;;  %v1465_v21 = vpop.f32.mrb[17].mxu0 }
 0x423   : > { %v836_v34 = vpop.f32.mrb[18].mxu0 }
 0x424   : > { %v843_v3 = vmul.f32 %v1586_v2, %v836_v34  ;;  %846 = vrot.lane.b32.xlu1 %v842_v1, %s1627_s13  ;;  %v1466_v4 = vpop.f32.mrb[19].mxu0 }
 0x426   : > { %848 = vrot.lane.b32.xlu0 %v843_v3, %s1627_s13 }
 0x429   : > { %v974_v6 = vpop.f32.mrb[20].mxu0 }
 0x42a   : > { %v983_v7 = vmul.f32 %v1588_v5, %v974_v6  ;;  %v1477_v38 = vpop.f32.mrb[21].mxu0 }
 0x42b   : > { %v977_v9 = vpop.f32.mrb[22].mxu0 }
 0x42c   : > { %v984_v10 = vmul.f32 %v1590_v8, %v977_v9  ;;  %987 = vrot.lane.b32.xlu1 %v983_v7, %s1628_s14  ;;  %v1478_v11 = vpop.f32.mrb[23].mxu0 }
 0x42e   : > { %989 = vrot.lane.b32.xlu0 %v984_v10, %s1628_s14 }
 0x431   : > { %v1115_v15 = vpop.f32.mrb[24].mxu0 }
 0x432   : > { %v1124_v17 = vmul.f32 %v1592_v13, %v1115_v15  ;;  %v1489_v18 = vpop.f32.mrb[25].mxu0 }
 0x433   : > { %v1118_v20 = vpop.f32.mrb[26].mxu0 }
 0x434   : > { %v1125_v22 = vmul.f32 %v1594_v19, %v1118_v20  ;;  %1128 = vrot.lane.b32.xlu1 %v1124_v17, %s1629_s15  ;;  %v1490_v23 = vpop.f32.mrb[27].mxu0 }
 0x436   : > { %1130 = vrot.lane.b32.xlu0 %v1125_v22, %s1629_s15 }
 0x439   : > { %v1256_v25 = vpop.f32.mrb[28].mxu0 }
 0x43a   : > { %v1265_v27 = vmul.f32 %v1596_v37, %v1256_v25  ;;  %v1501_v30 = vpop.f32.mrb[29].mxu0 }
 0x43b   : > { %v1259_v31 = vpop.f32.mrb[30].mxu0 }
 0x43c   : > { %v1266_v33 = vmul.f32 %v1598_v12, %v1259_v31  ;;  %1269 = vrot.lane.b32.xlu1 %v1265_v27, %s1630_s16  ;;  %v1502_v35 = vpop.f32.mrb[31].mxu0 }
 0x43e   : > { %1271 = vrot.lane.b32.xlu0 %v1266_v33, %s1630_s16 }
 0x459   : > { %v424_v0 = vpop.permute.xlu0 %423 }
 0x45a   : > { %430 = vst.msk [vmem:[%s1899_s8] sm:$0xff] %vm429_vm3, %v424_v0 }
 0x45b   : > { %v426_v39 = vpop.permute.xlu1 %425 }
 0x45c   : > { %431 = vst.msk [vmem:[%s1899_s8 + $0x8] sm:$0xff] %vm429_vm3, %v426_v39 }
 0x463   : > { %v565_v40 = vpop.permute.xlu1 %564 }
 0x464   : > { %571 = vst.msk [vmem:[%s1899_s8] sm:$0xff] %vm570_vm4, %v565_v40 }
 0x465   : > { %v567_v29 = vpop.permute.xlu0 %566 }
 0x466   : > { %572 = vst.msk [vmem:[%s1899_s8 + $0x8] sm:$0xff] %vm570_vm4, %v567_v29 }
 0x48e   : > { %v706_v42 = vpop.permute.xlu1 %705 }
 0x48f   : > { %712 = vst.msk [vmem:[%s1899_s8] sm:$0xff] %vm711_vm5, %v706_v42 }
 0x490   : > { %v708_v43 = vpop.permute.xlu0 %707 }
 0x491   : > { %713 = vst.msk [vmem:[%s1899_s8 + $0x8] sm:$0xff] %vm711_vm5, %v708_v43 }
 0x496   : > { %v847_v45 = vpop.permute.xlu1 %846 }
 0x497   : > { %853 = vst.msk [vmem:[%s1899_s8] sm:$0xff] %vm852_vm6, %v847_v45 }
 0x498   : > { %v849_v32 = vpop.permute.xlu0 %848 }
 0x499   : > { %854 = vst.msk [vmem:[%s1899_s8 + $0x8] sm:$0xff] %vm852_vm6, %v849_v32 }
 0x49e   : > { %v988_v46 = vpop.permute.xlu1 %987 }
 0x49f   : > { %994 = vst.msk [vmem:[%s1899_s8] sm:$0xff] %vm993_vm7, %v988_v46 }
 0x4a0   : > { %v990_v47 = vpop.permute.xlu0 %989 }
 0x4a1   : > { %995 = vst.msk [vmem:[%s1899_s8 + $0x8] sm:$0xff] %vm993_vm7, %v990_v47 }
 0x4a6   : > { %v1129_v48 = vpop.permute.xlu1 %1128 }
 0x4a7   : > { %1135 = vst.msk [vmem:[%s1899_s8] sm:$0xff] %vm1134_vm8, %v1129_v48 }
 0x4a8   : > { %v1131_v49 = vpop.permute.xlu0 %1130 }
 0x4a9   : > { %1136 = vst.msk [vmem:[%s1899_s8 + $0x8] sm:$0xff] %vm1134_vm8, %v1131_v49 }
 0x4ae   : > { %v1270_v36 = vpop.permute.xlu1 %1269 }
 0x4af   : > { %1276 = vst.msk [vmem:[%s1899_s8] sm:$0xff] %vm1275_vm9, %v1270_v36 }
 0x4b0   : > { %v1272_v50 = vpop.permute.xlu0 %1271 }
 0x4b1   : > { %1277 = vst.msk [vmem:[%s1899_s8 + $0x8] sm:$0xff] %vm1275_vm9, %v1272_v50 }
 0x4b2 PF: > { %s12_s9 = sadd.s32 1, %s1605_s9  }
 0x4b3   : > { %p9_p4 = scmp.ge.s32.totalorder %s12_s9, 4  }
 0x4b5   :  { %11 = sbr.rel (!%p9_p4) target bundleno = 1 (0x1), region = 61 }

// kernel: twins_stage_forward.19
= control target key start
LH: loop header
LB: loop body
LE: loop exit
PB: predicated region body
PF: predicated region fallthrough
CT: control target
= control target key end

     0   :  { %vm22_vm0 = vcmask 261120   ;;  %v241_v1 = vmov 0.0   ;;  %s342_s1 = inlined_call_operand.vmem [shape: bf16[128,32], index: 1, kind: input, shape index: {}]   ;;  %s343_s0 = inlined_call_operand.vmem [shape: f32[32,128], index: 0, kind: input, shape index: {}]   ;;  %s344_s2 = inlined_call_operand.vmem [shape: f32[1,32], index: 2, kind: input, shape index: {}]   ;;  %s345_s3 = inlined_call_operand.vmem [shape: f32[32,32], index: 3, kind: input, shape index: {}]   ;;  %s346_s4 = inlined_call_operand.vmem [shape: f32[32,32], index: 4, kind: output, shape index: {}]  }
   0x1   :  { %v233_v0 = vld [vmem:[%s342_s1] sm:$0xff]   ;;  %25 = vst.msk [vmem:[#allocation2 + $0x10] sm:$0xff] %vm22_vm0, %v241_v1  ;;  %23 = vst.msk [vmem:[#allocation2] sm:$0xff] %vm22_vm0, %v241_v1  ;;  %v234_v2 = vld [vmem:[%s342_s1 + $0x8] sm:$0xff]  }
   0x2   :  { %24 = vst.msk [vmem:[#allocation2 + $0x8] sm:$0xff] %vm22_vm0, %v241_v1  ;;  %26 = vst.msk [vmem:[#allocation2 + $0x18] sm:$0xff] %vm22_vm0, %v241_v1  ;;  %212 = vmatprep.subr.bf16.mxu0 %v233_v0  ;;  %v235_v3 = vld [vmem:[%s342_s1 + $0x10] sm:$0xff]   ;;  %v236_v4 = vld [vmem:[%s342_s1 + $0x18] sm:$0xff]  }
   0x3   :  { %213 = vmatpush3.bf16.msra.mxu0 %v233_v0  ;;  %v31_v5 = vld [vmem:[%s343_s0] sm:$0xff]  ;;  %v32_v6 = vld [vmem:[%s343_s0 + $0x8] sm:$0xff]  ;;  %v239_v10 = vld [vmem:[%s342_s1 + $0x30] sm:$0xff]  }
   0x4   :  { %214 = vmatprep.subr.bf16.mxu0 %v234_v2  ;;  %v35_v7 = vpack.c.bf16 %v32_v6, %v31_v5  ;;  %v237_v8 = vld [vmem:[%s342_s1 + $0x20] sm:$0xff]   ;;  %v238_v9 = vld [vmem:[%s342_s1 + $0x28] sm:$0xff]   ;;  %v240_v11 = vld [vmem:[%s342_s1 + $0x38] sm:$0xff]  }
   0x5   :  { %v33_v12 = vld [vmem:[%s343_s0 + $0x10] sm:$0xff]  ;;  %v34_v13 = vld [vmem:[%s343_s0 + $0x18] sm:$0xff]  ;;  %v201_v27 = vld [vmem:[%s344_s2] ss:$0 sm:$0xff] }
   0x6   :  { %228 = vmatprep.mubr.bf16.mxu0 %v35_v7  ;;  %v36_v14 = vpack.c.bf16 %v34_v13, %v33_v12  ;;  %v179_v29 = vld [vmem:[%s345_s3 + $0x10] sm:$0xff]  ;;  %v177_v32 = vld [vmem:[%s345_s3] sm:$0xff]  ;;  %v180_v35 = vld [vmem:[%s345_s3 + $0x18] sm:$0xff] }
   0x7   :  { %215 = vmatpush3.bf16.msra.mxu0 %v234_v2  ;;  %v178_v39 = vld [vmem:[%s345_s3 + $0x8] sm:$0xff] }
   0x8   :  { %216 = vmatprep.subr.bf16.mxu0 %v235_v3  ;;  %v29_v15 = vld [vmem:[#allocation2 + $0x10] sm:$0xff]  ;;  %v27_v16 = vld [vmem:[#allocation2] sm:$0xff] }
   0x9   :  { %v30_v18 = vld [vmem:[#allocation2 + $0x18] sm:$0xff]  ;;  %v28_v21 = vld [vmem:[#allocation2 + $0x8] sm:$0xff] }
   0xb   :  { %217 = vmatpush3.bf16.msra.mxu0 %v235_v3 }
   0xc   :  { %218 = vmatprep.subr.bf16.mxu0 %v236_v4 }
   0xf   :  { %219 = vmatpush3.bf16.msra.mxu0 %v236_v4 }
  0x10   :  { %220 = vmatprep.subr.bf16.mxu0 %v237_v8 }
  0x13   :  { %221 = vmatpush3.bf16.msra.mxu0 %v237_v8 }
  0x14   :  { %222 = vmatprep.subr.bf16.mxu0 %v238_v9 }
  0x17   :  { %223 = vmatpush3.bf16.msra.mxu0 %v238_v9 }
  0x18   :  { %224 = vmatprep.subr.bf16.mxu0 %v239_v10 }
  0x1b   :  { %225 = vmatpush3.bf16.msra.mxu0 %v239_v10 }
  0x1c   :  { %226 = vmatprep.subr.bf16.mxu0 %v240_v11 }
  0x1f   :  { %227 = vmatpush3.bf16.msra.mxu0 %v240_v11 }
  0x22   :  { %229 = vmatmul.mubr.bf16.vlgmr.msra.gmra.mrb[0].mxu0 %v36_v14 }
  0xf5   :  { %v230_v17 = vpop.f32.mrb[0].mxu0 }
  0xf6   :  { %v152_v19 = vadd.f32 %v230_v17, %v29_v15  ;;  %v135_v20 = vpop.f32.mrb[1].mxu0 }
  0xf7   :  { %v150_v22 = vadd.f32 %v135_v20, %v27_v16  ;;  %v231_v23 = vpop.f32.mrb[2].mxu0 }
  0xf8   :  { %157 = vst.msk [vmem:[#allocation2 + $0x10] sm:$0xff] %vm22_vm0, %v152_v19  ;;  %v153_v24 = vadd.f32 %v231_v23, %v30_v18  ;;  %v138_v25 = vpop.f32.mrb[3].mxu0 }
  0xf9   :  { %155 = vst.msk [vmem:[#allocation2] sm:$0xff] %vm22_vm0, %v150_v22  ;;  %v151_v26 = vadd.f32 %v138_v25, %v28_v21 }
  0xfa   :  { %158 = vst.msk [vmem:[#allocation2 + $0x18] sm:$0xff] %vm22_vm0, %v153_v24 }
  0xfb   :  { %156 = vst.msk [vmem:[#allocation2 + $0x8] sm:$0xff] %vm22_vm0, %v151_v26 }
  0xff   :  { %v164_v28 = vld [vmem:[#allocation2 + $0x10] sm:$0xff] }
 0x100   :  { %v175_v30 = vadd.f32 %v201_v27, %v164_v28  ;;  %v162_v31 = vld [vmem:[#allocation2] sm:$0xff] }
 0x101   :  { %v173_v33 = vadd.f32 %v201_v27, %v162_v31  ;;  %v165_v34 = vld [vmem:[#allocation2 + $0x18] sm:$0xff] }
 0x102   :  { %v183_v36 = vadd.f32 %v179_v29, %v175_v30  ;;  %v176_v37 = vadd.f32 %v201_v27, %v165_v34  ;;  %v163_v38 = vld [vmem:[#allocation2 + $0x8] sm:$0xff] }
 0x103   :  { %v181_v40 = vadd.f32 %v177_v32, %v173_v33  ;;  %v174_v41 = vadd.f32 %v201_v27, %v163_v38 }
 0x104   :  { %187 = vst.msk [vmem:[%s346_s4 + $0x10] sm:$0xff] %vm22_vm0, %v183_v36  ;;  %v184_v42 = vadd.f32 %v180_v35, %v176_v37 }
 0x105   :  { %185 = vst.msk [vmem:[%s346_s4] sm:$0xff] %vm22_vm0, %v181_v40  ;;  %v182_v43 = vadd.f32 %v178_v39, %v174_v41 }
 0x106   :  { %188 = vst.msk [vmem:[%s346_s4 + $0x18] sm:$0xff] %vm22_vm0, %v184_v42 }
 0x107   :  { %186 = vst.msk [vmem:[%s346_s4 + $0x8] sm:$0xff] %vm22_vm0, %v182_v43 }

// kernel: twins_stage_forward.20
= control target key start
LH: loop header
LB: loop body
LE: loop exit
PB: predicated region body
PF: predicated region fallthrough
CT: control target
= control target key end

     0   :  { %vm29_vm0 = vcmask 261120   ;;  %vm190_vm1 = vcmask 785408   ;;  %s309_s0 = inlined_call_operand.vmem [shape: f32[32,32], index: 0, kind: input, shape index: {}]   ;;  %s310_s3 = inlined_call_operand.vmem [shape: bf16[32,96], index: 3, kind: input, shape index: {}]   ;;  %s311_s1 = inlined_call_operand.vmem [shape: f32[1,32], index: 1, kind: input, shape index: {}]   ;;  %s312_s2 = inlined_call_operand.vmem [shape: f32[1,32], index: 2, kind: input, shape index: {}]   ;;  %s313_s4 = inlined_call_operand.vmem [shape: f32[1,96], index: 4, kind: input, shape index: {}]   ;;  %s314_s5 = inlined_call_operand.vmem [shape: f32[32,96], index: 5, kind: output, shape index: {}]  }
   0x1   :  { %v25_v0 = vld [vmem:[%s309_s0] sm:$0xff]  ;;  %v27_v1 = vld [vmem:[%s309_s0 + $0x10] sm:$0xff]  ;;  %v26_v2 = vld [vmem:[%s309_s0 + $0x8] sm:$0xff] }
   0x2   :  { %v30_v3 = vsel %vm29_vm0, %v25_v0, 0.0  ;;  %v36_v4 = vsel %vm29_vm0, %v27_v1, 0.0  ;;  %v28_v5 = vld [vmem:[%s309_s0 + $0x18] sm:$0xff]  ;;  %v33_v6 = vsel %vm29_vm0, %v26_v2, 0.0  ;;  %v218_v28 = vld [vmem:[%s310_s3] sm:$0xff]   ;;  %v219_v29 = vld [vmem:[%s310_s3 + $0x8] sm:$0xff]  }
   0x3   :  { %31 = vadd.xlane.f32.xlu0 %v30_v3  ;;  %37 = vadd.xlane.f32.xlu1 %v36_v4  ;;  %v39_v7 = vsel %vm29_vm0, %v28_v5, 0.0  ;;  %v199_v44 = vld [vmem:[%s311_s1] ss:$0 sm:$0xff] }
   0x4   :  { %210 = vmatprep.subr.bf16.mxu0 %v218_v28  ;;  %v200_v49 = vld [vmem:[%s312_s2] ss:$0 sm:$0xff] }
   0x5   :  { %211 = vmatpush3.bf16.msra.mxu0 %v218_v28 }
   0x6   :  { %212 = vmatprep.subr.bf16.mxu0 %v219_v29 }
   0x7   :  { %34 = vadd.xlane.f32.xlu0 %v33_v6  ;;  %40 = vadd.xlane.f32.xlu1 %v39_v7 }
   0x9   :  { %213 = vmatpush3.bf16.msra.mxu0 %v219_v29 }
  0x90   :  { %v32_v8 = vpop.xlane.xlu0 %31  ;;  %v38_v9 = vpop.xlane.xlu1 %37 }
  0x91   :  { %v43_v10 = vmul.f32 0.03125, %v32_v8  ;;  %v45_v11 = vmul.f32 0.03125, %v38_v9 }
  0x93   :  { %v47_v12 = vsub.f32 %v25_v0, %v43_v10  ;;  %v49_v13 = vsub.f32 %v27_v1, %v45_v11  ;;  %v201_v0 = vld [vmem:[%s313_s4] ss:$0 sm:$0xff] }
  0x94   :  { %v35_v14 = vpop.xlane.xlu0 %34  ;;  %v41_v15 = vpop.xlane.xlu1 %40 }
  0x95   :  { %v44_v16 = vmul.f32 0.03125, %v35_v14  ;;  %v46_v17 = vmul.f32 0.03125, %v41_v15  ;;  %v51_v18 = vmul.f32 %v47_v12, %v47_v12  ;;  %v53_v19 = vmul.f32 %v49_v13, %v49_v13 }
  0x97   :  { %v48_v20 = vsub.f32 %v26_v2, %v44_v16  ;;  %v50_v21 = vsub.f32 %v28_v5, %v46_v17  ;;  %v55_v22 = vsel %vm29_vm0, %v51_v18, 0.0  ;;  %v61_v23 = vsel %vm29_vm0, %v53_v19, 0.0 }
  0x98   :  { %56 = vadd.xlane.f32.xlu0 %v55_v22 }
  0x99   :  { %v52_v24 = vmul.f32 %v48_v20, %v48_v20  ;;  %v54_v25 = vmul.f32 %v50_v21, %v50_v21 }
  0x9b   :  { %v58_v26 = vsel %vm29_vm0, %v52_v24, 0.0  ;;  %v64_v27 = vsel %vm29_vm0, %v54_v25, 0.0 }
  0x9c   :  { %62 = vadd.xlane.f32.xlu0 %v61_v23  ;;  %59 = vadd.xlane.f32.xlu1 %v58_v26 }
  0xa0   :  { %65 = vadd.xlane.f32.xlu1 %v64_v27 }
 0x125   :  { %v57_v30 = vpop.xlane.xlu0 %56 }
 0x126   :  { %v67_v31 = vmul.f32 0.03125, %v57_v30 }
 0x128   :  { %v71_v32 = vadd.f32 1e-05, %v67_v31 }
 0x129   :  { %v60_v33 = vpop.xlane.xlu1 %59  ;;  %v63_v34 = vpop.xlane.xlu0 %62 }
 0x12a   :  { %220 = vrsqrt.f32 %v71_v32  ;;  %v68_v35 = vmul.f32 0.03125, %v60_v33  ;;  %v69_v36 = vmul.f32 0.03125, %v63_v34 }
 0x12c   :  { %v72_v37 = vadd.f32 1e-05, %v68_v35  ;;  %v73_v38 = vadd.f32 1e-05, %v69_v36 }
 0x12d   :  { %v66_v39 = vpop.xlane.xlu1 %65 }
 0x12e   :  { %222 = vrsqrt.f32 %v72_v37  ;;  %v70_v40 = vmul.f32 0.03125, %v66_v39 }
 0x12f   :  { %224 = vrsqrt.f32 %v73_v38 }
 0x130   :  { %v74_v41 = vadd.f32 1e-05, %v70_v40 }
 0x132   :  { %226 = vrsqrt.f32 %v74_v41 }
 0x134   :  { %v221_v42 = vpop.eup %220 }
 0x135   :  { %v79_v43 = vmul.f32 %v221_v42, %v47_v12 }
 0x137   :  { %v90_v47 = vmul.f32 %v199_v44, %v79_v43 }
 0x138   :  { %v223_v45 = vpop.eup %222 }
 0x139   :  { %v225_v46 = vpop.eup %224  ;;  %v80_v48 = vmul.f32 %v223_v45, %v48_v20  ;;  %v101_v53 = vadd.f32 %v200_v49, %v90_v47 }
 0x13a   :  { %v81_v50 = vmul.f32 %v225_v46, %v49_v13 }
 0x13b   :  { %v91_v51 = vmul.f32 %v199_v44, %v80_v48 }
 0x13c   :  { %v227_v52 = vpop.eup %226  ;;  %v92_v55 = vmul.f32 %v199_v44, %v81_v50 }
 0x13d   :  { %v102_v54 = vadd.f32 %v200_v49, %v91_v51  ;;  %v82_v56 = vmul.f32 %v227_v52, %v50_v21 }
 0x13e   :  { %v103_v59 = vadd.f32 %v200_v49, %v92_v55 }
 0x13f   :  { %v105_v57 = vpack.c.bf16 %v102_v54, %v101_v53  ;;  %v93_v58 = vmul.f32 %v199_v44, %v82_v56 }
 0x141   :  { %107 = vst.msk [vmem:[#allocation2] sm:$0xff] %vm29_vm0, %v105_v57  ;;  %v104_v60 = vadd.f32 %v200_v49, %v93_v58 }
 0x143   :  { %v106_v61 = vpack.c.bf16 %v104_v60, %v103_v59 }
 0x145   :  { %108 = vst.msk [vmem:[#allocation2 + $0x8] sm:$0xff] %vm29_vm0, %v106_v61 }
 0x148   :  { %v109_v62 = vld [vmem:[#allocation2] sm:$0xff] }
 0x149   :  { %214 = vmatprep.mubr.msk.bf16.mxu0 %vm29_vm0, %v109_v62 }
 0x14c   :  { %v110_v63 = vld [vmem:[#allocation2 + $0x8] sm:$0xff] }
 0x14d   :  { %215 = vmatmul.mubr.msk.bf16.vlgmr.msra.gmra.mrb[0].mxu0 %vm29_vm0, %v110_v63 }
 0x220   :  { %v216_v1 = vpop.f32.mrb[0].mxu0 }
 0x221   :  { %v184_v2 = vadd.f32 %v216_v1, %v201_v0  ;;  %v175_v3 = vpop.f32.mrb[1].mxu0 }
 0x222   :  { %v176_v4 = vadd.f32 %v201_v0, %v175_v3  ;;  %v217_v5 = vpop.f32.mrb[2].mxu0 }
 0x223   :  { %193 = vst.msk [vmem:[%s314_s5 + $0x10] sm:$0xff] %vm190_vm1, %v184_v2  ;;  %v187_v6 = vadd.f32 %v217_v5, %v201_v0  ;;  %v178_v7 = vpop.f32.mrb[3].mxu0 }
 0x224   :  { %191 = vst.msk [vmem:[%s314_s5] sm:$0xff] %vm190_vm1, %v176_v4  ;;  %v179_v8 = vadd.f32 %v201_v0, %v178_v7 }
 0x225   :  { %194 = vst.msk [vmem:[%s314_s5 + $0x18] sm:$0xff] %vm190_vm1, %v187_v6 }
 0x226   :  { %192 = vst.msk [vmem:[%s314_s5 + $0x8] sm:$0xff] %vm190_vm1, %v179_v8 }

// kernel: twins_stage_forward.23
= control target key start
LH: loop header
LB: loop body
LE: loop exit
PB: predicated region body
PF: predicated region fallthrough
CT: control target
= control target key end

     0   :  { %vm23_vm0 = vcmask 261120   ;;  %v281_v2 = vmov 0.0   ;;  %s385_s0 = inlined_call_operand.vmem [shape: f32[32,128], index: 0, kind: input, shape index: {}]   ;;  %s386_s1 = inlined_call_operand.vmem [shape: bf16[128,32], index: 1, kind: input, shape index: {}]   ;;  %s387_s2 = inlined_call_operand.vmem [shape: f32[1,32], index: 2, kind: input, shape index: {}]   ;;  %s388_s3 = inlined_call_operand.vmem [shape: f32[32,32], index: 3, kind: input, shape index: {}]   ;;  %s389_s4 = inlined_call_operand.hbm [shape: f32[32,32], index: 4, kind: output, shape index: {}]  }
   0x1   :  { %v249_v0 = vld [vmem:[%s386_s1] sm:$0xff]   ;;  %v250_v1 = vld [vmem:[%s386_s1 + $0x8] sm:$0xff]   ;;  %26 = vst.msk [vmem:[#allocation2 + $0x10] sm:$0xff] %vm23_vm0, %v281_v2  ;;  %24 = vst.msk [vmem:[#allocation2] sm:$0xff] %vm23_vm0, %v281_v2 }
   0x2   :  { %225 = vmatprep.subr.bf16.mxu0 %v249_v0  ;;  %25 = vst.msk [vmem:[#allocation2 + $0x8] sm:$0xff] %vm23_vm0, %v281_v2  ;;  %27 = vst.msk [vmem:[#allocation2 + $0x18] sm:$0xff] %vm23_vm0, %v281_v2  ;;  %v251_v3 = vld [vmem:[%s386_s1 + $0x10] sm:$0xff]   ;;  %v252_v4 = vld [vmem:[%s386_s1 + $0x18] sm:$0xff]  }
   0x3   :  { %226 = vmatpush3.bf16.msra.mxu0 %v249_v0  ;;  %v32_v5 = vld [vmem:[%s385_s0] sm:$0xff]  ;;  %v33_v6 = vld [vmem:[%s385_s0 + $0x8] sm:$0xff] }
   0x4   :  { %227 = vmatprep.subr.bf16.mxu0 %v250_v1  ;;  %v36_v7 = vpack.c.bf16 %v33_v6, %v32_v5 }
   0x7   :  { %228 = vmatpush3.bf16.msra.mxu0 %v250_v1 }
   0x8   :  { %229 = vmatprep.subr.bf16.mxu0 %v251_v3 }
   0x9   :  { %9 = vsyncpa [#allocation4], 0  ;;  %241 = vmatprep.mubr.bf16.mxu0 %v36_v7  ;;  %v253_v8 = vld [vmem:[%s386_s1 + $0x20] sm:$0xff]   ;;  %v254_v9 = vld [vmem:[%s386_s1 + $0x28] sm:$0xff]   ;;  %s282_s19 = smov [#allocation3]  }
   0xa   :  { %v255_v10 = vld [vmem:[%s386_s1 + $0x30] sm:$0xff]   ;;  %v256_v11 = vld [vmem:[%s386_s1 + $0x38] sm:$0xff]   ;;  %v28_v16 = vld [vmem:[#allocation2] sm:$0xff]  ;;  %s195_s20 = sshll.u32 %s282_s19, 4  ;;  %s196_s20 = int_to_ptr.vmem [resolvable:$true] %s195_s20 }
   0xb   :  { %230 = vmatpush3.bf16.msra.mxu0 %v251_v3  ;;  %v34_v12 = vld [vmem:[%s385_s0 + $0x10] sm:$0xff]  ;;  %v35_v13 = vld [vmem:[%s385_s0 + $0x18] sm:$0xff]  ;;  %v29_v21 = vld [vmem:[#allocation2 + $0x8] sm:$0xff]  ;;  %s257_s22 = scalar_lea.vmem %s196_s20, 512  ;;  %p262_p1 = scmp.lt.s32.totalorder %s196_s20, %s196_s20 }
   0xc   :  { %231 = vmatprep.subr.bf16.mxu0 %v252_v4  ;;  %v37_v14 = vpack.c.bf16 %v35_v13, %v34_v12  ;;  %v30_v15 = vld [vmem:[#allocation2 + $0x10] sm:$0xff]  ;;  %v31_v18 = vld [vmem:[#allocation2 + $0x18] sm:$0xff]  ;;  %v214_v27 = vld [vmem:[%s387_s2] ss:$0 sm:$0xff]  ;;  %p258_p0 = scmp.ne.s32.totalorder %s196_s20, %s257_s22  ;;  %p263_p2 = scmp.lt.s32.totalorder %s257_s22, %s257_s22 }
   0xd   :  { %v180_v29 = vld [vmem:[%s388_s3 + $0x10] sm:$0xff]  ;;  %v178_v32 = vld [vmem:[%s388_s3] sm:$0xff]  ;;  %v181_v35 = vld [vmem:[%s388_s3 + $0x18] sm:$0xff] }
   0xe   :  { %v179_v38 = vld [vmem:[%s388_s3 + $0x8] sm:$0xff]  ;;  %p264_p3 = por %p263_p2, %p262_p1 }
   0xf   :  { %232 = vmatpush3.bf16.msra.mxu0 %v252_v4 }
  0x10   :  { %233 = vmatprep.subr.bf16.mxu0 %v253_v8  ;;  %p265_p4 = pnand %p264_p3, %p258_p0 }
  0x13   :  { %234 = vmatpush3.bf16.msra.mxu0 %v253_v8 }
  0x14   :  { %235 = vmatprep.subr.bf16.mxu0 %v254_v9 }
  0x17   :  { %236 = vmatpush3.bf16.msra.mxu0 %v254_v9 }
  0x18   :  { %237 = vmatprep.subr.bf16.mxu0 %v255_v10 }
  0x1b   :  { %238 = vmatpush3.bf16.msra.mxu0 %v255_v10 }
  0x1c   :  { %239 = vmatprep.subr.bf16.mxu0 %v256_v11 }
  0x1f   :  { %240 = vmatpush3.bf16.msra.mxu0 %v256_v11 }
  0x22   :  { %242 = vmatmul.mubr.bf16.vlgmr.msra.gmra.mrb[0].mxu0 %v37_v14 }
  0xf5   :  { %v243_v17 = vpop.f32.mrb[0].mxu0 }
  0xf6   :  { %v153_v19 = vadd.f32 %v243_v17, %v30_v15  ;;  %v136_v20 = vpop.f32.mrb[1].mxu0 }
  0xf7   :  { %v151_v22 = vadd.f32 %v136_v20, %v28_v16  ;;  %v244_v23 = vpop.f32.mrb[2].mxu0 }
  0xf8   :  { %158 = vst.msk [vmem:[#allocation2 + $0x10] sm:$0xff] %vm23_vm0, %v153_v19  ;;  %v154_v24 = vadd.f32 %v244_v23, %v31_v18  ;;  %v139_v25 = vpop.f32.mrb[3].mxu0 }
  0xf9   :  { %156 = vst.msk [vmem:[#allocation2] sm:$0xff] %vm23_vm0, %v151_v22  ;;  %v152_v26 = vadd.f32 %v139_v25, %v29_v21 }
  0xfa   :  { %159 = vst.msk [vmem:[#allocation2 + $0x18] sm:$0xff] %vm23_vm0, %v154_v24 }
  0xfb   :  { %157 = vst.msk [vmem:[#allocation2 + $0x8] sm:$0xff] %vm23_vm0, %v152_v26 }
  0xff   :  { %v165_v28 = vld [vmem:[#allocation2 + $0x10] sm:$0xff] }
 0x100   :  { %v163_v30 = vld [vmem:[#allocation2] sm:$0xff]  ;;  %v176_v31 = vadd.f32 %v214_v27, %v165_v28 }
 0x101   :  { %v166_v33 = vld [vmem:[#allocation2 + $0x18] sm:$0xff]  ;;  %v174_v34 = vadd.f32 %v214_v27, %v163_v30 }
 0x102   :  { %v164_v36 = vld [vmem:[#allocation2 + $0x8] sm:$0xff]  ;;  %v177_v37 = vadd.f32 %v214_v27, %v166_v33  ;;  %v184_v39 = vadd.f32 %v180_v29, %v176_v31 }
 0x103   :  { %v175_v40 = vadd.f32 %v214_v27, %v164_v36  ;;  %v182_v41 = vadd.f32 %v178_v32, %v174_v34 }
 0x104   :  { %v185_v42 = vadd.f32 %v181_v35, %v177_v37  ;;  %188 = vst.msk [vmem:[#allocation3 + $0x10] sm:$0xff] %vm23_vm0, %v184_v39 }
 0x105   :  { %v183_v43 = vadd.f32 %v179_v38, %v175_v40  ;;  %186 = vst.msk [vmem:[#allocation3] sm:$0xff] %vm23_vm0, %v182_v41 }
 0x106   :  { %189 = vst.msk [vmem:[#allocation3 + $0x18] sm:$0xff] %vm23_vm0, %v185_v42 }
 0x107   :  { %187 = vst.msk [vmem:[#allocation3 + $0x8] sm:$0xff] %vm23_vm0, %v183_v43 }
 0x108   :  { %268 = shalt.err (!%p265_p4)
}
 0x109   :  { %s269_s24 = scalar_lea.hbm %s389_s4, 512 }
 0x10a   :  { %p270_p5 = scmp.ne.s32.totalorder %s389_s4, %s269_s24  ;;  %p273_p6 = scmp.lt.u32.totalorder %s269_s24, %s389_s4 }
 0x10c   :  { %p275_p7 = pnand %p273_p6, %p270_p5 }
 0x10e   :  { %278 = shalt.err (!%p275_p7)
}
 0x10f   :  { %s283_s29 = smov 128   ;;  %s284_s30 = smov 8  }
 0x110   :  { %201 = dma.vmem_to_hbm [thread:$0]  %s196_s20, 512, %s389_s4, [#allocation4], %s283_s29, %s283_s29, %s284_s30  }
 0x111   :  { %279 = dma.done.wait [#allocation4], 512  }
 0x112   :  { %280 = vsyncadd [#allocation4], 4294966784 }
 0x113   :  { %205 = vsyncpa [#allocation4], 1 }

// kernel: twins_stage_forward.21
= control target key start
LH: loop header
LB: loop body
LE: loop exit
PB: predicated region body
PF: predicated region fallthrough
CT: control target
= control target key end

     0   :  { %s4744_s6 = smov 0   ;;  %s5581_s0 = inlined_call_operand.vmem [shape: f32[8,4,96], index: 0, kind: input, shape index: {}]   ;;  %s5582_s1 = inlined_call_operand.vmem [shape: f32[8,4,32], index: 1, kind: output, shape index: {}]  }
   0x1 LB: > { %s3939_s7 = sadd.s32 4294967295, %s4700_s6   ;;  %p3943_p0 = scmp.ge.s32.totalorder %s4700_s6, 1  ;;  %s4700_s6 = sphi %s4744_s6, %s11_s6  }
   0x2   : > { %p88_p1 = scmp.lt.s32.totalorder %s4700_s6, 3 }
   0x4   : > { %p89_p2 = pnand %p3943_p0, %p88_p1 }
   0x6   : > { %92 = sbr.rel (%p89_p2) target bundleno = 3582 (0xdfe), region = 24 }
   0xd   : > { %s3944_s8 = sshll.u32 %s3939_s7, 2  ;;  %v5583_v0 = vmov 0.0   ;;  %vm4703_vm0 = vmmov 0   ;;  %s4704_s13 = smov 96   ;;  %vm132_vm1 = vcmask 31744   ;;  %vm372_vm2 = vcmask 1041408  }
   0xe   : > { %p109_p3 = scmp.lt.s32.totalorder %s3944_s8, 7  ;;  %4142 = vmatprep.subr.bf16.mxu0 %v5583_v0  ;;  %4148 = vmatprep.subr.bf16.mxu1 %v5583_v0  ;;  %s4705_s14 = smov 64   ;;  %vm326_vm3 = vcmask 27648   ;;  %vm1040_vm4 = vcmask 60448   ;;  %vm1513_vm5 = vcmask 93248   ;;  %vm1986_vm6 = vcmask 126048  }
   0xf   : > { %4144 = vmatprep.mubr.msk.bf16.mxu0 %vm4703_vm0, %v5583_v0  ;;  %4150 = vmatprep.mubr.msk.bf16.mxu1 %vm4703_vm0, %v5583_v0  ;;  %s4706_s15 = smov 92   ;;  %s4707_s16 = smov 124   ;;  %vm2459_vm7 = vcmask 158848   ;;  %vm2932_vm8 = vcmask 191648   ;;  %vm3405_vm9 = vcmask 224448   ;;  %vm3878_vm10 = vcmask 257248  }
  0x10   : > { %s5607_s8 = smov (!%p109_p3, %s3944_s8), 7  ;;  %s4708_s17 = smov 60  }
  0x11   : > { %s3945_s9 = sshll.u32 %s5607_s8, 2  ;;  %s4709_s18 = smov 88  }
  0x12   : > { %s4766_s12 = scalar_lea.vmem %s5581_s0, %s3945_s9  ;;  %s4710_s19 = smov 120  }
  0x13   : > { %v121_v1 = vld [vmem:[%s4766_s12] sm:$0xf]  ;;  %v122_v2 = vld [vmem:[%s4766_s12 + $0x4] sm:$0xf]  ;;  %v123_v3 = vld [vmem:[%s4766_s12 + $0x8] sm:$0xf] }
  0x14   : > { %v125_v4 = vpack.c.bf16 %v121_v1, %v121_v1  ;;  %v127_v5 = vpack.c.bf16 %v123_v3, %v123_v3  ;;  %v124_v6 = vld [vmem:[%s4766_s12 + $0xc] sm:$0xf]  ;;  %v126_v7 = vpack.c.bf16 %v122_v2, %v122_v2  ;;  %v573_v41 = vld [vmem:[%s4766_s12 + $0x4] sm:$0xf]  ;;  %v574_v43 = vld [vmem:[%s4766_s12 + $0x8] sm:$0xf] }
  0x15   : > { %v4772_v8 = vpack.c.bf16 %v124_v6, %v124_v6  ;;  %v577_v42 = vpack.c.bf16 %v573_v41, %v573_v41  ;;  %v578_v44 = vpack.c.bf16 %v574_v43, %v574_v43  ;;  %v575_v45 = vld [vmem:[%s4766_s12 + $0xc] sm:$0xf]  ;;  %v572_v46 = vld [vmem:[%s4766_s12] sm:$0xf]  ;;  %s4711_s20 = smov 56   ;;  %s4712_s21 = smov 84  }
  0x16   : > { %130 = vrot.lane.b32.xlu0 %v125_v4, %s4704_s13  ;;  %229 = vrot.lane.b32.xlu1 %v127_v5, %s4704_s13  ;;  %v4813_v47 = vpack.c.bf16 %v575_v45, %v575_v45  ;;  %v576_v48 = vpack.c.bf16 %v572_v46, %v572_v46  ;;  %s4713_s22 = smov 116   ;;  %s4714_s23 = smov 52  }
  0x17   : > { %s4715_s24 = smov 80   ;;  %s4716_s25 = smov 112  }
  0x18   : > { %s4717_s26 = smov 48   ;;  %s4718_s27 = smov 76  }
  0x19   : > { %s4719_s28 = smov 108   ;;  %s4720_s29 = smov 44  }
  0x1a   : > { %180 = vrot.lane.b32.xlu0 %v126_v7, %s4704_s13  ;;  %278 = vrot.lane.b32.xlu1 %v4772_v8, %s4704_s13  ;;  %s4721_s30 = smov 72   ;;  %s4722_s2 = smov 104  }
  0x1b   : > { %s4723_s3 = smov 40   ;;  %s4724_s4 = smov 68  }
  0x1c   : > { %s4725_s5 = smov 100   ;;  %s4726_s7 = smov 36  }
  0x1d   : > { %s4727_s10 = smov 4   ;;  %s4728_s11 = smov 8  }
  0x1e   : > { %367 = vrot.lane.b32.xlu1 %v125_v4, %s4705_s14  ;;  %416 = vrot.lane.b32.xlu0 %v126_v7, %s4705_s14  ;;  %s4730_s13 = smov 16   ;;  %s4733_s8 = smov 28  }
  0x22   : > { %464 = vrot.lane.b32.xlu1 %v127_v5, %s4705_s14 }
  0x88   : > { %v131_v9 = vpop.permute.xlu0 %130  ;;  %v230_v11 = vpop.permute.xlu1 %229 }
  0x89   : > { %v137_v10 = vsel %vm132_vm1, %v131_v9, 0  ;;  %v235_v14 = vsel %vm132_vm1, %v230_v11, 0 }
  0x8a   : > { %4143 = vmatpush3.bf16.xpose.msra.mxu0 %v137_v10 }
  0x8b   : > { %4154 = vmatprep.subr.bf16.mxu0 %v5583_v0 }
  0x8c   : > { %v181_v12 = vpop.permute.xlu0 %180  ;;  %v279_v15 = vpop.permute.xlu1 %278 }
  0x8d   : > { %v186_v13 = vsel %vm132_vm1, %v181_v12, 0  ;;  %v284_v16 = vsel %vm132_vm1, %v279_v15, 0 }
  0x8e   : > { %4149 = vmatpush3.bf16.xpose.msra.mxu1 %v186_v13 }
  0x8f   : > { %4160 = vmatprep.subr.bf16.mxu1 %v5583_v0 }
  0x90   : > { %v368_v17 = vpop.permute.xlu1 %367  ;;  %v417_v18 = vpop.permute.xlu0 %416 }
  0x91   : > { %4145 = vmatmul.mubr.msk.bf16.vlgmr.msra.gmra.mrb[0].mxu0 %vm132_vm1, %v125_v4  ;;  %v374_v19 = vsel %vm372_vm2, %v368_v17, 0  ;;  %v422_v20 = vsel %vm372_vm2, %v417_v18, 0 }
  0x92   : > { %4155 = vmatpush3.bf16.xpose.msra.mxu0 %v235_v14  ;;  %4156 = vmatprep.mubr.msk.bf16.mxu0 %vm4703_vm0, %v5583_v0 }
  0x93   : > { %4166 = vmatprep.subr.bf16.mxu0 %v5583_v0 }
  0x94   : > { %v465_v49 = vpop.permute.xlu1 %464 }
  0x95   : > { %4151 = vmatmul.mubr.msk.bf16.vlgmr.msra.gmra.mrb[0].mxu1 %vm132_vm1, %v126_v7  ;;  %v470_v2 = vsel %vm372_vm2, %v465_v49, 0 }
  0x96   : > { %4161 = vmatpush3.bf16.xpose.msra.mxu1 %v284_v16  ;;  %4162 = vmatprep.mubr.msk.bf16.mxu1 %vm4703_vm0, %v5583_v0 }
  0x97   : > { %4172 = vmatprep.subr.bf16.mxu1 %v5583_v0 }
  0x99   : > { %4157 = vmatmul.mubr.msk.bf16.vlgmr.msra.gmra.mrb[4].mxu0 %vm132_vm1, %v127_v5 }
  0x9a   : > { %4168 = vmatprep.mubr.msk.bf16.mxu0 %vm4703_vm0, %v5583_v0  ;;  %4167 = vmatpush3.bf16.msra.mxu0 %v374_v19 }
  0x9b   : > { %4178 = vmatprep.subr.bf16.mxu0 %v5583_v0 }
  0x9d   : > { %4163 = vmatmul.mubr.msk.bf16.vlgmr.msra.gmra.mrb[4].mxu1 %vm132_vm1, %v4772_v8 }
  0x9e   : > { %4174 = vmatprep.mubr.msk.bf16.mxu1 %vm4703_vm0, %v5583_v0  ;;  %4173 = vmatpush3.bf16.msra.mxu1 %v422_v20 }
  0x9f   : > { %4184 = vmatprep.subr.bf16.mxu1 %v5583_v0 }
 0x164   : > { %v173_v21 = vpop.f32.mrb[0].mxu0 }
 0x165   : > { %v4146_v22 = vpop.f32.mrb[1].mxu0  ;;  %v327_v23 = vsel %vm326_vm3, %v173_v21, -inf }
 0x166   : > { %328 = vmax.xlane.f32.xlu0 %v327_v23  ;;  %v176_v24 = vpop.f32.mrb[2].mxu0 }
 0x167   : > { %v4147_v25 = vpop.f32.mrb[3].mxu0 }
 0x168   : > { %v222_v26 = vpop.f32.mrb[0].mxu1 }
 0x169   : > { %v4152_v27 = vpop.f32.mrb[1].mxu1  ;;  %v330_v28 = vsel %vm326_vm3, %v222_v26, -inf }
 0x16a   : > { %331 = vmax.xlane.f32.xlu1 %v330_v28  ;;  %v225_v29 = vpop.f32.mrb[2].mxu1 }
 0x16b   : > { %v4153_v30 = vpop.f32.mrb[3].mxu1 }
 0x16c   : > { %v271_v31 = vpop.f32.mrb[4].mxu0 }
 0x16d   : > { %v4158_v32 = vpop.f32.mrb[5].mxu0  ;;  %v333_v33 = vsel %vm326_vm3, %v271_v31, -inf }
 0x16e   : > { %334 = vmax.xlane.f32.xlu0 %v333_v33  ;;  %v274_v34 = vpop.f32.mrb[6].mxu0 }
 0x16f   : > { %v4159_v35 = vpop.f32.mrb[7].mxu0 }
 0x170   : > { %v320_v36 = vpop.f32.mrb[4].mxu1 }
 0x171   : > { %v4164_v37 = vpop.f32.mrb[5].mxu1  ;;  %v336_v38 = vsel %vm326_vm3, %v320_v36, -inf }
 0x172   : > { %337 = vmax.xlane.f32.xlu0 %v336_v38  ;;  %v323_v39 = vpop.f32.mrb[6].mxu1 }
 0x173   : > { %v4165_v40 = vpop.f32.mrb[7].mxu1 }
 0x17b   : > { %512 = vrot.lane.b32.xlu1 %v4772_v8, %s4705_s14  ;;  %s4731_s14 = smov 20  }
 0x17f   : > { %634 = vrot.lane.b32.xlu1 %v577_v42, %s4706_s15 }
 0x183   : > { %685 = vrot.lane.b32.xlu1 %v578_v44, %s4706_s15 }
 0x187   : > { %736 = vrot.lane.b32.xlu1 %v4813_v47, %s4706_s15 }
 0x188   : > { %583 = vrot.lane.b32.xlu0 %v576_v48, %s4706_s15  ;;  %s4732_s15 = smov 24  }
 0x18b   : > { %734 = vrot.lane.b32.xlu1 %v4813_v47, %s4707_s16 }
 0x18c   : > { %581 = vrot.lane.b32.xlu0 %v576_v48, %s4707_s16 }
 0x18f   : > { %824 = vrot.lane.b32.xlu1 %v576_v48, %s4708_s17 }
 0x190   : > { %632 = vrot.lane.b32.xlu0 %v577_v42, %s4707_s16 }
 0x193   : > { %920 = vrot.lane.b32.xlu1 %v578_v44, %s4708_s17 }
 0x194   : > { %683 = vrot.lane.b32.xlu0 %v578_v44, %s4707_s16 }
 0x198   : > { %872 = vrot.lane.b32.xlu0 %v577_v42, %s4708_s17 }
 0x1f3   : > { %v329_v50 = vpop.xlane.xlu0 %328 }
 0x1f4   : > { %v339_v51 = vsub.f32 %v173_v21, %v329_v50 }
 0x1f6   : > { %v343_v52 = vmul.f32 1.442695, %v339_v51 }
 0x1f7   : > { %v332_v53 = vpop.xlane.xlu1 %331 }
 0x1f8   : > { %4566 = vpow2.f32 %v343_v52  ;;  %v340_v54 = vsub.f32 %v222_v26, %v332_v53 }
 0x1fa   : > { %v345_v55 = vmul.f32 1.442695, %v340_v54 }
 0x1fb   : > { %v335_v56 = vpop.xlane.xlu0 %334  ;;  %v513_v1 = vpop.permute.xlu1 %512 }
 0x1fc   : > { %4568 = vpow2.f32 %v345_v55  ;;  %v341_v57 = vsub.f32 %v271_v31, %v335_v56  ;;  %v518_v4 = vsel %vm372_vm2, %v513_v1, 0  ;;  %v1046_v1 = vld [vmem:[%s4766_s12 + $0x4] sm:$0xf] }
 0x1fe   : > { %v347_v58 = vmul.f32 1.442695, %v341_v57 }
 0x1ff   : > { %v338_v59 = vpop.xlane.xlu0 %337  ;;  %v635_v7 = vpop.permute.xlu1 %634 }
 0x200   : > { %4570 = vpow2.f32 %v347_v58  ;;  %v342_v60 = vsub.f32 %v320_v36, %v338_v59  ;;  %v640_v15 = vsel %vm132_vm1, %v635_v7, 0  ;;  %v1045_v7 = vld [vmem:[%s4766_s12] sm:$0xf] }
 0x202   : > { %v4820_v61 = vpop.eup %4566  ;;  %v349_v62 = vmul.f32 1.442695, %v342_v60 }
 0x203   : > { %v363_v63 = vpack.c.bf16 %v4820_v61, %v4820_v61  ;;  %v584_v6 = vpop.permute.xlu0 %583  ;;  %v686_v13 = vpop.permute.xlu1 %685 }
 0x204   : > { %4572 = vpow2.f32 %v349_v62  ;;  %v589_v10 = vsel %vm132_vm1, %v584_v6, 0  ;;  %v691_v16 = vsel %vm132_vm1, %v686_v13, 0  ;;  %v1048_v6 = vld [vmem:[%s4766_s12 + $0xc] sm:$0xf] }
 0x205   : > { %4169 = vmatmul.mubr.msk.bf16.vlgmr.msra.gmra.mrb[8].mxu0 %vm132_vm1, %v363_v63 }
 0x206   : > { %v4826_v3 = vpop.eup %4568  ;;  %4179 = vmatpush3.bf16.msra.mxu0 %v470_v2  ;;  %4180 = vmatprep.mubr.msk.bf16.mxu0 %vm4703_vm0, %v5583_v0  ;;  %v1050_v2 = vpack.c.bf16 %v1046_v1, %v1046_v1 }
 0x207   : > { %v364_v5 = vpack.c.bf16 %v4826_v3, %v4826_v3  ;;  %4190 = vmatprep.subr.bf16.mxu0 %v5583_v0  ;;  %v582_v14 = vpop.permute.xlu0 %581  ;;  %v737_v17 = vpop.permute.xlu1 %736 }
 0x208   : > { %v742_v19 = vsel %vm132_vm1, %v737_v17, 0 }
 0x209   : > { %4175 = vmatmul.mubr.msk.bf16.vlgmr.msra.gmra.mrb[8].mxu1 %vm132_vm1, %v364_v5 }
 0x20a   : > { %v4835_v8 = vpop.eup %4570  ;;  %4185 = vmatpush3.bf16.msra.mxu1 %v518_v4  ;;  %4186 = vmatprep.mubr.msk.bf16.mxu1 %vm4703_vm0, %v5583_v0  ;;  %v1047_v4 = vld [vmem:[%s4766_s12 + $0x8] sm:$0xf] }
 0x20b   : > { %v365_v9 = vpack.c.bf16 %v4835_v8, %v4835_v8  ;;  %4196 = vmatprep.subr.bf16.mxu1 %v5583_v0  ;;  %v633_v18 = vpop.permute.xlu0 %632  ;;  %v735_v21 = vpop.permute.xlu1 %734  ;;  %v1051_v5 = vpack.c.bf16 %v1047_v4, %v1047_v4 }
 0x20d   : > { %4181 = vmatmul.mubr.msk.bf16.vlgmr.msra.gmra.mrb[12].mxu0 %vm132_vm1, %v365_v9  ;;  %v4894_v9 = vpack.c.bf16 %v1048_v6, %v1048_v6 }
 0x20e   : > { %v4844_v11 = vpop.eup %4572  ;;  %4192 = vmatprep.mubr.msk.bf16.mxu0 %vm4703_vm0, %v5583_v0 }
 0x20f   : > { %4191 = vmatpush3.bf16.xpose.msra.mxu0 %v589_v10  ;;  %v366_v12 = vpack.c.bf16 %v4844_v11, %v4844_v11  ;;  %v684_v20 = vpop.permute.xlu0 %683  ;;  %v825_v22 = vpop.permute.xlu1 %824  ;;  %v1049_v10 = vpack.c.bf16 %v1045_v7, %v1045_v7 }
 0x210   : > { %4202 = vmatprep.subr.bf16.mxu0 %v5583_v0  ;;  %v830_v24 = vsel %vm372_vm2, %v825_v22, 0 }
 0x211   : > { %4187 = vmatmul.mubr.msk.bf16.vlgmr.msra.gmra.mrb[12].mxu1 %vm132_vm1, %v366_v12 }
 0x212   : > { %4198 = vmatprep.mubr.msk.bf16.mxu1 %vm4703_vm0, %v5583_v0 }
 0x213   : > { %4197 = vmatpush3.bf16.xpose.msra.mxu1 %v640_v15  ;;  %v873_v23 = vpop.permute.xlu0 %872 }
 0x214   : > { %4208 = vmatprep.subr.bf16.mxu1 %v5583_v0  ;;  %v878_v25 = vsel %vm372_vm2, %v873_v23, 0 }
 0x216   : > { %4193 = vmatmul.mubr.msk.bf16.vlgmr.msra.gmra.mrb[16].mxu0 %vm132_vm1, %v582_v14 }
 0x217   : > { %4203 = vmatpush3.bf16.xpose.msra.mxu0 %v691_v16  ;;  %4204 = vmatprep.mubr.msk.bf16.mxu0 %vm4703_vm0, %v5583_v0 }
 0x218   : > { %4214 = vmatprep.subr.bf16.mxu0 %v5583_v0 }
 0x21a   : > { %4199 = vmatmul.mubr.msk.bf16.vlgmr.msra.gmra.mrb[16].mxu1 %vm132_vm1, %v633_v18 }
 0x21b   : > { %4209 = vmatpush3.bf16.xpose.msra.mxu1 %v742_v19  ;;  %4210 = vmatprep.mubr.msk.bf16.mxu1 %vm4703_vm0, %v5583_v0 }
 0x21c   : > { %4220 = vmatprep.subr.bf16.mxu1 %v5583_v0 }
 0x21e   : > { %4205 = vmatmul.mubr.msk.bf16.vlgmr.msra.gmra.mrb[20].mxu0 %vm132_vm1, %v684_v20 }
 0x21f   : > { %4216 = vmatprep.mubr.msk.bf16.mxu0 %vm4703_vm0, %v5583_v0  ;;  %4215 = vmatpush3.bf16.msra.mxu0 %v830_v24 }
 0x220   : > { %4226 = vmatprep.subr.bf16.mxu0 %v5583_v0 }
 0x222   : > { %4211 = vmatmul.mubr.msk.bf16.vlgmr.msra.gmra.mrb[20].mxu1 %vm132_vm1, %v735_v21 }
 0x223   : > { %4222 = vmatprep.mubr.msk.bf16.mxu1 %vm4703_vm0, %v5583_v0  ;;  %4221 = vmatpush3.bf16.msra.mxu1 %v878_v25 }
 0x224   : > { %4232 = vmatprep.subr.bf16.mxu1 %v5583_v0 }
 0x2d8   : > { %v4876_v26 = vpop.f32.mrb[8].mxu0 }
 0x2d9   : > { %5585 = vst [vmem:[#allocation2_spill] sm:$0xff] %v4876_v26  ;;  %v4170_v27 = vpop.f32.mrb[9].mxu0 }
 0x2da   : > { %v413_v28 = vpop.f32.mrb[10].mxu0 }
 0x2db   : > { %v4171_v29 = vpop.f32.mrb[11].mxu0 }
 0x2dc   : > { %v4878_v30 = vpop.f32.mrb[8].mxu1 }
 0x2dd   : > { %5586 = vst [vmem:[#allocation3_spill] sm:$0xff] %v4878_v30  ;;  %v4176_v31 = vpop.f32.mrb[9].mxu1 }
 0x2de   : > { %v461_v32 = vpop.f32.mrb[10].mxu1 }
 0x2df   : > { %v4177_v33 = vpop.f32.mrb[11].mxu1 }
 0x2e0   : > { %v4880_v34 = vpop.f32.mrb[12].mxu0 }
 0x2e1   : > { %5587 = vst [vmem:[#allocation4_spill] sm:$0xff] %v4880_v34  ;;  %v4182_v35 = vpop.f32.mrb[13].mxu0 }
 0x2e2   : > { %v509_v36 = vpop.f32.mrb[14].mxu0 }
 0x2e3   : > { %v4183_v37 = vpop.f32.mrb[15].mxu0 }
 0x2e4   : > { %v4882_v38 = vpop.f32.mrb[12].mxu1 }
 0x2e5   : > { %5588 = vst [vmem:[#allocation5_spill] sm:$0xff] %v4882_v38  ;;  %v4188_v39 = vpop.f32.mrb[13].mxu1 }
 0x2e6   : > { %v557_v40 = vpop.f32.mrb[14].mxu1 }
 0x2e7   : > { %v4189_v41 = vpop.f32.mrb[15].mxu1 }
 0x2e9   : > { %v625_v42 = vpop.f32.mrb[16].mxu0 }
 0x2ea   : > { %v4194_v43 = vpop.f32.mrb[17].mxu0  ;;  %v784_v44 = vsel %vm326_vm3, %v625_v42, -inf }
 0x2eb   : > { %785 = vmax.xlane.f32.xlu0 %v784_v44  ;;  %v628_v45 = vpop.f32.mrb[18].mxu0 }
 0x2ec   : > { %v4195_v46 = vpop.f32.mrb[19].mxu0 }
 0x2ed   : > { %v676_v48 = vpop.f32.mrb[16].mxu1 }
 0x2ee   : > { %v4200_v49 = vpop.f32.mrb[17].mxu1  ;;  %v787_v50 = vsel %vm326_vm3, %v676_v48, -inf }
 0x2ef   : > { %788 = vmax.xlane.f32.xlu1 %v787_v50  ;;  %v679_v51 = vpop.f32.mrb[18].mxu1 }
 0x2f0   : > { %v4201_v52 = vpop.f32.mrb[19].mxu1 }
 0x2f1   : > { %v727_v53 = vpop.f32.mrb[20].mxu0 }
 0x2f2   : > { %v4206_v54 = vpop.f32.mrb[21].mxu0  ;;  %v790_v55 = vsel %vm326_vm3, %v727_v53, -inf }
 0x2f3   : > { %791 = vmax.xlane.f32.xlu0 %v790_v55  ;;  %v730_v56 = vpop.f32.mrb[22].mxu0 }
 0x2f4   : > { %v4207_v57 = vpop.f32.mrb[23].mxu0 }
 0x2f5   : > { %v778_v58 = vpop.f32.mrb[20].mxu1 }
 0x2f6   : > { %v4212_v59 = vpop.f32.mrb[21].mxu1  ;;  %v793_v60 = vsel %vm326_vm3, %v778_v58, -inf }
 0x2f7   : > { %v781_v62 = vpop.f32.mrb[22].mxu1  ;;  %794 = vmax.xlane.f32.xlu0 %v793_v60 }
 0x2f8   : > { %v4213_v63 = vpop.f32.mrb[23].mxu1 }
 0x300   : > { %968 = vrot.lane.b32.xlu1 %v4813_v47, %s4708_s17  ;;  %v921_v47 = vpop.permute.xlu1 %920 }
 0x301   : > { %v926_v28 = vsel %vm372_vm2, %v921_v47, 0 }
 0x304   : > { %1107 = vrot.lane.b32.xlu1 %v1050_v2, %s4709_s18 }
 0x308   : > { %1158 = vrot.lane.b32.xlu1 %v1051_v5, %s4709_s18 }
 0x30c   : > { %1209 = vrot.lane.b32.xlu1 %v4894_v9, %s4709_s18 }
 0x30d   : > { %1056 = vrot.lane.b32.xlu0 %v1049_v10, %s4709_s18  ;;  %s5516_s18 = scalar_lea.vmem %s5582_s1, %s3945_s9 }
 0x310   : > { %1207 = vrot.lane.b32.xlu1 %v4894_v9, %s4710_s19 }
 0x311   : > { %1054 = vrot.lane.b32.xlu0 %v1049_v10, %s4710_s19 }
 0x314   : > { %1297 = vrot.lane.b32.xlu1 %v1049_v10, %s4711_s20 }
 0x315   : > { %1105 = vrot.lane.b32.xlu0 %v1050_v2, %s4710_s19 }
 0x318   : > { %1393 = vrot.lane.b32.xlu1 %v1051_v5, %s4711_s20 }
 0x319   : > { %1156 = vrot.lane.b32.xlu0 %v1051_v5, %s4710_s19 }
 0x31d   : > { %1345 = vrot.lane.b32.xlu0 %v1050_v2, %s4711_s20 }
 0x378   : > { %v786_v12 = vpop.xlane.xlu0 %785 }
 0x379   : > { %v796_v13 = vsub.f32 %v625_v42, %v786_v12 }
 0x37b   : > { %v800_v14 = vmul.f32 1.442695, %v796_v13 }
 0x37c   : > { %v789_v15 = vpop.xlane.xlu1 %788 }
 0x37d   : > { %4574 = vpow2.f32 %v800_v14  ;;  %v797_v16 = vsub.f32 %v676_v48, %v789_v15 }
 0x37f   : > { %v802_v17 = vmul.f32 1.442695, %v797_v16 }
 0x380   : > { %v792_v18 = vpop.xlane.xlu0 %791  ;;  %v969_v27 = vpop.permute.xlu1 %968 }
 0x381   : > { %4576 = vpow2.f32 %v802_v17  ;;  %v798_v19 = vsub.f32 %v727_v53, %v792_v18  ;;  %v974_v31 = vsel %vm372_vm2, %v969_v27, 0 }
 0x383   : > { %v804_v20 = vmul.f32 1.442695, %v798_v19 }
 0x384   : > { %v795_v21 = vpop.xlane.xlu0 %794  ;;  %v1108_v35 = vpop.permute.xlu1 %1107 }
 0x385   : > { %4578 = vpow2.f32 %v804_v20  ;;  %v799_v22 = vsub.f32 %v778_v58, %v795_v21  ;;  %v1113_v44 = vsel %vm132_vm1, %v1108_v35, 0 }
 0x387   : > { %v4901_v23 = vpop.eup %4574  ;;  %v806_v24 = vmul.f32 1.442695, %v799_v22 }
 0x388   : > { %v820_v25 = vpack.c.bf16 %v4901_v23, %v4901_v23  ;;  %v1057_v33 = vpop.permute.xlu0 %1056  ;;  %v1159_v42 = vpop.permute.xlu1 %1158 }
 0x389   : > { %4580 = vpow2.f32 %v806_v24  ;;  %v1062_v39 = vsel %vm132_vm1, %v1057_v33, 0  ;;  %v1164_v45 = vsel %vm132_vm1, %v1159_v42, 0 }
 0x38a   : > { %4217 = vmatmul.mubr.msk.bf16.vlgmr.msra.gmra.mrb[24].mxu0 %vm132_vm1, %v820_v25 }
 0x38b   : > { %v4907_v29 = vpop.eup %4576  ;;  %4227 = vmatpush3.bf16.msra.mxu0 %v926_v28  ;;  %4228 = vmatprep.mubr.msk.bf16.mxu0 %vm4703_vm0, %v5583_v0 }
 0x38c   : > { %v821_v32 = vpack.c.bf16 %v4907_v29, %v4907_v29  ;;  %4238 = vmatprep.subr.bf16.mxu0 %v5583_v0  ;;  %v1055_v43 = vpop.permute.xlu0 %1054  ;;  %v1210_v46 = vpop.permute.xlu1 %1209 }
 0x38d   : > { %v1215_v49 = vsel %vm132_vm1, %v1210_v46, 0  ;;  %v1518_v46 = vld [vmem:[%s4766_s12] sm:$0xf] }
 0x38e   : > { %4223 = vmatmul.mubr.msk.bf16.vlgmr.msra.gmra.mrb[24].mxu1 %vm132_vm1, %v821_v32 }
 0x38f   : > { %v4916_v36 = vpop.eup %4578  ;;  %4233 = vmatpush3.bf16.msra.mxu1 %v974_v31  ;;  %4234 = vmatprep.mubr.msk.bf16.mxu1 %vm4703_vm0, %v5583_v0 }
 0x390   : > { %v822_v37 = vpack.c.bf16 %v4916_v36, %v4916_v36  ;;  %4244 = vmatprep.subr.bf16.mxu1 %v5583_v0  ;;  %v1106_v48 = vpop.permute.xlu0 %1105  ;;  %v1208_v51 = vpop.permute.xlu1 %1207 }
 0x392   : > { %4229 = vmatmul.mubr.msk.bf16.vlgmr.msra.gmra.mrb[28].mxu0 %vm132_vm1, %v822_v37 }
 0x393   : > { %v4925_v40 = vpop.eup %4580  ;;  %4240 = vmatprep.mubr.msk.bf16.mxu0 %vm4703_vm0, %v5583_v0 }
 0x394   : > { %4239 = vmatpush3.bf16.xpose.msra.mxu0 %v1062_v39  ;;  %v823_v41 = vpack.c.bf16 %v4925_v40, %v4925_v40  ;;  %v1157_v50 = vpop.permute.xlu0 %1156  ;;  %v1298_v52 = vpop.permute.xlu1 %1297 }
 0x395   : > { %4250 = vmatprep.subr.bf16.mxu0 %v5583_v0  ;;  %v1303_v54 = vsel %vm372_vm2, %v1298_v52, 0 }
 0x396   : > { %4235 = vmatmul.mubr.msk.bf16.vlgmr.msra.gmra.mrb[28].mxu1 %vm132_vm1, %v823_v41  ;;  %v1519_v41 = vld [vmem:[%s4766_s12 + $0x4] sm:$0xf] }
 0x397   : > { %4246 = vmatprep.mubr.msk.bf16.mxu1 %vm4703_vm0, %v5583_v0  ;;  %v1523_v42 = vpack.c.bf16 %v1519_v41, %v1519_v41 }
 0x398   : > { %4245 = vmatpush3.bf16.xpose.msra.mxu1 %v1113_v44  ;;  %v1346_v53 = vpop.permute.xlu0 %1345 }
 0x399   : > { %4256 = vmatprep.subr.bf16.mxu1 %v5583_v0  ;;  %v1351_v55 = vsel %vm372_vm2, %v1346_v53, 0 }
 0x39b   : > { %4241 = vmatmul.mubr.msk.bf16.vlgmr.msra.gmra.mrb[32].mxu0 %vm132_vm1, %v1055_v43  ;;  %v1520_v43 = vld [vmem:[%s4766_s12 + $0x8] sm:$0xf] }
 0x39c   : > { %4251 = vmatpush3.bf16.xpose.msra.mxu0 %v1164_v45  ;;  %4252 = vmatprep.mubr.msk.bf16.mxu0 %vm4703_vm0, %v5583_v0  ;;  %v1524_v44 = vpack.c.bf16 %v1520_v43, %v1520_v43  ;;  %v1521_v45 = vld [vmem:[%s4766_s12 + $0xc] sm:$0xf] }
 0x39d   : > { %4262 = vmatprep.subr.bf16.mxu0 %v5583_v0 }
 0x39f   : > { %4247 = vmatmul.mubr.msk.bf16.vlgmr.msra.gmra.mrb[32].mxu1 %vm132_vm1, %v1106_v48  ;;  %v4975_v48 = vpack.c.bf16 %v1521_v45, %v1521_v45 }
 0x3a0   : > { %4257 = vmatpush3.bf16.xpose.msra.mxu1 %v1215_v49  ;;  %4258 = vmatprep.mubr.msk.bf16.mxu1 %vm4703_vm0, %v5583_v0  ;;  %v1522_v49 = vpack.c.bf16 %v1518_v46, %v1518_v46 }
 0x3a1   : > { %4268 = vmatprep.subr.bf16.mxu1 %v5583_v0 }
 0x3a3   : > { %4253 = vmatmul.mubr.msk.bf16.vlgmr.msra.gmra.mrb[36].mxu0 %vm132_vm1, %v1157_v50 }
 0x3a4   : > { %4264 = vmatprep.mubr.msk.bf16.mxu0 %vm4703_vm0, %v5583_v0  ;;  %4263 = vmatpush3.bf16.msra.mxu0 %v1303_v54 }
 0x3a5   : > { %4274 = vmatprep.subr.bf16.mxu0 %v5583_v0 }
 0x3a7   : > { %4259 = vmatmul.mubr.msk.bf16.vlgmr.msra.gmra.mrb[36].mxu1 %vm132_vm1, %v1208_v51 }
 0x3a8   : > { %4270 = vmatprep.mubr.msk.bf16.mxu1 %vm4703_vm0, %v5583_v0  ;;  %4269 = vmatpush3.bf16.msra.mxu1 %v1351_v55 }
 0x3a9   : > { %4280 = vmatprep.subr.bf16.mxu1 %v5583_v0 }
 0x45d   : > { %v4957_v56 = vpop.f32.mrb[24].mxu0 }
 0x45e   : > { %v4218_v57 = vpop.f32.mrb[25].mxu0 }
 0x45f   : > { %v869_v58 = vpop.f32.mrb[26].mxu0 }
 0x460   : > { %v4219_v59 = vpop.f32.mrb[27].mxu0 }
 0x461   : > { %v4959_v60 = vpop.f32.mrb[24].mxu1 }
 0x462   : > { %v4224_v62 = vpop.f32.mrb[25].mxu1 }
 0x463   : > { %v917_v63 = vpop.f32.mrb[26].mxu1 }
 0x464   : > { %v4225_v1 = vpop.f32.mrb[27].mxu1 }
 0x465   : > { %v4961_v2 = vpop.f32.mrb[28].mxu0 }
 0x466   : > { %v4230_v4 = vpop.f32.mrb[29].mxu0 }
 0x467   : > { %v965_v5 = vpop.f32.mrb[30].mxu0 }
 0x468   : > { %v4231_v6 = vpop.f32.mrb[31].mxu0 }
 0x469   : > { %v4963_v7 = vpop.f32.mrb[28].mxu1 }
 0x46a   : > { %v4236_v10 = vpop.f32.mrb[29].mxu1 }
 0x46b   : > { %v1013_v47 = vpop.f32.mrb[30].mxu1 }
 0x46c   : > { %v4237_v12 = vpop.f32.mrb[31].mxu1 }
 0x46e   : > { %v1098_v13 = vpop.f32.mrb[32].mxu0 }
 0x46f   : > { %v4242_v14 = vpop.f32.mrb[33].mxu0  ;;  %v1257_v15 = vsel %vm326_vm3, %v1098_v13, -inf }
 0x470   : > { %1258 = vmax.xlane.f32.xlu0 %v1257_v15  ;;  %v1101_v16 = vpop.f32.mrb[34].mxu0 }
 0x471   : > { %v4243_v17 = vpop.f32.mrb[35].mxu0 }
 0x472   : > { %v1149_v18 = vpop.f32.mrb[32].mxu1 }
 0x473   : > { %v4248_v19 = vpop.f32.mrb[33].mxu1  ;;  %v1260_v20 = vsel %vm326_vm3, %v1149_v18, -inf }
 0x474   : > { %1261 = vmax.xlane.f32.xlu1 %v1260_v20  ;;  %v1152_v21 = vpop.f32.mrb[34].mxu1 }
 0x475   : > { %v4249_v22 = vpop.f32.mrb[35].mxu1 }
 0x476   : > { %v1200_v24 = vpop.f32.mrb[36].mxu0 }
 0x477   : > { %v4254_v25 = vpop.f32.mrb[37].mxu0  ;;  %v1263_v27 = vsel %vm326_vm3, %v1200_v24, -inf }
 0x478   : > { %1264 = vmax.xlane.f32.xlu0 %v1263_v27  ;;  %v1203_v28 = vpop.f32.mrb[38].mxu0 }
 0x479   : > { %v4255_v31 = vpop.f32.mrb[39].mxu0 }
 0x47a   : > { %v1251_v32 = vpop.f32.mrb[36].mxu1 }
 0x47b   : > { %v4260_v33 = vpop.f32.mrb[37].mxu1  ;;  %v1266_v35 = vsel %vm326_vm3, %v1251_v32, -inf }
 0x47c   : > { %v1254_v37 = vpop.f32.mrb[38].mxu1  ;;  %1267 = vmax.xlane.f32.xlu0 %v1266_v35 }
 0x47d   : > { %v4261_v39 = vpop.f32.mrb[39].mxu1 }
 0x485   : > { %1441 = vrot.lane.b32.xlu1 %v4894_v9, %s4711_s20  ;;  %v1394_v9 = vpop.permute.xlu1 %1393 }
 0x486   : > { %v1399_v10 = vsel %vm372_vm2, %v1394_v9, 0 }
 0x489   : > { %1580 = vrot.lane.b32.xlu1 %v1523_v42, %s4712_s21 }
 0x48d   : > { %1631 = vrot.lane.b32.xlu1 %v1524_v44, %s4712_s21 }
 0x491   : > { %1682 = vrot.lane.b32.xlu1 %v4975_v48, %s4712_s21 }
 0x492   : > { %1529 = vrot.lane.b32.xlu0 %v1522_v49, %s4712_s21 }
 0x495   : > { %1680 = vrot.lane.b32.xlu1 %v4975_v48, %s4713_s22 }
 0x496   : > { %1527 = vrot.lane.b32.xlu0 %v1522_v49, %s4713_s22 }
 0x499   : > { %1770 = vrot.lane.b32.xlu1 %v1522_v49, %s4714_s23 }
 0x49a   : > { %1578 = vrot.lane.b32.xlu0 %v1523_v42, %s4713_s22 }
 0x49d   : > { %1866 = vrot.lane.b32.xlu1 %v1524_v44, %s4714_s23 }
 0x49e   : > { %1629 = vrot.lane.b32.xlu0 %v1524_v44, %s4713_s22 }
 0x4a2   : > { %1818 = vrot.lane.b32.xlu0 %v1523_v42, %s4714_s23 }
 0x4fd   : > { %v1259_v50 = vpop.xlane.xlu0 %1258 }
 0x4fe   : > { %v1269_v51 = vsub.f32 %v1098_v13, %v1259_v50 }
 0x500   : > { %v1273_v52 = vmul.f32 1.442695, %v1269_v51 }
 0x501   : > { %v1262_v53 = vpop.xlane.xlu1 %1261 }
 0x502   : > { %4582 = vpow2.f32 %v1273_v52  ;;  %v1270_v54 = vsub.f32 %v1149_v18, %v1262_v53 }
 0x504   : > { %v1275_v55 = vmul.f32 1.442695, %v1270_v54 }
 0x505   : > { %v1265_v57 = vpop.xlane.xlu0 %1264  ;;  %v1442_v6 = vpop.permute.xlu1 %1441 }
 0x506   : > { %4584 = vpow2.f32 %v1275_v55  ;;  %v1271_v58 = vsub.f32 %v1200_v24, %v1265_v57  ;;  %v1447_v12 = vsel %vm372_vm2, %v1442_v6, 0 }
 0x508   : > { %v1277_v59 = vmul.f32 1.442695, %v1271_v58 }
 0x509   : > { %v1268_v62 = vpop.xlane.xlu0 %1267  ;;  %v1581_v15 = vpop.permute.xlu1 %1580 }
 0x50a   : > { %4586 = vpow2.f32 %v1277_v59  ;;  %v1272_v63 = vsub.f32 %v1251_v32, %v1268_v62  ;;  %v1586_v24 = vsel %vm132_vm1, %v1581_v15, 0 }
 0x50c   : > { %v4982_v1 = vpop.eup %4582  ;;  %v1279_v4 = vmul.f32 1.442695, %v1272_v63 }
 0x50d   : > { %v1293_v5 = vpack.c.bf16 %v4982_v1, %v4982_v1  ;;  %v1530_v14 = vpop.permute.xlu0 %1529  ;;  %v1632_v21 = vpop.permute.xlu1 %1631 }
 0x50e   : > { %4588 = vpow2.f32 %v1279_v4  ;;  %v1535_v18 = vsel %vm132_vm1, %v1530_v14, 0  ;;  %v1637_v25 = vsel %vm132_vm1, %v1632_v21, 0 }
 0x50f   : > { %4265 = vmatmul.mubr.msk.bf16.vlgmr.msra.gmra.mrb[40].mxu0 %vm132_vm1, %v1293_v5 }
 0x510   : > { %v4988_v47 = vpop.eup %4584  ;;  %4275 = vmatpush3.bf16.msra.mxu0 %v1399_v10  ;;  %4276 = vmatprep.mubr.msk.bf16.mxu0 %vm4703_vm0, %v5583_v0 }
 0x511   : > { %v1294_v13 = vpack.c.bf16 %v4988_v47, %v4988_v47  ;;  %4286 = vmatprep.subr.bf16.mxu0 %v5583_v0  ;;  %v1528_v22 = vpop.permute.xlu0 %1527  ;;  %v1683_v27 = vpop.permute.xlu1 %1682 }
 0x512   : > { %v1688_v31 = vsel %vm132_vm1, %v1683_v27, 0 }
 0x513   : > { %4271 = vmatmul.mubr.msk.bf16.vlgmr.msra.gmra.mrb[40].mxu1 %vm132_vm1, %v1294_v13 }
 0x514   : > { %v4997_v16 = vpop.eup %4586  ;;  %4281 = vmatpush3.bf16.msra.mxu1 %v1447_v12  ;;  %4282 = vmatprep.mubr.msk.bf16.mxu1 %vm4703_vm0, %v5583_v0 }
 0x515   : > { %v1295_v17 = vpack.c.bf16 %v4997_v16, %v4997_v16  ;;  %4292 = vmatprep.subr.bf16.mxu1 %v5583_v0  ;;  %v1579_v28 = vpop.permute.xlu0 %1578  ;;  %v1681_v33 = vpop.permute.xlu1 %1680 }
 0x517   : > { %4277 = vmatmul.mubr.msk.bf16.vlgmr.msra.gmra.mrb[44].mxu0 %vm132_vm1, %v1295_v17 }
 0x518   : > { %v5006_v19 = vpop.eup %4588  ;;  %4288 = vmatprep.mubr.msk.bf16.mxu0 %vm4703_vm0, %v5583_v0 }
 0x519   : > { %4287 = vmatpush3.bf16.xpose.msra.mxu0 %v1535_v18  ;;  %v1296_v20 = vpack.c.bf16 %v5006_v19, %v5006_v19  ;;  %v1630_v32 = vpop.permute.xlu0 %1629  ;;  %v1771_v35 = vpop.permute.xlu1 %1770 }
 0x51a   : > { %4298 = vmatprep.subr.bf16.mxu0 %v5583_v0  ;;  %v1776_v39 = vsel %vm372_vm2, %v1771_v35, 0  ;;  %v1993_v35 = vld [vmem:[%s4766_s12 + $0x8] sm:$0xf] }
 0x51b   : > { %4283 = vmatmul.mubr.msk.bf16.vlgmr.msra.gmra.mrb[44].mxu1 %vm132_vm1, %v1296_v20 }
 0x51c   : > { %4294 = vmatprep.mubr.msk.bf16.mxu1 %vm4703_vm0, %v5583_v0 }
 0x51d   : > { %4293 = vmatpush3.bf16.xpose.msra.mxu1 %v1586_v24  ;;  %v1819_v37 = vpop.permute.xlu0 %1818 }
 0x51e   : > { %4304 = vmatprep.subr.bf16.mxu1 %v5583_v0  ;;  %v1824_v41 = vsel %vm372_vm2, %v1819_v37, 0  ;;  %v1997_v37 = vpack.c.bf16 %v1993_v35, %v1993_v35 }
 0x520   : > { %4289 = vmatmul.mubr.msk.bf16.vlgmr.msra.gmra.mrb[48].mxu0 %vm132_vm1, %v1528_v22 }
 0x521   : > { %4299 = vmatpush3.bf16.xpose.msra.mxu0 %v1637_v25  ;;  %4300 = vmatprep.mubr.msk.bf16.mxu0 %vm4703_vm0, %v5583_v0 }
 0x522   : > { %4310 = vmatprep.subr.bf16.mxu0 %v5583_v0 }
 0x524   : > { %4295 = vmatmul.mubr.msk.bf16.vlgmr.msra.gmra.mrb[48].mxu1 %vm132_vm1, %v1579_v28 }
 0x525   : > { %4305 = vmatpush3.bf16.xpose.msra.mxu1 %v1688_v31  ;;  %4306 = vmatprep.mubr.msk.bf16.mxu1 %vm4703_vm0, %v5583_v0 }
 0x526   : > { %4316 = vmatprep.subr.bf16.mxu1 %v5583_v0 }
 0x528   : > { %4301 = vmatmul.mubr.msk.bf16.vlgmr.msra.gmra.mrb[52].mxu0 %vm132_vm1, %v1630_v32  ;;  %v1992_v32 = vld [vmem:[%s4766_s12 + $0x4] sm:$0xf] }
 0x529   : > { %4312 = vmatprep.mubr.msk.bf16.mxu0 %vm4703_vm0, %v5583_v0  ;;  %4311 = vmatpush3.bf16.msra.mxu0 %v1776_v39  ;;  %v1994_v39 = vld [vmem:[%s4766_s12 + $0xc] sm:$0xf] }
 0x52a   : > { %4322 = vmatprep.subr.bf16.mxu0 %v5583_v0 }
 0x52c   : > { %4307 = vmatmul.mubr.msk.bf16.vlgmr.msra.gmra.mrb[52].mxu1 %vm132_vm1, %v1681_v33  ;;  %v1996_v33 = vpack.c.bf16 %v1992_v32, %v1992_v32 }
 0x52d   : > { %4318 = vmatprep.mubr.msk.bf16.mxu1 %vm4703_vm0, %v5583_v0  ;;  %4317 = vmatpush3.bf16.msra.mxu1 %v1824_v41  ;;  %v1991_v41 = vld [vmem:[%s4766_s12] sm:$0xf] }
 0x52e   : > { %4328 = vmatprep.subr.bf16.mxu1 %v5583_v0 }
 0x5e2   : > { %v5038_v42 = vpop.f32.mrb[40].mxu0 }
 0x5e3   : > { %v4266_v43 = vpop.f32.mrb[41].mxu0 }
 0x5e4   : > { %v1342_v44 = vpop.f32.mrb[42].mxu0  ;;  %v5056_v43 = vpack.c.bf16 %v1994_v39, %v1994_v39 }
 0x5e5   : > { %v4267_v45 = vpop.f32.mrb[43].mxu0  ;;  %v1995_v44 = vpack.c.bf16 %v1991_v41, %v1991_v41 }
 0x5e6   : > { %v5040_v46 = vpop.f32.mrb[40].mxu1 }
 0x5e7   : > { %v4272_v49 = vpop.f32.mrb[41].mxu1 }
 0x5e8   : > { %v1390_v9 = vpop.f32.mrb[42].mxu1 }
 0x5e9   : > { %v4273_v50 = vpop.f32.mrb[43].mxu1 }
 0x5ea   : > { %v5042_v51 = vpop.f32.mrb[44].mxu0 }
 0x5eb   : > { %v4278_v52 = vpop.f32.mrb[45].mxu0 }
 0x5ec   : > { %v1438_v53 = vpop.f32.mrb[46].mxu0 }
 0x5ed   : > { %v4279_v54 = vpop.f32.mrb[47].mxu0 }
 0x5ee   : > { %v5044_v55 = vpop.f32.mrb[44].mxu1 }
 0x5ef   : > { %v4284_v57 = vpop.f32.mrb[45].mxu1 }
 0x5f0   : > { %v1486_v58 = vpop.f32.mrb[46].mxu1 }
 0x5f1   : > { %v4285_v59 = vpop.f32.mrb[47].mxu1 }
 0x5f3   : > { %v1571_v62 = vpop.f32.mrb[48].mxu0 }
 0x5f4   : > { %v4290_v63 = vpop.f32.mrb[49].mxu0  ;;  %v1730_v4 = vsel %vm326_vm3, %v1571_v62, -inf }
 0x5f5   : > { %1731 = vmax.xlane.f32.xlu0 %v1730_v4  ;;  %v1574_v5 = vpop.f32.mrb[50].mxu0 }
 0x5f6   : > { %v4291_v6 = vpop.f32.mrb[51].mxu0 }
 0x5f7   : > { %v1622_v10 = vpop.f32.mrb[48].mxu1 }
 0x5f8   : > { %v4296_v12 = vpop.f32.mrb[49].mxu1  ;;  %v1733_v13 = vsel %vm326_vm3, %v1622_v10, -inf }
 0x5f9   : > { %1734 = vmax.xlane.f32.xlu1 %v1733_v13  ;;  %v1625_v14 = vpop.f32.mrb[50].mxu1 }
 0x5fa   : > { %v4297_v15 = vpop.f32.mrb[51].mxu1 }
 0x5fb   : > { %v1673_v17 = vpop.f32.mrb[52].mxu0 }
 0x5fc   : > { %v4302_v18 = vpop.f32.mrb[53].mxu0  ;;  %v1736_v20 = vsel %vm326_vm3, %v1673_v17, -inf }
 0x5fd   : > { %1737 = vmax.xlane.f32.xlu0 %v1736_v20  ;;  %v1676_v21 = vpop.f32.mrb[54].mxu0 }
 0x5fe   : > { %v4303_v22 = vpop.f32.mrb[55].mxu0 }
 0x5ff   : > { %v1724_v24 = vpop.f32.mrb[52].mxu1 }
 0x600   : > { %v4308_v25 = vpop.f32.mrb[53].mxu1  ;;  %v1739_v27 = vsel %vm326_vm3, %v1724_v24, -inf }
 0x601   : > { %v1727_v28 = vpop.f32.mrb[54].mxu1  ;;  %1740 = vmax.xlane.f32.xlu0 %v1739_v27 }
 0x602   : > { %v4309_v31 = vpop.f32.mrb[55].mxu1 }
 0x60a   : > { %1914 = vrot.lane.b32.xlu1 %v4975_v48, %s4714_s23  ;;  %v1867_v48 = vpop.permute.xlu1 %1866 }
 0x60b   : > { %v1872_v12 = vsel %vm372_vm2, %v1867_v48, 0 }
 0x60e   : > { %2053 = vrot.lane.b32.xlu1 %v1996_v33, %s4715_s24 }
 0x612   : > { %2104 = vrot.lane.b32.xlu1 %v1997_v37, %s4715_s24 }
 0x616   : > { %2155 = vrot.lane.b32.xlu1 %v5056_v43, %s4715_s24 }
 0x617   : > { %2002 = vrot.lane.b32.xlu0 %v1995_v44, %s4715_s24 }
 0x61a   : > { %2153 = vrot.lane.b32.xlu1 %v5056_v43, %s4716_s25 }
 0x61b   : > { %2000 = vrot.lane.b32.xlu0 %v1995_v44, %s4716_s25 }
 0x61e   : > { %2243 = vrot.lane.b32.xlu1 %v1995_v44, %s4717_s26 }
 0x61f   : > { %2051 = vrot.lane.b32.xlu0 %v1996_v33, %s4716_s25 }
 0x622   : > { %2339 = vrot.lane.b32.xlu1 %v1997_v37, %s4717_s26 }
 0x623   : > { %2102 = vrot.lane.b32.xlu0 %v1997_v37, %s4716_s25 }
 0x627   : > { %2291 = vrot.lane.b32.xlu0 %v1996_v33, %s4717_s26 }
 0x682   : > { %v1732_v45 = vpop.xlane.xlu0 %1731 }
 0x683   : > { %v1742_v49 = vsub.f32 %v1571_v62, %v1732_v45 }
 0x685   : > { %v1746_v9 = vmul.f32 1.442695, %v1742_v49 }
 0x686   : > { %v1735_v50 = vpop.xlane.xlu1 %1734 }
 0x687   : > { %4590 = vpow2.f32 %v1746_v9  ;;  %v1743_v52 = vsub.f32 %v1622_v10, %v1735_v50 }
 0x689   : > { %v1748_v53 = vmul.f32 1.442695, %v1743_v52 }
 0x68a   : > { %v1738_v54 = vpop.xlane.xlu0 %1737  ;;  %v1915_v62 = vpop.permute.xlu1 %1914 }
 0x68b   : > { %4592 = vpow2.f32 %v1748_v53  ;;  %v1744_v57 = vsub.f32 %v1673_v17, %v1738_v54  ;;  %v1920_v13 = vsel %vm372_vm2, %v1915_v62, 0 }
 0x68d   : > { %v1750_v58 = vmul.f32 1.442695, %v1744_v57 }
 0x68e   : > { %v1741_v59 = vpop.xlane.xlu0 %1740  ;;  %v2054_v17 = vpop.permute.xlu1 %2053 }
 0x68f   : > { %4594 = vpow2.f32 %v1750_v58  ;;  %v1745_v63 = vsub.f32 %v1724_v24, %v1741_v59  ;;  %v2059_v28 = vsel %vm132_vm1, %v2054_v17, 0 }
 0x691   : > { %v5063_v4 = vpop.eup %4590  ;;  %v1752_v5 = vmul.f32 1.442695, %v1745_v63 }
 0x692   : > { %v1766_v6 = vpack.c.bf16 %v5063_v4, %v5063_v4  ;;  %v2003_v15 = vpop.permute.xlu0 %2002  ;;  %v2105_v25 = vpop.permute.xlu1 %2104 }
 0x693   : > { %4596 = vpow2.f32 %v1752_v5  ;;  %v2008_v21 = vsel %vm132_vm1, %v2003_v15, 0  ;;  %v2110_v31 = vsel %vm132_vm1, %v2105_v25, 0 }
 0x694   : > { %4313 = vmatmul.mubr.msk.bf16.vlgmr.msra.gmra.mrb[56].mxu0 %vm132_vm1, %v1766_v6 }
 0x695   : > { %v5069_v10 = vpop.eup %4592  ;;  %4323 = vmatpush3.bf16.msra.mxu0 %v1872_v12  ;;  %4324 = vmatprep.mubr.msk.bf16.mxu0 %vm4703_vm0, %v5583_v0 }
 0x696   : > { %v1767_v14 = vpack.c.bf16 %v5069_v10, %v5069_v10  ;;  %4334 = vmatprep.subr.bf16.mxu0 %v5583_v0  ;;  %v2001_v27 = vpop.permute.xlu0 %2000  ;;  %v2156_v32 = vpop.permute.xlu1 %2155 }
 0x697   : > { %v2161_v35 = vsel %vm132_vm1, %v2156_v32, 0 }
 0x698   : > { %4319 = vmatmul.mubr.msk.bf16.vlgmr.msra.gmra.mrb[56].mxu1 %vm132_vm1, %v1767_v14 }
 0x699   : > { %v5078_v18 = vpop.eup %4594  ;;  %4329 = vmatpush3.bf16.msra.mxu1 %v1920_v13  ;;  %4330 = vmatprep.mubr.msk.bf16.mxu1 %vm4703_vm0, %v5583_v0 }
 0x69a   : > { %v1768_v20 = vpack.c.bf16 %v5078_v18, %v5078_v18  ;;  %4340 = vmatprep.subr.bf16.mxu1 %v5583_v0  ;;  %v2052_v33 = vpop.permute.xlu0 %2051  ;;  %v2154_v39 = vpop.permute.xlu1 %2153 }
 0x69c   : > { %4325 = vmatmul.mubr.msk.bf16.vlgmr.msra.gmra.mrb[60].mxu0 %vm132_vm1, %v1768_v20 }
 0x69d   : > { %v5087_v22 = vpop.eup %4596  ;;  %4336 = vmatprep.mubr.msk.bf16.mxu0 %vm4703_vm0, %v5583_v0 }
 0x69e   : > { %4335 = vmatpush3.bf16.xpose.msra.mxu0 %v2008_v21  ;;  %v1769_v24 = vpack.c.bf16 %v5087_v22, %v5087_v22  ;;  %v2103_v37 = vpop.permute.xlu0 %2102  ;;  %v2244_v41 = vpop.permute.xlu1 %2243 }
 0x69f   : > { %4346 = vmatprep.subr.bf16.mxu0 %v5583_v0  ;;  %v2249_v48 = vsel %vm372_vm2, %v2244_v41, 0 }
 0x6a0   : > { %4331 = vmatmul.mubr.msk.bf16.vlgmr.msra.gmra.mrb[60].mxu1 %vm132_vm1, %v1769_v24 }
 0x6a1   : > { %4342 = vmatprep.mubr.msk.bf16.mxu1 %vm4703_vm0, %v5583_v0 }
 0x6a2   : > { %4341 = vmatpush3.bf16.xpose.msra.mxu1 %v2059_v28  ;;  %v2292_v44 = vpop.permute.xlu0 %2291 }
 0x6a3   : > { %4352 = vmatprep.subr.bf16.mxu1 %v5583_v0  ;;  %v2297_v45 = vsel %vm372_vm2, %v2292_v44, 0 }
 0x6a5   : > { %4337 = vmatmul.mubr.msk.bf16.vlgmr.msra.gmra.mrb[64].mxu0 %vm132_vm1, %v2001_v27 }
 0x6a6   : > { %4347 = vmatpush3.bf16.xpose.msra.mxu0 %v2110_v31  ;;  %4348 = vmatprep.mubr.msk.bf16.mxu0 %vm4703_vm0, %v5583_v0 }
 0x6a7   : > { %4358 = vmatprep.subr.bf16.mxu0 %v5583_v0 }
 0x6a9   : > { %4343 = vmatmul.mubr.msk.bf16.vlgmr.msra.gmra.mrb[64].mxu1 %vm132_vm1, %v2052_v33 }
 0x6aa   : > { %4353 = vmatpush3.bf16.xpose.msra.mxu1 %v2161_v35  ;;  %4354 = vmatprep.mubr.msk.bf16.mxu1 %vm4703_vm0, %v5583_v0 }
 0x6ab   : > { %4364 = vmatprep.subr.bf16.mxu1 %v5583_v0 }
 0x6ad   : > { %4349 = vmatmul.mubr.msk.bf16.vlgmr.msra.gmra.mrb[68].mxu0 %vm132_vm1, %v2103_v37 }
 0x6ae   : > { %4360 = vmatprep.mubr.msk.bf16.mxu0 %vm4703_vm0, %v5583_v0  ;;  %4359 = vmatpush3.bf16.msra.mxu0 %v2249_v48 }
 0x6af   : > { %4370 = vmatprep.subr.bf16.mxu0 %v5583_v0 }
 0x6b1   : > { %4355 = vmatmul.mubr.msk.bf16.vlgmr.msra.gmra.mrb[68].mxu1 %vm132_vm1, %v2154_v39 }
 0x6b2   : > { %4366 = vmatprep.mubr.msk.bf16.mxu1 %vm4703_vm0, %v5583_v0  ;;  %4365 = vmatpush3.bf16.msra.mxu1 %v2297_v45 }
 0x6b3   : > { %4376 = vmatprep.subr.bf16.mxu1 %v5583_v0 }
 0x767   : > { %v5119_v49 = vpop.f32.mrb[56].mxu0 }
 0x768   : > { %v4314_v9 = vpop.f32.mrb[57].mxu0 }
 0x769   : > { %v1815_v50 = vpop.f32.mrb[58].mxu0 }
 0x76a   : > { %v4315_v52 = vpop.f32.mrb[59].mxu0 }
 0x76b   : > { %v5121_v53 = vpop.f32.mrb[56].mxu1  ;;  %v2465_v52 = vld [vmem:[%s4766_s12 + $0x4] sm:$0xf] }
 0x76c   : > { %v4320_v54 = vpop.f32.mrb[57].mxu1 }
 0x76d   : > { %v1863_v57 = vpop.f32.mrb[58].mxu1  ;;  %v2469_v54 = vpack.c.bf16 %v2465_v52, %v2465_v52 }
 0x76e   : > { %v4321_v58 = vpop.f32.mrb[59].mxu1  ;;  %v2466_v57 = vld [vmem:[%s4766_s12 + $0x8] sm:$0xf] }
 0x76f   : > { %v5123_v59 = vpop.f32.mrb[60].mxu0  ;;  %v2470_v58 = vpack.c.bf16 %v2466_v57, %v2466_v57 }
 0x770   : > { %v4326_v63 = vpop.f32.mrb[61].mxu0 }
 0x771   : > { %v1911_v5 = vpop.f32.mrb[62].mxu0  ;;  %v2467_v63 = vld [vmem:[%s4766_s12 + $0xc] sm:$0xf] }
 0x772   : > { %v4327_v6 = vpop.f32.mrb[63].mxu0  ;;  %v2464_v5 = vld [vmem:[%s4766_s12] sm:$0xf] }
 0x773   : > { %v5125_v62 = vpop.f32.mrb[60].mxu1  ;;  %v5137_v6 = vpack.c.bf16 %v2467_v63, %v2467_v63 }
 0x774   : > { %v4332_v12 = vpop.f32.mrb[61].mxu1 }
 0x775   : > { %v1959_v13 = vpop.f32.mrb[62].mxu1  ;;  %v2468_v12 = vpack.c.bf16 %v2464_v5, %v2464_v5 }
 0x776   : > { %v4333_v14 = vpop.f32.mrb[63].mxu1 }
 0x778   : > { %v2044_v15 = vpop.f32.mrb[64].mxu0 }
 0x779   : > { %v4338_v17 = vpop.f32.mrb[65].mxu0  ;;  %v2203_v20 = vsel %vm326_vm3, %v2044_v15, -inf }
 0x77a   : > { %2204 = vmax.xlane.f32.xlu0 %v2203_v20  ;;  %v2047_v21 = vpop.f32.mrb[66].mxu0 }
 0x77b   : > { %v4339_v24 = vpop.f32.mrb[67].mxu0 }
 0x77c   : > { %v2095_v25 = vpop.f32.mrb[64].mxu1 }
 0x77d   : > { %v4344_v27 = vpop.f32.mrb[65].mxu1  ;;  %v2206_v28 = vsel %vm326_vm3, %v2095_v25, -inf }
 0x77e   : > { %2207 = vmax.xlane.f32.xlu1 %v2206_v28  ;;  %v2098_v31 = vpop.f32.mrb[66].mxu1 }
 0x77f   : > { %v4345_v32 = vpop.f32.mrb[67].mxu1 }
 0x780   : > { %v2146_v33 = vpop.f32.mrb[68].mxu0 }
 0x781   : > { %v4350_v35 = vpop.f32.mrb[69].mxu0  ;;  %v2209_v37 = vsel %vm326_vm3, %v2146_v33, -inf }
 0x782   : > { %2210 = vmax.xlane.f32.xlu0 %v2209_v37  ;;  %v2149_v39 = vpop.f32.mrb[70].mxu0 }
 0x783   : > { %v4351_v41 = vpop.f32.mrb[71].mxu0 }
 0x784   : > { %v2197_v44 = vpop.f32.mrb[68].mxu1 }
 0x785   : > { %v4356_v48 = vpop.f32.mrb[69].mxu1  ;;  %v2212_v45 = vsel %vm326_vm3, %v2197_v44, -inf }
 0x786   : > { %v2200_v9 = vpop.f32.mrb[70].mxu1  ;;  %2213 = vmax.xlane.f32.xlu0 %v2212_v45 }
 0x787   : > { %v4357_v50 = vpop.f32.mrb[71].mxu1 }
 0x78f   : > { %2387 = vrot.lane.b32.xlu1 %v5056_v43, %s4717_s26  ;;  %v2340_v43 = vpop.permute.xlu1 %2339 }
 0x790   : > { %v2345_v48 = vsel %vm372_vm2, %v2340_v43, 0 }
 0x793   : > { %2526 = vrot.lane.b32.xlu1 %v2469_v54, %s4718_s27 }
 0x797   : > { %2577 = vrot.lane.b32.xlu1 %v2470_v58, %s4718_s27 }
 0x79b   : > { %2628 = vrot.lane.b32.xlu1 %v5137_v6, %s4718_s27 }
 0x79c   : > { %2475 = vrot.lane.b32.xlu0 %v2468_v12, %s4718_s27 }
 0x79f   : > { %2626 = vrot.lane.b32.xlu1 %v5137_v6, %s4719_s28 }
 0x7a0   : > { %2473 = vrot.lane.b32.xlu0 %v2468_v12, %s4719_s28 }
 0x7a3   : > { %2716 = vrot.lane.b32.xlu1 %v2468_v12, %s4720_s29 }
 0x7a4   : > { %2524 = vrot.lane.b32.xlu0 %v2469_v54, %s4719_s28 }
 0x7a7   : > { %2812 = vrot.lane.b32.xlu1 %v2470_v58, %s4720_s29 }
 0x7a8   : > { %2575 = vrot.lane.b32.xlu0 %v2470_v58, %s4719_s28 }
 0x7ac   : > { %2764 = vrot.lane.b32.xlu0 %v2469_v54, %s4720_s29 }
 0x807   : > { %v2205_v13 = vpop.xlane.xlu0 %2204 }
 0x808   : > { %v2215_v14 = vsub.f32 %v2044_v15, %v2205_v13 }
 0x80a   : > { %v2219_v17 = vmul.f32 1.442695, %v2215_v14 }
 0x80b   : > { %v2208_v20 = vpop.xlane.xlu1 %2207 }
 0x80c   : > { %4598 = vpow2.f32 %v2219_v17  ;;  %v2216_v21 = vsub.f32 %v2095_v25, %v2208_v20 }
 0x80e   : > { %v2221_v24 = vmul.f32 1.442695, %v2216_v21 }
 0x80f   : > { %v2211_v27 = vpop.xlane.xlu0 %2210  ;;  %v2388_v15 = vpop.permute.xlu1 %2387 }
 0x810   : > { %4600 = vpow2.f32 %v2221_v24  ;;  %v2217_v28 = vsub.f32 %v2146_v33, %v2211_v27  ;;  %v2393_v33 = vsel %vm372_vm2, %v2388_v15, 0 }
 0x812   : > { %v2223_v31 = vmul.f32 1.442695, %v2217_v28 }
 0x813   : > { %v2214_v32 = vpop.xlane.xlu0 %2213  ;;  %v2527_v9 = vpop.permute.xlu1 %2526 }
 0x814   : > { %4602 = vpow2.f32 %v2223_v31  ;;  %v2218_v35 = vsub.f32 %v2197_v44, %v2214_v32  ;;  %v2532_v12 = vsel %vm132_vm1, %v2527_v9, 0 }
 0x816   : > { %v5144_v37 = vpop.eup %4598  ;;  %v2225_v39 = vmul.f32 1.442695, %v2218_v35 }
 0x817   : > { %v2239_v41 = vpack.c.bf16 %v5144_v37, %v5144_v37  ;;  %v2476_v45 = vpop.permute.xlu0 %2475  ;;  %v2578_v63 = vpop.permute.xlu1 %2577 }
 0x818   : > { %4604 = vpow2.f32 %v2225_v39  ;;  %v2481_v54 = vsel %vm132_vm1, %v2476_v45, 0  ;;  %v2583_v43 = vsel %vm132_vm1, %v2578_v63, 0 }
 0x819   : > { %4361 = vmatmul.mubr.msk.bf16.vlgmr.msra.gmra.mrb[72].mxu0 %vm132_vm1, %v2239_v41 }
 0x81a   : > { %v5150_v25 = vpop.eup %4600  ;;  %4371 = vmatpush3.bf16.msra.mxu0 %v2345_v48  ;;  %4372 = vmatprep.mubr.msk.bf16.mxu0 %vm4703_vm0, %v5583_v0 }
 0x81b   : > { %v2240_v44 = vpack.c.bf16 %v5150_v25, %v5150_v25  ;;  %4382 = vmatprep.subr.bf16.mxu0 %v5583_v0  ;;  %v2474_v5 = vpop.permute.xlu0 %2473  ;;  %v2629_v13 = vpop.permute.xlu1 %2628 }
 0x81c   : > { %v2634_v17 = vsel %vm132_vm1, %v2629_v13, 0 }
 0x81d   : > { %4367 = vmatmul.mubr.msk.bf16.vlgmr.msra.gmra.mrb[72].mxu1 %vm132_vm1, %v2240_v44 }
 0x81e   : > { %v5159_v50 = vpop.eup %4602  ;;  %4377 = vmatpush3.bf16.msra.mxu1 %v2393_v33  ;;  %4378 = vmatprep.mubr.msk.bf16.mxu1 %vm4703_vm0, %v5583_v0 }
 0x81f   : > { %v2241_v52 = vpack.c.bf16 %v5159_v50, %v5159_v50  ;;  %4388 = vmatprep.subr.bf16.mxu1 %v5583_v0  ;;  %v2525_v14 = vpop.permute.xlu0 %2524  ;;  %v2627_v21 = vpop.permute.xlu1 %2626 }
 0x821   : > { %4373 = vmatmul.mubr.msk.bf16.vlgmr.msra.gmra.mrb[76].mxu0 %vm132_vm1, %v2241_v52 }
 0x822   : > { %v5168_v57 = vpop.eup %4604  ;;  %4384 = vmatprep.mubr.msk.bf16.mxu0 %vm4703_vm0, %v5583_v0 }
 0x823   : > { %4383 = vmatpush3.bf16.xpose.msra.mxu0 %v2481_v54  ;;  %v2242_v58 = vpack.c.bf16 %v5168_v57, %v5168_v57  ;;  %v2576_v20 = vpop.permute.xlu0 %2575  ;;  %v2717_v24 = vpop.permute.xlu1 %2716 }
 0x824   : > { %4394 = vmatprep.subr.bf16.mxu0 %v5583_v0  ;;  %v2722_v28 = vsel %vm372_vm2, %v2717_v24, 0 }
 0x825   : > { %4379 = vmatmul.mubr.msk.bf16.vlgmr.msra.gmra.mrb[76].mxu1 %vm132_vm1, %v2242_v58 }
 0x826   : > { %4390 = vmatprep.mubr.msk.bf16.mxu1 %vm4703_vm0, %v5583_v0 }
 0x827   : > { %4389 = vmatpush3.bf16.xpose.msra.mxu1 %v2532_v12  ;;  %v2765_v27 = vpop.permute.xlu0 %2764 }
 0x828   : > { %4400 = vmatprep.subr.bf16.mxu1 %v5583_v0  ;;  %v2770_v31 = vsel %vm372_vm2, %v2765_v27, 0 }
 0x82a   : > { %4385 = vmatmul.mubr.msk.bf16.vlgmr.msra.gmra.mrb[80].mxu0 %vm132_vm1, %v2474_v5 }
 0x82b   : > { %4395 = vmatpush3.bf16.xpose.msra.mxu0 %v2583_v43  ;;  %4396 = vmatprep.mubr.msk.bf16.mxu0 %vm4703_vm0, %v5583_v0 }
 0x82c   : > { %4406 = vmatprep.subr.bf16.mxu0 %v5583_v0 }
 0x82e   : > { %4391 = vmatmul.mubr.msk.bf16.vlgmr.msra.gmra.mrb[80].mxu1 %vm132_vm1, %v2525_v14 }
 0x82f   : > { %4401 = vmatpush3.bf16.xpose.msra.mxu1 %v2634_v17  ;;  %4402 = vmatprep.mubr.msk.bf16.mxu1 %vm4703_vm0, %v5583_v0 }
 0x830   : > { %4412 = vmatprep.subr.bf16.mxu1 %v5583_v0 }
 0x832   : > { %4397 = vmatmul.mubr.msk.bf16.vlgmr.msra.gmra.mrb[84].mxu0 %vm132_vm1, %v2576_v20 }
 0x833   : > { %4408 = vmatprep.mubr.msk.bf16.mxu0 %vm4703_vm0, %v5583_v0  ;;  %4407 = vmatpush3.bf16.msra.mxu0 %v2722_v28 }
 0x834   : > { %4418 = vmatprep.subr.bf16.mxu0 %v5583_v0 }
 0x836   : > { %4403 = vmatmul.mubr.msk.bf16.vlgmr.msra.gmra.mrb[84].mxu1 %vm132_vm1, %v2627_v21 }
 0x837   : > { %4414 = vmatprep.mubr.msk.bf16.mxu1 %vm4703_vm0, %v5583_v0  ;;  %4413 = vmatpush3.bf16.msra.mxu1 %v2770_v31 }
 0x838   : > { %4424 = vmatprep.subr.bf16.mxu1 %v5583_v0 }
 0x8ec   : > { %v5200_v32 = vpop.f32.mrb[72].mxu0 }
 0x8ed   : > { %v4362_v35 = vpop.f32.mrb[73].mxu0 }
 0x8ee   : > { %v2288_v39 = vpop.f32.mrb[74].mxu0 }
 0x8ef   : > { %v4363_v41 = vpop.f32.mrb[75].mxu0 }
 0x8f0   : > { %v5202_v15 = vpop.f32.mrb[72].mxu1 }
 0x8f1   : > { %5589 = vst [vmem:[#allocation6_spill] sm:$0xff] %v5202_v15  ;;  %v4368_v48 = vpop.f32.mrb[73].mxu1 }
 0x8f2   : > { %v2336_v33 = vpop.f32.mrb[74].mxu1 }
 0x8f3   : > { %v4369_v44 = vpop.f32.mrb[75].mxu1 }
 0x8f4   : > { %v5204_v45 = vpop.f32.mrb[76].mxu0 }
 0x8f5   : > { %v4374_v9 = vpop.f32.mrb[77].mxu0 }
 0x8f6   : > { %v2384_v52 = vpop.f32.mrb[78].mxu0 }
 0x8f7   : > { %v4375_v54 = vpop.f32.mrb[79].mxu0 }
 0x8f8   : > { %v5206_v58 = vpop.f32.mrb[76].mxu1 }
 0x8f9   : > { %5590 = vst [vmem:[#allocation7_spill] sm:$0xff] %v5206_v58  ;;  %v4380_v63 = vpop.f32.mrb[77].mxu1 }
 0x8fa   : > { %v2432_v5 = vpop.f32.mrb[78].mxu1 }
 0x8fb   : > { %v4381_v12 = vpop.f32.mrb[79].mxu1  ;;  %v2938_v5 = vld [vmem:[%s4766_s12 + $0x4] sm:$0xf] }
 0x8fc   : > { %v2942_v12 = vpack.c.bf16 %v2938_v5, %v2938_v5 }
 0x8fd   : > { %v2517_v43 = vpop.f32.mrb[80].mxu0 }
 0x8fe   : > { %v4386_v13 = vpop.f32.mrb[81].mxu0  ;;  %v2676_v14 = vsel %vm326_vm3, %v2517_v43, -inf }
 0x8ff   : > { %2677 = vmax.xlane.f32.xlu0 %v2676_v14  ;;  %v2520_v17 = vpop.f32.mrb[82].mxu0  ;;  %v2939_v13 = vld [vmem:[%s4766_s12 + $0x8] sm:$0xf] }
 0x900   : > { %v4387_v20 = vpop.f32.mrb[83].mxu0  ;;  %v2943_v14 = vpack.c.bf16 %v2939_v13, %v2939_v13  ;;  %v2940_v17 = vld [vmem:[%s4766_s12 + $0xc] sm:$0xf] }
 0x901   : > { %v2568_v21 = vpop.f32.mrb[80].mxu1  ;;  %v2937_v20 = vld [vmem:[%s4766_s12] sm:$0xf] }
 0x902   : > { %v4392_v24 = vpop.f32.mrb[81].mxu1  ;;  %v2679_v27 = vsel %vm326_vm3, %v2568_v21, -inf }
 0x903   : > { %2680 = vmax.xlane.f32.xlu1 %v2679_v27  ;;  %v2571_v28 = vpop.f32.mrb[82].mxu1  ;;  %v5218_v24 = vpack.c.bf16 %v2940_v17, %v2940_v17  ;;  %v2941_v27 = vpack.c.bf16 %v2937_v20, %v2937_v20 }
 0x904   : > { %v4393_v31 = vpop.f32.mrb[83].mxu1 }
 0x905   : > { %v2619_v35 = vpop.f32.mrb[84].mxu0 }
 0x906   : > { %v4398_v39 = vpop.f32.mrb[85].mxu0  ;;  %v2682_v41 = vsel %vm326_vm3, %v2619_v35, -inf }
 0x907   : > { %2683 = vmax.xlane.f32.xlu0 %v2682_v41  ;;  %v2622_v48 = vpop.f32.mrb[86].mxu0 }
 0x908   : > { %v4399_v33 = vpop.f32.mrb[87].mxu0 }
 0x909   : > { %v2670_v44 = vpop.f32.mrb[84].mxu1 }
 0x90a   : > { %v4404_v9 = vpop.f32.mrb[85].mxu1  ;;  %v2685_v52 = vsel %vm326_vm3, %v2670_v44, -inf }
 0x90b   : > { %v2673_v54 = vpop.f32.mrb[86].mxu1  ;;  %2686 = vmax.xlane.f32.xlu0 %v2685_v52 }
 0x90c   : > { %v4405_v63 = vpop.f32.mrb[87].mxu1 }
 0x914   : > { %2860 = vrot.lane.b32.xlu1 %v5137_v6, %s4720_s29  ;;  %v2813_v6 = vpop.permute.xlu1 %2812 }
 0x915   : > { %v2818_v17 = vsel %vm372_vm2, %v2813_v6, 0 }
 0x918   : > { %2999 = vrot.lane.b32.xlu1 %v2942_v12, %s4721_s30 }
 0x91c   : > { %3050 = vrot.lane.b32.xlu1 %v2943_v14, %s4721_s30 }
 0x920   : > { %3101 = vrot.lane.b32.xlu1 %v5218_v24, %s4721_s30 }
 0x921   : > { %2948 = vrot.lane.b32.xlu0 %v2941_v27, %s4721_s30 }
 0x924   : > { %3099 = vrot.lane.b32.xlu1 %v5218_v24, %s4722_s2 }
 0x925   : > { %2946 = vrot.lane.b32.xlu0 %v2941_v27, %s4722_s2 }
 0x928   : > { %3189 = vrot.lane.b32.xlu1 %v2941_v27, %s4723_s3 }
 0x929   : > { %2997 = vrot.lane.b32.xlu0 %v2942_v12, %s4722_s2 }
 0x92c   : > { %3285 = vrot.lane.b32.xlu1 %v2943_v14, %s4723_s3 }
 0x92d   : > { %3048 = vrot.lane.b32.xlu0 %v2943_v14, %s4722_s2 }
 0x931   : > { %3237 = vrot.lane.b32.xlu0 %v2942_v12, %s4723_s3 }
 0x98c   : > { %v2678_v28 = vpop.xlane.xlu0 %2677 }
 0x98d   : > { %v2688_v31 = vsub.f32 %v2517_v43, %v2678_v28 }
 0x98f   : > { %v2692_v39 = vmul.f32 1.442695, %v2688_v31 }
 0x990   : > { %v2681_v41 = vpop.xlane.xlu1 %2680 }
 0x991   : > { %4606 = vpow2.f32 %v2692_v39  ;;  %v2689_v48 = vsub.f32 %v2568_v21, %v2681_v41 }
 0x993   : > { %v2694_v33 = vmul.f32 1.442695, %v2689_v48 }
 0x994   : > { %v2684_v9 = vpop.xlane.xlu0 %2683  ;;  %v2861_v43 = vpop.permute.xlu1 %2860 }
 0x995   : > { %4608 = vpow2.f32 %v2694_v33  ;;  %v2690_v52 = vsub.f32 %v2619_v35, %v2684_v9  ;;  %v2866_v35 = vsel %vm372_vm2, %v2861_v43, 0 }
 0x997   : > { %v2696_v54 = vmul.f32 1.442695, %v2690_v52 }
 0x998   : > { %v2687_v63 = vpop.xlane.xlu0 %2686  ;;  %v3000_v27 = vpop.permute.xlu1 %2999 }
 0x999   : > { %4610 = vpow2.f32 %v2696_v54  ;;  %v2691_v5 = vsub.f32 %v2670_v44, %v2687_v63  ;;  %v3005_v9 = vsel %vm132_vm1, %v3000_v27, 0 }
 0x99b   : > { %v5225_v13 = vpop.eup %4606  ;;  %v2698_v12 = vmul.f32 1.442695, %v2691_v5 }
 0x99c   : > { %v2712_v14 = vpack.c.bf16 %v5225_v13, %v5225_v13  ;;  %v2949_v20 = vpop.permute.xlu0 %2948  ;;  %v3051_v48 = vpop.permute.xlu1 %3050 }
 0x99d   : > { %4612 = vpow2.f32 %v2698_v12  ;;  %v2954_v31 = vsel %vm132_vm1, %v2949_v20, 0  ;;  %v3056_v52 = vsel %vm132_vm1, %v3051_v48, 0 }
 0x99e   : > { %4409 = vmatmul.mubr.msk.bf16.vlgmr.msra.gmra.mrb[88].mxu0 %vm132_vm1, %v2712_v14 }
 0x99f   : > { %v5231_v21 = vpop.eup %4608  ;;  %4419 = vmatpush3.bf16.msra.mxu0 %v2818_v17  ;;  %4420 = vmatprep.mubr.msk.bf16.mxu0 %vm4703_vm0, %v5583_v0 }
 0x9a0   : > { %v2713_v44 = vpack.c.bf16 %v5231_v21, %v5231_v21  ;;  %4430 = vmatprep.subr.bf16.mxu0 %v5583_v0  ;;  %v2947_v33 = vpop.permute.xlu0 %2946  ;;  %v3102_v54 = vpop.permute.xlu1 %3101 }
 0x9a1   : > { %v3107_v5 = vsel %vm132_vm1, %v3102_v54, 0 }
 0x9a2   : > { %4415 = vmatmul.mubr.msk.bf16.vlgmr.msra.gmra.mrb[88].mxu1 %vm132_vm1, %v2713_v44 }
 0x9a3   : > { %v5240_v6 = vpop.eup %4610  ;;  %4425 = vmatpush3.bf16.msra.mxu1 %v2866_v35  ;;  %4426 = vmatprep.mubr.msk.bf16.mxu1 %vm4703_vm0, %v5583_v0 }
 0x9a4   : > { %v2714_v28 = vpack.c.bf16 %v5240_v6, %v5240_v6  ;;  %4436 = vmatprep.subr.bf16.mxu1 %v5583_v0  ;;  %v2998_v63 = vpop.permute.xlu0 %2997  ;;  %v3100_v14 = vpop.permute.xlu1 %3099 }
 0x9a6   : > { %4421 = vmatmul.mubr.msk.bf16.vlgmr.msra.gmra.mrb[92].mxu0 %vm132_vm1, %v2714_v28 }
 0x9a7   : > { %v5249_v39 = vpop.eup %4612  ;;  %4432 = vmatprep.mubr.msk.bf16.mxu0 %vm4703_vm0, %v5583_v0 }
 0x9a8   : > { %4431 = vmatpush3.bf16.xpose.msra.mxu0 %v2954_v31  ;;  %v2715_v41 = vpack.c.bf16 %v5249_v39, %v5249_v39  ;;  %v3049_v12 = vpop.permute.xlu0 %3048  ;;  %v3190_v43 = vpop.permute.xlu1 %3189 }
 0x9a9   : > { %4442 = vmatprep.subr.bf16.mxu0 %v5583_v0  ;;  %v3195_v35 = vsel %vm372_vm2, %v3190_v43, 0 }
 0x9aa   : > { %4427 = vmatmul.mubr.msk.bf16.vlgmr.msra.gmra.mrb[92].mxu1 %vm132_vm1, %v2715_v41 }
 0x9ab   : > { %4438 = vmatprep.mubr.msk.bf16.mxu1 %vm4703_vm0, %v5583_v0 }
 0x9ac   : > { %4437 = vmatpush3.bf16.xpose.msra.mxu1 %v3005_v9  ;;  %v3238_v17 = vpop.permute.xlu0 %3237 }
 0x9ad   : > { %4448 = vmatprep.subr.bf16.mxu1 %v5583_v0  ;;  %v3243_v44 = vsel %vm372_vm2, %v3238_v17, 0 }
 0x9af   : > { %4433 = vmatmul.mubr.msk.bf16.vlgmr.msra.gmra.mrb[96].mxu0 %vm132_vm1, %v2947_v33 }
 0x9b0   : > { %4443 = vmatpush3.bf16.xpose.msra.mxu0 %v3056_v52  ;;  %4444 = vmatprep.mubr.msk.bf16.mxu0 %vm4703_vm0, %v5583_v0 }
 0x9b1   : > { %4454 = vmatprep.subr.bf16.mxu0 %v5583_v0 }
 0x9b3   : > { %4439 = vmatmul.mubr.msk.bf16.vlgmr.msra.gmra.mrb[96].mxu1 %vm132_vm1, %v2998_v63 }
 0x9b4   : > { %4449 = vmatpush3.bf16.xpose.msra.mxu1 %v3107_v5  ;;  %4450 = vmatprep.mubr.msk.bf16.mxu1 %vm4703_vm0, %v5583_v0 }
 0x9b5   : > { %4460 = vmatprep.subr.bf16.mxu1 %v5583_v0 }
 0x9b7   : > { %4445 = vmatmul.mubr.msk.bf16.vlgmr.msra.gmra.mrb[100].mxu0 %vm132_vm1, %v3049_v12 }
 0x9b8   : > { %4456 = vmatprep.mubr.msk.bf16.mxu0 %vm4703_vm0, %v5583_v0  ;;  %4455 = vmatpush3.bf16.msra.mxu0 %v3195_v35 }
 0x9b9   : > { %4466 = vmatprep.subr.bf16.mxu0 %v5583_v0 }
 0x9bb   : > { %4451 = vmatmul.mubr.msk.bf16.vlgmr.msra.gmra.mrb[100].mxu1 %vm132_vm1, %v3100_v14 }
 0x9bc   : > { %4462 = vmatprep.mubr.msk.bf16.mxu1 %vm4703_vm0, %v5583_v0  ;;  %4461 = vmatpush3.bf16.msra.mxu1 %v3243_v44 }
 0x9bd   : > { %4472 = vmatprep.subr.bf16.mxu1 %v5583_v0 }
 0xa71   : > { %v5281_v20 = vpop.f32.mrb[88].mxu0 }
 0xa72   : > { %v4410_v27 = vpop.f32.mrb[89].mxu0 }
 0xa73   : > { %v2761_v28 = vpop.f32.mrb[90].mxu0 }
 0xa74   : > { %v4411_v31 = vpop.f32.mrb[91].mxu0 }
 0xa75   : > { %v5283_v41 = vpop.f32.mrb[88].mxu1 }
 0xa76   : > { %5591 = vst [vmem:[#allocation8_spill] sm:$0xff] %v5283_v41  ;;  %v4416_v48 = vpop.f32.mrb[89].mxu1 }
 0xa77   : > { %v2809_v33 = vpop.f32.mrb[90].mxu1 }
 0xa78   : > { %v4417_v9 = vpop.f32.mrb[91].mxu1 }
 0xa79   : > { %v5285_v52 = vpop.f32.mrb[92].mxu0 }
 0xa7a   : > { %5592 = vst [vmem:[#allocation9_spill] sm:$0xff] %v5285_v52  ;;  %v4422_v54 = vpop.f32.mrb[93].mxu0 }
 0xa7b   : > { %v2857_v63 = vpop.f32.mrb[94].mxu0 }
 0xa7c   : > { %v4423_v5 = vpop.f32.mrb[95].mxu0 }
 0xa7d   : > { %v5287_v12 = vpop.f32.mrb[92].mxu1 }
 0xa7e   : > { %5593 = vst [vmem:[#allocation10_spill] sm:$0xff] %v5287_v12  ;;  %v4428_v14 = vpop.f32.mrb[93].mxu1 }
 0xa7f   : > { %v2905_v43 = vpop.f32.mrb[94].mxu1 }
 0xa80   : > { %v4429_v17 = vpop.f32.mrb[95].mxu1 }
 0xa82   : > { %v2990_v35 = vpop.f32.mrb[96].mxu0 }
 0xa83   : > { %v4434_v44 = vpop.f32.mrb[97].mxu0  ;;  %v3149_v27 = vsel %vm326_vm3, %v2990_v35, -inf }
 0xa84   : > { %3150 = vmax.xlane.f32.xlu0 %v3149_v27  ;;  %v2993_v28 = vpop.f32.mrb[98].mxu0 }
 0xa85   : > { %v4435_v31 = vpop.f32.mrb[99].mxu0 }
 0xa86   : > { %v3041_v48 = vpop.f32.mrb[96].mxu1 }
 0xa87   : > { %v4440_v33 = vpop.f32.mrb[97].mxu1  ;;  %v3152_v9 = vsel %vm326_vm3, %v3041_v48, -inf }
 0xa88   : > { %3153 = vmax.xlane.f32.xlu1 %v3152_v9  ;;  %v3044_v54 = vpop.f32.mrb[98].mxu1  ;;  %v3411_v9 = vld [vmem:[%s4766_s12 + $0x4] sm:$0xf] }
 0xa89   : > { %v4441_v63 = vpop.f32.mrb[99].mxu1  ;;  %v5296_v54 = vpack.c.bf16 %v3411_v9, %v3411_v9 }
 0xa8a   : > { %v3092_v5 = vpop.f32.mrb[100].mxu0  ;;  %v3412_v63 = vld [vmem:[%s4766_s12 + $0x8] sm:$0xf] }
 0xa8b   : > { %v4446_v14 = vpop.f32.mrb[101].mxu0  ;;  %v3155_v43 = vsel %vm326_vm3, %v3092_v5, -inf }
 0xa8c   : > { %3156 = vmax.xlane.f32.xlu0 %v3155_v43  ;;  %v3095_v17 = vpop.f32.mrb[102].mxu0  ;;  %v5300_v14 = vpack.c.bf16 %v3412_v63, %v3412_v63  ;;  %v3413_v43 = vld [vmem:[%s4766_s12 + $0xc] sm:$0xf] }
 0xa8d   : > { %v4447_v44 = vpop.f32.mrb[103].mxu0  ;;  %v3410_v17 = vld [vmem:[%s4766_s12] sm:$0xf]  ;;  %s4729_s12 = smov 12  }
 0xa8e   : > { %v3143_v27 = vpop.f32.mrb[100].mxu1  ;;  %v5305_v44 = vpack.c.bf16 %v3413_v43, %v3413_v43 }
 0xa8f   : > { %v4452_v28 = vpop.f32.mrb[101].mxu1  ;;  %v3158_v31 = vsel %vm326_vm3, %v3143_v27, -inf }
 0xa90   : > { %v3146_v33 = vpop.f32.mrb[102].mxu1  ;;  %3159 = vmax.xlane.f32.xlu0 %v3158_v31  ;;  %v3414_v28 = vpack.c.bf16 %v3410_v17, %v3410_v17 }
 0xa91   : > { %v4453_v0 = vpop.f32.mrb[103].mxu1 }
 0xa92   : > { %v3286_v0 = vpop.permute.xlu1 %3285 }
 0xa99   : > { %3333 = vrot.lane.b32.xlu1 %v5218_v24, %s4723_s3 }
 0xa9d   : > { %3472 = vrot.lane.b32.xlu1 %v5296_v54, %s4724_s4 }
 0xaa1   : > { %3523 = vrot.lane.b32.xlu1 %v5300_v14, %s4724_s4 }
 0xaa5   : > { %3574 = vrot.lane.b32.xlu1 %v5305_v44, %s4724_s4 }
 0xaa6   : > { %3421 = vrot.lane.b32.xlu0 %v3414_v28, %s4724_s4 }
 0xaa9   : > { %3572 = vrot.lane.b32.xlu1 %v5305_v44, %s4725_s5 }
 0xaaa   : > { %3419 = vrot.lane.b32.xlu0 %v3414_v28, %s4725_s5 }
 0xaad   : > { %3662 = vrot.lane.b32.xlu1 %v3414_v28, %s4726_s7 }
 0xaae   : > { %3470 = vrot.lane.b32.xlu0 %v5296_v54, %s4725_s5 }
 0xab2   : > { %3521 = vrot.lane.b32.xlu0 %v5300_v14, %s4725_s5 }
 0xb11   : > { %v3151_v24 = vpop.xlane.xlu0 %3150 }
 0xb12   : > { %v3161_v31 = vsub.f32 %v2990_v35, %v3151_v24  ;;  %v3291_v24 = vsel %vm372_vm2, %v3286_v0, 0 }
 0xb14   : > { %v3165_v33 = vmul.f32 1.442695, %v3161_v31 }
 0xb15   : > { %v3154_v9 = vpop.xlane.xlu1 %3153 }
 0xb16   : > { %4614 = vpow2.f32 %v3165_v33  ;;  %v3162_v63 = vsub.f32 %v3041_v48, %v3154_v9 }
 0xb18   : > { %v3167_v43 = vmul.f32 1.442695, %v3162_v63 }
 0xb19   : > { %v3157_v17 = vpop.xlane.xlu0 %3156  ;;  %v3334_v35 = vpop.permute.xlu1 %3333 }
 0xb1a   : > { %4616 = vpow2.f32 %v3167_v43  ;;  %v3163_v38 = vsub.f32 %v3092_v5, %v3157_v17  ;;  %v5594_v5 = vmov 0.0  }
 0xb1c   : > { %v3169_v34 = vmul.f32 1.442695, %v3163_v38 }
 0xb1d   : > { %v3160_v30 = vpop.xlane.xlu0 %3159 }
 0xb1e   : > { %4618 = vpow2.f32 %v3169_v34  ;;  %v3164_v12 = vsub.f32 %v3143_v27, %v3160_v30  ;;  %v3339_v30 = vsel %vm372_vm2, %v3334_v35, 0 }
 0xb20   : > { %v5312_v26 = vpop.eup %4614  ;;  %v3171_v41 = vmul.f32 1.442695, %v3164_v12 }
 0xb21   : > { %v3185_v28 = vpack.c.bf16 %v5312_v26, %v5312_v26  ;;  %v3422_v38 = vpop.permute.xlu0 %3421 }
 0xb22   : > { %4620 = vpow2.f32 %v3171_v41  ;;  %v3473_v41 = vpop.permute.xlu1 %3472  ;;  %v3427_v0 = vsel %vm132_vm1, %v3422_v38, 0 }
 0xb23   : > { %4457 = vmatmul.mubr.msk.bf16.vlgmr.msra.gmra.mrb[104].mxu0 %vm132_vm1, %v3185_v28  ;;  %v3478_v43 = vsel %vm132_vm1, %v3473_v41, 0 }
 0xb24   : > { %v5318_v48 = vpop.eup %4616  ;;  %4467 = vmatpush3.bf16.msra.mxu0 %v3291_v24  ;;  %4468 = vmatprep.mubr.msk.bf16.mxu0 %vm4703_vm0, %v5594_v5 }
 0xb25   : > { %v3186_v34 = vpack.c.bf16 %v5318_v48, %v5318_v48  ;;  %4478 = vmatprep.subr.bf16.mxu0 %v5594_v5  ;;  %v3420_v63 = vpop.permute.xlu0 %3419 }
 0xb26   : > { %v3524_v9 = vpop.permute.xlu1 %3523 }
 0xb27   : > { %4463 = vmatmul.mubr.msk.bf16.vlgmr.msra.gmra.mrb[104].mxu1 %vm132_vm1, %v3186_v34  ;;  %v3529_v17 = vsel %vm132_vm1, %v3524_v9, 0 }
 0xb28   : > { %v5327_v12 = vpop.eup %4618  ;;  %4473 = vmatpush3.bf16.msra.mxu1 %v3339_v30  ;;  %4474 = vmatprep.mubr.msk.bf16.mxu1 %vm4703_vm0, %v5594_v5 }
 0xb29   : > { %v3187_v27 = vpack.c.bf16 %v5327_v12, %v5327_v12  ;;  %4484 = vmatprep.subr.bf16.mxu1 %v5594_v5  ;;  %v3471_v35 = vpop.permute.xlu0 %3470 }
 0xb2a   : > { %v3575_v28 = vpop.permute.xlu1 %3574 }
 0xb2b   : > { %4469 = vmatmul.mubr.msk.bf16.vlgmr.msra.gmra.mrb[108].mxu0 %vm132_vm1, %v3187_v27  ;;  %v3580_v24 = vsel %vm132_vm1, %v3575_v28, 0 }
 0xb2c   : > { %v5336_v31 = vpop.eup %4620  ;;  %4480 = vmatprep.mubr.msk.bf16.mxu0 %vm4703_vm0, %v5594_v5 }
 0xb2d   : > { %4479 = vmatpush3.bf16.xpose.msra.mxu0 %v3427_v0  ;;  %v3188_v33 = vpack.c.bf16 %v5336_v31, %v5336_v31  ;;  %v3522_v30 = vpop.permute.xlu0 %3521 }
 0xb2e   : > { %4490 = vmatprep.subr.bf16.mxu0 %v5594_v5  ;;  %v3573_v34 = vpop.permute.xlu1 %3572 }
 0xb2f   : > { %4475 = vmatmul.mubr.msk.bf16.vlgmr.msra.gmra.mrb[108].mxu1 %vm132_vm1, %v3188_v33 }
 0xb30   : > { %4486 = vmatprep.mubr.msk.bf16.mxu1 %vm4703_vm0, %v5594_v5 }
 0xb31   : > { %4485 = vmatpush3.bf16.xpose.msra.mxu1 %v3478_v43 }
 0xb32   : > { %4496 = vmatprep.subr.bf16.mxu1 %v5594_v5  ;;  %v3663_v38 = vpop.permute.xlu1 %3662 }
 0xb33   : > { %v3668_v41 = vsel %vm372_vm2, %v3663_v38, 0 }
 0xb34   : > { %4481 = vmatmul.mubr.msk.bf16.vlgmr.msra.gmra.mrb[112].mxu0 %vm132_vm1, %v3420_v63 }
 0xb35   : > { %4491 = vmatpush3.bf16.xpose.msra.mxu0 %v3529_v17  ;;  %4492 = vmatprep.mubr.msk.bf16.mxu0 %vm4703_vm0, %v5594_v5 }
 0xb36   : > { %4502 = vmatprep.subr.bf16.mxu0 %v5594_v5 }
 0xb38   : > { %4487 = vmatmul.mubr.msk.bf16.vlgmr.msra.gmra.mrb[112].mxu1 %vm132_vm1, %v3471_v35 }
 0xb39   : > { %4497 = vmatpush3.bf16.xpose.msra.mxu1 %v3580_v24  ;;  %4498 = vmatprep.mubr.msk.bf16.mxu1 %vm4703_vm0, %v5594_v5 }
 0xb3a   : > { %4508 = vmatprep.subr.bf16.mxu1 %v5594_v5 }
 0xb3c   : > { %4493 = vmatmul.mubr.msk.bf16.vlgmr.msra.gmra.mrb[116].mxu0 %vm132_vm1, %v3522_v30 }
 0xb3d   : > { %4504 = vmatprep.mubr.msk.bf16.mxu0 %vm4703_vm0, %v5594_v5  ;;  %4503 = vmatpush3.bf16.msra.mxu0 %v3668_v41 }
 0xb3e   : > { %4514 = vmatprep.subr.bf16.mxu0 %v5594_v5 }
 0xb40   : > { %4499 = vmatmul.mubr.msk.bf16.vlgmr.msra.gmra.mrb[116].mxu1 %vm132_vm1, %v3573_v34 }
 0xb41   : > { %4510 = vmatprep.mubr.msk.bf16.mxu1 %vm4703_vm0, %v5594_v5 }
 0xbf6   : > { %v5366_v27 = vpop.f32.mrb[104].mxu0 }
 0xbf7   : > { %v4458_v0 = vpop.f32.mrb[105].mxu0 }
 0xbf8   : > { %v3234_v33 = vpop.f32.mrb[106].mxu0 }
 0xbf9   : > { %v4459_v9 = vpop.f32.mrb[107].mxu0 }
 0xbfa   : > { %v5368_v63 = vpop.f32.mrb[104].mxu1 }
 0xbfb   : > { %v4464_v43 = vpop.f32.mrb[105].mxu1 }
 0xbfc   : > { %v3282_v17 = vpop.f32.mrb[106].mxu1 }
 0xbfd   : > { %v4465_v28 = vpop.f32.mrb[107].mxu1 }
 0xbfe   : > { %v5370_v35 = vpop.f32.mrb[108].mxu0 }
 0xbff   : > { %v4470_v24 = vpop.f32.mrb[109].mxu0 }
 0xc00   : > { %v3330_v30 = vpop.f32.mrb[110].mxu0 }
 0xc01   : > { %v4471_v34 = vpop.f32.mrb[111].mxu0 }
 0xc02   : > { %v5372_v58 = vpop.f32.mrb[108].mxu1 }
 0xc03   : > { %5595 = vst [vmem:[#allocation11_spill] sm:$0xff] %v5372_v58  ;;  %v4476_v38 = vpop.f32.mrb[109].mxu1 }
 0xc04   : > { %v3378_v41 = vpop.f32.mrb[110].mxu1 }
 0xc05   : > { %v4477_v15 = vpop.f32.mrb[111].mxu1 }
 0xc07   : > { %v5374_v52 = vpop.f32.mrb[112].mxu0 }
 0xc08   : > { %v4482_v0 = vpop.f32.mrb[113].mxu0  ;;  %v3622_v33 = vsel %vm326_vm3, %v5374_v52, -inf }
 0xc09   : > { %3623 = vmax.xlane.f32.xlu0 %v3622_v33  ;;  %v3466_v9 = vpop.f32.mrb[114].mxu0 }
 0xc0a   : > { %v4483_v43 = vpop.f32.mrb[115].mxu0 }
 0xc0b   : > { %v5378_v17 = vpop.f32.mrb[112].mxu1 }
 0xc0c   : > { %v4488_v28 = vpop.f32.mrb[113].mxu1  ;;  %v3625_v24 = vsel %vm326_vm3, %v5378_v17, -inf }
 0xc0d   : > { %3626 = vmax.xlane.f32.xlu1 %v3625_v24  ;;  %v3517_v30 = vpop.f32.mrb[114].mxu1 }
 0xc0e   : > { %v4489_v34 = vpop.f32.mrb[115].mxu1  ;;  %v811_v30 = vsel %vm326_vm3, %v4907_v29, 0.0  ;;  %v1754_v29 = vsel %vm326_vm3, %v5063_v4, 0.0  ;;  %v1757_v4 = vsel %vm326_vm3, %v5069_v10, 0.0  ;;  %v3173_v10 = vsel %vm326_vm3, %v5312_v26, 0.0 }
 0xc0f   : > { %v5382_v38 = vpop.f32.mrb[116].mxu0  ;;  %v1281_v34 = vsel %vm326_vm3, %v4982_v1, 0.0  ;;  %v1284_v1 = vsel %vm326_vm3, %v4988_v47, 0.0  ;;  %v2700_v47 = vsel %vm326_vm3, %v5225_v13, 0.0  ;;  %v2703_v13 = vsel %vm326_vm3, %v5231_v21, 0.0 }
 0xc10   : > { %v4494_v15 = vpop.f32.mrb[117].mxu0  ;;  %v3628_v41 = vsel %vm326_vm3, %v5382_v38, -inf  ;;  %v3176_v26 = vsel %vm326_vm3, %v5318_v48, 0.0 }
 0xc11   : > { %3629 = vmax.xlane.f32.xlu0 %v3628_v41  ;;  %v3568_v0 = vpop.f32.mrb[118].mxu0 }
 0xc12   : > { %v4495_v33 = vpop.f32.mrb[119].mxu0 }
 0xc13   : > { %v5386_v9 = vpop.f32.mrb[116].mxu1 }
 0xc14   : > { %v4500_v43 = vpop.f32.mrb[117].mxu1  ;;  %v3631_v28 = vsel %vm326_vm3, %v5386_v9, -inf }
 0xc15   : > { %v3619_v58 = vpop.f32.mrb[118].mxu1  ;;  %3632 = vmax.xlane.f32.xlu0 %v3631_v28 }
 0xc16   : > { %v4501_v24 = vpop.f32.mrb[119].mxu1  ;;  %v808_v58 = vsel %vm326_vm3, %v4901_v23, 0.0  ;;  %v1760_v23 = vsel %vm326_vm3, %v5078_v18, 0.0  ;;  %v1763_v18 = vsel %vm326_vm3, %v5087_v22, 0.0  ;;  %v3179_v22 = vsel %vm326_vm3, %v5327_v12, 0.0 }
 0xc1e   : > { %3758 = vrot.lane.b32.xlu1 %v5300_v14, %s4726_s7  ;;  %v1287_v14 = vsel %vm326_vm3, %v4997_v16, 0.0  ;;  %v1290_v16 = vsel %vm326_vm3, %v5006_v19, 0.0  ;;  %v2706_v19 = vsel %vm326_vm3, %v5240_v6, 0.0  ;;  %v2709_v6 = vsel %vm326_vm3, %v5249_v39, 0.0 }
 0xc22   : > { %3806 = vrot.lane.b32.xlu1 %v5305_v44, %s4726_s7  ;;  %v814_v44 = vsel %vm326_vm3, %v4916_v36, 0.0  ;;  %v2227_v36 = vsel %vm326_vm3, %v5144_v37, 0.0  ;;  %v2230_v37 = vsel %vm326_vm3, %v5150_v25, 0.0  ;;  %v351_v25 = vsel %vm326_vm3, %v4820_v61, 0.0 }
 0xc2b   : > { %3710 = vrot.lane.b32.xlu0 %v5296_v54, %s4726_s7  ;;  %v817_v54 = vsel %vm326_vm3, %v4925_v40, 0.0  ;;  %v2233_v40 = vsel %vm326_vm3, %v5159_v50, 0.0  ;;  %v2236_v50 = vsel %vm326_vm3, %v5168_v57, 0.0  ;;  %v3182_v57 = vsel %vm326_vm3, %v5336_v31, 0.0 }
 0xc46   : > { %812 = vadd.xlane.f32.xlu1 %v811_v30 }
 0xc4a   : > { %1282 = vadd.xlane.f32.xlu1 %v1281_v34  ;;  %809 = vadd.xlane.f32.xlu0 %v808_v58 }
 0xc4e   : > { %1288 = vadd.xlane.f32.xlu1 %v1287_v14  ;;  %815 = vadd.xlane.f32.xlu0 %v814_v44 }
 0xc52   : > { %1755 = vadd.xlane.f32.xlu1 %v1754_v29  ;;  %818 = vadd.xlane.f32.xlu0 %v817_v54 }
 0xc56   : > { %1761 = vadd.xlane.f32.xlu1 %v1760_v23  ;;  %1285 = vadd.xlane.f32.xlu0 %v1284_v1 }
 0xc5a   : > { %2228 = vadd.xlane.f32.xlu1 %v2227_v36  ;;  %1291 = vadd.xlane.f32.xlu0 %v1290_v16 }
 0xc5e   : > { %2234 = vadd.xlane.f32.xlu1 %v2233_v40  ;;  %1758 = vadd.xlane.f32.xlu0 %v1757_v4  ;;  %v357_v40 = vsel %vm326_vm3, %v4835_v8, 0.0 }
 0xc62   : > { %2701 = vadd.xlane.f32.xlu1 %v2700_v47  ;;  %1764 = vadd.xlane.f32.xlu0 %v1763_v18  ;;  %v360_v18 = vsel %vm326_vm3, %v4844_v11, 0.0 }
 0xc66   : > { %2707 = vadd.xlane.f32.xlu1 %v2706_v19  ;;  %2231 = vadd.xlane.f32.xlu0 %v2230_v37 }
 0xc6a   : > { %3174 = vadd.xlane.f32.xlu1 %v3173_v10  ;;  %2237 = vadd.xlane.f32.xlu0 %v2236_v50 }
 0xc6e   : > { %3180 = vadd.xlane.f32.xlu1 %v3179_v22  ;;  %2704 = vadd.xlane.f32.xlu0 %v2703_v13 }
 0xc72   : > { %352 = vadd.xlane.f32.xlu1 %v351_v25  ;;  %2710 = vadd.xlane.f32.xlu0 %v2709_v6 }
 0xc76   : > { %3177 = vadd.xlane.f32.xlu0 %v3176_v26 }
 0xc7a   : > { %3183 = vadd.xlane.f32.xlu0 %v3182_v57 }
 0xc96   : > { %v3624_v12 = vpop.xlane.xlu0 %3623 }
 0xc97   : > { %v3634_v21 = vsub.f32 %v5374_v52, %v3624_v12 }
 0xc99   : > { %v3638_v15 = vmul.f32 1.442695, %v3634_v21 }
 0xc9a   : > { %v3627_v41 = vpop.xlane.xlu1 %3626 }
 0xc9b   : > { %4622 = vpow2.f32 %v3638_v15  ;;  %v3635_v61 = vsub.f32 %v5378_v17, %v3627_v41 }
 0xc9d   : > { %v3640_v0 = vmul.f32 1.442695, %v3635_v61 }
 0xc9e   : > { %v3630_v39 = vpop.xlane.xlu0 %3629  ;;  %v3759_v48 = vpop.permute.xlu1 %3758 }
 0xc9f   : > { %4624 = vpow2.f32 %v3640_v0  ;;  %v3636_v33 = vsub.f32 %v5382_v38, %v3630_v39  ;;  %v3764_v14 = vsel %vm372_vm2, %v3759_v48, 0 }
 0xca1   : > { %v3642_v43 = vmul.f32 1.442695, %v3636_v33 }
 0xca2   : > { %v3633_v28 = vpop.xlane.xlu0 %3632  ;;  %v3807_v44 = vpop.permute.xlu1 %3806 }
 0xca3   : > { %4626 = vpow2.f32 %v3642_v43  ;;  %v3637_v31 = vsub.f32 %v5386_v9, %v3633_v28  ;;  %v3812_v54 = vsel %vm372_vm2, %v3807_v44, 0 }
 0xca5   : > { %v4623_v24 = vpop.eup %4622  ;;  %v3644_v30 = vmul.f32 1.442695, %v3637_v31 }
 0xca6   : > { %v3711_v34 = vpop.permute.xlu0 %3710  ;;  %v3646_v52 = vsel %vm326_vm3, %v4623_v24, 0.0  ;;  %v3658_v58 = vpack.c.bf16 %v4623_v24, %v4623_v24 }
 0xca7   : > { %4628 = vpow2.f32 %v3644_v30  ;;  %v3716_v17 = vsel %vm372_vm2, %v3711_v34, 0  ;;  %3647 = vadd.xlane.f32.xlu1 %v3646_v52 }
 0xca8   : > { %4505 = vmatmul.mubr.msk.bf16.vlgmr.msra.gmra.mrb[120].mxu0 %vm132_vm1, %v3658_v58  ;;  %4509 = vmatpush3.bf16.msra.mxu1 %v3716_v17 }
 0xca9   : > { %v4625_v38 = vpop.eup %4624  ;;  %4515 = vmatpush3.bf16.msra.mxu0 %v3764_v14  ;;  %4516 = vmatprep.mubr.msk.bf16.mxu0 %vm4703_vm0, %v5594_v5 }
 0xcaa   : > { %v3649_v9 = vsel %vm326_vm3, %v4625_v38, 0.0  ;;  %v3659_v29 = vpack.c.bf16 %v4625_v38, %v4625_v38  ;;  %4520 = vmatprep.subr.bf16.mxu1 %v5594_v5 }
 0xcab   : > { %3650 = vadd.xlane.f32.xlu0 %v3649_v9 }
 0xcac   : > { %4511 = vmatmul.mubr.msk.bf16.vlgmr.msra.gmra.mrb[120].mxu1 %vm132_vm1, %v3659_v29 }
 0xcad   : > { %v4627_v23 = vpop.eup %4626  ;;  %4521 = vmatpush3.bf16.msra.mxu1 %v3812_v54  ;;  %4522 = vmatprep.mubr.msk.bf16.mxu1 %vm4703_vm0, %v5594_v5  ;;  %v354_v5 = vsel %vm326_vm3, %v4826_v3, 0.0 }
 0xcae   : > { %v3652_v1 = vsel %vm326_vm3, %v4627_v23, 0.0  ;;  %v3660_v36 = vpack.c.bf16 %v4627_v23, %v4627_v23 }
 0xcaf   : > { %3653 = vadd.xlane.f32.xlu1 %v3652_v1 }
 0xcb0   : > { %4517 = vmatmul.mubr.msk.bf16.vlgmr.msra.gmra.mrb[124].mxu0 %vm132_vm1, %v3660_v36 }
 0xcb1   : > { %v4629_v16 = vpop.eup %4628 }
 0xcb2   : > { %v3655_v4 = vsel %vm326_vm3, %v4629_v16, 0.0  ;;  %v3661_v47 = vpack.c.bf16 %v4629_v16, %v4629_v16 }
 0xcb3   : > { %358 = vadd.xlane.f32.xlu1 %v357_v40  ;;  %3656 = vadd.xlane.f32.xlu0 %v3655_v4  ;;  %v5596_v4 = vld [vmem:[#allocation9_spill] sm:$0xff] }
 0xcb4   : > { %4523 = vmatmul.mubr.msk.bf16.vlgmr.msra.gmra.mrb[124].mxu1 %vm132_vm1, %v3661_v47 }
 0xcb7   : > { %355 = vadd.xlane.f32.xlu0 %v354_v5  ;;  %v5597_v5 = vld [vmem:[#allocation6_spill] sm:$0xff] }
 0xcbb   : > { %361 = vadd.xlane.f32.xlu0 %v360_v18 }
 0xcd3   : > { %v813_v19 = vpop.xlane.xlu1 %812 }
 0xcd4   : > { %4630 = vrcp.f32 %v813_v19 }
 0xcd7   : > { %v1283_v37 = vpop.xlane.xlu1 %1282  ;;  %v810_v10 = vpop.xlane.xlu0 %809 }
 0xcd8   : > { %4632 = vrcp.f32 %v1283_v37 }
 0xcd9   : > { %4634 = vrcp.f32 %v810_v10  ;;  %v5598_v10 = vld [vmem:[#allocation7_spill] sm:$0xff] }
 0xcdb   : > { %v1289_v8 = vpop.xlane.xlu1 %1288  ;;  %v816_v50 = vpop.xlane.xlu0 %815 }
 0xcdc   : > { %4636 = vrcp.f32 %v1289_v8 }
 0xcdd   : > { %4638 = vrcp.f32 %v816_v50 }
 0xcde   : > { %v4631_v22 = vpop.eup %4630 }
 0xcdf   : > { %v1756_v13 = vpop.xlane.xlu1 %1755  ;;  %v819_v25 = vpop.xlane.xlu0 %818  ;;  %v1021_v3 = vmul.f32 %v4631_v22, %v4959_v60 }
 0xce0   : > { %4640 = vrcp.f32 %v1756_v13 }
 0xce1   : > { %4642 = vrcp.f32 %v819_v25  ;;  %1030 = vrot.lane.b32.xlu0 %v1021_v3, %s4727_s10  ;;  %v5599_v3 = vld [vmem:[#allocation8_spill] sm:$0xff] }
 0xce2   : > { %v4633_v11 = vpop.eup %4632 }
 0xce3   : > { %v4635_v6 = vpop.eup %4634  ;;  %v1762_v26 = vpop.xlane.xlu1 %1761  ;;  %v1493_v12 = vmul.f32 %v4633_v11, %v5038_v42 }
 0xce4   : > { %v1286_v57 = vpop.xlane.xlu0 %1285  ;;  %4644 = vrcp.f32 %v1762_v26  ;;  %v1020_v21 = vmul.f32 %v4635_v6, %v4957_v56  ;;  %v5600_v26 = vld [vmem:[#allocation2_spill] sm:$0xff] }
 0xce5   : > { %4646 = vrcp.f32 %v1286_v57  ;;  %1501 = vrot.lane.b32.xlu0 %v1493_v12, %s4728_s11  ;;  %v5601_v12 = vld [vmem:[#allocation10_spill] sm:$0xff] }
 0xce6   : > { %v4637_v15 = vpop.eup %4636  ;;  %1028 = vrot.lane.b32.xlu1 %v1020_v21, %s4727_s10 }
 0xce7   : > { %v4639_v60 = vpop.eup %4638  ;;  %v2229_v41 = vpop.xlane.xlu1 %2228  ;;  %v1495_v0 = vmul.f32 %v4637_v15, %v5042_v51 }
 0xce8   : > { %v1292_v61 = vpop.xlane.xlu0 %1291  ;;  %4648 = vrcp.f32 %v2229_v41  ;;  %v1022_v39 = vmul.f32 %v4639_v60, %v4961_v2  ;;  %v5602_v41 = vld [vmem:[#allocation11_spill] sm:$0xff] }
 0xce9   : > { %4650 = vrcp.f32 %v1292_v61  ;;  %1505 = vrot.lane.b32.xlu0 %v1495_v0, %s4728_s11 }
 0xcea   : > { %v4641_v42 = vpop.eup %4640  ;;  %1032 = vrot.lane.b32.xlu1 %v1022_v39, %s4727_s10 }
 0xceb   : > { %v4643_v56 = vpop.eup %4642  ;;  %v2235_v33 = vpop.xlane.xlu1 %2234  ;;  %v1966_v48 = vmul.f32 %v4641_v42, %v5119_v49 }
 0xcec   : > { %v1759_v43 = vpop.xlane.xlu0 %1758  ;;  %4652 = vrcp.f32 %v2235_v33  ;;  %v1023_v28 = vmul.f32 %v4643_v56, %v4963_v7 }
 0xced   : > { %4654 = vrcp.f32 %v1759_v43  ;;  %1974 = vrot.lane.b32.xlu0 %v1966_v48, %s4729_s12 }
 0xcee   : > { %v4645_v51 = vpop.eup %4644  ;;  %1034 = vrot.lane.b32.xlu1 %v1023_v28, %s4727_s10 }
 0xcef   : > { %v4647_v2 = vpop.eup %4646  ;;  %v2702_v31 = vpop.xlane.xlu1 %2701  ;;  %v1968_v30 = vmul.f32 %v4645_v51, %v5123_v59  ;;  %v5603_v51 = vld [vmem:[#allocation3_spill] sm:$0xff] }
 0xcf0   : > { %v1765_v24 = vpop.xlane.xlu0 %1764  ;;  %4656 = vrcp.f32 %v2702_v31  ;;  %v1494_v34 = vmul.f32 %v4647_v2, %v5040_v46  ;;  %v5604_v31 = vld [vmem:[#allocation4_spill] sm:$0xff] }
 0xcf1   : > { %4658 = vrcp.f32 %v1765_v24  ;;  %1978 = vrot.lane.b32.xlu0 %v1968_v30, %s4729_s12 }
 0xcf2   : > { %v4649_v49 = vpop.eup %4648  ;;  %1503 = vrot.lane.b32.xlu1 %v1494_v34, %s4728_s11 }
 0xcf3   : > { %v4651_v7 = vpop.eup %4650  ;;  %v2708_v52 = vpop.xlane.xlu1 %2707  ;;  %v2439_v14 = vmul.f32 %v4649_v49, %v5200_v32  ;;  %v5605_v49 = vld [vmem:[#allocation5_spill] sm:$0xff] }
 0xcf4   : > { %v2232_v58 = vpop.xlane.xlu0 %2231  ;;  %4660 = vrcp.f32 %v2708_v52  ;;  %v1496_v17 = vmul.f32 %v4651_v7, %v5044_v55 }
 0xcf5   : > { %4662 = vrcp.f32 %v2232_v58  ;;  %2447 = vrot.lane.b32.xlu0 %v2439_v14, %s4730_s13 }
 0xcf6   : > { %v4653_v59 = vpop.eup %4652  ;;  %1507 = vrot.lane.b32.xlu1 %v1496_v17, %s4728_s11 }
 0xcf7   : > { %v4655_v46 = vpop.eup %4654  ;;  %v3175_v44 = vpop.xlane.xlu1 %3174  ;;  %v2441_v9 = vmul.f32 %v4653_v59, %v5204_v45 }
 0xcf8   : > { %v2238_v38 = vpop.xlane.xlu0 %2237  ;;  %4664 = vrcp.f32 %v3175_v44  ;;  %v1967_v29 = vmul.f32 %v4655_v46, %v5121_v53 }
 0xcf9   : > { %4666 = vrcp.f32 %v2238_v38  ;;  %2451 = vrot.lane.b32.xlu0 %v2441_v9, %s4730_s13 }
 0xcfa   : > { %v4657_v32 = vpop.eup %4656  ;;  %1976 = vrot.lane.b32.xlu1 %v1967_v29, %s4729_s12 }
 0xcfb   : > { %v4659_v55 = vpop.eup %4658  ;;  %v3181_v54 = vpop.xlane.xlu1 %3180  ;;  %v2912_v1 = vmul.f32 %v4657_v32, %v5281_v20 }
 0xcfc   : > { %v2705_v23 = vpop.xlane.xlu0 %2704  ;;  %4668 = vrcp.f32 %v3181_v54  ;;  %v1969_v36 = vmul.f32 %v4659_v55, %v5125_v62 }
 0xcfd   : > { %4670 = vrcp.f32 %v2705_v23  ;;  %2920 = vrot.lane.b32.xlu0 %v2912_v1, %s4731_s14 }
 0xcfe   : > { %v4661_v45 = vpop.eup %4660  ;;  %1980 = vrot.lane.b32.xlu1 %v1969_v36, %s4729_s12 }
 0xcff   : > { %v4663_v53 = vpop.eup %4662  ;;  %v353_v16 = vpop.xlane.xlu1 %352  ;;  %v2914_v47 = vmul.f32 %v4661_v45, %v5596_v4 }
 0xd00   : > { %v2711_v40 = vpop.xlane.xlu0 %2710  ;;  %4672 = vrcp.f32 %v353_v16  ;;  %v2440_v18 = vmul.f32 %v4663_v53, %v5597_v5 }
 0xd01   : > { %4674 = vrcp.f32 %v2711_v40  ;;  %2924 = vrot.lane.b32.xlu0 %v2914_v47, %s4731_s14 }
 0xd02   : > { %v4665_v20 = vpop.eup %4664  ;;  %2449 = vrot.lane.b32.xlu1 %v2440_v18, %s4730_s13 }
 0xd03   : > { %v4667_v62 = vpop.eup %4666  ;;  %v3385_v37 = vmul.f32 %v4665_v20, %v5366_v27 }
 0xd04   : > { %v3178_v19 = vpop.xlane.xlu0 %3177  ;;  %v2442_v8 = vmul.f32 %v4667_v62, %v5598_v10 }
 0xd05   : > { %4676 = vrcp.f32 %v3178_v19  ;;  %3393 = vrot.lane.b32.xlu0 %v3385_v37, %s4732_s15 }
 0xd06   : > { %v4669_v50 = vpop.eup %4668  ;;  %2453 = vrot.lane.b32.xlu1 %v2442_v8, %s4730_s13 }
 0xd07   : > { %v4671_v22 = vpop.eup %4670  ;;  %v3387_v25 = vmul.f32 %v4669_v50, %v5370_v35 }
 0xd08   : > { %v3184_v13 = vpop.xlane.xlu0 %3183  ;;  %v2913_v11 = vmul.f32 %v4671_v22, %v5599_v3 }
 0xd09   : > { %4678 = vrcp.f32 %v3184_v13  ;;  %3397 = vrot.lane.b32.xlu0 %v3387_v25, %s4732_s15 }
 0xd0a   : > { %v4673_v6 = vpop.eup %4672  ;;  %2922 = vrot.lane.b32.xlu1 %v2913_v11, %s4731_s14 }
 0xd0b   : > { %v4675_v27 = vpop.eup %4674  ;;  %v564_v57 = vmul.f32 %v4673_v6, %v5600_v26 }
 0xd0c   : > { %v2915_v21 = vmul.f32 %v4675_v27, %v5601_v12 }
 0xd0d   : > { %568 = vst.msk [vmem:[%s5516_s18] sm:$0xf] %vm326_vm3, %v564_v57 }
 0xd0e   : > { %2926 = vrot.lane.b32.xlu1 %v2915_v21, %s4731_s14 }
 0xd0f   : > { %v4677_v35 = vpop.eup %4676 }
 0xd10   : > { %v3386_v15 = vmul.f32 %v4677_v35, %v5368_v63 }
 0xd12   : > { %3395 = vrot.lane.b32.xlu1 %v3386_v15, %s4732_s15 }
 0xd13   : > { %v4679_v60 = vpop.eup %4678 }
 0xd14   : > { %v3388_v61 = vmul.f32 %v4679_v60, %v5602_v41 }
 0xd16   : > { %3399 = vrot.lane.b32.xlu1 %v3388_v61, %s4732_s15 }
 0xd34   : > { %v3648_v0 = vpop.xlane.xlu1 %3647 }
 0xd38   : > { %v3651_v39 = vpop.xlane.xlu0 %3650 }
 0xd3c   : > { %v3654_v42 = vpop.xlane.xlu1 %3653 }
 0xd40   : > { %v5526_v56 = vpop.xlane.xlu0 %3656  ;;  %v359_v33 = vpop.xlane.xlu1 %358 }
 0xd41   : > { %4680 = vrcp.f32 %v359_v33 }
 0xd44   : > { %v356_v43 = vpop.xlane.xlu0 %355 }
 0xd45   : > { %4682 = vrcp.f32 %v356_v43 }
 0xd48   : > { %v362_v48 = vpop.xlane.xlu0 %361 }
 0xd49   : > { %4684 = vrcp.f32 %v362_v48 }
 0xd4a   : > { %4686 = vrcp.f32 %v3648_v0 }
 0xd4b   : > { %v4681_v63 = vpop.eup %4680  ;;  %4688 = vrcp.f32 %v3651_v39 }
 0xd4c   : > { %v566_v24 = vmul.f32 %v4681_v63, %v5604_v31  ;;  %4690 = vrcp.f32 %v3654_v42 }
 0xd4d   : > { %4692 = vrcp.f32 %v5526_v56 }
 0xd4e   : > { %570 = vst.msk [vmem:[%s5516_s18 + $0x8] sm:$0xf] %vm326_vm3, %v566_v24 }
 0xd4f   : > { %v4683_v28 = vpop.eup %4682 }
 0xd50   : > { %v565_v2 = vmul.f32 %v4683_v28, %v5603_v51 }
 0xd52   : > { %569 = vst.msk [vmem:[%s5516_s18 + $0x4] sm:$0xf] %vm326_vm3, %v565_v2 }
 0xd53   : > { %v4685_v30 = vpop.eup %4684  ;;  %v1031_v34 = vpop.permute.xlu0 %1030 }
 0xd54   : > { %v567_v7 = vmul.f32 %v4685_v30, %v5605_v49  ;;  %1042 = vst.msk [vmem:[%s5516_s18 + $0x4] sm:$0xf] %vm1040_vm4, %v1031_v34  ;;  %v4687_v53 = vpop.eup %4686 }
 0xd55   : > { %v4689_v20 = vpop.eup %4688 }
 0xd56   : > { %571 = vst.msk [vmem:[%s5516_s18 + $0xc] sm:$0xf] %vm326_vm3, %v567_v7  ;;  %v4691_v13 = vpop.eup %4690 }
 0xd57   : > { %v1502_v52 = vpop.permute.xlu0 %1501  ;;  %v4693_v12 = vpop.eup %4692 }
 0xd58   : > { %v1029_v58 = vpop.permute.xlu1 %1028 }
 0xd59   : > { %1041 = vst.msk [vmem:[%s5516_s18] sm:$0xf] %vm1040_vm4, %v1029_v58 }
 0xd5a   : > { %1514 = vst.msk [vmem:[%s5516_s18] sm:$0xf] %vm1513_vm5, %v1502_v52 }
 0xd5b   : > { %v1506_v14 = vpop.permute.xlu0 %1505 }
 0xd5c   : > { %v1033_v17 = vpop.permute.xlu1 %1032 }
 0xd5d   : > { %1043 = vst.msk [vmem:[%s5516_s18 + $0x8] sm:$0xf] %vm1040_vm4, %v1033_v17 }
 0xd5e   : > { %1516 = vst.msk [vmem:[%s5516_s18 + $0x8] sm:$0xf] %vm1513_vm5, %v1506_v14 }
 0xd5f   : > { %v1975_v59 = vpop.permute.xlu0 %1974 }
 0xd60   : > { %v1035_v46 = vpop.permute.xlu1 %1034  ;;  %1987 = vst.msk [vmem:[%s5516_s18] sm:$0xf] %vm1986_vm6, %v1975_v59 }
 0xd61   : > { %1044 = vst.msk [vmem:[%s5516_s18 + $0xc] sm:$0xf] %vm1040_vm4, %v1035_v46 }
 0xd63   : > { %v1979_v44 = vpop.permute.xlu0 %1978 }
 0xd64   : > { %v1504_v38 = vpop.permute.xlu1 %1503  ;;  %1989 = vst.msk [vmem:[%s5516_s18 + $0x8] sm:$0xf] %vm1986_vm6, %v1979_v44 }
 0xd65   : > { %1515 = vst.msk [vmem:[%s5516_s18 + $0x4] sm:$0xf] %vm1513_vm5, %v1504_v38 }
 0xd67   : > { %v2448_v9 = vpop.permute.xlu0 %2447 }
 0xd68   : > { %v1508_v29 = vpop.permute.xlu1 %1507  ;;  %2460 = vst.msk [vmem:[%s5516_s18] sm:$0xf] %vm2459_vm7, %v2448_v9 }
 0xd69   : > { %1517 = vst.msk [vmem:[%s5516_s18 + $0xc] sm:$0xf] %vm1513_vm5, %v1508_v29 }
 0xd6b   : > { %v2452_v55 = vpop.permute.xlu0 %2451 }
 0xd6c   : > { %v1977_v32 = vpop.permute.xlu1 %1976  ;;  %2462 = vst.msk [vmem:[%s5516_s18 + $0x8] sm:$0xf] %vm2459_vm7, %v2452_v55 }
 0xd6d   : > { %1988 = vst.msk [vmem:[%s5516_s18 + $0x4] sm:$0xf] %vm1986_vm6, %v1977_v32 }
 0xd6f   : > { %v2921_v23 = vpop.permute.xlu0 %2920 }
 0xd70   : > { %v1981_v54 = vpop.permute.xlu1 %1980  ;;  %2933 = vst.msk [vmem:[%s5516_s18] sm:$0xf] %vm2932_vm8, %v2921_v23 }
 0xd71   : > { %1990 = vst.msk [vmem:[%s5516_s18 + $0xc] sm:$0xf] %vm1986_vm6, %v1981_v54 }
 0xd73   : > { %v2925_v45 = vpop.permute.xlu0 %2924 }
 0xd74   : > { %v2450_v1 = vpop.permute.xlu1 %2449  ;;  %2935 = vst.msk [vmem:[%s5516_s18 + $0x8] sm:$0xf] %vm2932_vm8, %v2925_v45 }
 0xd75   : > { %2461 = vst.msk [vmem:[%s5516_s18 + $0x4] sm:$0xf] %vm2459_vm7, %v2450_v1 }
 0xd77   : > { %v3394_v62 = vpop.permute.xlu0 %3393 }
 0xd78   : > { %v2454_v36 = vpop.permute.xlu1 %2453  ;;  %3406 = vst.msk [vmem:[%s5516_s18] sm:$0xf] %vm3405_vm9, %v3394_v62 }
 0xd79   : > { %2463 = vst.msk [vmem:[%s5516_s18 + $0xc] sm:$0xf] %vm2459_vm7, %v2454_v36 }
 0xd7b   : > { %v3704_v16 = vpop.f32.mrb[120].mxu0  ;;  %v3398_v27 = vpop.permute.xlu0 %3397 }
 0xd7c   : > { %v3858_v40 = vmul.f32 %v4687_v53, %v3704_v16  ;;  %v2923_v4 = vpop.permute.xlu1 %2922  ;;  %v4506_v47 = vpop.f32.mrb[121].mxu0  ;;  %3408 = vst.msk [vmem:[%s5516_s18 + $0x8] sm:$0xf] %vm3405_vm9, %v3398_v27 }
 0xd7d   : > { %2934 = vst.msk [vmem:[%s5516_s18 + $0x4] sm:$0xf] %vm2932_vm8, %v2923_v4  ;;  %v3707_v5 = vpop.f32.mrb[122].mxu0 }
 0xd7e   : > { %v4507_v18 = vpop.f32.mrb[123].mxu0  ;;  %3866 = vrot.lane.b32.xlu0 %v3858_v40, %s4733_s8 }
 0xd7f   : > { %v3752_v19 = vpop.f32.mrb[120].mxu1 }
 0xd80   : > { %v3859_v37 = vmul.f32 %v4689_v20, %v3752_v19  ;;  %v2927_v10 = vpop.permute.xlu1 %2926  ;;  %v4512_v8 = vpop.f32.mrb[121].mxu1 }
 0xd81   : > { %2936 = vst.msk [vmem:[%s5516_s18 + $0xc] sm:$0xf] %vm2932_vm8, %v2927_v10  ;;  %v3755_v50 = vpop.f32.mrb[122].mxu1 }
 0xd82   : > { %v4513_v22 = vpop.f32.mrb[123].mxu1  ;;  %3868 = vrot.lane.b32.xlu1 %v3859_v37, %s4733_s8 }
 0xd83   : > { %v3800_v25 = vpop.f32.mrb[124].mxu0 }
 0xd84   : > { %v3860_v3 = vmul.f32 %v4691_v13, %v3800_v25  ;;  %v3396_v11 = vpop.permute.xlu1 %3395  ;;  %v4518_v6 = vpop.f32.mrb[125].mxu0 }
 0xd85   : > { %3407 = vst.msk [vmem:[%s5516_s18 + $0x4] sm:$0xf] %vm3405_vm9, %v3396_v11  ;;  %v3803_v26 = vpop.f32.mrb[126].mxu0 }
 0xd86   : > { %v4519_v57 = vpop.f32.mrb[127].mxu0  ;;  %3870 = vrot.lane.b32.xlu0 %v3860_v3, %s4733_s8 }
 0xd87   : > { %v3848_v21 = vpop.f32.mrb[124].mxu1 }
 0xd88   : > { %v3861_v35 = vmul.f32 %v4693_v12, %v3848_v21  ;;  %v3400_v15 = vpop.permute.xlu1 %3399  ;;  %v4524_v60 = vpop.f32.mrb[125].mxu1 }
 0xd89   : > { %3409 = vst.msk [vmem:[%s5516_s18 + $0xc] sm:$0xf] %vm3405_vm9, %v3400_v15  ;;  %v3851_v41 = vpop.f32.mrb[126].mxu1 }
 0xd8a   : > { %v4525_v61 = vpop.f32.mrb[127].mxu1  ;;  %3872 = vrot.lane.b32.xlu1 %v3861_v35, %s4733_s8 }
 0xdf0   : > { %v3867_v0 = vpop.permute.xlu0 %3866 }
 0xdf1   : > { %3879 = vst.msk [vmem:[%s5516_s18] sm:$0xf] %vm3878_vm10, %v3867_v0 }
 0xdf4   : > { %v3869_v39 = vpop.permute.xlu1 %3868 }
 0xdf5   : > { %3880 = vst.msk [vmem:[%s5516_s18 + $0x4] sm:$0xf] %vm3878_vm10, %v3869_v39 }
 0xdf8   : > { %v3871_v42 = vpop.permute.xlu0 %3870 }
 0xdf9   : > { %3881 = vst.msk [vmem:[%s5516_s18 + $0x8] sm:$0xf] %vm3878_vm10, %v3871_v42 }
 0xdfc   : > { %v3873_v56 = vpop.permute.xlu1 %3872 }
 0xdfd   : > { %3882 = vst.msk [vmem:[%s5516_s18 + $0xc] sm:$0xf] %vm3878_vm10, %v3873_v56 }
 0xdfe PF: > { %s11_s6 = sadd.s32 1, %s4700_s6  }
 0xdff   : > { %p8_p4 = scmp.ge.s32.totalorder %s11_s6, 4  }
 0xe01   :  { %10 = sbr.rel (!%p8_p4) target bundleno = 1 (0x1), region = 54 }

</bundles_post_ra>
